<compile_context>
chip_gen: v5e
topology: v5e:2x2
jax: 0.10.0
libtpu: 0.0.40
codegen_flags: <defaults>
</compile_context>

<pallas_src>
import functools

import jax
import jax.numpy as jnp
import numpy as np
from jax import lax
from jax.experimental import pallas as pl
from jax.experimental.pallas import tpu as pltpu


# ---------------------------------------------------------------------------
# tiling helpers
# ---------------------------------------------------------------------------
def _largest_divisor(n, limit, multiple=1):
    """Largest d with d | n, d <= limit, d % multiple == 0 (or None)."""
    best = None
    for d in range(1, n + 1):
        if n % d == 0 and d <= limit and d % multiple == 0:
            best = d
    return best


def _row_tile(ho):
    """Output-row strip height for the fused kernel (>=2 tiles when possible)."""
    limit = max(1, min(16, ho // 2))
    d = _largest_divisor(ho, limit)
    return d if d is not None else ho


def _spatial_lane_tile(hw):
    """Lane tile over flattened H*W: multiple of 128 (lane-dense) or full."""
    limit = min(2048, max(128, hw // 2))
    d = _largest_divisor(hw, limit, multiple=128)
    return d if d is not None else hw


# ---------------------------------------------------------------------------
# Pallas kernels
# ---------------------------------------------------------------------------
def _expand_smsu_kernel(x_ref, we_ref, be_ref, *rest,
                        kernel_sizes, pad, stride, valid_h, valid_w):
    """Fused: 1x1 expand conv (bf16 MXU) + folded BN + SiLU
              -> SMSU multi-kernel depthwise conv (BN scale pre-folded)
              -> summed BN shift + SiLU
              -> SE partial spatial pooling.
    Operates on one haloed output-row strip of one image per grid step."""
    n_br = len(kernel_sizes)
    w_refs = rest[:n_br]
    shift_ref = rest[n_br]
    y_ref = rest[n_br + 1]
    psum_ref = rest[n_br + 2]
    xe_ref = rest[n_br + 3]      # VMEM scratch: expanded haloed strip (f32)
    acc_ref = rest[n_br + 4]     # VMEM scratch: depthwise accumulator (f32)

    tile_ho, wo, cmid = acc_ref.shape
    h_in, wpp, _ = xe_ref.shape
    cin = x_ref.shape[-1]

    t = pl.program_id(1)
    step = stride * tile_ho
    row0 = pl.multiple_of(t * step, step)

    # --- 1) expand 1x1 conv on the haloed input row strip (mid tensor stays
    #        in VMEM, never written to HBM).
    xin = x_ref[0, pl.ds(row0, h_in), :, :]                  # (h_in, wpp, cin) bf16
    e = jnp.dot(xin.reshape(h_in * wpp, cin), we_ref[...],
                preferred_element_type=jnp.float32)
    e = e + be_ref[...]                                      # folded BN shift
    e = e * jax.nn.sigmoid(e)                                # SiLU (f32)
    e = e.reshape(h_in, wpp, cmid)
    # zero the positions that correspond to the depthwise conv's zero padding
    rows = row0 + lax.broadcasted_iota(jnp.int32, (h_in, wpp, 1), 0)
    cols = lax.broadcasted_iota(jnp.int32, (h_in, wpp, 1), 1)
    valid = ((rows >= pad) & (rows < pad + valid_h) &
             (cols >= pad) & (cols < pad + valid_w))
    xe_ref[...] = jnp.where(valid, e, 0.0)

    # --- 2) SMSU: sum over kernel sizes of depthwise conv; stride handled
    #        in-kernel via strided reads (no overcompute / subsample pass).
    # TODO(synk): the dx taps could use aligned strips + pltpu.roll (XLU) or an
    # im2col-to-MXU formulation to relieve the VALU/realignment hot spot.
    acc_ref[...] = jnp.zeros_like(acc_ref)
    for k, w_ref in zip(kernel_sizes, w_refs):
        w = w_ref[...]                                       # (k, k, cmid) f32
        off = pad - k // 2
        for dy in range(k):
            for dx in range(k):
                if stride == 1:
                    tap = xe_ref[pl.ds(off + dy, tile_ho),
                                 pl.ds(off + dx, wo), :]
                else:
                    tap = xe_ref[pl.ds(off + dy, tile_ho, stride=stride),
                                 pl.ds(off + dx, wo, stride=stride), :]
                acc_ref[...] += tap * w[dy, dx]

    # --- 3) summed BN shift + SiLU, SE partial pooling, bf16 store.
    y = acc_ref[...] + shift_ref[...]
    y = y * jax.nn.sigmoid(y)                                # SiLU (f32)
    ps = jnp.sum(y, axis=(0, 1), keepdims=True)              # (1, 1, cmid)
    psum_ref[0, 0] = jnp.broadcast_to(ps.reshape(1, cmid), (8, cmid))
    # TODO(synk): y's last dim (cmid) is lane-sparse for small mid channels;
    # a W-into-lanes repack would make this store lane-dense.
    y_ref[0] = y.astype(y_ref.dtype)


def _se_gate_kernel(ps_ref, w1_ref, b1_ref, w2_ref, b2_ref, gate_ref, *, inv_hw):
    """SE gate MLP on the pooled (N, Cmid) vector: mean -> 1x1+ReLU -> 1x1 ->
    Hardsigmoid. Inputs are the per-tile partial sums from the fused kernel."""
    ps = ps_ref[...]                                         # (N, T, 8, Cmid)
    # the 8 sublane rows are identical copies -> divide by 8 (exact in fp).
    m = jnp.sum(ps, axis=(1, 2)) * (inv_hw * 0.125)          # (N, Cmid) mean
    h = jnp.dot(m, w1_ref[...], preferred_element_type=jnp.float32) + b1_ref[...]
    h = jnp.maximum(h, 0.0)                                  # ReLU
    g = jnp.dot(h, w2_ref[...], preferred_element_type=jnp.float32) + b2_ref[...]
    g = jnp.clip(g / 6.0 + 0.5, 0.0, 1.0)                    # Hardsigmoid
    gate_ref[:, 0, :] = g


def _proj_residual_kernel(y_ref, gate_ref, wt_ref, shift_ref, res_ref, o_ref):
    """SE channel scale + point-linear 1x1 conv (folded BN) + residual add.
    Output is produced directly in NCHW-flat layout (lane-dense stores)."""
    a = (y_ref[0].astype(jnp.float32) * gate_ref[0]).astype(jnp.bfloat16)
    # (Cout, Cmid) x (TM, Cmid)^T -> (Cout, TM): transposed result straight
    # from the MXU, no separate XLU transpose.
    zt = lax.dot_general(wt_ref[...], a,
                         dimension_numbers=(((1,), (1,)), ((), ())),
                         preferred_element_type=jnp.float32)
    o_ref[0] = (zt + shift_ref[0] + res_ref[0]).astype(o_ref.dtype)


def _idconv_kernel(r_ref, w_ref, o_ref):
    """Identity 1x1 conv on the (NCHW-flat) residual branch."""
    z = jnp.dot(w_ref[...], r_ref[0].astype(jnp.bfloat16),
                preferred_element_type=jnp.float32)          # (Cout, TM)
    o_ref[0] = z.astype(o_ref.dtype)


# ---------------------------------------------------------------------------
# pallas_call wrappers
# ---------------------------------------------------------------------------
def fused_expand_smsu(xpad, w_exp, b_exp, w_dw, dw_shift, *,
                      kernel_sizes, pad, stride, H, W, tile_ho):
    """xpad: (N, Hp, Wpp, Cin) bf16 (zero padded, Wpp % 16 == 0).
    Returns y (N, Ho, Wo, Cmid) bf16 and SE partial sums (N, T, 8, Cmid) f32."""
    N, Hp, Wpp, Cin = xpad.shape
    Cmid = w_exp.shape[1]
    Ho, Wo = H // stride, W // stride
    T = Ho // tile_ho
    h_in = stride * tile_ho + 2 * pad

    in_specs = [
        pl.BlockSpec((1, Hp, Wpp, Cin), lambda n, t: (n, 0, 0, 0)),
        pl.BlockSpec((Cin, Cmid), lambda n, t: (0, 0)),
        pl.BlockSpec((1, Cmid), lambda n, t: (0, 0)),
    ]
    for w in w_dw:
        k = int(w.shape[0])
        in_specs.append(pl.BlockSpec((k, k, Cmid), lambda n, t: (0, 0, 0)))
    in_specs.append(pl.BlockSpec((1, Cmid), lambda n, t: (0, 0)))

    out_shape = (jax.ShapeDtypeStruct((N, Ho, Wo, Cmid), jnp.bfloat16),
                 jax.ShapeDtypeStruct((N, T, 8, Cmid), jnp.float32))
    out_specs = [pl.BlockSpec((1, tile_ho, Wo, Cmid), lambda n, t: (n, t, 0, 0)),
                 pl.BlockSpec((1, 1, 8, Cmid), lambda n, t: (n, t, 0, 0))]

    kernel = functools.partial(
        _expand_smsu_kernel, kernel_sizes=tuple(int(k) for k in kernel_sizes),
        pad=pad, stride=stride, valid_h=H, valid_w=W)

    y, psum = pl.pallas_call(
        kernel,
        out_shape=out_shape,
        grid_spec=pltpu.PrefetchScalarGridSpec(
            num_scalar_prefetch=0,
            grid=(N, T),
            in_specs=in_specs,
            out_specs=out_specs,
            scratch_shapes=[pltpu.VMEM((h_in, Wpp, Cmid), jnp.float32),
                            pltpu.VMEM((tile_ho, Wo, Cmid), jnp.float32)]),
        compiler_params=pltpu.CompilerParams(
            dimension_semantics=("parallel", "parallel"),
            vmem_limit_bytes=48 * 1024 * 1024),
    )(xpad, w_exp, b_exp, *w_dw, dw_shift)
    return y, psum


def se_gate(psum, w1, b1, w2, b2, hw):
    """psum: (N, T, 8, Cmid) partial sums. Returns gate (N, 1, Cmid) f32."""
    N, T, _, Cmid = psum.shape
    Cr = w1.shape[1]
    return pl.pallas_call(
        functools.partial(_se_gate_kernel, inv_hw=1.0 / float(hw)),
        out_shape=jax.ShapeDtypeStruct((N, 1, Cmid), jnp.float32),
        grid_spec=pltpu.PrefetchScalarGridSpec(
            num_scalar_prefetch=0,
            grid=(1,),
            in_specs=[pl.BlockSpec((N, T, 8, Cmid), lambda i: (0, 0, 0, 0)),
                      pl.BlockSpec((Cmid, Cr), lambda i: (0, 0)),
                      pl.BlockSpec((1, Cr), lambda i: (0, 0)),
                      pl.BlockSpec((Cr, Cmid), lambda i: (0, 0)),
                      pl.BlockSpec((1, Cmid), lambda i: (0, 0))],
            out_specs=pl.BlockSpec((N, 1, Cmid), lambda i: (0, 0, 0))),
    )(psum, w1, b1.reshape(1, Cr), w2, b2.reshape(1, Cmid))


def se_project_residual(y_flat, gate, w_proj_t, shift, res_flat):
    """y_flat: (N, HW, Cmid) bf16, gate: (N, 1, Cmid), w_proj_t: (Cout, Cmid)
    bf16, shift: (1, Cout, 1), res_flat: (N, Cout, HW). Returns (N, Cout, HW)."""
    N, HW, Cmid = y_flat.shape
    Cout = w_proj_t.shape[0]
    TM = _spatial_lane_tile(HW)
    S = HW // TM
    return pl.pallas_call(
        _proj_residual_kernel,
        out_shape=jax.ShapeDtypeStruct((N, Cout, HW), jnp.float32),
        grid_spec=pltpu.PrefetchScalarGridSpec(
            num_scalar_prefetch=0,
            grid=(N, S),
            in_specs=[pl.BlockSpec((1, TM, Cmid), lambda n, s: (n, s, 0)),
                      pl.BlockSpec((1, 1, Cmid), lambda n, s: (n, 0, 0)),
                      pl.BlockSpec((Cout, Cmid), lambda n, s: (0, 0)),
                      pl.BlockSpec((1, Cout, 1), lambda n, s: (0, 0, 0)),
                      pl.BlockSpec((1, Cout, TM), lambda n, s: (n, 0, s))],
            out_specs=pl.BlockSpec((1, Cout, TM), lambda n, s: (n, 0, s))),
        compiler_params=pltpu.CompilerParams(
            dimension_semantics=("parallel", "parallel"),
            vmem_limit_bytes=48 * 1024 * 1024),
    )(y_flat, gate, w_proj_t, shift, res_flat)


def identity_conv1x1(res_flat, w_t):
    """res_flat: (N, Cin, HW) f32, w_t: (Cout, Cin) bf16 -> (N, Cout, HW) f32."""
    N, Cin, HW = res_flat.shape
    Cout = w_t.shape[0]
    TM = _spatial_lane_tile(HW)
    S = HW // TM
    return pl.pallas_call(
        _idconv_kernel,
        out_shape=jax.ShapeDtypeStruct((N, Cout, HW), jnp.float32),
        grid_spec=pltpu.PrefetchScalarGridSpec(
            num_scalar_prefetch=0,
            grid=(N, S),
            in_specs=[pl.BlockSpec((1, Cin, TM), lambda n, s: (n, 0, s)),
                      pl.BlockSpec((Cout, Cin), lambda n, s: (0, 0))],
            out_specs=pl.BlockSpec((1, Cout, TM), lambda n, s: (n, 0, s))),
        compiler_params=pltpu.CompilerParams(
            dimension_semantics=("parallel", "parallel")),
    )(res_flat, w_t)


# ---------------------------------------------------------------------------
# Parameters (deterministic synthetic init; BN folded from gamma/beta/mean/var)
# ---------------------------------------------------------------------------
def init_params(key, cfg):
    in_c = cfg["in_channels"]
    out_c = cfg["out_channels"]
    mid = int(in_c * cfg["expand_ratio"])
    se_mid = mid // 4  # SE.REDUCTION = 4
    ks = list(cfg["kernel_size_array"])

    kit = iter(jax.random.split(key, 64))

    def nrm(shape, s=0.3):
        return s * jax.random.normal(next(kit), shape, jnp.float32)

    def bn(c):
        gamma = jax.random.uniform(next(kit), (c,), jnp.float32, 0.5, 1.5)
        beta = nrm((c,), 0.1)
        mean = nrm((c,), 0.1)
        var = jax.random.uniform(next(kit), (c,), jnp.float32, 0.5, 1.5)
        scale = gamma / jnp.sqrt(var + 1e-5)   # eval-mode BN fold
        shift = beta - mean * scale
        return scale, shift

    p = {}
    p["w_exp"] = nrm((in_c, mid))                       # inverted_bottleneck.conv
    p["s_exp"], p["t_exp"] = bn(mid)                    # inverted_bottleneck.bn
    p["w_dw"] = [nrm((k, k, mid)) for k in ks]          # SMSU depthwise (k,k,C)
    dw_bn = [bn(mid) for _ in ks]                       # SMSU per-branch BN
    p["s_dw"] = [s for s, _ in dw_bn]
    p["t_dw"] = [t for _, t in dw_bn]
    p["w_se1"] = nrm((mid, se_mid))                     # SE reduce (bias=True)
    p["b_se1"] = nrm((se_mid,), 0.1)
    p["w_se2"] = nrm((se_mid, mid))                     # SE expand (bias=True)
    p["b_se2"] = nrm((mid,), 0.1)
    p["w_proj"] = nrm((mid, out_c))                     # point_linear.conv
    # NOTE: point_linear BN is zero_init (gamma=0) in the PyTorch __init__;
    # random values are used here so the hot path is numerically exercised.
    p["s_proj"], p["t_proj"] = bn(out_c)
    p["w_idc"] = nrm((in_c, out_c))                     # identity_conv (1x1)
    return p


# ---------------------------------------------------------------------------
# Full MBConvLayer forward (Pallas) and a pure-JAX reference
# ---------------------------------------------------------------------------
def mbconv_forward(x_nchw, p, cfg):
    stride = cfg["stride"]
    ks = list(cfg["kernel_size_array"])
    N, Cin, H, W = x_nchw.shape
    Cmid = p["w_exp"].shape[1]
    Cout = p["w_proj"].shape[1]
    assert stride in (1, 2) and H % stride == 0 and W % stride == 0
    Ho, Wo = H // stride, W // stride
    pad = max(ks) // 2

    x_nchw = x_nchw.astype(jnp.float32)
    x_nhwc = jnp.transpose(x_nchw, (0, 2, 3, 1))

    # Zero pad for the depthwise halo; round the padded width up to a multiple
    # of 16 so the in-kernel (rows, Wpp, C) <-> (rows*Wpp, C) reshapes are
    # sublane-tile aligned for both bf16 and f32.
    Wp = W + 2 * pad
    Wpp = ((Wp + 15) // 16) * 16
    xpad = jnp.pad(x_nhwc, ((0, 0), (pad, pad), (pad, pad + (Wpp - Wp)),
                            (0, 0))).astype(jnp.bfloat16)

    tile_ho = _row_tile(Ho)

    # Fold BN (eval mode) into the 1x1 / depthwise weights host-side.
    w_exp_f = (p["w_exp"] * p["s_exp"][None, :]).astype(jnp.bfloat16)
    b_exp = p["t_exp"].reshape(1, Cmid).astype(jnp.float32)
    w_dw_f = [(w * s[None, None, :]).astype(jnp.float32)
              for w, s in zip(p["w_dw"], p["s_dw"])]
    dw_shift = sum(p["t_dw"]).reshape(1, Cmid).astype(jnp.float32)

    # Fused expand -> SMSU (stride in-kernel) -> SiLU -> SE partial pooling.
    y, psum = fused_expand_smsu(
        xpad, w_exp_f, b_exp, w_dw_f, dw_shift,
        kernel_sizes=ks, pad=pad, stride=stride, H=H, W=W, tile_ho=tile_ho)

    # SE gate MLP on the pooled vector only.
    gate = se_gate(psum, p["w_se1"], p["b_se1"], p["w_se2"], p["b_se2"],
                   hw=Ho * Wo)

    # Residual branch in NCHW-flat layout (so projection stores are lane-dense).
    if stride == 1 and Cout == Cin:
        res = x_nchw.reshape(N, Cout, Ho * Wo)
    else:
        r = x_nchw
        if stride == 2:
            # TODO(synk): AvgPool2d(2,2) residual downsample kept in plain JAX
            # (reshape/mean glue); all other compute is in Pallas kernels.
            r = r.reshape(N, Cin, Ho, 2, Wo, 2).mean(axis=(3, 5))
        r = r.reshape(N, Cin, Ho * Wo)
        if Cout != Cin:
            r = identity_conv1x1(r, p["w_idc"].T.astype(jnp.bfloat16))
        res = r

    # SE channel scale + point-linear 1x1 conv + folded BN + residual add.
    w_proj_t = (p["w_proj"] * p["s_proj"][None, :]).T.astype(jnp.bfloat16)
    shift_proj = p["t_proj"].reshape(1, Cout, 1).astype(jnp.float32)
    out = se_project_residual(y.reshape(N, Ho * Wo, Cmid), gate, w_proj_t,
                              shift_proj, res)
    return out.reshape(N, Cout, Ho, Wo)                  # already NCHW


def mbconv_reference(x_nchw, p, cfg):
    """Pure-JAX reference mirroring the kernels' compute dtypes (bf16 MXU
    operands, f32 accumulation / epilogues) for numerical validation."""
    stride = cfg["stride"]
    N, Cin, H, W = x_nchw.shape
    Cmid = p["w_exp"].shape[1]
    Cout = p["w_proj"].shape[1]
    Ho, Wo = H // stride, W // stride
    x_nchw = x_nchw.astype(jnp.float32)
    x = jnp.transpose(x_nchw, (0, 2, 3, 1))
    hi = lax.Precision.HIGHEST

    w_exp_f = (p["w_exp"] * p["s_exp"][None, :]).astype(jnp.bfloat16)
    e = jnp.einsum("nhwc,co->nhwo", x.astype(jnp.bfloat16), w_exp_f,
                   preferred_element_type=jnp.float32)
    e = e + p["t_exp"]
    e = e * jax.nn.sigmoid(e)

    acc = None
    for w, s in zip(p["w_dw"], p["s_dw"]):
        k = w.shape[0]
        wf = (w * s[None, None, :]).astype(jnp.float32)
        dw = lax.conv_general_dilated(
            e, wf[:, :, None, :], (stride, stride),
            [(k // 2, k // 2), (k // 2, k // 2)],
            dimension_numbers=("NHWC", "HWIO", "NHWC"),
            feature_group_count=Cmid, precision=hi)
        acc = dw if acc is None else acc + dw
    acc = acc + sum(p["t_dw"])
    y = acc * jax.nn.sigmoid(acc)

    m = y.mean(axis=(1, 2))
    h = jnp.maximum(jnp.dot(m, p["w_se1"], precision=hi) + p["b_se1"], 0.0)
    g = jnp.dot(h, p["w_se2"], precision=hi) + p["b_se2"]
    g = jnp.clip(g / 6.0 + 0.5, 0.0, 1.0)

    y16 = y.astype(jnp.bfloat16)
    a = (y16.astype(jnp.float32) * g[:, None, None, :]).astype(jnp.bfloat16)
    w_proj_f = (p["w_proj"] * p["s_proj"][None, :]).astype(jnp.bfloat16)
    z = jnp.einsum("nhwc,co->nhwo", a, w_proj_f,
                   preferred_element_type=jnp.float32)
    z = z + p["t_proj"]

    if stride == 1 and Cout == Cin:
        res = x
    else:
        r = x
        if stride == 2:
            r = r.reshape(N, Ho, 2, Wo, 2, Cin).mean(axis=(2, 4))
        if Cout != Cin:
            r = jnp.einsum("nhwc,co->nhwo", r.astype(jnp.bfloat16),
                           p["w_idc"].astype(jnp.bfloat16),
                           preferred_element_type=jnp.float32)
        res = r
    z = z + res
    return jnp.transpose(z, (0, 3, 1, 2))


# ---------------------------------------------------------------------------
if __name__ == "__main__":
    key = jax.random.PRNGKey(0)
    configs = [
        # stride=1, in==out -> plain residual add
        dict(in_channels=8, out_channels=8, stride=1, expand_ratio=4,
             kernel_size_array=(3, 5), N=2, H=16, W=16),
        # stride=1, channel change -> identity 1x1 conv on the residual
        dict(in_channels=8, out_channels=16, stride=1, expand_ratio=4,
             kernel_size_array=(3,), N=2, H=16, W=16),
        # stride=2, channel change -> AvgPool downsample + identity 1x1 conv
        dict(in_channels=8, out_channels=16, stride=2, expand_ratio=4,
             kernel_size_array=(3, 5), N=2, H=16, W=16),
    ]
    for cfg in configs:
        kp, kx, key = jax.random.split(key, 3)
        params = init_params(kp, cfg)
        x = jax.random.normal(
            kx, (cfg["N"], cfg["in_channels"], cfg["H"], cfg["W"]), jnp.float32)
        out = jax.block_until_ready(mbconv_forward(x, params, cfg))
        ref = mbconv_reference(x, params, cfg)
        np.testing.assert_allclose(np.asarray(out), np.asarray(ref),
                                   rtol=5e-3, atol=5e-3)
    print("KERNEL_OK")
</pallas_src>

<mosaic_0001>
module attributes {stable_mosaic.version = 11 : i64} {
  func.func @_expand_smsu_kernel(%arg0: i32, %arg1: i32, %arg2: memref<1x20x32x8xbf16, #tpu.memory_space<vmem>>, %arg3: memref<8x32xbf16, #tpu.memory_space<vmem>>, %arg4: memref<1x32xf32, #tpu.memory_space<vmem>>, %arg5: memref<3x3x32xf32, #tpu.memory_space<vmem>>, %arg6: memref<5x5x32xf32, #tpu.memory_space<vmem>>, %arg7: memref<1x32xf32, #tpu.memory_space<vmem>>, %arg8: memref<1x8x16x32xbf16, #tpu.memory_space<vmem>>, %arg9: memref<1x1x8x32xf32, #tpu.memory_space<vmem>>, %arg10: memref<12x32x32xf32, #tpu.memory_space<vmem>>, %arg11: memref<8x16x32xf32, #tpu.memory_space<vmem>>) attributes {dimension_semantics = [#tpu.dimension_semantics<parallel>, #tpu.dimension_semantics<parallel>], iteration_bounds = array<i64: 2, 2>, scalar_prefetch = 0 : i64, scratch_operands = 2 : i64, tpu.core_type = #tpu.core_type<tc>, window_params = [{transform_indices = @transform_0, window_bounds = array<i64: 1, 20, 32, 8>}, {pipeline_mode = #tpu.pipeline_mode<synchronous>, transform_indices = @transform_1, window_bounds = array<i64: 8, 32>}, {pipeline_mode = #tpu.pipeline_mode<synchronous>, transform_indices = @transform_2, window_bounds = array<i64: 1, 32>}, {pipeline_mode = #tpu.pipeline_mode<synchronous>, transform_indices = @transform_3, window_bounds = array<i64: 3, 3, 32>}, {pipeline_mode = #tpu.pipeline_mode<synchronous>, transform_indices = @transform_4, window_bounds = array<i64: 5, 5, 32>}, {pipeline_mode = #tpu.pipeline_mode<synchronous>, transform_indices = @transform_5, window_bounds = array<i64: 1, 32>}, {transform_indices = @transform_6, window_bounds = array<i64: 1, 8, 16, 32>}, {transform_indices = @transform_7, window_bounds = array<i64: 1, 1, 8, 32>}]} {
    %c8_i32 = arith.constant 8 : i32
    %0 = arith.muli %arg1, %c8_i32 : i32
    %1 = tpu.assume_multiple %0, 8 : i32
    %c0 = arith.constant 0 : index
    %2 = arith.index_cast %1 : i32 to index
    %c0_0 = arith.constant 0 : index
    %c0_1 = arith.constant 0 : index
    %3 = vector.load %arg2[%c0, %2, %c0_0, %c0_1] : memref<1x20x32x8xbf16, #tpu.memory_space<vmem>>, vector<1x12x32x8xbf16>
    %4 = vector.shape_cast %3 : vector<1x12x32x8xbf16> to vector<12x32x8xbf16>
    %5 = vector.shape_cast %4 : vector<12x32x8xbf16> to vector<384x8xbf16>
    %c0_2 = arith.constant 0 : index
    %c0_3 = arith.constant 0 : index
    %6 = vector.load %arg3[%c0_2, %c0_3] : memref<8x32xbf16, #tpu.memory_space<vmem>>, vector<8x32xbf16>
    %cst = arith.constant dense<0.000000e+00> : vector<384x32xf32>
    %7 = tpu.matmul %5, %6, %cst {dimension_numbers = #tpu.dot_dimension_numbers<[1], [0], [0], [1], [0, 0, 1, 1], [], []>} : vector<384x8xbf16>, vector<8x32xbf16>, vector<384x32xf32> -> vector<384x32xf32>
    %c0_4 = arith.constant 0 : index
    %c0_5 = arith.constant 0 : index
    %8 = vector.load %arg4[%c0_4, %c0_5] : memref<1x32xf32, #tpu.memory_space<vmem>>, vector<1x32xf32>
    %9 = vector.broadcast %8 : vector<1x32xf32> to vector<384x32xf32>
    %10 = arith.addf %7, %9 : vector<384x32xf32>
    %11 = arith.negf %10 : vector<384x32xf32>
    %12 = math.exp %11 : vector<384x32xf32>
    %cst_6 = arith.constant 1.000000e+00 : f32
    %13 = vector.broadcast %cst_6 : f32 to vector<384x32xf32>
    %14 = arith.addf %13, %12 : vector<384x32xf32>
    %15 = arith.divf %13, %14 : vector<384x32xf32>
    %16 = arith.mulf %10, %15 : vector<384x32xf32>
    %17 = vector.shape_cast %16 : vector<384x32xf32> to vector<12x32x32xf32>
    %18 = tpu.iota {dimensions = array<i32: 0>} : vector<12x32x1xi32>
    %19 = vector.broadcast %1 : i32 to vector<12x32x1xi32>
    %20 = arith.addi %19, %18 : vector<12x32x1xi32>
    %21 = tpu.iota {dimensions = array<i32: 1>} : vector<12x32x1xi32>
    %c2_i32 = arith.constant 2 : i32
    %22 = vector.broadcast %c2_i32 : i32 to vector<12x32x1xi32>
    %23 = arith.cmpi sge, %20, %22 : vector<12x32x1xi32>
    %c18_i32 = arith.constant 18 : i32
    %24 = vector.broadcast %c18_i32 : i32 to vector<12x32x1xi32>
    %25 = arith.cmpi slt, %20, %24 : vector<12x32x1xi32>
    %26 = arith.andi %23, %25 : vector<12x32x1xi1>
    %c2_i32_7 = arith.constant 2 : i32
    %27 = vector.broadcast %c2_i32_7 : i32 to vector<12x32x1xi32>
    %28 = arith.cmpi sge, %21, %27 : vector<12x32x1xi32>
    %29 = arith.andi %26, %28 : vector<12x32x1xi1>
    %c18_i32_8 = arith.constant 18 : i32
    %30 = vector.broadcast %c18_i32_8 : i32 to vector<12x32x1xi32>
    %31 = arith.cmpi slt, %21, %30 : vector<12x32x1xi32>
    %32 = arith.andi %29, %31 : vector<12x32x1xi1>
    %cst_9 = arith.constant 0.000000e+00 : f32
    %33 = vector.shape_cast %32 : vector<12x32x1xi1> to vector<12x32x1xi1>
    %34 = vector.broadcast %33 : vector<12x32x1xi1> to vector<12x32x32xi1>
    %35 = vector.broadcast %cst_9 : f32 to vector<12x32x32xf32>
    %36 = arith.select %34, %17, %35 : vector<12x32x32xi1>, vector<12x32x32xf32>
    %c0_10 = arith.constant 0 : index
    %c0_11 = arith.constant 0 : index
    %c0_12 = arith.constant 0 : index
    %37 = vector.load %arg10[%c0_10, %c0_11, %c0_12] : memref<12x32x32xf32, #tpu.memory_space<vmem>>, vector<12x32x32xf32>
    tpu.vector_store %arg10[%c0_10, %c0_11, %c0_12], %36 {strides = array<i32>} : memref<12x32x32xf32, #tpu.memory_space<vmem>>, vector<12x32x32xf32>,
    %cst_13 = arith.constant 0.000000e+00 : f32
    %38 = vector.broadcast %cst_13 : f32 to vector<8x16x32xf32>
    %c0_14 = arith.constant 0 : index
    %c0_15 = arith.constant 0 : index
    %c0_16 = arith.constant 0 : index
    %39 = vector.load %arg11[%c0_14, %c0_15, %c0_16] : memref<8x16x32xf32, #tpu.memory_space<vmem>>, vector<8x16x32xf32>
    tpu.vector_store %arg11[%c0_14, %c0_15, %c0_16], %38 {strides = array<i32>} : memref<8x16x32xf32, #tpu.memory_space<vmem>>, vector<8x16x32xf32>,
    %c0_17 = arith.constant 0 : index
    %c0_18 = arith.constant 0 : index
    %c0_19 = arith.constant 0 : index
    %40 = vector.load %arg5[%c0_17, %c0_18, %c0_19] : memref<3x3x32xf32, #tpu.memory_space<vmem>>, vector<3x3x32xf32>
    %c1 = arith.constant 1 : index
    %c1_20 = arith.constant 1 : index
    %c0_21 = arith.constant 0 : index
    %41 = vector.load %arg10[%c1, %c1_20, %c0_21] : memref<12x32x32xf32, #tpu.memory_space<vmem>>, vector<8x16x32xf32>
    %c0_22 = arith.constant 0 : index
    %c0_23 = arith.constant 0 : index
    %c0_24 = arith.constant 0 : index
    %42 = vector.load %arg11[%c0_22, %c0_23, %c0_24] : memref<8x16x32xf32, #tpu.memory_space<vmem>>, vector<8x16x32xf32>
    %43 = vector.extract_strided_slice %40 {offsets = [0, 0, 0], sizes = [1, 1, 32], strides = [1, 1, 1]} : vector<3x3x32xf32> to vector<1x1x32xf32>
    %44 = vector.shape_cast %43 : vector<1x1x32xf32> to vector<32xf32>
    %45 = vector.shape_cast %44 : vector<32xf32> to vector<1x1x32xf32>
    %46 = vector.broadcast %45 : vector<1x1x32xf32> to vector<8x16x32xf32>
    %47 = arith.mulf %41, %46 : vector<8x16x32xf32>
    %48 = arith.addf %42, %47 : vector<8x16x32xf32>
    %c0_25 = arith.constant 0 : index
    %c0_26 = arith.constant 0 : index
    %c0_27 = arith.constant 0 : index
    %49 = vector.load %arg11[%c0_25, %c0_26, %c0_27] : memref<8x16x32xf32, #tpu.memory_space<vmem>>, vector<8x16x32xf32>
    tpu.vector_store %arg11[%c0_25, %c0_26, %c0_27], %48 {strides = array<i32>} : memref<8x16x32xf32, #tpu.memory_space<vmem>>, vector<8x16x32xf32>,
    %c1_28 = arith.constant 1 : index
    %c2 = arith.constant 2 : index
    %c0_29 = arith.constant 0 : index
    %50 = vector.load %arg10[%c1_28, %c2, %c0_29] : memref<12x32x32xf32, #tpu.memory_space<vmem>>, vector<8x16x32xf32>
    %c0_30 = arith.constant 0 : index
    %c0_31 = arith.constant 0 : index
    %c0_32 = arith.constant 0 : index
    %51 = vector.load %arg11[%c0_30, %c0_31, %c0_32] : memref<8x16x32xf32, #tpu.memory_space<vmem>>, vector<8x16x32xf32>
    %52 = vector.extract_strided_slice %40 {offsets = [0, 1, 0], sizes = [1, 1, 32], strides = [1, 1, 1]} : vector<3x3x32xf32> to vector<1x1x32xf32>
    %53 = vector.shape_cast %52 : vector<1x1x32xf32> to vector<32xf32>
    %54 = vector.shape_cast %53 : vector<32xf32> to vector<1x1x32xf32>
    %55 = vector.broadcast %54 : vector<1x1x32xf32> to vector<8x16x32xf32>
    %56 = arith.mulf %50, %55 : vector<8x16x32xf32>
    %57 = arith.addf %51, %56 : vector<8x16x32xf32>
    %c0_33 = arith.constant 0 : index
    %c0_34 = arith.constant 0 : index
    %c0_35 = arith.constant 0 : index
    %58 = vector.load %arg11[%c0_33, %c0_34, %c0_35] : memref<8x16x32xf32, #tpu.memory_space<vmem>>, vector<8x16x32xf32>
    tpu.vector_store %arg11[%c0_33, %c0_34, %c0_35], %57 {strides = array<i32>} : memref<8x16x32xf32, #tpu.memory_space<vmem>>, vector<8x16x32xf32>,
    %c1_36 = arith.constant 1 : index
    %c3 = arith.constant 3 : index
    %c0_37 = arith.constant 0 : index
    %59 = vector.load %arg10[%c1_36, %c3, %c0_37] : memref<12x32x32xf32, #tpu.memory_space<vmem>>, vector<8x16x32xf32>
    %c0_38 = arith.constant 0 : index
    %c0_39 = arith.constant 0 : index
    %c0_40 = arith.constant 0 : index
    %60 = vector.load %arg11[%c0_38, %c0_39, %c0_40] : memref<8x16x32xf32, #tpu.memory_space<vmem>>, vector<8x16x32xf32>
    %61 = vector.extract_strided_slice %40 {offsets = [0, 2, 0], sizes = [1, 1, 32], strides = [1, 1, 1]} : vector<3x3x32xf32> to vector<1x1x32xf32>
    %62 = vector.shape_cast %61 : vector<1x1x32xf32> to vector<32xf32>
    %63 = vector.shape_cast %62 : vector<32xf32> to vector<1x1x32xf32>
    %64 = vector.broadcast %63 : vector<1x1x32xf32> to vector<8x16x32xf32>
    %65 = arith.mulf %59, %64 : vector<8x16x32xf32>
    %66 = arith.addf %60, %65 : vector<8x16x32xf32>
    %c0_41 = arith.constant 0 : index
    %c0_42 = arith.constant 0 : index
    %c0_43 = arith.constant 0 : index
    %67 = vector.load %arg11[%c0_41, %c0_42, %c0_43] : memref<8x16x32xf32, #tpu.memory_space<vmem>>, vector<8x16x32xf32>
    tpu.vector_store %arg11[%c0_41, %c0_42, %c0_43], %66 {strides = array<i32>} : memref<8x16x32xf32, #tpu.memory_space<vmem>>, vector<8x16x32xf32>,
    %c2_44 = arith.constant 2 : index
    %c1_45 = arith.constant 1 : index
    %c0_46 = arith.constant 0 : index
    %68 = vector.load %arg10[%c2_44, %c1_45, %c0_46] : memref<12x32x32xf32, #tpu.memory_space<vmem>>, vector<8x16x32xf32>
    %c0_47 = arith.constant 0 : index
    %c0_48 = arith.constant 0 : index
    %c0_49 = arith.constant 0 : index
    %69 = vector.load %arg11[%c0_47, %c0_48, %c0_49] : memref<8x16x32xf32, #tpu.memory_space<vmem>>, vector<8x16x32xf32>
    %70 = vector.extract_strided_slice %40 {offsets = [1, 0, 0], sizes = [1, 1, 32], strides = [1, 1, 1]} : vector<3x3x32xf32> to vector<1x1x32xf32>
    %71 = vector.shape_cast %70 : vector<1x1x32xf32> to vector<32xf32>
    %72 = vector.shape_cast %71 : vector<32xf32> to vector<1x1x32xf32>
    %73 = vector.broadcast %72 : vector<1x1x32xf32> to vector<8x16x32xf32>
    %74 = arith.mulf %68, %73 : vector<8x16x32xf32>
    %75 = arith.addf %69, %74 : vector<8x16x32xf32>
    %c0_50 = arith.constant 0 : index
    %c0_51 = arith.constant 0 : index
    %c0_52 = arith.constant 0 : index
    %76 = vector.load %arg11[%c0_50, %c0_51, %c0_52] : memref<8x16x32xf32, #tpu.memory_space<vmem>>, vector<8x16x32xf32>
    tpu.vector_store %arg11[%c0_50, %c0_51, %c0_52], %75 {strides = array<i32>} : memref<8x16x32xf32, #tpu.memory_space<vmem>>, vector<8x16x32xf32>,
    %c2_53 = arith.constant 2 : index
    %c2_54 = arith.constant 2 : index
    %c0_55 = arith.constant 0 : index
    %77 = vector.load %arg10[%c2_53, %c2_54, %c0_55] : memref<12x32x32xf32, #tpu.memory_space<vmem>>, vector<8x16x32xf32>
    %c0_56 = arith.constant 0 : index
    %c0_57 = arith.constant 0 : index
    %c0_58 = arith.constant 0 : index
    %78 = vector.load %arg11[%c0_56, %c0_57, %c0_58] : memref<8x16x32xf32, #tpu.memory_space<vmem>>, vector<8x16x32xf32>
    %79 = vector.extract_strided_slice %40 {offsets = [1, 1, 0], sizes = [1, 1, 32], strides = [1, 1, 1]} : vector<3x3x32xf32> to vector<1x1x32xf32>
    %80 = vector.shape_cast %79 : vector<1x1x32xf32> to vector<32xf32>
    %81 = vector.shape_cast %80 : vector<32xf32> to vector<1x1x32xf32>
    %82 = vector.broadcast %81 : vector<1x1x32xf32> to vector<8x16x32xf32>
    %83 = arith.mulf %77, %82 : vector<8x16x32xf32>
    %84 = arith.addf %78, %83 : vector<8x16x32xf32>
    %c0_59 = arith.constant 0 : index
    %c0_60 = arith.constant 0 : index
    %c0_61 = arith.constant 0 : index
    %85 = vector.load %arg11[%c0_59, %c0_60, %c0_61] : memref<8x16x32xf32, #tpu.memory_space<vmem>>, vector<8x16x32xf32>
    tpu.vector_store %arg11[%c0_59, %c0_60, %c0_61], %84 {strides = array<i32>} : memref<8x16x32xf32, #tpu.memory_space<vmem>>, vector<8x16x32xf32>,
    %c2_62 = arith.constant 2 : index
    %c3_63 = arith.constant 3 : index
    %c0_64 = arith.constant 0 : index
    %86 = vector.load %arg10[%c2_62, %c3_63, %c0_64] : memref<12x32x32xf32, #tpu.memory_space<vmem>>, vector<8x16x32xf32>
    %c0_65 = arith.constant 0 : index
    %c0_66 = arith.constant 0 : index
    %c0_67 = arith.constant 0 : index
    %87 = vector.load %arg11[%c0_65, %c0_66, %c0_67] : memref<8x16x32xf32, #tpu.memory_space<vmem>>, vector<8x16x32xf32>
    %88 = vector.extract_strided_slice %40 {offsets = [1, 2, 0], sizes = [1, 1, 32], strides = [1, 1, 1]} : vector<3x3x32xf32> to vector<1x1x32xf32>
    %89 = vector.shape_cast %88 : vector<1x1x32xf32> to vector<32xf32>
    %90 = vector.shape_cast %89 : vector<32xf32> to vector<1x1x32xf32>
    %91 = vector.broadcast %90 : vector<1x1x32xf32> to vector<8x16x32xf32>
    %92 = arith.mulf %86, %91 : vector<8x16x32xf32>
    %93 = arith.addf %87, %92 : vector<8x16x32xf32>
    %c0_68 = arith.constant 0 : index
    %c0_69 = arith.constant 0 : index
    %c0_70 = arith.constant 0 : index
    %94 = vector.load %arg11[%c0_68, %c0_69, %c0_70] : memref<8x16x32xf32, #tpu.memory_space<vmem>>, vector<8x16x32xf32>
    tpu.vector_store %arg11[%c0_68, %c0_69, %c0_70], %93 {strides = array<i32>} : memref<8x16x32xf32, #tpu.memory_space<vmem>>, vector<8x16x32xf32>,
    %c3_71 = arith.constant 3 : index
    %c1_72 = arith.constant 1 : index
    %c0_73 = arith.constant 0 : index
    %95 = vector.load %arg10[%c3_71, %c1_72, %c0_73] : memref<12x32x32xf32, #tpu.memory_space<vmem>>, vector<8x16x32xf32>
    %c0_74 = arith.constant 0 : index
    %c0_75 = arith.constant 0 : index
    %c0_76 = arith.constant 0 : index
    %96 = vector.load %arg11[%c0_74, %c0_75, %c0_76] : memref<8x16x32xf32, #tpu.memory_space<vmem>>, vector<8x16x32xf32>
    %97 = vector.extract_strided_slice %40 {offsets = [2, 0, 0], sizes = [1, 1, 32], strides = [1, 1, 1]} : vector<3x3x32xf32> to vector<1x1x32xf32>
    %98 = vector.shape_cast %97 : vector<1x1x32xf32> to vector<32xf32>
    %99 = vector.shape_cast %98 : vector<32xf32> to vector<1x1x32xf32>
    %100 = vector.broadcast %99 : vector<1x1x32xf32> to vector<8x16x32xf32>
    %101 = arith.mulf %95, %100 : vector<8x16x32xf32>
    %102 = arith.addf %96, %101 : vector<8x16x32xf32>
    %c0_77 = arith.constant 0 : index
    %c0_78 = arith.constant 0 : index
    %c0_79 = arith.constant 0 : index
    %103 = vector.load %arg11[%c0_77, %c0_78, %c0_79] : memref<8x16x32xf32, #tpu.memory_space<vmem>>, vector<8x16x32xf32>
    tpu.vector_store %arg11[%c0_77, %c0_78, %c0_79], %102 {strides = array<i32>} : memref<8x16x32xf32, #tpu.memory_space<vmem>>, vector<8x16x32xf32>,
    %c3_80 = arith.constant 3 : index
    %c2_81 = arith.constant 2 : index
    %c0_82 = arith.constant 0 : index
    %104 = vector.load %arg10[%c3_80, %c2_81, %c0_82] : memref<12x32x32xf32, #tpu.memory_space<vmem>>, vector<8x16x32xf32>
    %c0_83 = arith.constant 0 : index
    %c0_84 = arith.constant 0 : index
    %c0_85 = arith.constant 0 : index
    %105 = vector.load %arg11[%c0_83, %c0_84, %c0_85] : memref<8x16x32xf32, #tpu.memory_space<vmem>>, vector<8x16x32xf32>
    %106 = vector.extract_strided_slice %40 {offsets = [2, 1, 0], sizes = [1, 1, 32], strides = [1, 1, 1]} : vector<3x3x32xf32> to vector<1x1x32xf32>
    %107 = vector.shape_cast %106 : vector<1x1x32xf32> to vector<32xf32>
    %108 = vector.shape_cast %107 : vector<32xf32> to vector<1x1x32xf32>
    %109 = vector.broadcast %108 : vector<1x1x32xf32> to vector<8x16x32xf32>
    %110 = arith.mulf %104, %109 : vector<8x16x32xf32>
    %111 = arith.addf %105, %110 : vector<8x16x32xf32>
    %c0_86 = arith.constant 0 : index
    %c0_87 = arith.constant 0 : index
    %c0_88 = arith.constant 0 : index
    %112 = vector.load %arg11[%c0_86, %c0_87, %c0_88] : memref<8x16x32xf32, #tpu.memory_space<vmem>>, vector<8x16x32xf32>
    tpu.vector_store %arg11[%c0_86, %c0_87, %c0_88], %111 {strides = array<i32>} : memref<8x16x32xf32, #tpu.memory_space<vmem>>, vector<8x16x32xf32>,
    %c3_89 = arith.constant 3 : index
    %c3_90 = arith.constant 3 : index
    %c0_91 = arith.constant 0 : index
    %113 = vector.load %arg10[%c3_89, %c3_90, %c0_91] : memref<12x32x32xf32, #tpu.memory_space<vmem>>, vector<8x16x32xf32>
    %c0_92 = arith.constant 0 : index
    %c0_93 = arith.constant 0 : index
    %c0_94 = arith.constant 0 : index
    %114 = vector.load %arg11[%c0_92, %c0_93, %c0_94] : memref<8x16x32xf32, #tpu.memory_space<vmem>>, vector<8x16x32xf32>
    %115 = vector.extract_strided_slice %40 {offsets = [2, 2, 0], sizes = [1, 1, 32], strides = [1, 1, 1]} : vector<3x3x32xf32> to vector<1x1x32xf32>
    %116 = vector.shape_cast %115 : vector<1x1x32xf32> to vector<32xf32>
    %117 = vector.shape_cast %116 : vector<32xf32> to vector<1x1x32xf32>
    %118 = vector.broadcast %117 : vector<1x1x32xf32> to vector<8x16x32xf32>
    %119 = arith.mulf %113, %118 : vector<8x16x32xf32>
    %120 = arith.addf %114, %119 : vector<8x16x32xf32>
    %c0_95 = arith.constant 0 : index
    %c0_96 = arith.constant 0 : index
    %c0_97 = arith.constant 0 : index
    %121 = vector.load %arg11[%c0_95, %c0_96, %c0_97] : memref<8x16x32xf32, #tpu.memory_space<vmem>>, vector<8x16x32xf32>
    tpu.vector_store %arg11[%c0_95, %c0_96, %c0_97], %120 {strides = array<i32>} : memref<8x16x32xf32, #tpu.memory_space<vmem>>, vector<8x16x32xf32>,
    %c0_98 = arith.constant 0 : index
    %c0_99 = arith.constant 0 : index
    %c0_100 = arith.constant 0 : index
    %122 = vector.load %arg6[%c0_98, %c0_99, %c0_100] : memref<5x5x32xf32, #tpu.memory_space<vmem>>, vector<5x5x32xf32>
    %c0_101 = arith.constant 0 : index
    %c0_102 = arith.constant 0 : index
    %c0_103 = arith.constant 0 : index
    %123 = vector.load %arg10[%c0_101, %c0_102, %c0_103] : memref<12x32x32xf32, #tpu.memory_space<vmem>>, vector<8x16x32xf32>
    %c0_104 = arith.constant 0 : index
    %c0_105 = arith.constant 0 : index
    %c0_106 = arith.constant 0 : index
    %124 = vector.load %arg11[%c0_104, %c0_105, %c0_106] : memref<8x16x32xf32, #tpu.memory_space<vmem>>, vector<8x16x32xf32>
    %125 = vector.extract_strided_slice %122 {offsets = [0, 0, 0], sizes = [1, 1, 32], strides = [1, 1, 1]} : vector<5x5x32xf32> to vector<1x1x32xf32>
    %126 = vector.shape_cast %125 : vector<1x1x32xf32> to vector<32xf32>
    %127 = vector.shape_cast %126 : vector<32xf32> to vector<1x1x32xf32>
    %128 = vector.broadcast %127 : vector<1x1x32xf32> to vector<8x16x32xf32>
    %129 = arith.mulf %123, %128 : vector<8x16x32xf32>
    %130 = arith.addf %124, %129 : vector<8x16x32xf32>
    %c0_107 = arith.constant 0 : index
    %c0_108 = arith.constant 0 : index
    %c0_109 = arith.constant 0 : index
    %131 = vector.load %arg11[%c0_107, %c0_108, %c0_109] : memref<8x16x32xf32, #tpu.memory_space<vmem>>, vector<8x16x32xf32>
    tpu.vector_store %arg11[%c0_107, %c0_108, %c0_109], %130 {strides = array<i32>} : memref<8x16x32xf32, #tpu.memory_space<vmem>>, vector<8x16x32xf32>,
    %c0_110 = arith.constant 0 : index
    %c1_111 = arith.constant 1 : index
    %c0_112 = arith.constant 0 : index
    %132 = vector.load %arg10[%c0_110, %c1_111, %c0_112] : memref<12x32x32xf32, #tpu.memory_space<vmem>>, vector<8x16x32xf32>
    %c0_113 = arith.constant 0 : index
    %c0_114 = arith.constant 0 : index
    %c0_115 = arith.constant 0 : index
    %133 = vector.load %arg11[%c0_113, %c0_114, %c0_115] : memref<8x16x32xf32, #tpu.memory_space<vmem>>, vector<8x16x32xf32>
    %134 = vector.extract_strided_slice %122 {offsets = [0, 1, 0], sizes = [1, 1, 32], strides = [1, 1, 1]} : vector<5x5x32xf32> to vector<1x1x32xf32>
    %135 = vector.shape_cast %134 : vector<1x1x32xf32> to vector<32xf32>
    %136 = vector.shape_cast %135 : vector<32xf32> to vector<1x1x32xf32>
    %137 = vector.broadcast %136 : vector<1x1x32xf32> to vector<8x16x32xf32>
    %138 = arith.mulf %132, %137 : vector<8x16x32xf32>
    %139 = arith.addf %133, %138 : vector<8x16x32xf32>
    %c0_116 = arith.constant 0 : index
    %c0_117 = arith.constant 0 : index
    %c0_118 = arith.constant 0 : index
    %140 = vector.load %arg11[%c0_116, %c0_117, %c0_118] : memref<8x16x32xf32, #tpu.memory_space<vmem>>, vector<8x16x32xf32>
    tpu.vector_store %arg11[%c0_116, %c0_117, %c0_118], %139 {strides = array<i32>} : memref<8x16x32xf32, #tpu.memory_space<vmem>>, vector<8x16x32xf32>,
    %c0_119 = arith.constant 0 : index
    %c2_120 = arith.constant 2 : index
    %c0_121 = arith.constant 0 : index
    %141 = vector.load %arg10[%c0_119, %c2_120, %c0_121] : memref<12x32x32xf32, #tpu.memory_space<vmem>>, vector<8x16x32xf32>
    %c0_122 = arith.constant 0 : index
    %c0_123 = arith.constant 0 : index
    %c0_124 = arith.constant 0 : index
    %142 = vector.load %arg11[%c0_122, %c0_123, %c0_124] : memref<8x16x32xf32, #tpu.memory_space<vmem>>, vector<8x16x32xf32>
    %143 = vector.extract_strided_slice %122 {offsets = [0, 2, 0], sizes = [1, 1, 32], strides = [1, 1, 1]} : vector<5x5x32xf32> to vector<1x1x32xf32>
    %144 = vector.shape_cast %143 : vector<1x1x32xf32> to vector<32xf32>
    %145 = vector.shape_cast %144 : vector<32xf32> to vector<1x1x32xf32>
    %146 = vector.broadcast %145 : vector<1x1x32xf32> to vector<8x16x32xf32>
    %147 = arith.mulf %141, %146 : vector<8x16x32xf32>
    %148 = arith.addf %142, %147 : vector<8x16x32xf32>
    %c0_125 = arith.constant 0 : index
    %c0_126 = arith.constant 0 : index
    %c0_127 = arith.constant 0 : index
    %149 = vector.load %arg11[%c0_125, %c0_126, %c0_127] : memref<8x16x32xf32, #tpu.memory_space<vmem>>, vector<8x16x32xf32>
    tpu.vector_store %arg11[%c0_125, %c0_126, %c0_127], %148 {strides = array<i32>} : memref<8x16x32xf32, #tpu.memory_space<vmem>>, vector<8x16x32xf32>,
    %c0_128 = arith.constant 0 : index
    %c3_129 = arith.constant 3 : index
    %c0_130 = arith.constant 0 : index
    %150 = vector.load %arg10[%c0_128, %c3_129, %c0_130] : memref<12x32x32xf32, #tpu.memory_space<vmem>>, vector<8x16x32xf32>
    %c0_131 = arith.constant 0 : index
    %c0_132 = arith.constant 0 : index
    %c0_133 = arith.constant 0 : index
    %151 = vector.load %arg11[%c0_131, %c0_132, %c0_133] : memref<8x16x32xf32, #tpu.memory_space<vmem>>, vector<8x16x32xf32>
    %152 = vector.extract_strided_slice %122 {offsets = [0, 3, 0], sizes = [1, 1, 32], strides = [1, 1, 1]} : vector<5x5x32xf32> to vector<1x1x32xf32>
    %153 = vector.shape_cast %152 : vector<1x1x32xf32> to vector<32xf32>
    %154 = vector.shape_cast %153 : vector<32xf32> to vector<1x1x32xf32>
    %155 = vector.broadcast %154 : vector<1x1x32xf32> to vector<8x16x32xf32>
    %156 = arith.mulf %150, %155 : vector<8x16x32xf32>
    %157 = arith.addf %151, %156 : vector<8x16x32xf32>
    %c0_134 = arith.constant 0 : index
    %c0_135 = arith.constant 0 : index
    %c0_136 = arith.constant 0 : index
    %158 = vector.load %arg11[%c0_134, %c0_135, %c0_136] : memref<8x16x32xf32, #tpu.memory_space<vmem>>, vector<8x16x32xf32>
    tpu.vector_store %arg11[%c0_134, %c0_135, %c0_136], %157 {strides = array<i32>} : memref<8x16x32xf32, #tpu.memory_space<vmem>>, vector<8x16x32xf32>,
    %c0_137 = arith.constant 0 : index
    %c4 = arith.constant 4 : index
    %c0_138 = arith.constant 0 : index
    %159 = vector.load %arg10[%c0_137, %c4, %c0_138] : memref<12x32x32xf32, #tpu.memory_space<vmem>>, vector<8x16x32xf32>
    %c0_139 = arith.constant 0 : index
    %c0_140 = arith.constant 0 : index
    %c0_141 = arith.constant 0 : index
    %160 = vector.load %arg11[%c0_139, %c0_140, %c0_141] : memref<8x16x32xf32, #tpu.memory_space<vmem>>, vector<8x16x32xf32>
    %161 = vector.extract_strided_slice %122 {offsets = [0, 4, 0], sizes = [1, 1, 32], strides = [1, 1, 1]} : vector<5x5x32xf32> to vector<1x1x32xf32>
    %162 = vector.shape_cast %161 : vector<1x1x32xf32> to vector<32xf32>
    %163 = vector.shape_cast %162 : vector<32xf32> to vector<1x1x32xf32>
    %164 = vector.broadcast %163 : vector<1x1x32xf32> to vector<8x16x32xf32>
    %165 = arith.mulf %159, %164 : vector<8x16x32xf32>
    %166 = arith.addf %160, %165 : vector<8x16x32xf32>
    %c0_142 = arith.constant 0 : index
    %c0_143 = arith.constant 0 : index
    %c0_144 = arith.constant 0 : index
    %167 = vector.load %arg11[%c0_142, %c0_143, %c0_144] : memref<8x16x32xf32, #tpu.memory_space<vmem>>, vector<8x16x32xf32>
    tpu.vector_store %arg11[%c0_142, %c0_143, %c0_144], %166 {strides = array<i32>} : memref<8x16x32xf32, #tpu.memory_space<vmem>>, vector<8x16x32xf32>,
    %c1_145 = arith.constant 1 : index
    %c0_146 = arith.constant 0 : index
    %c0_147 = arith.constant 0 : index
    %168 = vector.load %arg10[%c1_145, %c0_146, %c0_147] : memref<12x32x32xf32, #tpu.memory_space<vmem>>, vector<8x16x32xf32>
    %c0_148 = arith.constant 0 : index
    %c0_149 = arith.constant 0 : index
    %c0_150 = arith.constant 0 : index
    %169 = vector.load %arg11[%c0_148, %c0_149, %c0_150] : memref<8x16x32xf32, #tpu.memory_space<vmem>>, vector<8x16x32xf32>
    %170 = vector.extract_strided_slice %122 {offsets = [1, 0, 0], sizes = [1, 1, 32], strides = [1, 1, 1]} : vector<5x5x32xf32> to vector<1x1x32xf32>
    %171 = vector.shape_cast %170 : vector<1x1x32xf32> to vector<32xf32>
    %172 = vector.shape_cast %171 : vector<32xf32> to vector<1x1x32xf32>
    %173 = vector.broadcast %172 : vector<1x1x32xf32> to vector<8x16x32xf32>
    %174 = arith.mulf %168, %173 : vector<8x16x32xf32>
    %175 = arith.addf %169, %174 : vector<8x16x32xf32>
    %c0_151 = arith.constant 0 : index
    %c0_152 = arith.constant 0 : index
    %c0_153 = arith.constant 0 : index
    %176 = vector.load %arg11[%c0_151, %c0_152, %c0_153] : memref<8x16x32xf32, #tpu.memory_space<vmem>>, vector<8x16x32xf32>
    tpu.vector_store %arg11[%c0_151, %c0_152, %c0_153], %175 {strides = array<i32>} : memref<8x16x32xf32, #tpu.memory_space<vmem>>, vector<8x16x32xf32>,
    %c1_154 = arith.constant 1 : index
    %c1_155 = arith.constant 1 : index
    %c0_156 = arith.constant 0 : index
    %177 = vector.load %arg10[%c1_154, %c1_155, %c0_156] : memref<12x32x32xf32, #tpu.memory_space<vmem>>, vector<8x16x32xf32>
    %c0_157 = arith.constant 0 : index
    %c0_158 = arith.constant 0 : index
    %c0_159 = arith.constant 0 : index
    %178 = vector.load %arg11[%c0_157, %c0_158, %c0_159] : memref<8x16x32xf32, #tpu.memory_space<vmem>>, vector<8x16x32xf32>
    %179 = vector.extract_strided_slice %122 {offsets = [1, 1, 0], sizes = [1, 1, 32], strides = [1, 1, 1]} : vector<5x5x32xf32> to vector<1x1x32xf32>
    %180 = vector.shape_cast %179 : vector<1x1x32xf32> to vector<32xf32>
    %181 = vector.shape_cast %180 : vector<32xf32> to vector<1x1x32xf32>
    %182 = vector.broadcast %181 : vector<1x1x32xf32> to vector<8x16x32xf32>
    %183 = arith.mulf %177, %182 : vector<8x16x32xf32>
    %184 = arith.addf %178, %183 : vector<8x16x32xf32>
    %c0_160 = arith.constant 0 : index
    %c0_161 = arith.constant 0 : index
    %c0_162 = arith.constant 0 : index
    %185 = vector.load %arg11[%c0_160, %c0_161, %c0_162] : memref<8x16x32xf32, #tpu.memory_space<vmem>>, vector<8x16x32xf32>
    tpu.vector_store %arg11[%c0_160, %c0_161, %c0_162], %184 {strides = array<i32>} : memref<8x16x32xf32, #tpu.memory_space<vmem>>, vector<8x16x32xf32>,
    %c1_163 = arith.constant 1 : index
    %c2_164 = arith.constant 2 : index
    %c0_165 = arith.constant 0 : index
    %186 = vector.load %arg10[%c1_163, %c2_164, %c0_165] : memref<12x32x32xf32, #tpu.memory_space<vmem>>, vector<8x16x32xf32>
    %c0_166 = arith.constant 0 : index
    %c0_167 = arith.constant 0 : index
    %c0_168 = arith.constant 0 : index
    %187 = vector.load %arg11[%c0_166, %c0_167, %c0_168] : memref<8x16x32xf32, #tpu.memory_space<vmem>>, vector<8x16x32xf32>
    %188 = vector.extract_strided_slice %122 {offsets = [1, 2, 0], sizes = [1, 1, 32], strides = [1, 1, 1]} : vector<5x5x32xf32> to vector<1x1x32xf32>
    %189 = vector.shape_cast %188 : vector<1x1x32xf32> to vector<32xf32>
    %190 = vector.shape_cast %189 : vector<32xf32> to vector<1x1x32xf32>
    %191 = vector.broadcast %190 : vector<1x1x32xf32> to vector<8x16x32xf32>
    %192 = arith.mulf %186, %191 : vector<8x16x32xf32>
    %193 = arith.addf %187, %192 : vector<8x16x32xf32>
    %c0_169 = arith.constant 0 : index
    %c0_170 = arith.constant 0 : index
    %c0_171 = arith.constant 0 : index
    %194 = vector.load %arg11[%c0_169, %c0_170, %c0_171] : memref<8x16x32xf32, #tpu.memory_space<vmem>>, vector<8x16x32xf32>
    tpu.vector_store %arg11[%c0_169, %c0_170, %c0_171], %193 {strides = array<i32>} : memref<8x16x32xf32, #tpu.memory_space<vmem>>, vector<8x16x32xf32>,
    %c1_172 = arith.constant 1 : index
    %c3_173 = arith.constant 3 : index
    %c0_174 = arith.constant 0 : index
    %195 = vector.load %arg10[%c1_172, %c3_173, %c0_174] : memref<12x32x32xf32, #tpu.memory_space<vmem>>, vector<8x16x32xf32>
    %c0_175 = arith.constant 0 : index
    %c0_176 = arith.constant 0 : index
    %c0_177 = arith.constant 0 : index
    %196 = vector.load %arg11[%c0_175, %c0_176, %c0_177] : memref<8x16x32xf32, #tpu.memory_space<vmem>>, vector<8x16x32xf32>
    %197 = vector.extract_strided_slice %122 {offsets = [1, 3, 0], sizes = [1, 1, 32], strides = [1, 1, 1]} : vector<5x5x32xf32> to vector<1x1x32xf32>
    %198 = vector.shape_cast %197 : vector<1x1x32xf32> to vector<32xf32>
    %199 = vector.shape_cast %198 : vector<32xf32> to vector<1x1x32xf32>
    %200 = vector.broadcast %199 : vector<1x1x32xf32> to vector<8x16x32xf32>
    %201 = arith.mulf %195, %200 : vector<8x16x32xf32>
    %202 = arith.addf %196, %201 : vector<8x16x32xf32>
    %c0_178 = arith.constant 0 : index
    %c0_179 = arith.constant 0 : index
    %c0_180 = arith.constant 0 : index
    %203 = vector.load %arg11[%c0_178, %c0_179, %c0_180] : memref<8x16x32xf32, #tpu.memory_space<vmem>>, vector<8x16x32xf32>
    tpu.vector_store %arg11[%c0_178, %c0_179, %c0_180], %202 {strides = array<i32>} : memref<8x16x32xf32, #tpu.memory_space<vmem>>, vector<8x16x32xf32>,
    %c1_181 = arith.constant 1 : index
    %c4_182 = arith.constant 4 : index
    %c0_183 = arith.constant 0 : index
    %204 = vector.load %arg10[%c1_181, %c4_182, %c0_183] : memref<12x32x32xf32, #tpu.memory_space<vmem>>, vector<8x16x32xf32>
    %c0_184 = arith.constant 0 : index
    %c0_185 = arith.constant 0 : index
    %c0_186 = arith.constant 0 : index
    %205 = vector.load %arg11[%c0_184, %c0_185, %c0_186] : memref<8x16x32xf32, #tpu.memory_space<vmem>>, vector<8x16x32xf32>
    %206 = vector.extract_strided_slice %122 {offsets = [1, 4, 0], sizes = [1, 1, 32], strides = [1, 1, 1]} : vector<5x5x32xf32> to vector<1x1x32xf32>
    %207 = vector.shape_cast %206 : vector<1x1x32xf32> to vector<32xf32>
    %208 = vector.shape_cast %207 : vector<32xf32> to vector<1x1x32xf32>
    %209 = vector.broadcast %208 : vector<1x1x32xf32> to vector<8x16x32xf32>
    %210 = arith.mulf %204, %209 : vector<8x16x32xf32>
    %211 = arith.addf %205, %210 : vector<8x16x32xf32>
    %c0_187 = arith.constant 0 : index
    %c0_188 = arith.constant 0 : index
    %c0_189 = arith.constant 0 : index
    %212 = vector.load %arg11[%c0_187, %c0_188, %c0_189] : memref<8x16x32xf32, #tpu.memory_space<vmem>>, vector<8x16x32xf32>
    tpu.vector_store %arg11[%c0_187, %c0_188, %c0_189], %211 {strides = array<i32>} : memref<8x16x32xf32, #tpu.memory_space<vmem>>, vector<8x16x32xf32>,
    %c2_190 = arith.constant 2 : index
    %c0_191 = arith.constant 0 : index
    %c0_192 = arith.constant 0 : index
    %213 = vector.load %arg10[%c2_190, %c0_191, %c0_192] : memref<12x32x32xf32, #tpu.memory_space<vmem>>, vector<8x16x32xf32>
    %c0_193 = arith.constant 0 : index
    %c0_194 = arith.constant 0 : index
    %c0_195 = arith.constant 0 : index
    %214 = vector.load %arg11[%c0_193, %c0_194, %c0_195] : memref<8x16x32xf32, #tpu.memory_space<vmem>>, vector<8x16x32xf32>
    %215 = vector.extract_strided_slice %122 {offsets = [2, 0, 0], sizes = [1, 1, 32], strides = [1, 1, 1]} : vector<5x5x32xf32> to vector<1x1x32xf32>
    %216 = vector.shape_cast %215 : vector<1x1x32xf32> to vector<32xf32>
    %217 = vector.shape_cast %216 : vector<32xf32> to vector<1x1x32xf32>
    %218 = vector.broadcast %217 : vector<1x1x32xf32> to vector<8x16x32xf32>
    %219 = arith.mulf %213, %218 : vector<8x16x32xf32>
    %220 = arith.addf %214, %219 : vector<8x16x32xf32>
    %c0_196 = arith.constant 0 : index
    %c0_197 = arith.constant 0 : index
    %c0_198 = arith.constant 0 : index
    %221 = vector.load %arg11[%c0_196, %c0_197, %c0_198] : memref<8x16x32xf32, #tpu.memory_space<vmem>>, vector<8x16x32xf32>
    tpu.vector_store %arg11[%c0_196, %c0_197, %c0_198], %220 {strides = array<i32>} : memref<8x16x32xf32, #tpu.memory_space<vmem>>, vector<8x16x32xf32>,
    %c2_199 = arith.constant 2 : index
    %c1_200 = arith.constant 1 : index
    %c0_201 = arith.constant 0 : index
    %222 = vector.load %arg10[%c2_199, %c1_200, %c0_201] : memref<12x32x32xf32, #tpu.memory_space<vmem>>, vector<8x16x32xf32>
    %c0_202 = arith.constant 0 : index
    %c0_203 = arith.constant 0 : index
    %c0_204 = arith.constant 0 : index
    %223 = vector.load %arg11[%c0_202, %c0_203, %c0_204] : memref<8x16x32xf32, #tpu.memory_space<vmem>>, vector<8x16x32xf32>
    %224 = vector.extract_strided_slice %122 {offsets = [2, 1, 0], sizes = [1, 1, 32], strides = [1, 1, 1]} : vector<5x5x32xf32> to vector<1x1x32xf32>
    %225 = vector.shape_cast %224 : vector<1x1x32xf32> to vector<32xf32>
    %226 = vector.shape_cast %225 : vector<32xf32> to vector<1x1x32xf32>
    %227 = vector.broadcast %226 : vector<1x1x32xf32> to vector<8x16x32xf32>
    %228 = arith.mulf %222, %227 : vector<8x16x32xf32>
    %229 = arith.addf %223, %228 : vector<8x16x32xf32>
    %c0_205 = arith.constant 0 : index
    %c0_206 = arith.constant 0 : index
    %c0_207 = arith.constant 0 : index
    %230 = vector.load %arg11[%c0_205, %c0_206, %c0_207] : memref<8x16x32xf32, #tpu.memory_space<vmem>>, vector<8x16x32xf32>
    tpu.vector_store %arg11[%c0_205, %c0_206, %c0_207], %229 {strides = array<i32>} : memref<8x16x32xf32, #tpu.memory_space<vmem>>, vector<8x16x32xf32>,
    %c2_208 = arith.constant 2 : index
    %c2_209 = arith.constant 2 : index
    %c0_210 = arith.constant 0 : index
    %231 = vector.load %arg10[%c2_208, %c2_209, %c0_210] : memref<12x32x32xf32, #tpu.memory_space<vmem>>, vector<8x16x32xf32>
    %c0_211 = arith.constant 0 : index
    %c0_212 = arith.constant 0 : index
    %c0_213 = arith.constant 0 : index
    %232 = vector.load %arg11[%c0_211, %c0_212, %c0_213] : memref<8x16x32xf32, #tpu.memory_space<vmem>>, vector<8x16x32xf32>
    %233 = vector.extract_strided_slice %122 {offsets = [2, 2, 0], sizes = [1, 1, 32], strides = [1, 1, 1]} : vector<5x5x32xf32> to vector<1x1x32xf32>
    %234 = vector.shape_cast %233 : vector<1x1x32xf32> to vector<32xf32>
    %235 = vector.shape_cast %234 : vector<32xf32> to vector<1x1x32xf32>
    %236 = vector.broadcast %235 : vector<1x1x32xf32> to vector<8x16x32xf32>
    %237 = arith.mulf %231, %236 : vector<8x16x32xf32>
    %238 = arith.addf %232, %237 : vector<8x16x32xf32>
    %c0_214 = arith.constant 0 : index
    %c0_215 = arith.constant 0 : index
    %c0_216 = arith.constant 0 : index
    %239 = vector.load %arg11[%c0_214, %c0_215, %c0_216] : memref<8x16x32xf32, #tpu.memory_space<vmem>>, vector<8x16x32xf32>
    tpu.vector_store %arg11[%c0_214, %c0_215, %c0_216], %238 {strides = array<i32>} : memref<8x16x32xf32, #tpu.memory_space<vmem>>, vector<8x16x32xf32>,
    %c2_217 = arith.constant 2 : index
    %c3_218 = arith.constant 3 : index
    %c0_219 = arith.constant 0 : index
    %240 = vector.load %arg10[%c2_217, %c3_218, %c0_219] : memref<12x32x32xf32, #tpu.memory_space<vmem>>, vector<8x16x32xf32>
    %c0_220 = arith.constant 0 : index
    %c0_221 = arith.constant 0 : index
    %c0_222 = arith.constant 0 : index
    %241 = vector.load %arg11[%c0_220, %c0_221, %c0_222] : memref<8x16x32xf32, #tpu.memory_space<vmem>>, vector<8x16x32xf32>
    %242 = vector.extract_strided_slice %122 {offsets = [2, 3, 0], sizes = [1, 1, 32], strides = [1, 1, 1]} : vector<5x5x32xf32> to vector<1x1x32xf32>
    %243 = vector.shape_cast %242 : vector<1x1x32xf32> to vector<32xf32>
    %244 = vector.shape_cast %243 : vector<32xf32> to vector<1x1x32xf32>
    %245 = vector.broadcast %244 : vector<1x1x32xf32> to vector<8x16x32xf32>
    %246 = arith.mulf %240, %245 : vector<8x16x32xf32>
    %247 = arith.addf %241, %246 : vector<8x16x32xf32>
    %c0_223 = arith.constant 0 : index
    %c0_224 = arith.constant 0 : index
    %c0_225 = arith.constant 0 : index
    %248 = vector.load %arg11[%c0_223, %c0_224, %c0_225] : memref<8x16x32xf32, #tpu.memory_space<vmem>>, vector<8x16x32xf32>
    tpu.vector_store %arg11[%c0_223, %c0_224, %c0_225], %247 {strides = array<i32>} : memref<8x16x32xf32, #tpu.memory_space<vmem>>, vector<8x16x32xf32>,
    %c2_226 = arith.constant 2 : index
    %c4_227 = arith.constant 4 : index
    %c0_228 = arith.constant 0 : index
    %249 = vector.load %arg10[%c2_226, %c4_227, %c0_228] : memref<12x32x32xf32, #tpu.memory_space<vmem>>, vector<8x16x32xf32>
    %c0_229 = arith.constant 0 : index
    %c0_230 = arith.constant 0 : index
    %c0_231 = arith.constant 0 : index
    %250 = vector.load %arg11[%c0_229, %c0_230, %c0_231] : memref<8x16x32xf32, #tpu.memory_space<vmem>>, vector<8x16x32xf32>
    %251 = vector.extract_strided_slice %122 {offsets = [2, 4, 0], sizes = [1, 1, 32], strides = [1, 1, 1]} : vector<5x5x32xf32> to vector<1x1x32xf32>
    %252 = vector.shape_cast %251 : vector<1x1x32xf32> to vector<32xf32>
    %253 = vector.shape_cast %252 : vector<32xf32> to vector<1x1x32xf32>
    %254 = vector.broadcast %253 : vector<1x1x32xf32> to vector<8x16x32xf32>
    %255 = arith.mulf %249, %254 : vector<8x16x32xf32>
    %256 = arith.addf %250, %255 : vector<8x16x32xf32>
    %c0_232 = arith.constant 0 : index
    %c0_233 = arith.constant 0 : index
    %c0_234 = arith.constant 0 : index
    %257 = vector.load %arg11[%c0_232, %c0_233, %c0_234] : memref<8x16x32xf32, #tpu.memory_space<vmem>>, vector<8x16x32xf32>
    tpu.vector_store %arg11[%c0_232, %c0_233, %c0_234], %256 {strides = array<i32>} : memref<8x16x32xf32, #tpu.memory_space<vmem>>, vector<8x16x32xf32>,
    %c3_235 = arith.constant 3 : index
    %c0_236 = arith.constant 0 : index
    %c0_237 = arith.constant 0 : index
    %258 = vector.load %arg10[%c3_235, %c0_236, %c0_237] : memref<12x32x32xf32, #tpu.memory_space<vmem>>, vector<8x16x32xf32>
    %c0_238 = arith.constant 0 : index
    %c0_239 = arith.constant 0 : index
    %c0_240 = arith.constant 0 : index
    %259 = vector.load %arg11[%c0_238, %c0_239, %c0_240] : memref<8x16x32xf32, #tpu.memory_space<vmem>>, vector<8x16x32xf32>
    %260 = vector.extract_strided_slice %122 {offsets = [3, 0, 0], sizes = [1, 1, 32], strides = [1, 1, 1]} : vector<5x5x32xf32> to vector<1x1x32xf32>
    %261 = vector.shape_cast %260 : vector<1x1x32xf32> to vector<32xf32>
    %262 = vector.shape_cast %261 : vector<32xf32> to vector<1x1x32xf32>
    %263 = vector.broadcast %262 : vector<1x1x32xf32> to vector<8x16x32xf32>
    %264 = arith.mulf %258, %263 : vector<8x16x32xf32>
    %265 = arith.addf %259, %264 : vector<8x16x32xf32>
    %c0_241 = arith.constant 0 : index
    %c0_242 = arith.constant 0 : index
    %c0_243 = arith.constant 0 : index
    %266 = vector.load %arg11[%c0_241, %c0_242, %c0_243] : memref<8x16x32xf32, #tpu.memory_space<vmem>>, vector<8x16x32xf32>
    tpu.vector_store %arg11[%c0_241, %c0_242, %c0_243], %265 {strides = array<i32>} : memref<8x16x32xf32, #tpu.memory_space<vmem>>, vector<8x16x32xf32>,
    %c3_244 = arith.constant 3 : index
    %c1_245 = arith.constant 1 : index
    %c0_246 = arith.constant 0 : index
    %267 = vector.load %arg10[%c3_244, %c1_245, %c0_246] : memref<12x32x32xf32, #tpu.memory_space<vmem>>, vector<8x16x32xf32>
    %c0_247 = arith.constant 0 : index
    %c0_248 = arith.constant 0 : index
    %c0_249 = arith.constant 0 : index
    %268 = vector.load %arg11[%c0_247, %c0_248, %c0_249] : memref<8x16x32xf32, #tpu.memory_space<vmem>>, vector<8x16x32xf32>
    %269 = vector.extract_strided_slice %122 {offsets = [3, 1, 0], sizes = [1, 1, 32], strides = [1, 1, 1]} : vector<5x5x32xf32> to vector<1x1x32xf32>
    %270 = vector.shape_cast %269 : vector<1x1x32xf32> to vector<32xf32>
    %271 = vector.shape_cast %270 : vector<32xf32> to vector<1x1x32xf32>
    %272 = vector.broadcast %271 : vector<1x1x32xf32> to vector<8x16x32xf32>
    %273 = arith.mulf %267, %272 : vector<8x16x32xf32>
    %274 = arith.addf %268, %273 : vector<8x16x32xf32>
    %c0_250 = arith.constant 0 : index
    %c0_251 = arith.constant 0 : index
    %c0_252 = arith.constant 0 : index
    %275 = vector.load %arg11[%c0_250, %c0_251, %c0_252] : memref<8x16x32xf32, #tpu.memory_space<vmem>>, vector<8x16x32xf32>
    tpu.vector_store %arg11[%c0_250, %c0_251, %c0_252], %274 {strides = array<i32>} : memref<8x16x32xf32, #tpu.memory_space<vmem>>, vector<8x16x32xf32>,
    %c3_253 = arith.constant 3 : index
    %c2_254 = arith.constant 2 : index
    %c0_255 = arith.constant 0 : index
    %276 = vector.load %arg10[%c3_253, %c2_254, %c0_255] : memref<12x32x32xf32, #tpu.memory_space<vmem>>, vector<8x16x32xf32>
    %c0_256 = arith.constant 0 : index
    %c0_257 = arith.constant 0 : index
    %c0_258 = arith.constant 0 : index
    %277 = vector.load %arg11[%c0_256, %c0_257, %c0_258] : memref<8x16x32xf32, #tpu.memory_space<vmem>>, vector<8x16x32xf32>
    %278 = vector.extract_strided_slice %122 {offsets = [3, 2, 0], sizes = [1, 1, 32], strides = [1, 1, 1]} : vector<5x5x32xf32> to vector<1x1x32xf32>
    %279 = vector.shape_cast %278 : vector<1x1x32xf32> to vector<32xf32>
    %280 = vector.shape_cast %279 : vector<32xf32> to vector<1x1x32xf32>
    %281 = vector.broadcast %280 : vector<1x1x32xf32> to vector<8x16x32xf32>
    %282 = arith.mulf %276, %281 : vector<8x16x32xf32>
    %283 = arith.addf %277, %282 : vector<8x16x32xf32>
    %c0_259 = arith.constant 0 : index
    %c0_260 = arith.constant 0 : index
    %c0_261 = arith.constant 0 : index
    %284 = vector.load %arg11[%c0_259, %c0_260, %c0_261] : memref<8x16x32xf32, #tpu.memory_space<vmem>>, vector<8x16x32xf32>
    tpu.vector_store %arg11[%c0_259, %c0_260, %c0_261], %283 {strides = array<i32>} : memref<8x16x32xf32, #tpu.memory_space<vmem>>, vector<8x16x32xf32>,
    %c3_262 = arith.constant 3 : index
    %c3_263 = arith.constant 3 : index
    %c0_264 = arith.constant 0 : index
    %285 = vector.load %arg10[%c3_262, %c3_263, %c0_264] : memref<12x32x32xf32, #tpu.memory_space<vmem>>, vector<8x16x32xf32>
    %c0_265 = arith.constant 0 : index
    %c0_266 = arith.constant 0 : index
    %c0_267 = arith.constant 0 : index
    %286 = vector.load %arg11[%c0_265, %c0_266, %c0_267] : memref<8x16x32xf32, #tpu.memory_space<vmem>>, vector<8x16x32xf32>
    %287 = vector.extract_strided_slice %122 {offsets = [3, 3, 0], sizes = [1, 1, 32], strides = [1, 1, 1]} : vector<5x5x32xf32> to vector<1x1x32xf32>
    %288 = vector.shape_cast %287 : vector<1x1x32xf32> to vector<32xf32>
    %289 = vector.shape_cast %288 : vector<32xf32> to vector<1x1x32xf32>
    %290 = vector.broadcast %289 : vector<1x1x32xf32> to vector<8x16x32xf32>
    %291 = arith.mulf %285, %290 : vector<8x16x32xf32>
    %292 = arith.addf %286, %291 : vector<8x16x32xf32>
    %c0_268 = arith.constant 0 : index
    %c0_269 = arith.constant 0 : index
    %c0_270 = arith.constant 0 : index
    %293 = vector.load %arg11[%c0_268, %c0_269, %c0_270] : memref<8x16x32xf32, #tpu.memory_space<vmem>>, vector<8x16x32xf32>
    tpu.vector_store %arg11[%c0_268, %c0_269, %c0_270], %292 {strides = array<i32>} : memref<8x16x32xf32, #tpu.memory_space<vmem>>, vector<8x16x32xf32>,
    %c3_271 = arith.constant 3 : index
    %c4_272 = arith.constant 4 : index
    %c0_273 = arith.constant 0 : index
    %294 = vector.load %arg10[%c3_271, %c4_272, %c0_273] : memref<12x32x32xf32, #tpu.memory_space<vmem>>, vector<8x16x32xf32>
    %c0_274 = arith.constant 0 : index
    %c0_275 = arith.constant 0 : index
    %c0_276 = arith.constant 0 : index
    %295 = vector.load %arg11[%c0_274, %c0_275, %c0_276] : memref<8x16x32xf32, #tpu.memory_space<vmem>>, vector<8x16x32xf32>
    %296 = vector.extract_strided_slice %122 {offsets = [3, 4, 0], sizes = [1, 1, 32], strides = [1, 1, 1]} : vector<5x5x32xf32> to vector<1x1x32xf32>
    %297 = vector.shape_cast %296 : vector<1x1x32xf32> to vector<32xf32>
    %298 = vector.shape_cast %297 : vector<32xf32> to vector<1x1x32xf32>
    %299 = vector.broadcast %298 : vector<1x1x32xf32> to vector<8x16x32xf32>
    %300 = arith.mulf %294, %299 : vector<8x16x32xf32>
    %301 = arith.addf %295, %300 : vector<8x16x32xf32>
    %c0_277 = arith.constant 0 : index
    %c0_278 = arith.constant 0 : index
    %c0_279 = arith.constant 0 : index
    %302 = vector.load %arg11[%c0_277, %c0_278, %c0_279] : memref<8x16x32xf32, #tpu.memory_space<vmem>>, vector<8x16x32xf32>
    tpu.vector_store %arg11[%c0_277, %c0_278, %c0_279], %301 {strides = array<i32>} : memref<8x16x32xf32, #tpu.memory_space<vmem>>, vector<8x16x32xf32>,
    %c4_280 = arith.constant 4 : index
    %c0_281 = arith.constant 0 : index
    %c0_282 = arith.constant 0 : index
    %303 = vector.load %arg10[%c4_280, %c0_281, %c0_282] : memref<12x32x32xf32, #tpu.memory_space<vmem>>, vector<8x16x32xf32>
    %c0_283 = arith.constant 0 : index
    %c0_284 = arith.constant 0 : index
    %c0_285 = arith.constant 0 : index
    %304 = vector.load %arg11[%c0_283, %c0_284, %c0_285] : memref<8x16x32xf32, #tpu.memory_space<vmem>>, vector<8x16x32xf32>
    %305 = vector.extract_strided_slice %122 {offsets = [4, 0, 0], sizes = [1, 1, 32], strides = [1, 1, 1]} : vector<5x5x32xf32> to vector<1x1x32xf32>
    %306 = vector.shape_cast %305 : vector<1x1x32xf32> to vector<32xf32>
    %307 = vector.shape_cast %306 : vector<32xf32> to vector<1x1x32xf32>
    %308 = vector.broadcast %307 : vector<1x1x32xf32> to vector<8x16x32xf32>
    %309 = arith.mulf %303, %308 : vector<8x16x32xf32>
    %310 = arith.addf %304, %309 : vector<8x16x32xf32>
    %c0_286 = arith.constant 0 : index
    %c0_287 = arith.constant 0 : index
    %c0_288 = arith.constant 0 : index
    %311 = vector.load %arg11[%c0_286, %c0_287, %c0_288] : memref<8x16x32xf32, #tpu.memory_space<vmem>>, vector<8x16x32xf32>
    tpu.vector_store %arg11[%c0_286, %c0_287, %c0_288], %310 {strides = array<i32>} : memref<8x16x32xf32, #tpu.memory_space<vmem>>, vector<8x16x32xf32>,
    %c4_289 = arith.constant 4 : index
    %c1_290 = arith.constant 1 : index
    %c0_291 = arith.constant 0 : index
    %312 = vector.load %arg10[%c4_289, %c1_290, %c0_291] : memref<12x32x32xf32, #tpu.memory_space<vmem>>, vector<8x16x32xf32>
    %c0_292 = arith.constant 0 : index
    %c0_293 = arith.constant 0 : index
    %c0_294 = arith.constant 0 : index
    %313 = vector.load %arg11[%c0_292, %c0_293, %c0_294] : memref<8x16x32xf32, #tpu.memory_space<vmem>>, vector<8x16x32xf32>
    %314 = vector.extract_strided_slice %122 {offsets = [4, 1, 0], sizes = [1, 1, 32], strides = [1, 1, 1]} : vector<5x5x32xf32> to vector<1x1x32xf32>
    %315 = vector.shape_cast %314 : vector<1x1x32xf32> to vector<32xf32>
    %316 = vector.shape_cast %315 : vector<32xf32> to vector<1x1x32xf32>
    %317 = vector.broadcast %316 : vector<1x1x32xf32> to vector<8x16x32xf32>
    %318 = arith.mulf %312, %317 : vector<8x16x32xf32>
    %319 = arith.addf %313, %318 : vector<8x16x32xf32>
    %c0_295 = arith.constant 0 : index
    %c0_296 = arith.constant 0 : index
    %c0_297 = arith.constant 0 : index
    %320 = vector.load %arg11[%c0_295, %c0_296, %c0_297] : memref<8x16x32xf32, #tpu.memory_space<vmem>>, vector<8x16x32xf32>
    tpu.vector_store %arg11[%c0_295, %c0_296, %c0_297], %319 {strides = array<i32>} : memref<8x16x32xf32, #tpu.memory_space<vmem>>, vector<8x16x32xf32>,
    %c4_298 = arith.constant 4 : index
    %c2_299 = arith.constant 2 : index
    %c0_300 = arith.constant 0 : index
    %321 = vector.load %arg10[%c4_298, %c2_299, %c0_300] : memref<12x32x32xf32, #tpu.memory_space<vmem>>, vector<8x16x32xf32>
    %c0_301 = arith.constant 0 : index
    %c0_302 = arith.constant 0 : index
    %c0_303 = arith.constant 0 : index
    %322 = vector.load %arg11[%c0_301, %c0_302, %c0_303] : memref<8x16x32xf32, #tpu.memory_space<vmem>>, vector<8x16x32xf32>
    %323 = vector.extract_strided_slice %122 {offsets = [4, 2, 0], sizes = [1, 1, 32], strides = [1, 1, 1]} : vector<5x5x32xf32> to vector<1x1x32xf32>
    %324 = vector.shape_cast %323 : vector<1x1x32xf32> to vector<32xf32>
    %325 = vector.shape_cast %324 : vector<32xf32> to vector<1x1x32xf32>
    %326 = vector.broadcast %325 : vector<1x1x32xf32> to vector<8x16x32xf32>
    %327 = arith.mulf %321, %326 : vector<8x16x32xf32>
    %328 = arith.addf %322, %327 : vector<8x16x32xf32>
    %c0_304 = arith.constant 0 : index
    %c0_305 = arith.constant 0 : index
    %c0_306 = arith.constant 0 : index
    %329 = vector.load %arg11[%c0_304, %c0_305, %c0_306] : memref<8x16x32xf32, #tpu.memory_space<vmem>>, vector<8x16x32xf32>
    tpu.vector_store %arg11[%c0_304, %c0_305, %c0_306], %328 {strides = array<i32>} : memref<8x16x32xf32, #tpu.memory_space<vmem>>, vector<8x16x32xf32>,
    %c4_307 = arith.constant 4 : index
    %c3_308 = arith.constant 3 : index
    %c0_309 = arith.constant 0 : index
    %330 = vector.load %arg10[%c4_307, %c3_308, %c0_309] : memref<12x32x32xf32, #tpu.memory_space<vmem>>, vector<8x16x32xf32>
    %c0_310 = arith.constant 0 : index
    %c0_311 = arith.constant 0 : index
    %c0_312 = arith.constant 0 : index
    %331 = vector.load %arg11[%c0_310, %c0_311, %c0_312] : memref<8x16x32xf32, #tpu.memory_space<vmem>>, vector<8x16x32xf32>
    %332 = vector.extract_strided_slice %122 {offsets = [4, 3, 0], sizes = [1, 1, 32], strides = [1, 1, 1]} : vector<5x5x32xf32> to vector<1x1x32xf32>
    %333 = vector.shape_cast %332 : vector<1x1x32xf32> to vector<32xf32>
    %334 = vector.shape_cast %333 : vector<32xf32> to vector<1x1x32xf32>
    %335 = vector.broadcast %334 : vector<1x1x32xf32> to vector<8x16x32xf32>
    %336 = arith.mulf %330, %335 : vector<8x16x32xf32>
    %337 = arith.addf %331, %336 : vector<8x16x32xf32>
    %c0_313 = arith.constant 0 : index
    %c0_314 = arith.constant 0 : index
    %c0_315 = arith.constant 0 : index
    %338 = vector.load %arg11[%c0_313, %c0_314, %c0_315] : memref<8x16x32xf32, #tpu.memory_space<vmem>>, vector<8x16x32xf32>
    tpu.vector_store %arg11[%c0_313, %c0_314, %c0_315], %337 {strides = array<i32>} : memref<8x16x32xf32, #tpu.memory_space<vmem>>, vector<8x16x32xf32>,
    %c4_316 = arith.constant 4 : index
    %c4_317 = arith.constant 4 : index
    %c0_318 = arith.constant 0 : index
    %339 = vector.load %arg10[%c4_316, %c4_317, %c0_318] : memref<12x32x32xf32, #tpu.memory_space<vmem>>, vector<8x16x32xf32>
    %c0_319 = arith.constant 0 : index
    %c0_320 = arith.constant 0 : index
    %c0_321 = arith.constant 0 : index
    %340 = vector.load %arg11[%c0_319, %c0_320, %c0_321] : memref<8x16x32xf32, #tpu.memory_space<vmem>>, vector<8x16x32xf32>
    %341 = vector.extract_strided_slice %122 {offsets = [4, 4, 0], sizes = [1, 1, 32], strides = [1, 1, 1]} : vector<5x5x32xf32> to vector<1x1x32xf32>
    %342 = vector.shape_cast %341 : vector<1x1x32xf32> to vector<32xf32>
    %343 = vector.shape_cast %342 : vector<32xf32> to vector<1x1x32xf32>
    %344 = vector.broadcast %343 : vector<1x1x32xf32> to vector<8x16x32xf32>
    %345 = arith.mulf %339, %344 : vector<8x16x32xf32>
    %346 = arith.addf %340, %345 : vector<8x16x32xf32>
    %c0_322 = arith.constant 0 : index
    %c0_323 = arith.constant 0 : index
    %c0_324 = arith.constant 0 : index
    %347 = vector.load %arg11[%c0_322, %c0_323, %c0_324] : memref<8x16x32xf32, #tpu.memory_space<vmem>>, vector<8x16x32xf32>
    tpu.vector_store %arg11[%c0_322, %c0_323, %c0_324], %346 {strides = array<i32>} : memref<8x16x32xf32, #tpu.memory_space<vmem>>, vector<8x16x32xf32>,
    %c0_325 = arith.constant 0 : index
    %c0_326 = arith.constant 0 : index
    %c0_327 = arith.constant 0 : index
    %348 = vector.load %arg11[%c0_325, %c0_326, %c0_327] : memref<8x16x32xf32, #tpu.memory_space<vmem>>, vector<8x16x32xf32>
    %c0_328 = arith.constant 0 : index
    %c0_329 = arith.constant 0 : index
    %349 = vector.load %arg7[%c0_328, %c0_329] : memref<1x32xf32, #tpu.memory_space<vmem>>, vector<1x32xf32>
    %350 = vector.shape_cast %349 : vector<1x32xf32> to vector<1x1x32xf32>
    %351 = vector.broadcast %350 : vector<1x1x32xf32> to vector<8x16x32xf32>
    %352 = arith.addf %348, %351 : vector<8x16x32xf32>
    %353 = arith.negf %352 : vector<8x16x32xf32>
    %354 = math.exp %353 : vector<8x16x32xf32>
    %cst_330 = arith.constant 1.000000e+00 : f32
    %355 = vector.broadcast %cst_330 : f32 to vector<8x16x32xf32>
    %356 = arith.addf %355, %354 : vector<8x16x32xf32>
    %357 = arith.divf %355, %356 : vector<8x16x32xf32>
    %358 = arith.mulf %352, %357 : vector<8x16x32xf32>
    %cst_331 = arith.constant dense<0.000000e+00> : vector<32xf32>
    %359 = vector.multi_reduction <add>, %358, %cst_331 [0, 1] : vector<8x16x32xf32> to vector<32xf32>
    %360 = vector.shape_cast %359 : vector<32xf32> to vector<1x1x32xf32>
    %361 = vector.shape_cast %360 : vector<1x1x32xf32> to vector<1x32xf32>
    %362 = vector.shape_cast %361 : vector<1x32xf32> to vector<1x32xf32>
    %363 = vector.broadcast %362 : vector<1x32xf32> to vector<8x32xf32>
    %c0_332 = arith.constant 0 : index
    %c0_333 = arith.constant 0 : index
    %c0_334 = arith.constant 0 : index
    %c0_335 = arith.constant 0 : index
    %364 = vector.load %arg9[%c0_332, %c0_333, %c0_334, %c0_335] : memref<1x1x8x32xf32, #tpu.memory_space<vmem>>, vector<1x1x8x32xf32>
    %365 = vector.shape_cast %364 : vector<1x1x8x32xf32> to vector<8x32xf32>
    %366 = vector.shape_cast %363 : vector<8x32xf32> to vector<1x1x8x32xf32>
    tpu.vector_store %arg9[%c0_332, %c0_333, %c0_334, %c0_335], %366 {strides = array<i32>} : memref<1x1x8x32xf32, #tpu.memory_space<vmem>>, vector<1x1x8x32xf32>,
    %367 = arith.truncf %358 : vector<8x16x32xf32> to vector<8x16x32xbf16>
    %c0_336 = arith.constant 0 : index
    %c0_337 = arith.constant 0 : index
    %c0_338 = arith.constant 0 : index
    %c0_339 = arith.constant 0 : index
    %368 = vector.load %arg8[%c0_336, %c0_337, %c0_338, %c0_339] : memref<1x8x16x32xbf16, #tpu.memory_space<vmem>>, vector<1x8x16x32xbf16>
    %369 = vector.shape_cast %368 : vector<1x8x16x32xbf16> to vector<8x16x32xbf16>
    %370 = vector.shape_cast %367 : vector<8x16x32xbf16> to vector<1x8x16x32xbf16>
    tpu.vector_store %arg8[%c0_336, %c0_337, %c0_338, %c0_339], %370 {strides = array<i32>} : memref<1x8x16x32xbf16, #tpu.memory_space<vmem>>, vector<1x8x16x32xbf16>,
    return
  }
  func.func @transform_0(%arg0: i32, %arg1: i32) -> (i32, i32, i32, i32) {
    %c0_i32 = arith.constant 0 : i32
    %c0_i32_0 = arith.constant 0 : i32
    %c0_i32_1 = arith.constant 0 : i32
    %c0_i32_2 = arith.constant 0 : i32
    return %arg0, %c0_i32, %c0_i32_0, %c0_i32_1 : i32, i32, i32, i32
  }
  func.func @transform_1(%arg0: i32, %arg1: i32) -> (i32, i32) {
    %c0_i32 = arith.constant 0 : i32
    %c0_i32_0 = arith.constant 0 : i32
    %c0_i32_1 = arith.constant 0 : i32
    return %c0_i32, %c0_i32_0 : i32, i32
  }
  func.func @transform_2(%arg0: i32, %arg1: i32) -> (i32, i32) {
    %c0_i32 = arith.constant 0 : i32
    %c0_i32_0 = arith.constant 0 : i32
    %c0_i32_1 = arith.constant 0 : i32
    return %c0_i32, %c0_i32_0 : i32, i32
  }
  func.func @transform_3(%arg0: i32, %arg1: i32) -> (i32, i32, i32) {
    %c0_i32 = arith.constant 0 : i32
    %c0_i32_0 = arith.constant 0 : i32
    %c0_i32_1 = arith.constant 0 : i32
    %c0_i32_2 = arith.constant 0 : i32
    return %c0_i32, %c0_i32_0, %c0_i32_1 : i32, i32, i32
  }
  func.func @transform_4(%arg0: i32, %arg1: i32) -> (i32, i32, i32) {
    %c0_i32 = arith.constant 0 : i32
    %c0_i32_0 = arith.constant 0 : i32
    %c0_i32_1 = arith.constant 0 : i32
    %c0_i32_2 = arith.constant 0 : i32
    return %c0_i32, %c0_i32_0, %c0_i32_1 : i32, i32, i32
  }
  func.func @transform_5(%arg0: i32, %arg1: i32) -> (i32, i32) {
    %c0_i32 = arith.constant 0 : i32
    %c0_i32_0 = arith.constant 0 : i32
    %c0_i32_1 = arith.constant 0 : i32
    return %c0_i32, %c0_i32_0 : i32, i32
  }
  func.func @transform_6(%arg0: i32, %arg1: i32) -> (i32, i32, i32, i32) {
    %c0_i32 = arith.constant 0 : i32
    %c0_i32_0 = arith.constant 0 : i32
    %c0_i32_1 = arith.constant 0 : i32
    return %arg0, %arg1, %c0_i32, %c0_i32_0 : i32, i32, i32, i32
  }
  func.func @transform_7(%arg0: i32, %arg1: i32) -> (i32, i32, i32, i32) {
    %c0_i32 = arith.constant 0 : i32
    %c0_i32_0 = arith.constant 0 : i32
    %c0_i32_1 = arith.constant 0 : i32
    return %arg0, %arg1, %c0_i32, %c0_i32_0 : i32, i32, i32, i32
  }
}

</mosaic_0001>

<bundles_post_ra>
// kernel: tpu_custom_call.1
= control target key start
LH: loop header
LB: loop body
LE: loop exit
PB: predicated region body
PF: predicated region fallthrough
CT: control target
= control target key end

     0   :  { %s9883_s0 = inlined_call_operand.vmem [shape: bf16[2,20,32,8], index: 0, kind: input, shape index: {}]   ;;  %s9884_s1 = inlined_call_operand.vmem [shape: bf16[8,32], index: 1, kind: input, shape index: {}]   ;;  %s9885_s2 = inlined_call_operand.vmem [shape: f32[1,32], index: 2, kind: input, shape index: {}]   ;;  %s9886_s3 = inlined_call_operand.vmem [shape: f32[3,3,32], index: 3, kind: input, shape index: {}]   ;;  %s9887_s4 = inlined_call_operand.vmem [shape: f32[5,5,32], index: 4, kind: input, shape index: {}]   ;;  %s9888_s5 = inlined_call_operand.vmem [shape: f32[1,32], index: 5, kind: input, shape index: {}]   ;;  %s9889_s6 = inlined_call_operand.hbm [shape: bf16[2,16,16,32], index: 6, kind: output, shape index: {0}]   ;;  %s9890_s7 = inlined_call_operand.hbm [shape: f32[2,2,8,32], index: 7, kind: output, shape index: {1}]  }
   0x1   :  { %9914 = sst [smem:[#allocation22_spill]] %s9883_s0 }
   0x2   :  { %9915 = sst [smem:[#allocation23_spill]] %s9884_s1 }
   0x3   :  { %9916 = sst [smem:[#allocation24_spill]] %s9885_s2 }
   0x4   :  { %13 = vsyncpa [#allocation5], 0 }
   0x5   :  { %15 = vsyncpa [#allocation5 + $0x1], 0 }
   0x6   :  { %16 = vsyncpa [#allocation7], 0 }
   0x7   :  { %18 = vsyncpa [#allocation7 + $0x1], 0  ;;  %s6192_s24 = smov 0   ;;  %s6194_s25 = smov 0  }
   0x8   :  { %s6196_s26 = smov 0   ;;  %s6198_s27 = smov 0  }
   0x9   :  { %s6200_s28 = smov 0   ;;  %s6202_s29 = smov 0  }
   0xa   :  { %s6204_s30 = smov 0   ;;  %s6206_s8 = smov 0  }
   0xb LB: > { %s5361_s9 = sadd.s32 4294967295, %s6147_s8   ;;  %s5362_s10 = sadd.s32 4294967294, %s6147_s8   ;;  %s6147_s8 = sphi %s6206_s8, %s24_s8   ;;  %s6143_s30 = sphi %s6204_s30, %s10647_s30   ;;  %s6139_s29 = sphi %s6202_s29, %s10646_s29   ;;  %s6135_s28 = sphi %s6200_s28, %s10645_s28   ;;  %s6131_s27 = sphi %s6198_s27, %s10644_s27   ;;  %s6127_s26 = sphi %s6196_s26, %s10643_s26   ;;  %s6123_s25 = sphi %s6194_s25, %s10642_s25   ;;  %s6119_s24 = sphi %s6192_s24, %s10641_s24  }
   0xc   : > { %s33_s11 = sadd.s32 1, %s6139_s29  ;;  %s36_s12 = sadd.s32 1, %s6143_s30 }
   0xd   : > { %p34_p0 = scmp.ge.s32.totalorder %s33_s11, 2  ;;  %p186_p1 = scmp.ne.s32.totalorder %s6127_s26, %s6123_s25 }
   0xe   : > { %p187_p2 = scmp.eq.s32.totalorder %s5361_s9, 3  ;;  %p192_p5 = scmp.ne.s32.totalorder %s6123_s25, %s6119_s24 }
   0xf   : > { %s10649_s11 = smov (%p34_p0, %s33_s11), 0  ;;  %s10651_s12 = smov (!%p34_p0, %s36_s12), %s6143_s30 }
  0x10   : > { %s172_s13 = ssub.s32 %s6139_s29, %s10649_s11  ;;  %p6243_p3 = por %p187_p2, %p186_p1 }
  0x11   : > { %p38_p4 = scmp.ge.s32.totalorder %s10651_s12, 2  ;;  %p193_p6 = scmp.eq.s32.totalorder %s5362_s10, 3 }
  0x12   : > { %p5365_p7 = scmp.ge.s32.totalorder %s6147_s8, 1  ;;  %p262_p9 = scmp.lt.s32.totalorder %s6147_s8, 5 }
  0x13   : > { %s10653_s12 = smov (%p38_p4, %s10651_s12), 0  ;;  %p6252_p8 = por %p193_p6, %p192_p5 }
  0x14   : > { %s171_s16 = ssub.s32 %s6143_s30, %s10653_s12  ;;  %s176_s17 = sadd.s32 1, %s6127_s26 }
  0x15   : > { %s173_s18 = sor.u32 %s172_s13, %s171_s16  ;;  %p263_p10 = pnand %p5365_p7, %p262_p9 }
  0x16   : > { %p174_p11 = scmp.eq.s32.totalorder %s173_s18, 0 }
  0x17   : > { %266 = sbr.rel (%p263_p10) target bundleno = 1089 (0x441), region = 44 }
  0x18   : > { %s6261_s19 = scalar_select %p174_p11, %s6127_s26, %s176_s17  }
  0x1c   : > { %s9919_s1 = sld [smem:[#allocation23_spill]]  ;;  %vm556_vm0 = vcmask 1043456   ;;  %p299_p12 = scmp.lt.s32.totalorder %s6135_s28, 1  ;;  %vm9891_vm1 = vcmask 64512   ;;  %vm9892_vm2 = vcmask 261120   ;;  %v6149_v35 = vmov 0.0  }
  0x1d   : > { %s5567_s9 = sshll.u32 %s6131_s27, 7  ;;  %s9920_s0 = sld [smem:[#allocation22_spill]]  ;;  %2003 = vst.msk [vmem:[#allocation3 + $0x20] sm:$0xff] %vm9892_vm2, %v6149_v35  ;;  %v1661_v39 = vlaneseq }
  0x1e   : > { %s300_s22 = scalar_select %p299_p12, %s6135_s28, 1  ;;  %2005 = vst.msk [vmem:[#allocation3 + $0x30] sm:$0xff] %vm9892_vm2, %v6149_v35 }
  0x1f   : > { %s9921_s2 = sld [smem:[#allocation24_spill]]  ;;  %s5369_s21 = sshll.u32 %s6131_s27, 3  ;;  %v6342_v45 = vshrl.u32 %v1661_v39, 7  ;;  %1999 = vst.msk [vmem:[#allocation3] sm:$0xff] %vm9892_vm2, %v6149_v35 }
  0x20   : > { %s5596_s23 = smul.u32 320, %s300_s22  ;;  %v6338_v38 = vstv %s5369_s21  ;;  %2000 = vst.msk [vmem:[#allocation3 + $0x8] sm:$0xff] %vm9892_vm2, %v6149_v35  ;;  %s8793_s13 = sand.u32 1, %s6123_s25  }
  0x21   : > { %9922 = vst [vmem:[#allocation10_spill] sm:$0xff] %v6338_v38  ;;  %v1652_v42 = vadd.s32 3, %v6338_v38  ;;  %vm1666_vm3 = vcmp.ge.s32.totalorder %v6338_v38, 2  ;;  %vm1678_vm4 = vcmp.lt.s32.totalorder %v6338_v38, 18  ;;  %vm1702_vm8 = vcmp.ge.s32.totalorder %v6342_v45, 2 }
  0x22   : > { %v358_v0 = vld [vmem:[%s9919_s1] sm:$0xf]  ;;  %9923 = vst [vmem:[#allocation11_spill] sm:$0xff] %v6342_v45  ;;  %vm6370_vm12 = vmand %vm1666_vm3, %vm1678_vm4  ;;  %v6456_v39 = vadd.s32 6, %v6338_v38 }
  0x23   : > { %v558_v1 = vsel %vm556_vm0, %v358_v0, 0  ;;  %s303_s16 = scalar_lea.vmem %s9920_s0, %s5596_s23  ;;  %vm1669_vm5 = vcmp.ge.s32.totalorder %v1652_v42, 2  ;;  %vm1681_vm6 = vcmp.lt.s32.totalorder %v1652_v42, 18  ;;  %2001 = vst.msk [vmem:[#allocation3 + $0x10] sm:$0xff] %vm9892_vm2, %v6149_v35  ;;  %vm6416_vm4 = vmand %vm6370_vm12, %vm1702_vm8  ;;  %s5592_s23 = sshll.u32 %s6131_s27, 4 }
  0x24   : > { %567 = vmatpush.bf16.msra.mxu0 %v558_v1  ;;  %5593 = vmatpush.bf16.msra.mxu1 %v558_v1  ;;  %s6272_s17 = scalar_lea.vmem %s303_s16, %s5567_s9  ;;  %vm6376_vm13 = vmand %vm1669_vm5, %vm1681_vm6  ;;  %2002 = vst.msk [vmem:[#allocation3 + $0x18] sm:$0xff] %vm9892_vm2, %v6149_v35  ;;  %vm1672_vm6 = vcmp.ge.s32.totalorder %v6456_v39, 2  ;;  %s5366_s16 = sshll.u32 %s8793_s13, 6 }
  0x25   : > { %5594 = vmatpush.bf16.msra.mxu2 %v558_v1  ;;  %5595 = vmatpush.bf16.msra.mxu3 %v558_v1  ;;  %v5568_v2 = vld [vmem:[%s6272_s17] sm:$0xff]  ;;  %v5574_v3 = vld [vmem:[%s6272_s17 + $0x30] sm:$0xff]  ;;  %v5569_v5 = vld [vmem:[%s6272_s17 + $0x8] sm:$0xff]  ;;  %2004 = vst.msk [vmem:[#allocation3 + $0x28] sm:$0xff] %vm9892_vm2, %v6149_v35  ;;  %s8821_s18 = scalar_lea.vmem [#allocation4], %s5366_s16  ;;  %s5560_s9 = sshll.u32 %s6135_s28, 5 }
  0x26   : > { %v5580_v4 = vld [vmem:[%s6272_s17 + $0x60] sm:$0xff]  ;;  %v5575_v6 = vld [vmem:[%s6272_s17 + $0x38] sm:$0xff]  ;;  %v5581_v7 = vld [vmem:[%s6272_s17 + $0x68] sm:$0xff]  ;;  %2006 = vst.msk [vmem:[#allocation3 + $0x38] sm:$0xff] %vm9892_vm2, %v6149_v35  ;;  %s5226_s10 = sadd.s32 %s5592_s23, %s5560_s9  ;;  %s5229_s22 = sshll.u32 %s8821_s18, 4  ;;  %s5230_s22 = int_to_ptr.vmem [resolvable:$true] %s5229_s22 }
  0x27   : > { %5468 = vmatmul.msk.bf16.vlgmr.msra.gmra.mxu0 %vm9891_vm1, %v5568_v2  ;;  %5474 = vmatmul.msk.bf16.vlgmr.msra.gmra.mxu1 %vm9891_vm1, %v5574_v3  ;;  %v5570_v8 = vld [vmem:[%s6272_s17 + $0x10] sm:$0xff]  ;;  %v5576_v9 = vld [vmem:[%s6272_s17 + $0x40] sm:$0xff]  ;;  %v5571_v12 = vld [vmem:[%s6272_s17 + $0x18] sm:$0xff]  ;;  %2007 = vst.msk [vmem:[#allocation3 + $0x40] sm:$0xff] %vm9892_vm2, %v6149_v35  ;;  %s5561_s16 = sshll.u32 %s5226_s10, 2  ;;  %s5209_s9 = scalar_lea.sflag [#allocation5], %s8793_s13 }
  0x28   : > { %5480 = vmatmul.msk.bf16.vlgmr.msra.gmra.mxu2 %vm9891_vm1, %v5580_v4  ;;  %v5582_v10 = vld [vmem:[%s6272_s17 + $0x70] sm:$0xff]  ;;  %v5577_v13 = vld [vmem:[%s6272_s17 + $0x48] sm:$0xff]  ;;  %v5583_v14 = vld [vmem:[%s6272_s17 + $0x78] sm:$0xff]  ;;  %2008 = vst.msk [vmem:[#allocation3 + $0x48] sm:$0xff] %vm9892_vm2, %v6149_v35  ;;  %s5228_s21 = scalar_lea.hbm %s9889_s6, %s5561_s16 }
  0x29   : > { %v5586_v11 = vld [vmem:[%s6272_s17 + $0x90] sm:$0xff]  ;;  %v5587_v15 = vld [vmem:[%s6272_s17 + $0x98] sm:$0xff]  ;;  %v5572_v16 = vld [vmem:[%s6272_s17 + $0x20] sm:$0xff]  ;;  %2009 = vst.msk [vmem:[#allocation3 + $0x50] sm:$0xff] %vm9892_vm2, %v6149_v35  ;;  %s5231_s23 = sshll.u32 %s5228_s21, 4  ;;  %s6041_s21 = scalar_lea.hbm %s9889_s6, 256  ;;  %s5232_s23 = int_to_ptr.hbm [resolvable:$true] %s5231_s23 }
  0x2a   : > { %5486 = vmatmul.msk.bf16.vlgmr.msra.gmra.mxu3 %vm9891_vm1, %v5586_v11  ;;  %v5578_v17 = vld [vmem:[%s6272_s17 + $0x50] sm:$0xff]  ;;  %v5584_v18 = vld [vmem:[%s6272_s17 + $0x80] sm:$0xff]  ;;  %v5573_v20 = vld [vmem:[%s6272_s17 + $0x28] sm:$0xff]  ;;  %2010 = vst.msk [vmem:[#allocation3 + $0x58] sm:$0xff] %vm9892_vm2, %v6149_v35  ;;  %s6035_s10 = sshra.s32 %s5232_s23, 4  ;;  %s6036_s10 = int_to_ptr.hbm [resolvable:$true] %s6035_s10 }
  0x2b   : > { %v5588_v19 = vld [vmem:[%s6272_s17 + $0xa0] sm:$0xff]  ;;  %v5579_v21 = vld [vmem:[%s6272_s17 + $0x58] sm:$0xff]  ;;  %v5585_v22 = vld [vmem:[%s6272_s17 + $0x88] sm:$0xff]  ;;  %2011 = vst.msk [vmem:[#allocation3 + $0x60] sm:$0xff] %vm9892_vm2, %v6149_v35  ;;  %s6037_s16 = scalar_lea.hbm %s6036_s10, 64  ;;  %p6042_p2 = scmp.lt.s32.totalorder %s6036_s10, %s9889_s6 }
  0x2c   : > { %v5589_v23 = vld [vmem:[%s6272_s17 + $0xa8] sm:$0xff]  ;;  %v6321_v24 = vld [vmem:[%s9921_s2] ss:$0 sm:$0xff]  ;;  %vm6431_vm5 = vmand %vm6376_vm13, %vm1702_vm8  ;;  %2012 = vst.msk [vmem:[#allocation3 + $0x68] sm:$0xff] %vm9892_vm2, %v6149_v35  ;;  %p6038_p13 = scmp.ne.s32.totalorder %s6036_s10, %s6037_s16  ;;  %p6043_p4 = scmp.lt.s32.totalorder %s6041_s21, %s6037_s16 }
  0x2d   : > { %2013 = vst.msk [vmem:[#allocation3 + $0x70] sm:$0xff] %vm9892_vm2, %v6149_v35 }
  0x2e   : > { %2014 = vst.msk [vmem:[#allocation3 + $0x78] sm:$0xff] %vm9892_vm2, %v6149_v35  ;;  %p6039_p0 = pnand %p6038_p13, %p6243_p3  ;;  %p6044_p5 = por %p6043_p4, %p6042_p2 }
  0x30   : > { %p6040_p1 = pneg %p6039_p0 }
  0x32   : > { %p6045_p6 = pnand %p6044_p5, %p6040_p1 }
  0x37   : > { %5469 = vmatmul.msk.bf16.gmra.mxu0 %vm9891_vm1, %v5569_v5  ;;  %5475 = vmatmul.msk.bf16.gmra.mxu1 %vm9891_vm1, %v5575_v6 }
  0x38   : > { %5481 = vmatmul.msk.bf16.gmra.mxu2 %vm9891_vm1, %v5581_v7 }
  0x3a   : > { %5487 = vmatmul.msk.bf16.gmra.mxu3 %vm9891_vm1, %v5587_v15 }
  0x47   : > { %5470 = vmatmul.msk.bf16.gmra.mxu0 %vm9891_vm1, %v5570_v8  ;;  %5476 = vmatmul.msk.bf16.gmra.mxu1 %vm9891_vm1, %v5576_v9 }
  0x48   : > { %5482 = vmatmul.msk.bf16.gmra.mxu2 %vm9891_vm1, %v5582_v10 }
  0x4a   : > { %5488 = vmatmul.msk.bf16.gmra.mxu3 %vm9891_vm1, %v5588_v19 }
  0x57   : > { %5471 = vmatmul.msk.bf16.gmra.mxu0 %vm9891_vm1, %v5571_v12  ;;  %5477 = vmatmul.msk.bf16.gmra.mxu1 %vm9891_vm1, %v5577_v13 }
  0x58   : > { %5483 = vmatmul.msk.bf16.gmra.mxu2 %vm9891_vm1, %v5583_v14 }
  0x5a   : > { %5489 = vmatmul.msk.bf16.gmra.mxu3 %vm9891_vm1, %v5589_v23 }
  0x67   : > { %5472 = vmatmul.msk.bf16.gmra.mxu0 %vm9891_vm1, %v5572_v16  ;;  %5478 = vmatmul.msk.bf16.gmra.mxu1 %vm9891_vm1, %v5578_v17 }
  0x68   : > { %5484 = vmatmul.msk.bf16.gmra.mxu2 %vm9891_vm1, %v5584_v18 }
  0x77   : > { %5473 = vmatmul.msk.bf16.gmra.mxu0 %vm9891_vm1, %v5573_v20  ;;  %5479 = vmatmul.msk.bf16.gmra.mxu1 %vm9891_vm1, %v5579_v21 }
  0x78   : > { %5485 = vmatmul.msk.bf16.gmra.mxu2 %vm9891_vm1, %v5585_v22 }
  0xa4   : > { %v569_v25 = vpop.f32.mrf.mxu0  ;;  %v599_v26 = vpop.f32.mrf.mxu1 }
  0xa5   : > { %v6324_v27 = vadd.f32 %v6321_v24, %v569_v25  ;;  %v6327_v28 = vadd.f32 %v6321_v24, %v599_v26 }
  0xa7   : > { %v5492_v29 = vmul.f32 -1.442695, %v6324_v27  ;;  %v5504_v30 = vmul.f32 -1.442695, %v6327_v28 }
  0xa9   : > { %5678 = vpow2.f32 %v5492_v29 }
  0xaa   : > { %5680 = vpow2.f32 %v5504_v30 }
  0xab   : > { %v629_v31 = vpop.f32.mrf.mxu2 }
  0xac   : > { %v571_v32 = vpop.f32.mrf.mxu0  ;;  %v601_v33 = vpop.f32.mrf.mxu1  ;;  %v6347_v46 = vadd.f32 %v6321_v24, %v629_v31 }
  0xad   : > { %v6350_v48 = vadd.f32 %v6321_v24, %v571_v32  ;;  %v6353_v49 = vadd.f32 %v6321_v24, %v601_v33 }
  0xae   : > { %v5516_v58 = vmul.f32 -1.442695, %v6347_v46 }
  0xaf   : > { %v5679_v34 = vpop.eup %5678  ;;  %v5493_v60 = vmul.f32 -1.442695, %v6350_v48  ;;  %v5505_v61 = vmul.f32 -1.442695, %v6353_v49 }
  0xb0   : > { %v5681_v36 = vpop.eup %5680  ;;  %v6334_v37 = vadd.f32 1.0, %v5679_v34 }
  0xb1   : > { %v845_v40 = vadd.f32 1.0, %v5681_v36 }
  0xb2   : > { %5682 = vrcp.f32 %v6334_v37  ;;  %vm886_vm7 = vweird.f32 %v6334_v37  ;;  %v892_v52 = vand.u32 2147483648, %v6334_v37  ;;  %v890_v53 = vand.u32 2147483647, %v6334_v37 }
  0xb3   : > { %5684 = vrcp.f32 %v845_v40  ;;  %v631_v41 = vpop.f32.mrf.mxu2  ;;  %vm1066_vm9 = vweird.f32 %v845_v40  ;;  %v1070_v55 = vand.u32 2147483647, %v845_v40  ;;  %v1072_v57 = vand.u32 2147483648, %v845_v40 }
  0xb4   : > { %v574_v43 = vpop.f32.mrf.mxu0  ;;  %v604_v44 = vpop.f32.mrf.mxu1  ;;  %v6364_v62 = vadd.f32 %v6321_v24, %v631_v41  ;;  %v893_v2 = vor.u32 1.1754944e-38, %v892_v52  ;;  %5686 = vpow2.f32 %v5516_v58  ;;  %vm891_vm3 = vcmp.eq.f32.partialorder %v890_v53, 8.507059e+37 }
  0xb5   : > { %5688 = vpow2.f32 %v5493_v60  ;;  %v6384_v8 = vadd.f32 %v6321_v24, %v574_v43  ;;  %vm6392_vm15 = vcmp.eq.f32.partialorder %v1070_v55, 8.507059e+37  ;;  %v1073_v12 = vor.u32 1.1754944e-38, %v1072_v57 }
  0xb6   : > { %v5517_v7 = vmul.f32 -1.442695, %v6364_v62  ;;  %5690 = vpow2.f32 %v5505_v61  ;;  %v6405_v15 = vadd.f32 %v6321_v24, %v604_v44 }
  0xb7   : > { %v5494_v14 = vmul.f32 -1.442695, %v6384_v8 }
  0xb8   : > { %v5683_v47 = vpop.eup %5682  ;;  %5692 = vpow2.f32 %v5517_v7  ;;  %v5506_v30 = vmul.f32 -1.442695, %v6405_v15 }
  0xb9   : > { %v5685_v50 = vpop.eup %5684  ;;  %v882_v51 = vmul.f32 %v5683_v47, %v6334_v37  ;;  %vm887_vm11 = vweird.f32 %v5683_v47  ;;  %5694 = vpow2.f32 %v5494_v14 }
  0xba   : > { %v1062_v54 = vmul.f32 %v5685_v50, %v845_v40  ;;  %vm1067_vm10 = vweird.f32 %v5685_v50  ;;  %vm888_vm0 = vmor %vm886_vm7, %vm887_vm11  ;;  %v5687_v21 = vpop.eup %5686 }
  0xbb   : > { %v883_v56 = vsub.f32 1.0, %v882_v51  ;;  %v634_v63 = vpop.f32.mrf.mxu2  ;;  %vm6388_vm14 = vmor %vm1066_vm9, %vm1067_vm10  ;;  %v5689_v26 = vpop.eup %5688  ;;  %vm1684_vm9 = vcmp.lt.s32.totalorder %v6456_v39, 18 }
  0xbc   : > { %v1063_v59 = vsub.f32 1.0, %v1062_v54  ;;  %v576_v0 = vpop.f32.mrf.mxu0  ;;  %v606_v4 = vpop.f32.mrf.mxu1  ;;  %v6410_v17 = vadd.f32 %v6321_v24, %v634_v63  ;;  %v6447_v34 = vadd.f32 1.0, %v5689_v26 }
  0xbd   : > { %v884_v1 = vmul.f32 %v5683_v47, %v883_v56  ;;  %v5691_v32 = vpop.eup %5690 }
  0xbe   : > { %v1064_v5 = vmul.f32 %v5685_v50, %v1063_v59  ;;  %v5518_v36 = vmul.f32 -1.442695, %v6410_v17  ;;  %v6461_v41 = vadd.f32 1.0, %v5691_v32  ;;  %v907_v51 = vand.u32 2147483648, %v6447_v34 }
  0xbf   : > { %v885_v9 = vadd.f32 %v5683_v47, %v884_v1  ;;  %vm901_vm10 = vweird.f32 %v6447_v34  ;;  %v6506_v1 = vadd.s32 16, %v6342_v45 }
  0xc0   : > { %v1065_v13 = vadd.f32 %v5685_v50, %v1064_v5  ;;  %v1085_v56 = vand.u32 2147483647, %v6461_v41  ;;  %v1087_v57 = vand.u32 2147483648, %v6461_v41  ;;  %v908_v0 = vor.u32 1.1754944e-38, %v907_v51 }
  0xc1   : > { %v889_v16 = vsel %vm888_vm0, %v5683_v47, %v885_v9  ;;  %9940 = vst [vmem:[#allocation12_spill] sm:$0xff] %v6506_v1 }
  0xc2   : > { %v894_v18 = vsel %vm891_vm3, %v893_v2, %v889_v16  ;;  %v1069_v20 = vsel %vm6388_vm14, %v5685_v50, %v1065_v13  ;;  %v905_v50 = vand.u32 2147483647, %v6447_v34 }
  0xc3   : > { %v1601_v22 = vmul.f32 %v894_v18, %v6324_v27  ;;  %v1074_v23 = vsel %vm6392_vm15, %v1073_v12, %v1069_v20  ;;  %v6440_v27 = vadd.f32 1.0, %v5687_v21  ;;  %v636_v31 = vpop.f32.mrf.mxu2  ;;  %v1088_v12 = vor.u32 1.1754944e-38, %v1087_v57 }
  0xc4   : > { %v1613_v29 = vmul.f32 %v1074_v23, %v6327_v28  ;;  %v5693_v28 = vpop.eup %5692  ;;  %vm6496_vm14 = vcmp.eq.f32.partialorder %v905_v50, 8.507059e+37  ;;  %v579_v3 = vpop.f32.mrf.mxu0 }
  0xc5   : > { %v1902_v33 = vsel %vm6416_vm4, %v1601_v22, 0.0  ;;  %5696 = vrcp.f32 %v6440_v27  ;;  %v5695_v40 = vpop.eup %5694  ;;  %v6463_v42 = vadd.f32 1.0, %v5693_v28  ;;  %v1250_v43 = vand.u32 2147483647, %v6440_v27 }
  0xc6   : > { %1951 = vst.msk [vmem:[#allocation2] sm:$0xff] %vm9892_vm2, %v1902_v33  ;;  %v1914_v37 = vsel %vm6431_vm5, %v1613_v29, 0.0  ;;  %5698 = vrcp.f32 %v6447_v34  ;;  %v6468_v44 = vadd.f32 1.0, %v5695_v40  ;;  %v1252_v47 = vand.u32 2147483648, %v6440_v27  ;;  %vm6536_vm5 = vmand %vm1672_vm6, %vm1684_vm9 }
  0xc7   : > { %1963 = vst.msk [vmem:[#allocation2 + $0x60] sm:$0xff] %vm9892_vm2, %v1914_v37  ;;  %5700 = vpow2.f32 %v5506_v30  ;;  %vm1246_vm7 = vweird.f32 %v6440_v27  ;;  %vm6489_vm11 = vcmp.eq.f32.partialorder %v1250_v43, 8.507059e+37  ;;  %v1265_v35 = vand.u32 2147483647, %v6463_v42  ;;  %vm6551_vm9 = vmand %vm6536_vm5, %vm1702_vm8 }
  0xc8   : > { %5702 = vpow2.f32 %v5518_v36  ;;  %v1253_v59 = vor.u32 1.1754944e-38, %v1252_v47  ;;  %v1267_v7 = vand.u32 2147483648, %v6463_v42  ;;  %vm6510_vm4 = vcmp.eq.f32.partialorder %v1085_v56, 8.507059e+37 }
  0xc9   : > { %5704 = vrcp.f32 %v6461_v41  ;;  %vm6518_vm2 = vcmp.eq.f32.partialorder %v1265_v35, 8.507059e+37  ;;  %v920_v25 = vand.u32 2147483647, %v6468_v44  ;;  %v922_v26 = vand.u32 2147483648, %v6468_v44 }
  0xca   : > { %5706 = vrcp.f32 %v6463_v42 }
  0xcb   : > { %v5697_v52 = vpop.eup %5696  ;;  %5708 = vrcp.f32 %v6468_v44  ;;  %v923_v56 = vor.u32 1.1754944e-38, %v922_v26 }
  0xcc   : > { %v5699_v53 = vpop.eup %5698  ;;  %v1242_v54 = vmul.f32 %v5697_v52, %v6440_v27  ;;  %vm1247_vm3 = vweird.f32 %v5697_v52  ;;  %v581_v26 = vpop.f32.mrf.mxu0 }
  0xcd   : > { %v5701_v58 = vpop.eup %5700  ;;  %v897_v60 = vmul.f32 %v5699_v53, %v6447_v34  ;;  %vm902_vm1 = vweird.f32 %v5699_v53  ;;  %vm6525_vm0 = vmor %vm1246_vm7, %vm1247_vm3 }
  0xce   : > { %v6501_v63 = vpop.eup %5702  ;;  %v1243_v4 = vsub.f32 1.0, %v1242_v54  ;;  %v6515_v13 = vadd.f32 1.0, %v5701_v58  ;;  %vm903_vm3 = vmor %vm901_vm10, %vm902_vm1  ;;  %vm9951_vm1 = vweird.f32 %v6461_v41 }
  0xcf   : > { %v5705_v2 = vpop.eup %5704  ;;  %v898_v5 = vsub.f32 1.0, %v897_v60 }
  0xd0   : > { %v5707_v9 = vpop.eup %5706  ;;  %v1077_v10 = vmul.f32 %v5705_v2, %v6461_v41  ;;  %v1244_v16 = vmul.f32 %v5697_v52, %v1243_v4  ;;  %vm1082_vm7 = vweird.f32 %v5705_v2  ;;  %5710 = vrcp.f32 %v6515_v13 }
  0xd1   : > { %v5709_v14 = vpop.eup %5708  ;;  %v899_v18 = vmul.f32 %v5699_v53, %v898_v5  ;;  %v1257_v19 = vmul.f32 %v5707_v9, %v6463_v42  ;;  %vm1262_vm15 = vweird.f32 %v5707_v9  ;;  %vm1083_vm10 = vmor %vm9951_vm1, %vm1082_vm7  ;;  %vm9953_vm7 = vweird.f32 %v6468_v44 }
  0xd2   : > { %v1078_v22 = vsub.f32 1.0, %v1077_v10  ;;  %v912_v23 = vmul.f32 %v5709_v14, %v6468_v44  ;;  %v1245_v29 = vadd.f32 %v5697_v52, %v1244_v16  ;;  %vm917_vm6 = vweird.f32 %v5709_v14 }
  0xd3   : > { %v900_v27 = vadd.f32 %v5699_v53, %v899_v18  ;;  %v1258_v31 = vsub.f32 1.0, %v1257_v19 }
  0xd4   : > { %v1079_v32 = vmul.f32 %v5705_v2, %v1078_v22  ;;  %v913_v33 = vsub.f32 1.0, %v912_v23  ;;  %v1249_v36 = vsel %vm6525_vm0, %v5697_v52, %v1245_v29 }
  0xd5   : > { %v904_v28 = vsel %vm903_vm3, %v5699_v53, %v900_v27  ;;  %v1259_v37 = vmul.f32 %v5707_v9, %v1258_v31  ;;  %v1254_v39 = vsel %vm6489_vm11, %v1253_v59, %v1249_v36  ;;  %v1268_v53 = vor.u32 1.1754944e-38, %v1267_v7  ;;  %vm918_vm3 = vmor %vm9953_vm7, %vm917_vm6 }
  0xd6   : > { %v909_v40 = vsel %vm6496_vm14, %v908_v0, %v904_v28  ;;  %v1080_v43 = vadd.f32 %v5705_v2, %v1079_v32  ;;  %v914_v47 = vmul.f32 %v5709_v14, %v913_v33  ;;  %v1625_v50 = vmul.f32 %v1254_v39, %v6347_v46 }
  0xd7   : > { %v1602_v51 = vmul.f32 %v909_v40, %v6350_v48  ;;  %v1260_v52 = vadd.f32 %v5707_v9, %v1259_v37  ;;  %vm9952_vm11 = vweird.f32 %v6463_v42  ;;  %vm1756_vm14 = vcmp.lt.s32.totalorder %v6506_v1, 18  ;;  %v5711_v42 = vpop.eup %5710 }
  0xd8   : > { %v1084_v54 = vsel %vm1083_vm10, %v5705_v2, %v1080_v43  ;;  %vm1263_vm0 = vmor %vm9952_vm11, %vm1262_vm15  ;;  %v915_v55 = vadd.f32 %v5709_v14, %v914_v47  ;;  %v1926_v46 = vsel %vm6551_vm9, %v1625_v50, 0.0  ;;  %vm9954_vm15 = vcmask 261120   ;;  %v639_v47 = vpop.f32.mrf.mxu2 }
  0xd9   : > { %v1903_v48 = vsel %vm6370_vm12, %v1602_v51, 0.0  ;;  %v1089_v41 = vsel %vm6510_vm4, %v1088_v12, %v1084_v54  ;;  %v1264_v57 = vsel %vm1263_vm0, %v5707_v9, %v1260_v52  ;;  %1975 = vst.msk [vmem:[#allocation2 + $0xc0] sm:$0xff] %vm9954_vm15, %v1926_v46  ;;  %vm921_vm9 = vcmp.eq.f32.partialorder %v920_v25, 8.507059e+37  ;;  %vm9955_vm1 = vmmov %vm9954_vm15  ;;  %v6598_v9 = vld [vmem:[%s9886_s3] sm:$0x7]  ;;  %v6637_v54 = vpop.f32.mrf.mxu0 }
  0xda   : > { %v1614_v58 = vmul.f32 %v1089_v41, %v6353_v49  ;;  %v1269_v59 = vsel %vm6518_vm2, %v1268_v53, %v1264_v57  ;;  %v919_v60 = vsel %vm918_vm3, %v5709_v14, %v915_v55  ;;  %1952 = vst.msk [vmem:[#allocation2 + $0x8] sm:$0xff] %vm9955_vm1, %v1903_v48  ;;  %vm1760_vm4 = vmand %vm6370_vm12, %vm1756_vm14  ;;  %v1092_v44 = vmul.f32 %v5711_v42, %v6515_v13  ;;  %v609_v14 = vpop.f32.mrf.mxu1  ;;  %v2039_v25 = vld [vmem:[#allocation3 + $0x20] sm:$0xff] }
  0xdb   : > { %v1626_v61 = vmul.f32 %v1269_v59, %v6364_v62  ;;  %v924_v35 = vsel %vm921_vm9, %v923_v56, %v919_v60  ;;  %vm9956_vm2 = vmmov %vm9955_vm1  ;;  %v859_v62 = vadd.f32 1.0, %v6501_v63  ;;  %vm1096_vm12 = vweird.f32 %v6515_v13  ;;  %v2040_v60 = vld [vmem:[#allocation3 + $0x28] sm:$0xff] }
  0xdc   : > { %v1915_v49 = vsel %vm6376_vm13, %v1614_v58, 0.0  ;;  %v1603_v0 = vmul.f32 %v924_v35, %v6384_v8  ;;  %v1093_v4 = vsub.f32 1.0, %v1092_v44  ;;  %vm9957_vm6 = vmmov %vm9955_vm1  ;;  %vm1097_vm11 = vweird.f32 %v5711_v42 }
  0xdd   : > { %1964 = vst.msk [vmem:[#allocation2 + $0x68] sm:$0xff] %vm9956_vm2, %v1915_v49  ;;  %v1927_v2 = vsel %vm6536_vm5, %v1626_v61, 0.0  ;;  %vm9958_vm10 = vmmov %vm9955_vm1  ;;  %5712 = vrcp.f32 %v859_v62  ;;  %v6602_v8 = vadd.f32 %v6321_v24, %v579_v3  ;;  %v1102_v63 = vand.u32 2147483648, %v6515_v13 }
  0xde   : > { %1976 = vst.msk [vmem:[#allocation2 + $0xc8] sm:$0xff] %vm9957_vm6, %v1927_v2  ;;  %v1904_v5 = vsel %vm1760_vm4, %v1603_v0, 0.0  ;;  %v1094_v7 = vmul.f32 %v5711_v42, %v1093_v4  ;;  %v6606_v10 = vperm.slane %v6598_v9, 0  ;;  %v1100_v12 = vand.u32 2147483647, %v6515_v13  ;;  %vm1098_vm0 = vmor %vm1096_vm12, %vm1097_vm11 }
  0xdf   : > { %1953 = vst.msk [vmem:[#allocation2 + $0x10] sm:$0xff] %vm9958_vm10, %v1904_v5  ;;  %v5496_v18 = vmul.f32 -1.442695, %v6602_v8  ;;  %v1103_v20 = vor.u32 1.1754944e-38, %v1102_v63  ;;  %v6611_v21 = vadd.f32 %v6321_v24, %v609_v14  ;;  %vm6619_vm3 = vmand %vm6376_vm13, %vm1756_vm14  ;;  %vm1276_vm15 = vweird.f32 %v859_v62  ;;  %v2046_v14 = vld [vmem:[#allocation3 + $0x58] sm:$0xff] }
  0xe0   : > { %v1095_v11 = vadd.f32 %v5711_v42, %v1094_v7  ;;  %vm1101_vm7 = vcmp.eq.f32.partialorder %v1100_v12, 8.507059e+37  ;;  %v1282_v33 = vand.u32 2147483648, %v859_v62  ;;  %vm9961_vm9 = vmmov %vm9955_vm1  ;;  %v1280_v37 = vand.u32 2147483647, %v859_v62  ;;  %v641_v3 = vpop.f32.mrf.mxu2 }
  0xe1   : > { %5714 = vpow2.f32 %v5496_v18  ;;  %v5508_v13 = vmul.f32 -1.442695, %v6611_v21  ;;  %v6626_v40 = vperm.slane %v6598_v9, 1  ;;  %vm9962_vm13 = vmmov %vm9956_vm2  ;;  %v6635_v53 = vadd.f32 %v6321_v24, %v639_v47  ;;  %v586_v4 = vpop.f32.mrf.mxu0 }
  0xe2   : > { %v1099_v23 = vsel %vm1098_vm0, %v5711_v42, %v1095_v11  ;;  %v611_v39 = vpop.f32.mrf.mxu1  ;;  %vm1281_vm2 = vcmp.eq.f32.partialorder %v1280_v37, 8.507059e+37  ;;  %vm1784_vm6 = vmand %vm6536_vm5, %vm1756_vm14  ;;  %v6658_v2 = vadd.f32 %v6321_v24, %v581_v26  ;;  %v1650_v18 = vadd.s32 1, %v6338_v38 }
  0xe3   : > { %v5713_v19 = vpop.eup %5712  ;;  %v1104_v27 = vsel %vm1101_vm7, %v1103_v20, %v1099_v23  ;;  %5716 = vpow2.f32 %v5508_v13  ;;  %v5520_v58 = vmul.f32 -1.442695, %v6635_v53  ;;  %vm9963_vm10 = vmmov %vm9961_vm9 }
  0xe4   : > { %v2023_v16 = vld [vmem:[#allocation2 + $0x61] sm:$0xff]  ;;  %v1272_v29 = vmul.f32 %v5713_v19, %v859_v62  ;;  %v1615_v36 = vmul.f32 %v1104_v27, %v6405_v15  ;;  %vm1277_vm1 = vweird.f32 %v5713_v19  ;;  %v1283_v15 = vor.u32 1.1754944e-38, %v1282_v33  ;;  %vm9964_vm12 = vmmov %vm9961_vm9 }
  0xe5   : > { %v2056_v22 = vmul.f32 %v6606_v10, %v2023_v16  ;;  %v2104_v50 = vld [vmem:[#allocation2 + $0x62] sm:$0xff]  ;;  %vm1278_vm4 = vmor %vm1276_vm15, %vm1277_vm1  ;;  %v6662_v62 = vadd.f32 %v6321_v24, %v611_v39  ;;  %v5497_v63 = vmul.f32 -1.442695, %v6658_v2  ;;  %v1653_v27 = vadd.s32 4, %v6338_v38 }
  0xe6   : > { %v1273_v28 = vsub.f32 1.0, %v1272_v29  ;;  %v1916_v6 = vsel %vm6619_vm3, %v1615_v36, 0.0  ;;  %v2137_v55 = vmul.f32 %v6626_v40, %v2104_v50  ;;  %v2185_v49 = vld [vmem:[#allocation2 + $0x63] sm:$0xff]  ;;  %vm9965_vm5 = vmmov %vm9961_vm9  ;;  %vm1667_vm0 = vcmp.ge.s32.totalorder %v1650_v18, 2 }
  0xe7   : > { %v2072_v31 = vadd.f32 %v2056_v22, %v2039_v25  ;;  %v5715_v34 = vpop.eup %5714  ;;  %1965 = vst.msk [vmem:[#allocation2 + $0x70] sm:$0xff] %vm9962_vm13, %v1916_v6  ;;  %v5509_v20 = vmul.f32 -1.442695, %v6662_v62  ;;  %vm9966_vm11 = vmmov %vm9965_vm5  ;;  %vm1679_vm7 = vcmp.lt.s32.totalorder %v1650_v18, 18 }
  0xe8   : > { %v1274_v43 = vmul.f32 %v5713_v19, %v1273_v28  ;;  %v6632_v52 = vadd.f32 1.0, %v5715_v34  ;;  %vm9967_vm3 = vmmov %vm9965_vm5  ;;  %v6696_v47 = vpop.f32.mrf.mxu2 }
  0xe9   : > { %2088 = vst.msk [vmem:[#allocation3 + $0x20] sm:$0xff] %vm9961_vm9, %v2072_v31  ;;  %v5717_v46 = vpop.eup %5716  ;;  %vm9968_vm15 = vmmov %vm9967_vm3  ;;  %v6792_v34 = vadd.f32 %v6321_v24, %v6696_v47 }
  0xea   : > { %v1275_v51 = vadd.f32 %v5713_v19, %v1274_v43  ;;  %5718 = vrcp.f32 %v6632_v52  ;;  %v6648_v35 = vadd.f32 1.0, %v5717_v46  ;;  %v6652_v30 = vpop.f32.mrf.mxu1  ;;  %v950_v29 = vand.u32 2147483647, %v6632_v52  ;;  %vm6692_vm13 = vmand %vm1667_vm0, %vm1679_vm7 }
  0xeb   : > { %5720 = vpow2.f32 %v5520_v58  ;;  %v952_v32 = vand.u32 2147483648, %v6632_v52  ;;  %vm946_vm9 = vweird.f32 %v6632_v52  ;;  %v6715_v58 = vadd.f32 %v6321_v24, %v641_v3 }
  0xec   : > { %v1279_v56 = vsel %vm1278_vm4, %v5713_v19, %v1275_v51  ;;  %5722 = vrcp.f32 %v6648_v35  ;;  %vm6688_vm1 = vcmp.eq.f32.partialorder %v950_v29, 8.507059e+37  ;;  %vm1670_vm4 = vcmp.ge.s32.totalorder %v1653_v27, 2 }
  0xed   : > { %v1284_v48 = vsel %vm1281_vm2, %v1283_v15, %v1279_v56  ;;  %5724 = vpow2.f32 %v5497_v63  ;;  %v953_v6 = vor.u32 1.1754944e-38, %v952_v32  ;;  %v5521_v18 = vmul.f32 -1.442695, %v6715_v58 }
  0xee   : > { %v1627_v57 = vmul.f32 %v1284_v48, %v6410_v17  ;;  %v2024_v59 = vld [vmem:[#allocation2 + $0x69] sm:$0xff]  ;;  %v6655_v17 = vperm.slane %v6598_v9, 2  ;;  %5726 = vpow2.f32 %v5509_v20  ;;  %v1132_v48 = vand.u32 2147483648, %v6648_v35 }
  0xef   : > { %v2057_v44 = vmul.f32 %v6606_v10, %v2024_v59  ;;  %v2105_v11 = vld [vmem:[#allocation2 + $0x6a] sm:$0xff]  ;;  %v6719_v59 = vadd.f32 %v6321_v24, %v6637_v54 }
  0xf0   : > { %v2120_v41 = vld [vmem:[#allocation3 + $0x20] sm:$0xff]  ;;  %v1928_v61 = vsel %vm1784_vm6, %v1627_v57, 0.0  ;;  %v6664_v5 = vpop.eup %5718  ;;  %v2218_v7 = vmul.f32 %v6655_v17, %v2185_v49  ;;  %v2138_v13 = vmul.f32 %v6626_v40, %v2105_v11  ;;  %v2186_v50 = vld [vmem:[#allocation2 + $0x6b] sm:$0xff]  ;;  %vm1126_vm6 = vweird.f32 %v6648_v35  ;;  %v646_v29 = vpop.f32.mrf.mxu2 }
  0xf1   : > { %v2153_v42 = vadd.f32 %v2137_v55, %v2120_v41  ;;  %1977 = vst.msk [vmem:[#allocation2 + $0xd0] sm:$0xff] %vm9964_vm12, %v1928_v61  ;;  %v2073_v0 = vadd.f32 %v2057_v44, %v2040_v60  ;;  %v942_v16 = vmul.f32 %v6664_v5, %v6632_v52  ;;  %v5721_v22 = vpop.eup %5720  ;;  %vm947_vm2 = vweird.f32 %v6664_v5  ;;  %vm6710_vm12 = vmand %vm6692_vm13, %vm1702_vm8 }
  0xf2   : > { %v616_v25 = vpop.f32.mrf.mxu1  ;;  %v6674_v26 = vpop.eup %5722  ;;  %v6684_v39 = vadd.f32 1.0, %v5721_v22  ;;  %v1130_v55 = vand.u32 2147483647, %v6648_v35  ;;  %v2219_v60 = vmul.f32 %v6655_v17, %v2186_v50  ;;  %v1656_v49 = vadd.s32 7, %v6338_v38 }
  0xf3   : > { %2169 = vst.msk [vmem:[#allocation3 + $0x20] sm:$0xff] %vm9963_vm10, %v2153_v42  ;;  %v943_v36 = vsub.f32 1.0, %v942_v16  ;;  %v1122_v37 = vmul.f32 %v6674_v26, %v6648_v35  ;;  %v5725_v56 = vpop.eup %5724  ;;  %vm1127_vm10 = vweird.f32 %v6674_v26  ;;  %v1133_v52 = vor.u32 1.1754944e-38, %v1132_v48 }
  0xf4   : > { %2089 = vst.msk [vmem:[#allocation3 + $0x28] sm:$0xff] %vm9965_vm5, %v2073_v0  ;;  %5728 = vrcp.f32 %v6684_v39  ;;  %v5727_v41 = vpop.eup %5726  ;;  %vm1682_vm5 = vcmp.lt.s32.totalorder %v1653_v27, 18  ;;  %vm6734_vm0 = vmor %vm1126_vm6, %vm1127_vm10  ;;  %vm6738_vm7 = vcmp.eq.f32.partialorder %v1130_v55, 8.507059e+37  ;;  %v1310_v25 = vand.u32 2147483647, %v6684_v39 }
  0xf5   : > { %v944_v51 = vmul.f32 %v6664_v5, %v943_v36  ;;  %v1123_v46 = vsub.f32 1.0, %v1122_v37  ;;  %v6753_v11 = vadd.f32 1.0, %v5727_v41  ;;  %vm1673_vm10 = vcmp.ge.s32.totalorder %v1656_v49, 2 }
  0xf6   : > { %v6788_v37 = vadd.f32 %v6321_v24, %v6652_v30  ;;  %v6873_v30 = vld [vmem:[%s9886_s3 + $0x4] sm:$0x7] }
  0xf7   : > { %v945_v57 = vadd.f32 %v6664_v5, %v944_v51  ;;  %v1124_v44 = vmul.f32 %v6674_v26, %v1123_v46  ;;  %v589_v51 = vpop.f32.mrf.mxu0  ;;  %v6989_v35 = vperm.slane %v6873_v30, 1 }
  0xf8   : > { %v2030_v12 = vld [vmem:[#allocation2 + $0xc9] sm:$0xff]  ;;  %v5510_v48 = vmul.f32 -1.442695, %v6788_v37 }
  0xf9   : > { %v2063_v23 = vmul.f32 %v6606_v10, %v2030_v12  ;;  %v2111_v15 = vld [vmem:[#allocation2 + $0xca] sm:$0xff] }
  0xfa   : > { %v2201_v9 = vld [vmem:[#allocation3 + $0x20] sm:$0xff]  ;;  %v2144_v61 = vmul.f32 %v6626_v40, %v2111_v15  ;;  %v5729_v20 = vpop.eup %5728 }
  0xfb   : > { %v2234_v19 = vadd.f32 %v2218_v7, %v2201_v9  ;;  %v2079_v31 = vadd.f32 %v2063_v23, %v2046_v14  ;;  %v2121_v33 = vld [vmem:[#allocation3 + $0x28] sm:$0xff]  ;;  %v6742_v7 = vadd.f32 1.0, %v5725_v56  ;;  %vm1307_vm6 = vweird.f32 %v5729_v20 }
  0xfc   : > { %v2154_v28 = vadd.f32 %v2138_v13, %v2121_v33  ;;  %v2192_v14 = vld [vmem:[#allocation2 + $0xcb] sm:$0xff] }
  0xfd   : > { %2250 = vst.msk [vmem:[#allocation3 + $0x20] sm:$0xff] %vm9966_vm11, %v2234_v19  ;;  %vm948_vm11 = vmor %vm946_vm9, %vm947_vm2  ;;  %5730 = vrcp.f32 %v6742_v7  ;;  %v5498_v19 = vmul.f32 -1.442695, %v6719_v59  ;;  %v2225_v32 = vmul.f32 %v6655_v17, %v2192_v14  ;;  %v965_v56 = vand.u32 2147483647, %v6742_v7 }
  0xfe   : > { %2095 = vst.msk [vmem:[#allocation3 + $0x58] sm:$0xff] %vm9967_vm3, %v2079_v31  ;;  %v949_v4 = vsel %vm948_vm11, %v6664_v5, %v945_v57  ;;  %v1125_v5 = vadd.f32 %v6674_v26, %v1124_v44  ;;  %vm6749_vm3 = vmand %vm1670_vm4, %vm1682_vm5  ;;  %5732 = vrcp.f32 %v6753_v11  ;;  %v1312_v31 = vand.u32 2147483648, %v6684_v39 }
  0xff   : > { %2170 = vst.msk [vmem:[#allocation3 + $0x28] sm:$0xff] %vm9968_vm15, %v2154_v28  ;;  %v954_v63 = vsel %vm6688_vm1, %v953_v6, %v949_v4  ;;  %vm6773_vm9 = vmand %vm6749_vm3, %vm1702_vm8  ;;  %vm1306_vm4 = vweird.f32 %v6684_v39  ;;  %5734 = vpow2.f32 %v5521_v18  ;;  %vm6795_vm11 = vcmp.eq.f32.partialorder %v1310_v25, 8.507059e+37 }
 0x100   : > { %v1605_v16 = vmul.f32 %v954_v63, %v6602_v8  ;;  %v1129_v23 = vsel %vm6734_vm0, %v6674_v26, %v1125_v5  ;;  %v1302_v26 = vmul.f32 %v5729_v20, %v6684_v39  ;;  %vm9983_vm1 = vmmov %vm9968_vm15  ;;  %v1313_v15 = vor.u32 1.1754944e-38, %v1312_v31 }
 0x101   : > { %v1134_v27 = vsel %vm6738_vm7, %v1133_v52, %v1129_v23  ;;  %vm9984_vm2 = vmmov %vm9983_vm1  ;;  %5736 = vpow2.f32 %v5498_v19  ;;  %v967_v46 = vand.u32 2147483648, %v6742_v7  ;;  %v1145_v4 = vand.u32 2147483647, %v6753_v11 }
 0x102   : > { %v1906_v8 = vsel %vm6710_vm12, %v1605_v16, 0.0  ;;  %v1617_v33 = vmul.f32 %v1134_v27, %v6611_v21  ;;  %v1303_v36 = vsub.f32 1.0, %v1302_v26  ;;  %vm1685_vm12 = vcmp.lt.s32.totalorder %v1656_v49, 18  ;;  %vm9985_vm5 = vmmov %vm9983_vm1 }
 0x103   : > { %1955 = vst.msk [vmem:[#allocation2 + $0x20] sm:$0xff] %vm9984_vm2, %v1906_v8  ;;  %v5731_v21 = vpop.eup %5730  ;;  %vm6802_vm0 = vmor %vm1306_vm4, %vm1307_vm6  ;;  %5738 = vpow2.f32 %v5510_v48  ;;  %v1147_v52 = vand.u32 2147483648, %v6753_v11  ;;  %vm961_vm2 = vweird.f32 %v6742_v7  ;;  %vm966_vm6 = vcmp.eq.f32.partialorder %v965_v56, 8.507059e+37 }
 0x104   : > { %v1918_v28 = vsel %vm6773_vm9, %v1617_v33, 0.0  ;;  %v1304_v6 = vmul.f32 %v5729_v20, %v1303_v36  ;;  %v5733_v55 = vpop.eup %5732  ;;  %v957_v47 = vmul.f32 %v5731_v21, %v6742_v7  ;;  %vm6812_vm7 = vmand %vm1673_vm10, %vm1685_vm12  ;;  %vm1141_vm12 = vweird.f32 %v6753_v11 }
 0x105   : > { %v2127_v0 = vld [vmem:[#allocation3 + $0x58] sm:$0xff]  ;;  %1967 = vst.msk [vmem:[#allocation2 + $0x80] sm:$0xff] %vm9985_vm5, %v1918_v28  ;;  %v1137_v39 = vmul.f32 %v5733_v55, %v6753_v11  ;;  %v5735_v54 = vpop.eup %5734  ;;  %vm9992_vm9 = vmmov %vm9983_vm1  ;;  %vm1142_vm4 = vweird.f32 %v5733_v55  ;;  %v1148_v29 = vor.u32 1.1754944e-38, %v1147_v52 }
 0x106   : > { %v2160_v9 = vadd.f32 %v2144_v61, %v2127_v0  ;;  %v2202_v12 = vld [vmem:[#allocation3 + $0x28] sm:$0xff]  ;;  %v1305_v57 = vadd.f32 %v5729_v20, %v1304_v6  ;;  %v6819_v61 = vadd.f32 %v6321_v24, %v589_v51  ;;  %v958_v0 = vsub.f32 1.0, %v957_v47 }
 0x107   : > { %v2235_v22 = vadd.f32 %v2219_v60, %v2202_v12  ;;  %v5522_v60 = vmul.f32 -1.442695, %v6792_v34  ;;  %v1138_v3 = vsub.f32 1.0, %v1137_v39  ;;  %v6836_v5 = vadd.f32 1.0, %v5735_v54  ;;  %v5737_v14 = vpop.eup %5736 }
 0x108   : > { %2176 = vst.msk [vmem:[#allocation3 + $0x58] sm:$0xff] %vm9968_vm15, %v2160_v9  ;;  %v1309_v49 = vsel %vm6802_vm0, %v5729_v20, %v1305_v57  ;;  %vm962_vm15 = vweird.f32 %v5731_v21  ;;  %v959_v63 = vmul.f32 %v5731_v21, %v958_v0  ;;  %v5500_v12 = vmul.f32 -1.442695, %v6819_v61  ;;  %v2035_v57 = vld [vmem:[#allocation3] sm:$0xff] }
 0x109   : > { %2251 = vst.msk [vmem:[#allocation3 + $0x28] sm:$0xff] %vm9983_vm1, %v2235_v22  ;;  %v1314_v9 = vsel %vm6795_vm11, %v1313_v15, %v1309_v49  ;;  %vm6832_vm1 = vmand %vm6812_vm7, %vm1702_vm8  ;;  %v1139_v18 = vmul.f32 %v5733_v55, %v1138_v3  ;;  %5740 = vpow2.f32 %v5522_v60  ;;  %v968_v22 = vor.u32 1.1754944e-38, %v967_v46  ;;  %v5739_v25 = vpop.eup %5738 }
 0x10a   : > { %v1629_v16 = vmul.f32 %v1314_v9, %v6635_v53  ;;  %v960_v19 = vadd.f32 %v5731_v21, %v959_v63  ;;  %5742 = vrcp.f32 %v6836_v5  ;;  %vm963_vm10 = vmor %vm961_vm2, %vm962_vm15  ;;  %v6847_v8 = vadd.f32 1.0, %v5737_v14 }
 0x10b   : > { %v1140_v23 = vadd.f32 %v5733_v55, %v1139_v18  ;;  %vm1143_vm11 = vmor %vm1141_vm12, %vm1142_vm4  ;;  %5744 = vpow2.f32 %v5500_v12  ;;  %vm1146_vm0 = vcmp.eq.f32.partialorder %v1145_v4, 8.507059e+37  ;;  %v6849_v13 = vadd.f32 1.0, %v5739_v25 }
 0x10c   : > { %v1930_v20 = vsel %vm6832_vm1, %v1629_v16, 0.0  ;;  %v964_v53 = vsel %vm963_vm10, %v5731_v21, %v960_v19  ;;  %5746 = vrcp.f32 %v6847_v8  ;;  %vm9995_vm15 = vmmov %vm9985_vm5  ;;  %v1325_v47 = vand.u32 2147483647, %v6836_v5 }
 0x10d   : > { %1979 = vst.msk [vmem:[#allocation2 + $0xe0] sm:$0xff] %vm9985_vm5, %v1930_v20  ;;  %v969_v7 = vsel %vm966_vm6, %v968_v22, %v964_v53  ;;  %v1144_v27 = vsel %vm1143_vm11, %v5733_v55, %v1140_v23  ;;  %5748 = vrcp.f32 %v6849_v13  ;;  %v1327_v56 = vand.u32 2147483648, %v6836_v5  ;;  %v2041_v20 = vld [vmem:[#allocation3 + $0x30] sm:$0xff] }
 0x10e   : > { %v1606_v26 = vmul.f32 %v969_v7, %v6658_v2  ;;  %v1149_v31 = vsel %vm1146_vm0, %v1148_v29, %v1144_v27  ;;  %vm1321_vm1 = vweird.f32 %v6836_v5  ;;  %v980_v48 = vand.u32 2147483647, %v6847_v8 }
 0x10f   : > { %v2208_v41 = vld [vmem:[#allocation3 + $0x58] sm:$0xff]  ;;  %v5741_v11 = vpop.eup %5740  ;;  %v982_v54 = vand.u32 2147483648, %v6847_v8  ;;  %vm6890_vm2 = vcmp.eq.f32.partialorder %v1325_v47, 8.507059e+37  ;;  %v1328_v3 = vor.u32 1.1754944e-38, %v1327_v56  ;;  %v1160_v52 = vand.u32 2147483647, %v6849_v13 }
 0x110   : > { %v2241_v44 = vadd.f32 %v2225_v32, %v2208_v41  ;;  %v1618_v32 = vmul.f32 %v1149_v31, %v6662_v62  ;;  %v5743_v33 = vpop.eup %5742  ;;  %v1907_v36 = vsel %vm6692_vm13, %v1606_v26, 0.0  ;;  %v6862_v50 = vadd.f32 1.0, %v5741_v11  ;;  %v2283_v26 = vld [vmem:[#allocation3 + $0x20] sm:$0xff] }
 0x111   : > { %1956 = vst.msk [vmem:[#allocation2 + $0x28] sm:$0xff] %vm9995_vm15, %v1907_v36  ;;  %v1317_v21 = vmul.f32 %v5743_v33, %v6836_v5  ;;  %v5745_v2 = vpop.eup %5744  ;;  %vm1322_vm4 = vweird.f32 %v5743_v33  ;;  %v1162_v9 = vand.u32 2147483648, %v6849_v13  ;;  %vm976_vm10 = vweird.f32 %v6847_v8 }
 0x112   : > { %2257 = vst.msk [vmem:[#allocation3 + $0x58] sm:$0xff] %vm9992_vm9, %v2241_v44  ;;  %v1919_v28 = vsel %vm6749_vm3, %v1618_v32, 0.0  ;;  %vm9996_vm9 = vmmov %vm9985_vm5  ;;  %v6864_v62 = vpop.eup %5746  ;;  %v6866_v15 = vadd.f32 1.0, %v5745_v2  ;;  %5750 = vrcp.f32 %v6862_v50  ;;  %v6886_v44 = vperm.slane %v6873_v30, 0  ;;  %v2042_v2 = vld [vmem:[#allocation3 + $0x38] sm:$0xff] }
 0x113   : > { %1968 = vst.msk [vmem:[#allocation2 + $0x88] sm:$0xff] %vm9996_vm9, %v1919_v28  ;;  %v1318_v6 = vsub.f32 1.0, %v1317_v21  ;;  %v6868_v51 = vpop.eup %5748  ;;  %v972_v46 = vmul.f32 %v6864_v62, %v6847_v8  ;;  %vm1323_vm6 = vmor %vm1321_vm1, %vm1322_vm4  ;;  %vm1156_vm12 = vweird.f32 %v6849_v13  ;;  %vm6901_vm5 = vcmp.eq.f32.partialorder %v980_v48, 8.507059e+37 }
 0x114   : > { %v1152_v60 = vmul.f32 %v6868_v51, %v6849_v13  ;;  %5752 = vrcp.f32 %v6866_v15  ;;  %vm10001_vm11 = vmmov %vm9996_vm9  ;;  %v983_v23 = vor.u32 1.1754944e-38, %v982_v54  ;;  %v1342_v25 = vand.u32 2147483648, %v6862_v50 }
 0x115   : > { %v1319_v55 = vmul.f32 %v5743_v33, %v1318_v6  ;;  %v973_v63 = vsub.f32 1.0, %v972_v46  ;;  %vm1157_vm0 = vweird.f32 %v6868_v51  ;;  %vm6916_vm15 = vcmp.eq.f32.partialorder %v1160_v52, 8.507059e+37  ;;  %vm10004_vm4 = vmmov %vm10001_vm11 }
 0x116   : > { %v1153_v18 = vsub.f32 1.0, %v1152_v60  ;;  %v1163_v27 = vor.u32 1.1754944e-38, %v1162_v9  ;;  %vm977_vm9 = vweird.f32 %v6864_v62  ;;  %vm1336_vm1 = vweird.f32 %v6862_v50 }
 0x117   : > { %v1320_v39 = vadd.f32 %v5743_v33, %v1319_v55  ;;  %v974_v11 = vmul.f32 %v6864_v62, %v973_v63  ;;  %v1340_v32 = vand.u32 2147483647, %v6862_v50  ;;  %v1343_v55 = vor.u32 1.1754944e-38, %v1342_v25 }
 0x118   : > { %v2019_v41 = vld [vmem:[#allocation2 + $0x21] sm:$0xff]  ;;  %v6905_v19 = vpop.eup %5750  ;;  %v1154_v28 = vmul.f32 %v6868_v51, %v1153_v18  ;;  %v1010_v13 = vand.u32 2147483647, %v6866_v15 }
 0x119   : > { %v2052_v0 = vmul.f32 %v6606_v10, %v2019_v41  ;;  %v1324_v12 = vsel %vm1323_vm6, %v5743_v33, %v1320_v39  ;;  %v2100_v31 = vld [vmem:[#allocation2 + $0x22] sm:$0xff]  ;;  %v975_v21 = vadd.f32 %v6864_v62, %v974_v11  ;;  %v1332_v6 = vmul.f32 %v6905_v19, %v6862_v50  ;;  %vm978_vm6 = vmor %vm976_vm10, %vm977_vm9 }
 0x11a   : > { %v2025_v4 = vld [vmem:[#allocation2 + $0x81] sm:$0xff]  ;;  %v1329_v5 = vsel %vm6890_vm2, %v1328_v3, %v1324_v12  ;;  %v6912_v53 = vpop.eup %5752  ;;  %vm6933_vm2 = vmor %vm1156_vm12, %vm1157_vm0  ;;  %v2133_v56 = vmul.f32 %v6626_v40, %v2100_v31  ;;  %v1155_v46 = vadd.f32 %v6868_v51, %v1154_v28  ;;  %vm1337_vm12 = vweird.f32 %v6905_v19 }
 0x11b   : > { %v2068_v24 = vadd.f32 %v2052_v0, %v2035_v57  ;;  %v2058_v14 = vmul.f32 %v6606_v10, %v2025_v4  ;;  %v2300_v22 = vmul.f32 %v6886_v44, %v2025_v4  ;;  %v1630_v29 = vmul.f32 %v1329_v5, %v6715_v58  ;;  %vm10008_vm0 = vmmov %vm10004_vm4  ;;  %v2106_v49 = vld [vmem:[#allocation2 + $0x82] sm:$0xff] }
 0x11c   : > { %v1002_v47 = vmul.f32 %v6912_v53, %v6866_v15  ;;  %v979_v48 = vsel %vm978_vm6, %v6864_v62, %v975_v21  ;;  %v1333_v41 = vsub.f32 1.0, %v1332_v6  ;;  %v1651_v39 = vadd.s32 2, %v6338_v38  ;;  %vm6957_vm10 = vmand %vm6692_vm13, %vm1756_vm14  ;;  %v2187_v43 = vld [vmem:[#allocation2 + $0x83] sm:$0xff] }
 0x11d   : > { %2084 = vst.msk [vmem:[#allocation3] sm:$0xff] %vm10001_vm11, %v2068_v24  ;;  %v1931_v58 = vsel %vm6812_vm7, %v1630_v29, 0.0  ;;  %v2074_v33 = vadd.f32 %v2058_v14, %v2041_v20  ;;  %v2316_v36 = vadd.f32 %v2300_v22, %v2283_v26  ;;  %vm10007_vm11 = vmmov %vm10004_vm4  ;;  %v984_v8 = vsel %vm6901_vm5, %v983_v23, %v979_v48  ;;  %v2181_v23 = vld [vmem:[#allocation2 + $0x23] sm:$0xff] }
 0x11e   : > { %1980 = vst.msk [vmem:[#allocation2 + $0xe8] sm:$0xff] %vm10004_vm4, %v1931_v58  ;;  %v1003_v57 = vsub.f32 1.0, %v1002_v47  ;;  %v1159_v62 = vsel %vm6933_vm2, %v6868_v51, %v1155_v46  ;;  %vm1007_vm9 = vweird.f32 %v6912_v53  ;;  %v1012_v4 = vand.u32 2147483648, %v6866_v15  ;;  %vm6973_vm13 = vmand %vm6749_vm3, %vm1756_vm14  ;;  %v2284_v47 = vld [vmem:[#allocation3 + $0x28] sm:$0xff] }
 0x11f   : > { %2090 = vst.msk [vmem:[#allocation3 + $0x30] sm:$0xff] %vm10007_vm11, %v2074_v33  ;;  %v1607_v3 = vmul.f32 %v984_v8, %v6719_v59  ;;  %v1164_v52 = vsel %vm6916_vm15, %v1163_v27, %v1159_v62  ;;  %v1334_v51 = vmul.f32 %v6905_v19, %v1333_v41  ;;  %vm6983_vm5 = vmor %vm1336_vm1, %vm1337_vm12  ;;  %vm1668_vm15 = vcmp.ge.s32.totalorder %v1651_v39, 2  ;;  %v2048_v41 = vld [vmem:[#allocation3 + $0x68] sm:$0xff]  ;;  %v649_v59 = vpop.f32.mrf.mxu2 }
 0x120   : > { %2332 = vst.msk [vmem:[#allocation3 + $0x20] sm:$0xff] %vm10008_vm0, %v2316_v36  ;;  %v1619_v9 = vmul.f32 %v1164_v52, %v6788_v37  ;;  %v1004_v24 = vmul.f32 %v6912_v53, %v1003_v57  ;;  %vm1680_vm4 = vcmp.lt.s32.totalorder %v1651_v39, 18  ;;  %vm10015_vm3 = vmmov %vm10008_vm0  ;;  %vm1341_vm2 = vcmp.eq.f32.partialorder %v1340_v32, 8.507059e+37  ;;  %v2036_v36 = vld [vmem:[#allocation3 + $0x8] sm:$0xff]  ;;  %v619_v52 = vpop.f32.mrf.mxu1 }
 0x121   : > { %v1908_v37 = vsel %vm6957_vm10, %v1607_v3, 0.0  ;;  %v1335_v63 = vadd.f32 %v6905_v19, %v1334_v51  ;;  %v2139_v50 = vmul.f32 %v6626_v40, %v2106_v49  ;;  %vm10016_vm1 = vmmov %vm10008_vm0  ;;  %vm1006_vm6 = vweird.f32 %v6866_v15  ;;  %v4461_v15 = vld [vmem:[#allocation2 + $0xc1] sm:$0xff] }
 0x122   : > { %1957 = vst.msk [vmem:[#allocation2 + $0x30] sm:$0xff] %vm10016_vm1, %v1908_v37  ;;  %v1920_v12 = vsel %vm6973_vm13, %v1619_v9, 0.0  ;;  %v1005_v14 = vadd.f32 %v6912_v53, %v1004_v24  ;;  %vm7001_vm11 = vmand %vm1668_vm15, %vm1680_vm4  ;;  %v2381_v18 = vmul.f32 %v6989_v35, %v2106_v49  ;;  %v1013_v22 = vor.u32 1.1754944e-38, %v1012_v4 }
 0x123   : > { %vm10019_vm12 = vmmov %vm10008_vm0  ;;  %v1339_v20 = vsel %vm6983_vm5, %v6905_v19, %v1335_v63  ;;  %vm1011_vm13 = vcmp.eq.f32.partialorder %v1010_v13, 8.507059e+37  ;;  %v2214_v11 = vmul.f32 %v6655_v17, %v2181_v23  ;;  %v7048_v24 = vperm.slane %v6873_v30, 2 }
 0x124   : > { %v2116_v60 = vld [vmem:[#allocation3] sm:$0xff]  ;;  %1969 = vst.msk [vmem:[#allocation2 + $0x90] sm:$0xff] %vm10019_vm12, %v1920_v12  ;;  %vm1008_vm0 = vmor %vm1006_vm6, %vm1007_vm9  ;;  %v1344_v25 = vsel %vm1341_vm2, %v1343_v55, %v1339_v20  ;;  %v2220_v23 = vmul.f32 %v6655_v17, %v2187_v43 }
 0x125   : > { %v2149_v54 = vadd.f32 %v2133_v56, %v2116_v60  ;;  %vm7016_vm10 = vmand %vm6812_vm7, %vm1756_vm14  ;;  %v1009_v27 = vsel %vm1008_vm0, %v6912_v53, %v1005_v14  ;;  %v1631_v19 = vmul.f32 %v1344_v25, %v6792_v34  ;;  %v7055_v14 = vld [vmem:[%s9921_s2] ss:$0 sm:$0xff]  ;;  %v2462_v20 = vmul.f32 %v7048_v24, %v2187_v43 }
 0x126   : > { %v2122_v5 = vld [vmem:[#allocation3 + $0x30] sm:$0xff]  ;;  %v1014_v31 = vsel %vm1011_vm13, %v1013_v22, %v1009_v27  ;;  %vm1714_vm9 = vmand %vm7001_vm11, %vm1702_vm8  ;;  %v7063_v22 = vadd.f32 %v7055_v14, %v649_v59  ;;  %v1654_v43 = vadd.s32 5, %v6338_v38 }
 0x127   : > { %2165 = vst.msk [vmem:[#allocation3] sm:$0xff] %vm10015_vm3, %v2149_v54  ;;  %v2364_v29 = vld [vmem:[#allocation3 + $0x20] sm:$0xff]  ;;  %v2155_v7 = vadd.f32 %v2139_v50, %v2122_v5  ;;  %vm10022_vm5 = vmmov %vm10016_vm1  ;;  %v1609_v42 = vmul.f32 %v1014_v31, %v6819_v61  ;;  %v1932_v32 = vsel %vm7016_vm10, %v1631_v19, 0.0  ;;  %v2290_v54 = vld [vmem:[#allocation3 + $0x58] sm:$0xff] }
 0x128   : > { %v2397_v26 = vadd.f32 %v2381_v18, %v2364_v29  ;;  %vm10023_vm7 = vmmov %vm10016_vm1  ;;  %v7058_v18 = vadd.f32 %v7055_v14, %v619_v52  ;;  %v7067_v29 = vld [vmem:[#allocation2 + $0xe1] sm:$0xff] }
 0x129   : > { %2171 = vst.msk [vmem:[#allocation3 + $0x30] sm:$0xff] %vm10022_vm5, %v2155_v7  ;;  %vm10024_vm15 = vmmov %vm10016_vm1  ;;  %v1910_v34 = vsel %vm1714_vm9, %v1609_v42, 0.0  ;;  %v2020_v33 = vld [vmem:[#allocation2 + $0x29] sm:$0xff] }
 0x12a   : > { %2413 = vst.msk [vmem:[#allocation3 + $0x20] sm:$0xff] %vm10023_vm7, %v2397_v26  ;;  %vm10025_vm4 = vmmov %vm10016_vm1  ;;  %v2053_v28 = vmul.f32 %v6606_v10, %v2020_v33  ;;  %v2101_v13 = vld [vmem:[#allocation2 + $0x2a] sm:$0xff]  ;;  %v5512_v31 = vmul.f32 -1.442695, %v7058_v18  ;;  %v4542_v52 = vld [vmem:[#allocation2 + $0xc2] sm:$0xff] }
 0x12b   : > { %1981 = vst.msk [vmem:[#allocation2 + $0xf0] sm:$0xff] %vm10024_vm15, %v1932_v32  ;;  %v2026_v21 = vld [vmem:[#allocation2 + $0x89] sm:$0xff]  ;;  %vm10026_vm3 = vmmov %vm10016_vm1  ;;  %v2134_v57 = vmul.f32 %v6626_v40, %v2101_v13  ;;  %v5524_v32 = vmul.f32 -1.442695, %v7063_v22 }
 0x12c   : > { %1959 = vst.msk [vmem:[#allocation2 + $0x40] sm:$0xff] %vm10025_vm4, %v1910_v34  ;;  %v2069_v61 = vadd.f32 %v2053_v28, %v2036_v36  ;;  %v2059_v6 = vmul.f32 %v6606_v10, %v2026_v21  ;;  %v2301_v55 = vmul.f32 %v6886_v44, %v2026_v21  ;;  %vm10027_vm2 = vmmov %vm10016_vm1  ;;  %v2107_v39 = vld [vmem:[#allocation2 + $0x8a] sm:$0xff]  ;;  %5754 = vpow2.f32 %v5512_v31 }
 0x12d   : > { %vm10028_vm6 = vmmov %vm10016_vm1  ;;  %v2140_v49 = vmul.f32 %v6626_v40, %v2107_v39  ;;  %v2382_v9 = vmul.f32 %v6989_v35, %v2107_v39  ;;  %v2182_v30 = vld [vmem:[#allocation2 + $0x2b] sm:$0xff]  ;;  %v2064_v28 = vmul.f32 %v7067_v29, %v6606_v10  ;;  %5756 = vpow2.f32 %v5524_v32  ;;  %v591_v39 = vpop.f32.mrf.mxu0 }
 0x12e   : > { %v2197_v53 = vld [vmem:[#allocation3] sm:$0xff]  ;;  %2085 = vst.msk [vmem:[#allocation3 + $0x8] sm:$0xff] %vm10027_vm2, %v2069_v61  ;;  %v2075_v56 = vadd.f32 %v2059_v6, %v2042_v2  ;;  %v2317_v46 = vadd.f32 %v2301_v55, %v2284_v47  ;;  %vm10029_vm12 = vmmov %vm10016_vm1  ;;  %v2215_v27 = vmul.f32 %v6655_v17, %v2182_v30  ;;  %v2188_v19 = vld [vmem:[#allocation2 + $0x8b] sm:$0xff] }
 0x12f   : > { %v2230_v58 = vadd.f32 %v2214_v11, %v2197_v53  ;;  %vm10030_vm0 = vmmov %vm10016_vm1  ;;  %v2062_v53 = vmul.f32 %v4461_v15, %v6606_v10  ;;  %v2045_v36 = vld [vmem:[#allocation3 + $0x50] sm:$0xff]  ;;  %v2221_v21 = vmul.f32 %v6655_v17, %v2188_v19  ;;  %v2047_v6 = vld [vmem:[#allocation3 + $0x60] sm:$0xff]  ;;  %v2463_v47 = vmul.f32 %v7048_v24, %v2188_v19 }
 0x130   : > { %2091 = vst.msk [vmem:[#allocation3 + $0x38] sm:$0xff] %vm10016_vm1, %v2075_v56  ;;  %vm10031_vm10 = vmmov %vm10030_vm0  ;;  %v2203_v5 = vld [vmem:[#allocation3 + $0x30] sm:$0xff] }
 0x131   : > { %2246 = vst.msk [vmem:[#allocation3] sm:$0xff] %vm10026_vm3, %v2230_v58  ;;  %v2445_v12 = vld [vmem:[#allocation3 + $0x20] sm:$0xff]  ;;  %vm10032_vm13 = vmmov %vm10030_vm0  ;;  %v2236_v26 = vadd.f32 %v2220_v23, %v2203_v5  ;;  %v7103_v5 = vadd.f32 %v7055_v14, %v591_v39  ;;  %v8564_v1 = vld [vmem:[#allocation2 + $0x8b] sm:$0xff] }
 0x132   : > { %v2032_v48 = vld [vmem:[#allocation2 + $0xe9] sm:$0xff]  ;;  %2333 = vst.msk [vmem:[#allocation3 + $0x28] sm:$0xff] %vm10028_vm6, %v2317_v46  ;;  %vm10033_vm9 = vmmov %vm10030_vm0  ;;  %v2478_v7 = vadd.f32 %v2462_v20, %v2445_v12  ;;  %v1657_v12 = vadd.s32 8, %v6338_v38 }
 0x133   : > { %v2065_v60 = vmul.f32 %v6606_v10, %v2032_v48  ;;  %v2307_v0 = vmul.f32 %v6886_v44, %v2032_v48  ;;  %v2113_v25 = vld [vmem:[#allocation2 + $0xea] sm:$0xff]  ;;  %vm10034_vm5 = vmmov %vm10030_vm0  ;;  %v2078_v48 = vadd.f32 %v2062_v53, %v2045_v36 }
 0x134   : > { %v2146_v11 = vmul.f32 %v6626_v40, %v2113_v25  ;;  %2494 = vst.msk [vmem:[#allocation3 + $0x20] sm:$0xff] %vm10034_vm5, %v2478_v7  ;;  %v2388_v33 = vmul.f32 %v6989_v35, %v2113_v25  ;;  %vm10035_vm7 = vmmov %vm10030_vm0  ;;  %vm1683_vm5 = vcmp.lt.s32.totalorder %v1654_v43, 18 }
 0x135   : > { %v2117_v8 = vld [vmem:[#allocation3 + $0x8] sm:$0xff]  ;;  %v2081_v4 = vadd.f32 %v2065_v60, %v2048_v41  ;;  %v2323_v3 = vadd.f32 %v2307_v0, %v2290_v54  ;;  %2252 = vst.msk [vmem:[#allocation3 + $0x30] sm:$0xff] %vm10035_vm7, %v2236_v26  ;;  %vm10036_vm15 = vmmov %vm10030_vm0  ;;  %v5755_v60 = vpop.eup %5754 }
 0x136   : > { %v2150_v62 = vadd.f32 %v2134_v57, %v2117_v8  ;;  %vm10037_vm4 = vmmov %vm10030_vm0  ;;  %v2080_v57 = vadd.f32 %v2064_v28, %v2047_v6  ;;  %v2194_v8 = vld [vmem:[#allocation2 + $0xeb] sm:$0xff]  ;;  %v5757_v0 = vpop.eup %5756  ;;  %v7124_v6 = vld [vmem:[#allocation2 + $0xe3] sm:$0xff] }
 0x137   : > { %v2123_v51 = vld [vmem:[#allocation3 + $0x38] sm:$0xff]  ;;  %2097 = vst.msk [vmem:[#allocation3 + $0x68] sm:$0xff] %vm10030_vm0, %v2081_v4  ;;  %vm10038_vm3 = vmmov %vm10030_vm0  ;;  %v7087_v4 = vadd.f32 1.0, %v5757_v0  ;;  %v2227_v54 = vmul.f32 %v6655_v17, %v2194_v8 }
 0x138   : > { %2166 = vst.msk [vmem:[#allocation3 + $0x8] sm:$0xff] %vm10029_vm12, %v2150_v62  ;;  %v2156_v37 = vadd.f32 %v2140_v49, %v2123_v51  ;;  %vm10039_vm2 = vmmov %vm10030_vm0  ;;  %v853_v62 = vadd.f32 1.0, %v5755_v60  ;;  %v7094_v51 = vld [vmem:[#allocation2 + $0xe2] sm:$0xff] }
 0x139   : > { %v2365_v63 = vld [vmem:[#allocation3 + $0x28] sm:$0xff]  ;;  %2339 = vst.msk [vmem:[#allocation3 + $0x58] sm:$0xff] %vm10031_vm10, %v2323_v3  ;;  %vm10040_vm1 = vmmov %vm10030_vm0  ;;  %v2469_v3 = vmul.f32 %v7048_v24, %v2194_v8  ;;  %v2145_v30 = vmul.f32 %v7094_v51, %v6626_v40  ;;  %vm1366_vm7 = vweird.f32 %v7087_v4  ;;  %v1370_v28 = vand.u32 2147483647, %v7087_v4 }
 0x13a   : > { %v2398_v50 = vadd.f32 %v2382_v9, %v2365_v63  ;;  %2172 = vst.msk [vmem:[#allocation3 + $0x38] sm:$0xff] %vm10032_vm13, %v2156_v37  ;;  %vm10041_vm6 = vmmov %vm10030_vm0  ;;  %5758 = vrcp.f32 %v853_v62  ;;  %v621_v37 = vpop.f32.mrf.mxu1  ;;  %vm1671_vm13 = vcmp.ge.s32.totalorder %v1654_v43, 2  ;;  %v1190_v31 = vand.u32 2147483647, %v853_v62 }
 0x13b   : > { %2094 = vst.msk [vmem:[#allocation3 + $0x50] sm:$0xff] %vm10041_vm6, %v2078_v48  ;;  %vm10042_vm12 = vmmov %vm10030_vm0  ;;  %5760 = vrcp.f32 %v7087_v4  ;;  %v7106_v7 = vadd.f32 %v7055_v14, %v621_v37  ;;  %v1192_v32 = vand.u32 2147483648, %v853_v62  ;;  %vm1674_vm6 = vcmp.ge.s32.totalorder %v1657_v12, 2 }
 0x13c   : > { %2414 = vst.msk [vmem:[#allocation3 + $0x28] sm:$0xff] %vm10033_vm9, %v2398_v50  ;;  %v2143_v50 = vmul.f32 %v4542_v52, %v6626_v40  ;;  %vm10043_vm10 = vmmov %vm10030_vm0  ;;  %vm1186_vm9 = vweird.f32 %v853_v62  ;;  %v2226_v43 = vmul.f32 %v7124_v6, %v6655_v17 }
 0x13d   : > { %2096 = vst.msk [vmem:[#allocation3 + $0x60] sm:$0xff] %vm10042_vm12, %v2080_v57  ;;  %vm1686_vm12 = vcmp.lt.s32.totalorder %v1657_v12, 18 }
 0x13e   : > { %v2129_v58 = vld [vmem:[#allocation3 + $0x68] sm:$0xff] }
 0x13f   : > { %v2198_v42 = vld [vmem:[#allocation3 + $0x8] sm:$0xff]  ;;  %v2162_v61 = vadd.f32 %v2146_v11, %v2129_v58  ;;  %v5501_v11 = vmul.f32 -1.442695, %v7103_v5 }
 0x140   : > { %v2231_v34 = vadd.f32 %v2215_v27, %v2198_v42  ;;  %v2371_v2 = vld [vmem:[#allocation3 + $0x58] sm:$0xff]  ;;  %v5759_v23 = vpop.eup %5758  ;;  %v7108_v27 = vpop.f32.mrf.mxu0 }
 0x141   : > { %v2204_v55 = vld [vmem:[#allocation3 + $0x38] sm:$0xff]  ;;  %v2404_v56 = vadd.f32 %v2388_v33, %v2371_v2  ;;  %2178 = vst.msk [vmem:[#allocation3 + $0x68] sm:$0xff] %vm10037_vm4, %v2162_v61  ;;  %v5761_v19 = vpop.eup %5760  ;;  %v1182_v26 = vmul.f32 %v5759_v23, %v853_v62  ;;  %vm1187_vm4 = vweird.f32 %v5759_v23  ;;  %v1372_v33 = vand.u32 2147483648, %v7087_v4 }
 0x142   : > { %2247 = vst.msk [vmem:[#allocation3 + $0x8] sm:$0xff] %vm10036_vm15, %v2231_v34  ;;  %v2237_v46 = vadd.f32 %v2221_v21, %v2204_v55  ;;  %v2126_v20 = vld [vmem:[#allocation3 + $0x50] sm:$0xff]  ;;  %v1362_v53 = vmul.f32 %v5761_v19, %v7087_v4  ;;  %vm10044_vm15 = vmmov %vm10030_vm0  ;;  %v5513_v34 = vmul.f32 -1.442695, %v7106_v7  ;;  %5762 = vpow2.f32 %v5501_v11  ;;  %v4623_v21 = vld [vmem:[#allocation2 + $0xc3] sm:$0xff] }
 0x143   : > { %v2446_v13 = vld [vmem:[#allocation3 + $0x28] sm:$0xff]  ;;  %2420 = vst.msk [vmem:[#allocation3 + $0x58] sm:$0xff] %vm10038_vm3, %v2404_v56  ;;  %v2159_v15 = vadd.f32 %v2143_v50, %v2126_v20  ;;  %v1183_v58 = vsub.f32 1.0, %v1182_v26  ;;  %vm10045_vm3 = vmmov %vm10030_vm0  ;;  %v1373_v39 = vor.u32 1.1754944e-38, %v1372_v33  ;;  %v2224_v62 = vmul.f32 %v4623_v21, %v6655_v17 }
 0x144   : > { %v2479_v41 = vadd.f32 %v2463_v47, %v2446_v13  ;;  %2253 = vst.msk [vmem:[#allocation3 + $0x38] sm:$0xff] %vm10039_vm2, %v2237_v46  ;;  %v2128_v25 = vld [vmem:[#allocation3 + $0x60] sm:$0xff]  ;;  %v1363_v36 = vsub.f32 1.0, %v1362_v53  ;;  %vm1367_vm2 = vweird.f32 %v5761_v19  ;;  %5764 = vpow2.f32 %v5513_v34  ;;  %v651_v46 = vpop.f32.mrf.mxu2  ;;  %v7131_v13 = vpop.f32.mrf.mxu1 }
 0x145   : > { %v2161_v42 = vadd.f32 %v2145_v30, %v2128_v25  ;;  %2175 = vst.msk [vmem:[#allocation3 + $0x50] sm:$0xff] %vm10044_vm15, %v2159_v15  ;;  %v1184_v61 = vmul.f32 %v5759_v23, %v1183_v58  ;;  %v1193_v47 = vor.u32 1.1754944e-38, %v1192_v32  ;;  %v7195_v34 = vadd.f32 %v7055_v14, %v7108_v27 }
 0x146   : > { %2495 = vst.msk [vmem:[#allocation3 + $0x28] sm:$0xff] %vm10040_vm1, %v2479_v41  ;;  %vm7120_vm1 = vmand %vm1671_vm13, %vm1683_vm5  ;;  %v1364_v56 = vmul.f32 %v5761_v19, %v1363_v36 }
 0x147   : > { %2177 = vst.msk [vmem:[#allocation3 + $0x60] sm:$0xff] %vm10045_vm3, %v2161_v42  ;;  %v1185_v48 = vadd.f32 %v5759_v23, %v1184_v61  ;;  %vm7140_vm13 = vmor %vm1366_vm7, %vm1367_vm2 }
 0x148   : > { %v2210_v49 = vld [vmem:[#allocation3 + $0x68] sm:$0xff]  ;;  %v1365_v60 = vadd.f32 %v5761_v19, %v1364_v56  ;;  %vm7148_vm5 = vmand %vm1674_vm6, %vm1686_vm12 }
 0x149   : > { %v2243_v9 = vadd.f32 %v2227_v54, %v2210_v49  ;;  %v659_v54 = vpop.f32.mrf.mxu3  ;;  %v596_v49 = vpop.f32.mrf.mxu0  ;;  %vm7169_vm7 = vmand %vm7120_vm1, %vm1702_vm8 }
 0x14a   : > { %v2452_v59 = vld [vmem:[#allocation3 + $0x58] sm:$0xff]  ;;  %v1369_v12 = vsel %vm7140_vm13, %v5761_v19, %v1365_v60  ;;  %vm1738_vm15 = vmand %vm7148_vm5, %vm1702_vm8 }
 0x14b   : > { %v2485_v63 = vadd.f32 %v2469_v3, %v2452_v59  ;;  %2259 = vst.msk [vmem:[#allocation3 + $0x68] sm:$0xff] %vm10030_vm0, %v2243_v9  ;;  %vm7127_vm0 = vmor %vm1186_vm9, %vm1187_vm4  ;;  %vm7144_vm9 = vcmp.eq.f32.partialorder %v1370_v28, 8.507059e+37  ;;  %v5763_v3 = vpop.eup %5762  ;;  %v7158_v9 = vadd.f32 %v7055_v14, %v659_v54  ;;  %v7161_v59 = vadd.f32 %v7055_v14, %v651_v46 }
 0x14c   : > { %v1189_v4 = vsel %vm7127_vm0, %v5759_v23, %v1185_v48  ;;  %v2207_v52 = vld [vmem:[#allocation3 + $0x50] sm:$0xff]  ;;  %v5765_v37 = vpop.eup %5764  ;;  %v842_v23 = vadd.f32 1.0, %v5763_v3  ;;  %v1374_v15 = vsel %vm7144_vm9, %v1373_v39, %v1369_v12  ;;  %vm10060_vm4 = vmmov %vm10045_vm3  ;;  %v626_v11 = vpop.f32.mrf.mxu1  ;;  %v2387_v3 = vmul.f32 %v7094_v51, %v6989_v35 }
 0x14d   : > { %2501 = vst.msk [vmem:[#allocation3 + $0x58] sm:$0xff] %vm10043_vm10, %v2485_v63  ;;  %vm7133_vm10 = vcmp.eq.f32.partialorder %v1190_v31, 8.507059e+37  ;;  %v2240_v30 = vadd.f32 %v2224_v62, %v2207_v52  ;;  %v854_v31 = vadd.f32 1.0, %v5765_v37  ;;  %v1633_v42 = vmul.f32 %v1374_v15, %v7063_v22  ;;  %vm10061_vm2 = vmmov %vm10045_vm3 }
 0x14e   : > { %v1194_v63 = vsel %vm7133_vm10, %v1193_v47, %v1189_v4  ;;  %v2209_v20 = vld [vmem:[#allocation3 + $0x60] sm:$0xff]  ;;  %5766 = vrcp.f32 %v842_v23  ;;  %vm10062_vm6 = vmmov %vm10061_vm2  ;;  %v5528_v32 = vmul.f32 -1.442695, %v7158_v9  ;;  %v5525_v53 = vmul.f32 -1.442695, %v7161_v59 }
 0x14f   : > { %v1621_v25 = vmul.f32 %v1194_v63, %v7058_v18  ;;  %v2242_v26 = vadd.f32 %v2226_v43, %v2209_v20  ;;  %2256 = vst.msk [vmem:[#allocation3 + $0x50] sm:$0xff] %vm10060_vm4, %v2240_v30  ;;  %5768 = vrcp.f32 %v854_v31  ;;  %v1934_v18 = vsel %vm1738_vm15, %v1633_v42, 0.0  ;;  %vm10063_vm12 = vmmov %vm10061_vm2 }
 0x150   : > { %1983 = vst.msk [vmem:[#allocation2 + $0x100] sm:$0xff] %vm10062_vm6, %v1934_v18  ;;  %v2306_v22 = vmul.f32 %v7067_v29, %v6886_v44  ;;  %5770 = vpow2.f32 %v5528_v32  ;;  %v5502_v47 = vmul.f32 -1.442695, %v7195_v34  ;;  %vm1021_vm0 = vweird.f32 %v842_v23  ;;  %vm10064_vm6 = vmmov %vm10061_vm2 }
 0x151   : > { %v1922_v19 = vsel %vm7169_vm7, %v1621_v25, 0.0  ;;  %2258 = vst.msk [vmem:[#allocation3 + $0x60] sm:$0xff] %vm10045_vm3, %v2242_v26  ;;  %5772 = vpow2.f32 %v5525_v53  ;;  %v1025_v29 = vand.u32 2147483647, %v842_v23  ;;  %v1027_v46 = vand.u32 2147483648, %v842_v23 }
 0x152   : > { %1971 = vst.msk [vmem:[#allocation2 + $0xa0] sm:$0xff] %vm10061_vm2, %v1922_v19  ;;  %v1205_v48 = vand.u32 2147483647, %v854_v31  ;;  %v1207_v60 = vand.u32 2147483648, %v854_v31  ;;  %5774 = vpow2.f32 %v5502_v47  ;;  %v7205_v62 = vadd.f32 %v7055_v14, %v7131_v13 }
 0x153   : > { %v1028_v4 = vor.u32 1.1754944e-38, %v1027_v46  ;;  %vm1026_vm7 = vcmp.eq.f32.partialorder %v1025_v29, 8.507059e+37  ;;  %vm1201_vm15 = vweird.f32 %v854_v31  ;;  %v1658_v11 = vadd.s32 9, %v6338_v38  ;;  %v2037_v29 = vld [vmem:[#allocation3 + $0x10] sm:$0xff] }
 0x154   : > { %v5767_v58 = vpop.eup %5766  ;;  %vm1206_vm3 = vcmp.eq.f32.partialorder %v1205_v48, 8.507059e+37  ;;  %v1208_v13 = vor.u32 1.1754944e-38, %v1207_v60  ;;  %v5514_v51 = vmul.f32 -1.442695, %v7205_v62 }
 0x155   : > { %v5769_v33 = vpop.eup %5768  ;;  %v1017_v28 = vmul.f32 %v5767_v58, %v842_v23  ;;  %vm1022_vm10 = vweird.f32 %v5767_v58 }
 0x156   : > { %v2289_v36 = vld [vmem:[#allocation3 + $0x50] sm:$0xff]  ;;  %v1197_v61 = vmul.f32 %v5769_v33, %v854_v31  ;;  %v5771_v56 = vpop.eup %5770  ;;  %vm1202_vm13 = vweird.f32 %v5769_v33  ;;  %vm1023_vm9 = vmor %vm1021_vm0, %vm1022_vm10 }
 0x157   : > { %v2322_v21 = vadd.f32 %v2306_v22, %v2289_v36  ;;  %v1018_v55 = vsub.f32 1.0, %v1017_v28  ;;  %v5773_v41 = vpop.eup %5772  ;;  %v7199_v39 = vadd.f32 1.0, %v5771_v56  ;;  %vm1203_vm4 = vmor %vm1201_vm15, %vm1202_vm13  ;;  %vm1675_vm13 = vcmp.ge.s32.totalorder %v1658_v11, 2 }
 0x158   : > { %v1198_v57 = vsub.f32 1.0, %v1197_v61  ;;  %v7201_v8 = vadd.f32 1.0, %v5773_v41  ;;  %v5775_v30 = vpop.eup %5774 }
 0x159   : > { %2338 = vst.msk [vmem:[#allocation3 + $0x50] sm:$0xff] %vm10063_vm12, %v2322_v21  ;;  %v1019_v27 = vmul.f32 %v5767_v58, %v1018_v55  ;;  %5776 = vrcp.f32 %v7199_v39  ;;  %v7222_v42 = vadd.f32 1.0, %v5775_v30  ;;  %vm10065_vm12 = vmmov %vm10061_vm2  ;;  %v1432_v53 = vand.u32 2147483648, %v7199_v39 }
 0x15a   : > { %v1199_v49 = vmul.f32 %v5769_v33, %v1198_v57  ;;  %5778 = vrcp.f32 %v7201_v8  ;;  %vm1426_vm0 = vweird.f32 %v7199_v39  ;;  %v7247_v57 = vpop.f32.mrf.mxu3 }
 0x15b   : > { %v1020_v54 = vadd.f32 %v5767_v58, %v1019_v27  ;;  %5780 = vpow2.f32 %v5514_v51  ;;  %v1433_v47 = vor.u32 1.1754944e-38, %v1432_v53  ;;  %v1387_v51 = vand.u32 2147483648, %v7201_v8 }
 0x15c   : > { %v1200_v43 = vadd.f32 %v5769_v33, %v1199_v49  ;;  %5782 = vrcp.f32 %v7222_v42 }
 0x15d   : > { %v1024_v52 = vsel %vm1023_vm9, %v5767_v58, %v1020_v54  ;;  %vm1687_vm9 = vcmp.lt.s32.totalorder %v1658_v11, 18  ;;  %v2279_v54 = vld [vmem:[#allocation3] sm:$0xff]  ;;  %v1388_v11 = vor.u32 1.1754944e-38, %v1387_v51 }
 0x15e   : > { %v1029_v63 = vsel %vm1026_vm7, %v1028_v4, %v1024_v52  ;;  %v1204_v20 = vsel %vm1203_vm4, %v5769_v33, %v1200_v43  ;;  %v1430_v33 = vand.u32 2147483647, %v7199_v39  ;;  %vm10066_vm7 = vmmov %vm10061_vm2 }
 0x15f   : > { %v1610_v12 = vmul.f32 %v1029_v63, %v7103_v5  ;;  %v1209_v23 = vsel %vm1206_vm3, %v1208_v13, %v1204_v20  ;;  %v5777_v25 = vpop.eup %5776  ;;  %vm7241_vm3 = vmand %vm1675_vm13, %vm1687_vm9  ;;  %v1385_v20 = vand.u32 2147483647, %v7201_v8 }
 0x160   : > { %v2370_v37 = vld [vmem:[#allocation3 + $0x50] sm:$0xff]  ;;  %v1622_v26 = vmul.f32 %v1209_v23, %v7106_v7  ;;  %v1422_v31 = vmul.f32 %v5777_v25, %v7199_v39  ;;  %v7224_v19 = vpop.eup %5778  ;;  %v2468_v7 = vmul.f32 %v7124_v6, %v7048_v24  ;;  %vm1427_vm10 = vweird.f32 %v5777_v25  ;;  %v7236_v6 = vpop.f32.mrf.mxu2  ;;  %v7252_v39 = vld [vmem:[%s9886_s3 + $0x8] sm:$0x7] }
 0x161   : > { %v2403_v50 = vadd.f32 %v2387_v3, %v2370_v37  ;;  %v1911_v15 = vsel %vm7001_vm11, %v1610_v12, 0.0  ;;  %v1377_v22 = vmul.f32 %v7224_v19, %v7201_v8  ;;  %v5781_v36 = vpop.eup %5780  ;;  %vm1428_vm15 = vmor %vm1426_vm0, %vm1427_vm10  ;;  %vm1431_vm4 = vcmp.eq.f32.partialorder %v1430_v33, 8.507059e+37 }
 0x162   : > { %1960 = vst.msk [vmem:[#allocation2 + $0x48] sm:$0xff] %vm10064_vm6, %v1911_v15  ;;  %v1923_v5 = vsel %vm7120_vm1, %v1622_v26, 0.0  ;;  %v1423_v18 = vsub.f32 1.0, %v1422_v31  ;;  %v7245_v41 = vadd.f32 1.0, %v5781_v36  ;;  %v5783_v27 = vpop.eup %5782  ;;  %vm10071_vm0 = vmmov %vm10064_vm6  ;;  %vm1382_vm13 = vweird.f32 %v7224_v19  ;;  %v2043_v15 = vld [vmem:[#allocation3 + $0x40] sm:$0xff]  ;;  %v664_v36 = vpop.f32.mrf.mxu3 }
 0x163   : > { %2419 = vst.msk [vmem:[#allocation3 + $0x50] sm:$0xff] %vm10061_vm2, %v2403_v50  ;;  %v1378_v56 = vsub.f32 1.0, %v1377_v22  ;;  %vm7258_vm2 = vmand %vm7241_vm3, %vm1702_vm8  ;;  %v1032_v13 = vmul.f32 %v5783_v27, %v7222_v42  ;;  %v7267_v50 = vperm.slane %v7252_v39, 0  ;;  %v1042_v33 = vand.u32 2147483648, %v7222_v42 }
 0x164   : > { %1972 = vst.msk [vmem:[#allocation2 + $0xa8] sm:$0xff] %vm10065_vm12, %v1923_v5  ;;  %v1424_v32 = vmul.f32 %v5777_v25, %v1423_v18  ;;  %5784 = vrcp.f32 %v7245_v41  ;;  %vm1381_vm12 = vweird.f32 %v7201_v8  ;;  %vm10072_vm10 = vmmov %vm10071_vm0  ;;  %v2285_v18 = vld [vmem:[#allocation3 + $0x30] sm:$0xff]  ;;  %v1222_v16 = vand.u32 2147483648, %v7245_v41 }
 0x165   : > { %v1379_v52 = vmul.f32 %v7224_v19, %v1378_v56  ;;  %v1033_v31 = vsub.f32 1.0, %v1032_v13  ;;  %vm1383_vm9 = vmor %vm1381_vm12, %vm1382_vm13  ;;  %v1043_v56 = vor.u32 1.1754944e-38, %v1042_v33  ;;  %v2038_v13 = vld [vmem:[#allocation3 + $0x18] sm:$0xff]  ;;  %v2291_v33 = vld [vmem:[#allocation3 + $0x60] sm:$0xff] }
 0x166   : > { %v1425_v61 = vadd.f32 %v5777_v25, %v1424_v32  ;;  %v1040_v32 = vand.u32 2147483647, %v7222_v42 }
 0x168   : > { %v1429_v60 = vsel %vm1428_vm15, %v5777_v25, %v1425_v61  ;;  %v1380_v25 = vadd.f32 %v7224_v19, %v1379_v52  ;;  %v1034_v61 = vmul.f32 %v5783_v27, %v1033_v31  ;;  %vm1037_vm15 = vweird.f32 %v5783_v27  ;;  %v2049_v31 = vld [vmem:[#allocation3 + $0x70] sm:$0xff] }
 0x169   : > { %v2021_v21 = vld [vmem:[#allocation2 + $0x41] sm:$0xff]  ;;  %v1434_v49 = vsel %vm1431_vm4, %v1433_v47, %v1429_v60  ;;  %vm10073_vm4 = vmmov %vm10071_vm0  ;;  %vm1041_vm13 = vcmp.eq.f32.partialorder %v1040_v32, 8.507059e+37 }
 0x16a   : > { %v2451_v58 = vld [vmem:[#allocation3 + $0x50] sm:$0xff]  ;;  %v2054_v55 = vmul.f32 %v6606_v10, %v2021_v21  ;;  %v2296_v46 = vmul.f32 %v6886_v44, %v2021_v21  ;;  %v1637_v37 = vmul.f32 %v1434_v49, %v7158_v9  ;;  %v656_v9 = vpop.f32.mrf.mxu2  ;;  %v7282_v5 = vpop.eup %5784  ;;  %v1384_v53 = vsel %vm1383_vm9, %v7224_v19, %v1380_v25  ;;  %vm1768_vm9 = vmand %vm7001_vm11, %vm1756_vm14 }
 0x16b   : > { %v2484_v28 = vadd.f32 %v2468_v7, %v2451_v58  ;;  %v2027_v43 = vld [vmem:[#allocation2 + $0xa1] sm:$0xff]  ;;  %v1212_v8 = vmul.f32 %v7282_v5, %v7245_v41  ;;  %v1035_v47 = vadd.f32 %v5783_v27, %v1034_v61  ;;  %v666_v60 = vpop.f32.mrf.mxu3  ;;  %v7306_v49 = vadd.f32 %v7055_v14, %v7247_v57 }
 0x16c   : > { %v2070_v4 = vadd.f32 %v2054_v55, %v2037_v29  ;;  %v2312_v63 = vadd.f32 %v2296_v46, %v2279_v54  ;;  %v1938_v12 = vsel %vm7258_vm2, %v1637_v37, 0.0  ;;  %v2060_v30 = vmul.f32 %v6606_v10, %v2027_v43  ;;  %v2527_v7 = vld [vmem:[#allocation3 + $0x20] sm:$0xff] }
 0x16d   : > { %2500 = vst.msk [vmem:[#allocation3 + $0x50] sm:$0xff] %vm10066_vm7, %v2484_v28  ;;  %v2302_v23 = vmul.f32 %v6886_v44, %v2027_v43  ;;  %v2544_v26 = vmul.f32 %v7267_v50, %v2027_v43  ;;  %vm1386_vm7 = vcmp.eq.f32.partialorder %v1385_v20, 8.507059e+37  ;;  %vm1036_vm2 = vweird.f32 %v7222_v42  ;;  %v2102_v9 = vld [vmem:[#allocation2 + $0x42] sm:$0xff] }
 0x16e   : > { %2086 = vst.msk [vmem:[#allocation3 + $0x10] sm:$0xff] %vm10064_vm6, %v2070_v4  ;;  %v2076_v22 = vadd.f32 %v2060_v30, %v2043_v15  ;;  %v1389_v28 = vsel %vm1386_vm7, %v1388_v11, %v1384_v53  ;;  %vm10074_vm6 = vmmov %vm10071_vm0  ;;  %v1213_v42 = vsub.f32 1.0, %v1212_v8  ;;  %v5529_v3 = vmul.f32 -1.442695, %v7306_v49  ;;  %v2280_v30 = vld [vmem:[#allocation3 + $0x8] sm:$0xff] }
 0x16f   : > { %2328 = vst.msk [vmem:[#allocation3] sm:$0xff] %vm10071_vm0, %v2312_v63  ;;  %v2318_v58 = vadd.f32 %v2302_v23, %v2285_v18  ;;  %v2560_v21 = vadd.f32 %v2544_v26, %v2527_v7  ;;  %v1634_v55 = vmul.f32 %v1389_v28, %v7161_v59  ;;  %vm1038_vm12 = vmor %vm1036_vm2, %vm1037_vm15  ;;  %vm1216_vm15 = vweird.f32 %v7245_v41 }
 0x170   : > { %1987 = vst.msk [vmem:[#allocation2 + $0x120] sm:$0xff] %vm10072_vm10, %v1938_v12  ;;  %vm10075_vm10 = vmmov %vm10071_vm0  ;;  %v1039_v59 = vsel %vm1038_vm12, %v5783_v27, %v1035_v47  ;;  %v1214_v27 = vmul.f32 %v7282_v5, %v1213_v42  ;;  %v1220_v57 = vand.u32 2147483647, %v7245_v41  ;;  %v7325_v43 = vadd.f32 %v7055_v14, %v664_v36 }
 0x171   : > { %2092 = vst.msk [vmem:[#allocation3 + $0x40] sm:$0xff] %vm10073_vm4, %v2076_v22  ;;  %v1935_v19 = vsel %vm7148_vm5, %v1634_v55, 0.0  ;;  %v1044_v29 = vsel %vm1041_vm13, %v1043_v56, %v1039_v59  ;;  %vm10076_vm7 = vmmov %vm10071_vm0  ;;  %vm1217_vm4 = vweird.f32 %v7282_v5  ;;  %v1223_v12 = vor.u32 1.1754944e-38, %v1222_v16  ;;  %v2108_v55 = vld [vmem:[#allocation2 + $0xa2] sm:$0xff] }
 0x172   : > { %2334 = vst.msk [vmem:[#allocation3 + $0x30] sm:$0xff] %vm10074_vm6, %v2318_v58  ;;  %v1611_v46 = vmul.f32 %v1044_v29, %v7195_v34  ;;  %v7316_v34 = vadd.f32 %v7055_v14, %v7236_v6  ;;  %v1215_v4 = vadd.f32 %v7282_v5, %v1214_v27  ;;  %vm7320_vm11 = vmor %vm1216_vm15, %vm1217_vm4  ;;  %5786 = vpow2.f32 %v5529_v3  ;;  %v2528_v58 = vld [vmem:[#allocation3 + $0x28] sm:$0xff] }
 0x173   : > { %2576 = vst.msk [vmem:[#allocation3 + $0x20] sm:$0xff] %vm10071_vm0, %v2560_v21  ;;  %vm1221_vm2 = vcmp.eq.f32.partialorder %v1220_v57, 8.507059e+37  ;;  %v5530_v23 = vmul.f32 -1.442695, %v7325_v43  ;;  %v2135_v7 = vmul.f32 %v6626_v40, %v2102_v9  ;;  %vm10079_vm6 = vmmov %vm10071_vm0  ;;  %v2377_v36 = vmul.f32 %v6989_v35, %v2102_v9 }
 0x174   : > { %1984 = vst.msk [vmem:[#allocation2 + $0x108] sm:$0xff] %vm10075_vm10, %v1935_v19  ;;  %v1912_v54 = vsel %vm1768_vm9, %v1611_v46, 0.0  ;;  %v5526_v6 = vmul.f32 -1.442695, %v7316_v34  ;;  %v1219_v51 = vsel %vm7320_vm11, %v7282_v5, %v1215_v4  ;;  %vm10080_vm12 = vmmov %vm10071_vm0  ;;  %v2533_v19 = vld [vmem:[#allocation3 + $0x50] sm:$0xff]  ;;  %v7362_v42 = vperm.slane %v7252_v39, 1 }
 0x175   : > { %1961 = vst.msk [vmem:[#allocation2 + $0x50] sm:$0xff] %vm10076_vm7, %v1912_v54  ;;  %v2118_v18 = vld [vmem:[#allocation3 + $0x10] sm:$0xff]  ;;  %v1224_v32 = vsel %vm1221_vm2, %v1223_v12, %v1219_v51  ;;  %vm7348_vm0 = vmand %vm7120_vm1, %vm1756_vm14  ;;  %v2141_v60 = vmul.f32 %v6626_v40, %v2108_v55  ;;  %v2383_v3 = vmul.f32 %v6989_v35, %v2108_v55 }
 0x176   : > { %5788 = vpow2.f32 %v5526_v6  ;;  %v2360_v53 = vld [vmem:[#allocation3] sm:$0xff]  ;;  %v1623_v28 = vmul.f32 %v1224_v32, %v7205_v62  ;;  %v2151_v61 = vadd.f32 %v2135_v7, %v2118_v18  ;;  %vm10083_vm1 = vmmov %vm10079_vm6  ;;  %v2625_v4 = vmul.f32 %v7362_v42, %v2108_v55  ;;  %v2286_v32 = vld [vmem:[#allocation3 + $0x38] sm:$0xff] }
 0x177   : > { %5790 = vpow2.f32 %v5530_v23  ;;  %v2393_v56 = vadd.f32 %v2377_v36, %v2360_v53  ;;  %vm10084_vm10 = vmmov %vm10083_vm1 }
 0x178   : > { %v5787_v5 = vpop.eup %5786  ;;  %v1924_v2 = vsel %vm7348_vm0, %v1623_v28, 0.0  ;;  %v2124_v62 = vld [vmem:[#allocation3 + $0x40] sm:$0xff]  ;;  %vm10085_vm13 = vmmov %vm10083_vm1  ;;  %v7402_v28 = vld [vmem:[#allocation2 + $0x69] sm:$0xff] }
 0x179   : > { %v7358_v59 = vadd.f32 1.0, %v5787_v5  ;;  %1973 = vst.msk [vmem:[#allocation2 + $0xb0] sm:$0xff] %vm10084_vm10, %v1924_v2  ;;  %v2366_v27 = vld [vmem:[#allocation3 + $0x30] sm:$0xff]  ;;  %vm10086_vm9 = vmmov %vm10083_vm1  ;;  %v2157_v6 = vadd.f32 %v2141_v60, %v2124_v62 }
 0x17a   : > { %2167 = vst.msk [vmem:[#allocation3 + $0x10] sm:$0xff] %vm10085_vm13, %v2151_v61  ;;  %vm10087_vm7 = vmmov %vm10083_vm1  ;;  %v2399_v51 = vadd.f32 %v2383_v3, %v2366_v27  ;;  %v7410_v61 = vmul.f32 %v7402_v28, %v7267_v50 }
 0x17b   : > { %v2033_v37 = vld [vmem:[#allocation2 + $0x101] sm:$0xff]  ;;  %5792 = vrcp.f32 %v7358_v59  ;;  %2409 = vst.msk [vmem:[#allocation3] sm:$0xff] %vm10087_vm7, %v2393_v56  ;;  %vm10088_vm15 = vmmov %vm10083_vm1  ;;  %v1447_v36 = vand.u32 2147483648, %v7358_v59  ;;  %vm1441_vm13 = vweird.f32 %v7358_v59 }
 0x17c   : > { %v7327_v63 = vld [vmem:[#allocation2 + $0x49] sm:$0xff]  ;;  %v2066_v26 = vmul.f32 %v6606_v10, %v2033_v37  ;;  %v2308_v11 = vmul.f32 %v6886_v44, %v2033_v37  ;;  %v2550_v22 = vmul.f32 %v7267_v50, %v2033_v37  ;;  %v5789_v29 = vpop.eup %5788  ;;  %v2608_v37 = vld [vmem:[#allocation3 + $0x20] sm:$0xff]  ;;  %vm10089_vm4 = vmmov %vm10083_vm1 }
 0x17d   : > { %v2055_v20 = vmul.f32 %v6606_v10, %v7327_v63  ;;  %v2297_v41 = vmul.f32 %v6886_v44, %v7327_v63  ;;  %v7354_v8 = vld [vmem:[#allocation2 + $0x4a] sm:$0xff]  ;;  %v5791_v16 = vpop.eup %5790  ;;  %v2641_v9 = vadd.f32 %v2625_v4, %v2608_v37  ;;  %vm10090_vm11 = vmmov %vm10083_vm1  ;;  %v2114_v5 = vld [vmem:[#allocation2 + $0x102] sm:$0xff]  ;;  %v1448_v37 = vor.u32 1.1754944e-38, %v1447_v36 }
 0x17e   : > { %v2082_v21 = vadd.f32 %v2066_v26, %v2049_v31  ;;  %v2324_v47 = vadd.f32 %v2308_v11, %v2291_v33  ;;  %v2566_v46 = vadd.f32 %v2550_v22, %v2533_v19  ;;  %v2136_v54 = vmul.f32 %v6626_v40, %v7354_v8  ;;  %vm10091_vm2 = vmmov %vm10083_vm1  ;;  %v2183_v11 = vld [vmem:[#allocation2 + $0x43] sm:$0xff] }
 0x17f   : > { %v2071_v25 = vadd.f32 %v2055_v20, %v2038_v13  ;;  %v2313_v15 = vadd.f32 %v2297_v41, %v2280_v30  ;;  %v2378_v52 = vmul.f32 %v6989_v35, %v7354_v8  ;;  %v7376_v20 = vadd.f32 1.0, %v5789_v29  ;;  %2173 = vst.msk [vmem:[#allocation3 + $0x40] sm:$0xff] %vm10091_vm2, %v2157_v6  ;;  %vm10094_vm0 = vmmov %vm10083_vm1 }
 0x180   : > { %2098 = vst.msk [vmem:[#allocation3 + $0x70] sm:$0xff] %vm10083_vm1, %v2082_v21  ;;  %v7380_v30 = vadd.f32 1.0, %v5791_v16  ;;  %v7383_v23 = vld [vmem:[#allocation2 + $0xa9] sm:$0xff]  ;;  %v1445_v33 = vand.u32 2147483647, %v7358_v59  ;;  %v7406_v21 = vmul.f32 %v7402_v28, %v6886_v44  ;;  %v7415_v19 = vmul.f32 %v6655_v17, %v2183_v11  ;;  %vm10096_vm10 = vmmov %vm10094_vm0 }
 0x181   : > { %2087 = vst.msk [vmem:[#allocation3 + $0x18] sm:$0xff] %vm10079_vm6, %v2071_v25  ;;  %v2044_v25 = vld [vmem:[#allocation3 + $0x48] sm:$0xff]  ;;  %5794 = vrcp.f32 %v7376_v20  ;;  %v2061_v26 = vmul.f32 %v6606_v10, %v7383_v23  ;;  %v2303_v31 = vmul.f32 %v6886_v44, %v7383_v23  ;;  %vm10092_vm6 = vmmov %vm10083_vm1  ;;  %v7394_v18 = vpop.eup %5792  ;;  %v2545_v7 = vmul.f32 %v7267_v50, %v7383_v23 }
 0x182   : > { %2329 = vst.msk [vmem:[#allocation3 + $0x8] sm:$0xff] %vm10080_vm12, %v2313_v15  ;;  %v7387_v15 = vld [vmem:[#allocation2 + $0x4b] sm:$0xff]  ;;  %vm10093_vm12 = vmmov %vm10083_vm1  ;;  %5796 = vrcp.f32 %v7380_v30  ;;  %v7418_v2 = vmul.f32 %v7048_v24, %v2183_v11  ;;  %v1437_v62 = vmul.f32 %v7394_v18, %v7358_v59  ;;  %v2147_v27 = vmul.f32 %v6626_v40, %v2114_v5 }
 0x183   : > { %2340 = vst.msk [vmem:[#allocation3 + $0x60] sm:$0xff] %vm10086_vm9, %v2324_v47  ;;  %v2077_v53 = vadd.f32 %v2061_v26, %v2044_v25  ;;  %v2319_v22 = vadd.f32 %v2303_v31, %v2286_v32  ;;  %v2217_v55 = vmul.f32 %v6655_v17, %v7387_v15  ;;  %v2561_v47 = vadd.f32 %v2545_v7, %v2528_v58  ;;  %vm10095_vm1 = vmmov %vm10094_vm0 }
 0x184   : > { %2582 = vst.msk [vmem:[#allocation3 + $0x50] sm:$0xff] %vm10088_vm15, %v2566_v46  ;;  %v2459_v29 = vmul.f32 %v7048_v24, %v7387_v15  ;;  %v2389_v16 = vmul.f32 %v6989_v35, %v2114_v5  ;;  %v2631_v3 = vmul.f32 %v7362_v42, %v2114_v5  ;;  %vm7435_vm9 = vcmp.eq.f32.partialorder %v1445_v33, 8.507059e+37  ;;  %vm10099_vm7 = vmmov %vm10094_vm0 }
 0x185   : > { %2415 = vst.msk [vmem:[#allocation3 + $0x30] sm:$0xff] %vm10092_vm6, %v2399_v51  ;;  %vm1396_vm15 = vweird.f32 %v7376_v20  ;;  %v1402_v6 = vand.u32 2147483648, %v7376_v20  ;;  %v1438_v51 = vsub.f32 1.0, %v1437_v62  ;;  %vm1456_vm2 = vweird.f32 %v7380_v30 }
 0x186   : > { %2657 = vst.msk [vmem:[#allocation3 + $0x20] sm:$0xff] %vm10093_vm12, %v2641_v9 }
 0x187   : > { %2093 = vst.msk [vmem:[#allocation3 + $0x48] sm:$0xff] %vm10094_vm0, %v2077_v53  ;;  %v7425_v46 = vpop.eup %5794  ;;  %v2130_v25 = vld [vmem:[#allocation3 + $0x70] sm:$0xff]  ;;  %v1439_v53 = vmul.f32 %v7394_v18, %v1438_v51 }
 0x188   : > { %v2119_v57 = vld [vmem:[#allocation3 + $0x18] sm:$0xff]  ;;  %2335 = vst.msk [vmem:[#allocation3 + $0x38] sm:$0xff] %vm10095_vm1, %v2319_v22  ;;  %v1392_v9 = vmul.f32 %v7425_v46, %v7376_v20  ;;  %v2163_v32 = vadd.f32 %v2147_v27, %v2130_v25  ;;  %vm1397_vm6 = vweird.f32 %v7425_v46  ;;  %v2199_v27 = vld [vmem:[#allocation3 + $0x10] sm:$0xff] }
 0x189   : > { %v2152_v13 = vadd.f32 %v2136_v54, %v2119_v57  ;;  %v2361_v12 = vld [vmem:[#allocation3 + $0x8] sm:$0xff]  ;;  %2577 = vst.msk [vmem:[#allocation3 + $0x28] sm:$0xff] %vm10096_vm10, %v2561_v47  ;;  %vm10103_vm10 = vmmov %vm10095_vm1 }
 0x18a   : > { %v2394_v41 = vadd.f32 %v2378_v52, %v2361_v12  ;;  %v7431_v57 = vld [vmem:[#allocation2 + $0xaa] sm:$0xff]  ;;  %v1400_v12 = vand.u32 2147483647, %v7376_v20  ;;  %v2372_v26 = vld [vmem:[#allocation3 + $0x60] sm:$0xff]  ;;  %v1393_v22 = vsub.f32 1.0, %v1392_v9  ;;  %2179 = vst.msk [vmem:[#allocation3 + $0x70] sm:$0xff] %vm10095_vm1, %v2163_v32 }
 0x18b   : > { %2168 = vst.msk [vmem:[#allocation3 + $0x18] sm:$0xff] %vm10089_vm4, %v2152_v13  ;;  %v7439_v13 = vpop.eup %5796  ;;  %vm10100_vm4 = vmmov %vm10094_vm0  ;;  %v2614_v31 = vld [vmem:[#allocation3 + $0x50] sm:$0xff]  ;;  %v2142_v11 = vmul.f32 %v6626_v40, %v7431_v57  ;;  %v2405_v7 = vadd.f32 %v2389_v16, %v2372_v26  ;;  %v2384_v36 = vmul.f32 %v6989_v35, %v7431_v57  ;;  %v1403_v9 = vor.u32 1.1754944e-38, %v1402_v6 }
 0x18c   : > { %2410 = vst.msk [vmem:[#allocation3 + $0x8] sm:$0xff] %vm10090_vm11, %v2394_v41  ;;  %v1460_v41 = vand.u32 2147483647, %v7380_v30  ;;  %vm1442_vm11 = vweird.f32 %v7394_v18  ;;  %v2647_v5 = vadd.f32 %v2631_v3, %v2614_v31  ;;  %v1452_v58 = vmul.f32 %v7439_v13, %v7380_v30  ;;  %v2447_v25 = vld [vmem:[#allocation3 + $0x30] sm:$0xff] }
 0x18d   : > { %vm7465_vm12 = vmor %vm1441_vm13, %vm1442_vm11  ;;  %vm1457_vm0 = vweird.f32 %v7439_v13  ;;  %2421 = vst.msk [vmem:[#allocation3 + $0x60] sm:$0xff] %vm10103_vm10, %v2405_v7  ;;  %v2441_v7 = vld [vmem:[#allocation3] sm:$0xff] }
 0x18e   : > { %v2125_v33 = vld [vmem:[#allocation3 + $0x48] sm:$0xff]  ;;  %v1453_v16 = vsub.f32 1.0, %v1452_v58  ;;  %vm7479_vm13 = vmor %vm1396_vm15, %vm1397_vm6 }
 0x18f   : > { %v2367_v62 = vld [vmem:[#allocation3 + $0x38] sm:$0xff]  ;;  %vm10110_vm11 = vmmov %vm10095_vm1 }
 0x190   : > { %v2400_v59 = vadd.f32 %v2384_v36, %v2367_v62  ;;  %v2609_v3 = vld [vmem:[#allocation3 + $0x28] sm:$0xff]  ;;  %2663 = vst.msk [vmem:[#allocation3 + $0x50] sm:$0xff] %vm10110_vm11, %v2647_v5  ;;  %vm10111_vm15 = vmmov %vm10095_vm1  ;;  %v2232_v5 = vadd.f32 %v7415_v19, %v2199_v27  ;;  %v2474_v36 = vadd.f32 %v7418_v2, %v2441_v7  ;;  %v2205_v27 = vld [vmem:[#allocation3 + $0x40] sm:$0xff] }
 0x191   : > { %vm7507_vm6 = vmor %vm1456_vm2, %vm1457_vm0  ;;  %v2189_v2 = vld [vmem:[#allocation2 + $0xa3] sm:$0xff] }
 0x192   : > { %v2200_v56 = vld [vmem:[#allocation3 + $0x18] sm:$0xff]  ;;  %2416 = vst.msk [vmem:[#allocation3 + $0x38] sm:$0xff] %vm10111_vm15, %v2400_v59  ;;  %vm7527_vm2 = vmand %vm7148_vm5, %vm1756_vm14 }
 0x193   : > { %v2233_v60 = vadd.f32 %v2217_v55, %v2200_v56  ;;  %v2442_v54 = vld [vmem:[#allocation3 + $0x8] sm:$0xff]  ;;  %v2626_v55 = vmul.f32 %v7362_v42, %v7431_v57  ;;  %v1462_v56 = vand.u32 2147483648, %v7380_v30  ;;  %vm10118_vm0 = vmmov %vm10095_vm1 }
 0x194   : > { %v2475_v4 = vadd.f32 %v2459_v29, %v2442_v54  ;;  %v2158_v29 = vadd.f32 %v2142_v11, %v2125_v33  ;;  %v1394_v54 = vmul.f32 %v7425_v46, %v1393_v22  ;;  %v1454_v11 = vmul.f32 %v7439_v13, %v1453_v16  ;;  %v669_v22 = vpop.f32.mrf.mxu3  ;;  %v7519_v30 = vld [vmem:[#allocation2 + $0xab] sm:$0xff]  ;;  %vm10119_vm5 = vmmov %vm10118_vm0 }
 0x195   : > { %2249 = vst.msk [vmem:[#allocation3 + $0x18] sm:$0xff] %vm10099_vm7, %v2233_v60  ;;  %v1440_v60 = vadd.f32 %v7394_v18, %v1439_v53  ;;  %vm7483_vm7 = vcmp.eq.f32.partialorder %v1400_v12, 8.507059e+37  ;;  %v2642_v31 = vadd.f32 %v2626_v55, %v2609_v3  ;;  %v1463_v53 = vor.u32 1.1754944e-38, %v1462_v56  ;;  %vm7549_vm10 = vmand %vm7241_vm3, %vm1756_vm14 }
 0x196   : > { %2491 = vst.msk [vmem:[#allocation3 + $0x8] sm:$0xff] %vm10100_vm4, %v2475_v4  ;;  %vm7487_vm4 = vcmp.eq.f32.partialorder %v1460_v41, 8.507059e+37  ;;  %v1395_v12 = vadd.f32 %v7425_v46, %v1394_v54  ;;  %v2465_v48 = vmul.f32 %v7048_v24, %v7519_v30  ;;  %v2222_v3 = vmul.f32 %v6655_v17, %v2189_v2  ;;  %v7576_v4 = vld [vmem:[#allocation2 + $0x103] sm:$0xff]  ;;  %vm10126_vm11 = vmmov %vm10118_vm0 }
 0x197   : > { %2174 = vst.msk [vmem:[#allocation3 + $0x48] sm:$0xff] %vm10095_vm1, %v2158_v29  ;;  %v1444_v20 = vsel %vm7465_vm12, %v7394_v18, %v1440_v60  ;;  %vm10114_vm12 = vmmov %vm10095_vm1 }
 0x198   : > { %v1449_v32 = vsel %vm7435_vm9, %v1448_v37, %v1444_v20  ;;  %2658 = vst.msk [vmem:[#allocation3 + $0x28] sm:$0xff] %vm10114_vm12, %v2642_v31  ;;  %v1399_v19 = vsel %vm7479_vm13, %v7425_v46, %v1395_v12  ;;  %v1455_v37 = vadd.f32 %v7439_v13, %v1454_v11  ;;  %vm10115_vm9 = vmmov %vm10095_vm1  ;;  %v2464_v31 = vmul.f32 %v7048_v24, %v2189_v2  ;;  %v2689_v11 = vld [vmem:[#allocation3 + $0x20] sm:$0xff] }
 0x199   : > { %v1638_v52 = vmul.f32 %v1449_v32, %v7306_v49  ;;  %v1404_v58 = vsel %vm7483_vm7, %v1403_v9, %v1399_v19  ;;  %v7532_v49 = vadd.f32 %v7055_v14, %v669_v22  ;;  %vm10122_vm13 = vmmov %vm10118_vm0  ;;  %v2448_v60 = vld [vmem:[#allocation3 + $0x38] sm:$0xff]  ;;  %v2238_v7 = vadd.f32 %v2222_v3, %v2205_v27 }
 0x19a   : > { %v1635_v33 = vmul.f32 %v1404_v58, %v7316_v34  ;;  %v1459_v0 = vsel %vm7507_vm6, %v7439_v13, %v1455_v37  ;;  %v7554_v34 = vperm.slane %v7252_v39, 2  ;;  %v2223_v13 = vmul.f32 %v6655_v17, %v7519_v30  ;;  %2248 = vst.msk [vmem:[#allocation3 + $0x10] sm:$0xff] %vm10122_vm13, %v2232_v5  ;;  %vm10124_vm7 = vmmov %vm10118_vm0  ;;  %v2211_v5 = vld [vmem:[#allocation3 + $0x70] sm:$0xff]  ;;  %v2050_v58 = vld [vmem:[#allocation3 + $0x78] sm:$0xff] }
 0x19b   : > { %v1939_v46 = vsel %vm7241_vm3, %v1638_v52, 0.0  ;;  %v1464_v55 = vsel %vm7487_vm4, %v1463_v53, %v1459_v0  ;;  %vm10123_vm3 = vmmov %vm10118_vm0  ;;  %v5532_v39 = vmul.f32 -1.442695, %v7532_v49  ;;  %2490 = vst.msk [vmem:[#allocation3] sm:$0xff] %vm10124_vm7, %v2474_v36  ;;  %v2481_v51 = vadd.f32 %v2465_v48, %v2448_v60  ;;  %v7593_v52 = vld [vmem:[%s9887_s4] sm:$0x1f] }
 0x19c   : > { %v2282_v26 = vld [vmem:[#allocation3 + $0x18] sm:$0xff]  ;;  %1988 = vst.msk [vmem:[#allocation2 + $0x128] sm:$0xff] %vm10119_vm5, %v1939_v46  ;;  %v1936_v47 = vsel %vm7527_vm2, %v1635_v33, 0.0  ;;  %v1639_v56 = vmul.f32 %v1464_v55, %v7325_v43  ;;  %v2707_v54 = vmul.f32 %v7554_v34, %v7519_v30  ;;  %v7571_v43 = vld [vmem:[#allocation2 + $0x6a] sm:$0xff]  ;;  %vm10125_vm4 = vmmov %vm10118_vm0  ;;  %v7585_v18 = vpop.f32.mrf.mxu3  ;;  %v2228_v22 = vmul.f32 %v6655_v17, %v7576_v4 }
 0x19d   : > { %v2315_v6 = vadd.f32 %v7406_v21, %v2282_v26  ;;  %v2524_v41 = vld [vmem:[#allocation3 + $0x8] sm:$0xff]  ;;  %1985 = vst.msk [vmem:[#allocation2 + $0x110] sm:$0xff] %vm10123_vm3, %v1936_v47  ;;  %v2380_v59 = vmul.f32 %v7571_v43, %v6989_v35  ;;  %v2622_v26 = vmul.f32 %v7571_v43, %v7362_v42  ;;  %vm10127_vm1 = vmmov %vm10118_vm0  ;;  %5798 = vpow2.f32 %v5532_v39 }
 0x19e   : > { %v2557_v21 = vadd.f32 %v7410_v61, %v2524_v41  ;;  %v2206_v29 = vld [vmem:[#allocation3 + $0x48] sm:$0xff]  ;;  %v1940_v16 = vsel %vm7549_vm10, %v1639_v56, 0.0  ;;  %2497 = vst.msk [vmem:[#allocation3 + $0x38] sm:$0xff] %vm10127_vm1, %v2481_v51  ;;  %vm10128_vm15 = vmmov %vm10118_vm0  ;;  %v2244_v61 = vadd.f32 %v2228_v22, %v2211_v5  ;;  %v7602_v36 = vperm.slane %v7593_v52, 0 }
 0x19f   : > { %2331 = vst.msk [vmem:[#allocation3 + $0x18] sm:$0xff] %vm10115_vm9, %v2315_v6  ;;  %v2239_v62 = vadd.f32 %v2223_v13, %v2206_v29  ;;  %v2690_v9 = vld [vmem:[#allocation3 + $0x28] sm:$0xff]  ;;  %v2706_v6 = vmul.f32 %v7554_v34, %v2189_v2  ;;  %vm10129_vm6 = vmmov %vm10118_vm0 }
 0x1a0   : > { %2573 = vst.msk [vmem:[#allocation3 + $0x8] sm:$0xff] %vm10118_vm0, %v2557_v21  ;;  %v2723_v12 = vadd.f32 %v2707_v54, %v2690_v9  ;;  %v2480_v21 = vadd.f32 %v2464_v31, %v2447_v25  ;;  %vm10130_vm12 = vmmov %vm10118_vm0  ;;  %v7597_v46 = vld [vmem:[#allocation2 + $0x48] sm:$0xff]  ;;  %v2453_v9 = vld [vmem:[#allocation3 + $0x60] sm:$0xff] }
 0x1a1   : > { %1989 = vst.msk [vmem:[#allocation2 + $0x130] sm:$0xff] %vm10125_vm4, %v1940_v16  ;;  %v2722_v19 = vadd.f32 %v2706_v6, %v2689_v11  ;;  %vm10131_vm9 = vmmov %vm10118_vm0  ;;  %v7604_v0 = vld [vmem:[#allocation2 + $0xc9] sm:$0xff]  ;;  %v2793_v48 = vmul.f32 %v7597_v46, %v7602_v36  ;;  %v2534_v11 = vld [vmem:[#allocation3 + $0x58] sm:$0xff] }
 0x1a2   : > { %2255 = vst.msk [vmem:[#allocation3 + $0x48] sm:$0xff] %vm10126_vm11, %v2239_v62  ;;  %v2305_v55 = vmul.f32 %v7604_v0, %v6886_v44  ;;  %vm10132_vm2 = vmmov %vm10118_vm0  ;;  %v2547_v2 = vmul.f32 %v7604_v0, %v7267_v50  ;;  %v7617_v62 = vld [vmem:[#allocation2 + $0x6b] sm:$0xff] }
 0x1a3   : > { %2739 = vst.msk [vmem:[#allocation3 + $0x28] sm:$0xff] %vm10128_vm15, %v2723_v12  ;;  %v5799_v14 = vpop.eup %5798  ;;  %vm10133_vm5 = vmmov %vm10118_vm0  ;;  %v2461_v60 = vmul.f32 %v7617_v62, %v7048_v24  ;;  %v2703_v16 = vmul.f32 %v7617_v62, %v7554_v34  ;;  %v2292_v51 = vld [vmem:[#allocation3 + $0x68] sm:$0xff]  ;;  %v2695_v6 = vld [vmem:[#allocation3 + $0x50] sm:$0xff] }
 0x1a4   : > { %v2034_v37 = vld [vmem:[#allocation2 + $0x109] sm:$0xff]  ;;  %2254 = vst.msk [vmem:[#allocation3 + $0x40] sm:$0xff] %vm10131_vm9, %v2238_v7  ;;  %vm10134_vm10 = vmmov %vm10118_vm0  ;;  %v7625_v25 = vadd.f32 1.0, %v5799_v14  ;;  %v2712_v7 = vmul.f32 %v7554_v34, %v7576_v4 }
 0x1a5   : > { %v2067_v33 = vmul.f32 %v6606_v10, %v2034_v37  ;;  %2496 = vst.msk [vmem:[#allocation3 + $0x30] sm:$0xff] %vm10132_vm2, %v2480_v21  ;;  %v2309_v10 = vmul.f32 %v6886_v44, %v2034_v37  ;;  %v2530_v29 = vld [vmem:[#allocation3 + $0x38] sm:$0xff]  ;;  %v2551_v39 = vmul.f32 %v7267_v50, %v2034_v37  ;;  %vm10135_vm13 = vmmov %vm10118_vm0  ;;  %v2115_v5 = vld [vmem:[#allocation2 + $0x10a] sm:$0xff]  ;;  %v7641_v37 = vperm.slane %v7593_v52, 1 }
 0x1a6   : > { %v2363_v20 = vld [vmem:[#allocation3 + $0x18] sm:$0xff]  ;;  %2738 = vst.msk [vmem:[#allocation3 + $0x20] sm:$0xff] %vm10118_vm0, %v2722_v19  ;;  %v2563_v54 = vadd.f32 %v2547_v2, %v2530_v29  ;;  %vm10136_vm3 = vmmov %vm10118_vm0  ;;  %v2728_v21 = vadd.f32 %v2712_v7, %v2695_v6  ;;  %5800 = vrcp.f32 %v7625_v25  ;;  %v2148_v19 = vmul.f32 %v6626_v40, %v2115_v5  ;;  %v7672_v6 = vld [vmem:[#allocation2 + $0xcb] sm:$0xff] }
 0x1a7   : > { %v2396_v41 = vadd.f32 %v2380_v59, %v2363_v20  ;;  %v2605_v32 = vld [vmem:[#allocation3 + $0x8] sm:$0xff]  ;;  %v2083_v47 = vadd.f32 %v2067_v33, %v2050_v58  ;;  %2260 = vst.msk [vmem:[#allocation3 + $0x70] sm:$0xff] %vm10133_vm5, %v2244_v61  ;;  %v2470_v20 = vmul.f32 %v7048_v24, %v7576_v4  ;;  %v2325_v12 = vadd.f32 %v2309_v10, %v2292_v51  ;;  %vm10137_vm7 = vmmov %vm10118_vm0 }
 0x1a8   : > { %v2638_v53 = vadd.f32 %v2622_v26, %v2605_v32  ;;  %2579 = vst.msk [vmem:[#allocation3 + $0x38] sm:$0xff] %vm10136_vm3, %v2563_v54  ;;  %vm10138_vm4 = vmmov %vm10118_vm0  ;;  %v7643_v4 = vld [vmem:[#allocation2 + $0xca] sm:$0xff]  ;;  %v2874_v40 = vmul.f32 %v7641_v37, %v7327_v63  ;;  %v5893_v51 = vld [vmem:[#allocation2 + $0x61] sm:$0xff]  ;;  %vm1486_vm3 = vweird.f32 %v7625_v25 }
 0x1a9   : > { %2412 = vst.msk [vmem:[#allocation3 + $0x18] sm:$0xff] %vm10129_vm6, %v2396_v41  ;;  %v2288_v13 = vld [vmem:[#allocation3 + $0x48] sm:$0xff]  ;;  %v7630_v41 = vpop.f32.mrf.mxu3  ;;  %v2486_v22 = vadd.f32 %v2470_v20, %v2453_v9  ;;  %vm10139_vm11 = vmmov %vm10118_vm0  ;;  %v2386_v58 = vmul.f32 %v7643_v4, %v6989_v35  ;;  %v2298_v9 = vmul.f32 %v5893_v51, %v6886_v44  ;;  %v2390_v20 = vmul.f32 %v6989_v35, %v2115_v5 }
 0x1aa   : > { %2654 = vst.msk [vmem:[#allocation3 + $0x8] sm:$0xff] %vm10130_vm12, %v2638_v53  ;;  %v2321_v56 = vadd.f32 %v2305_v55, %v2288_v13  ;;  %v2776_v27 = vld [vmem:[#allocation3 + $0x28] sm:$0xff]  ;;  %v2567_v53 = vadd.f32 %v2551_v39, %v2534_v11  ;;  %vm10140_vm1 = vmmov %vm10118_vm0  ;;  %v2628_v55 = vmul.f32 %v7643_v4, %v7362_v42  ;;  %v2540_v11 = vmul.f32 %v5893_v51, %v7267_v50 }
 0x1ab   : > { %2099 = vst.msk [vmem:[#allocation3 + $0x78] sm:$0xff] %vm10134_vm10, %v2083_v47  ;;  %v2809_v3 = vadd.f32 %v2793_v48, %v2776_v27  ;;  %vm10141_vm15 = vmmov %vm10118_vm0  ;;  %v2756_v33 = vld [vmem:[#allocation2 + $0x8] sm:$0xff] }
 0x1ac   : > { %2337 = vst.msk [vmem:[#allocation3 + $0x48] sm:$0xff] %vm10135_vm13, %v2321_v56  ;;  %vm10142_vm6 = vmmov %vm10118_vm0  ;;  %v7654_v10 = vld [vmem:[#allocation2 + $0x89] sm:$0xff]  ;;  %v2789_v54 = vmul.f32 %v7602_v36, %v2756_v33 }
 0x1ad   : > { %2825 = vst.msk [vmem:[#allocation3 + $0x28] sm:$0xff] %vm10137_vm7, %v2809_v3  ;;  %vm10143_vm12 = vmmov %vm10118_vm0  ;;  %v2543_v56 = vmul.f32 %v7654_v10, %v7267_v50  ;;  %v7666_v3 = vperm.slane %v7593_v52, 2 }
 0x1ae   : > { %2341 = vst.msk [vmem:[#allocation3 + $0x68] sm:$0xff] %vm10140_vm1, %v2325_v12  ;;  %vm10144_vm9 = vmmov %vm10118_vm0  ;;  %v2523_v12 = vld [vmem:[#allocation3] sm:$0xff] }
 0x1af   : > { %2583 = vst.msk [vmem:[#allocation3 + $0x58] sm:$0xff] %vm10141_vm15, %v2567_v53  ;;  %v2611_v47 = vld [vmem:[#allocation3 + $0x38] sm:$0xff]  ;;  %vm10145_vm2 = vmmov %vm10118_vm0 }
 0x1b0   : > { %v2444_v59 = vld [vmem:[#allocation3 + $0x18] sm:$0xff]  ;;  %2502 = vst.msk [vmem:[#allocation3 + $0x60] sm:$0xff] %vm10142_vm6, %v2486_v22  ;;  %v2644_v29 = vadd.f32 %v2628_v55, %v2611_v47  ;;  %vm10146_vm5 = vmmov %vm10118_vm0  ;;  %v2632_v22 = vmul.f32 %v7362_v42, %v2115_v5  ;;  %v7692_v47 = vld [vmem:[#allocation2 + $0x8a] sm:$0xff] }
 0x1b1   : > { %v2477_v26 = vadd.f32 %v2461_v60, %v2444_v59  ;;  %v2686_v31 = vld [vmem:[#allocation3 + $0x8] sm:$0xff]  ;;  %2744 = vst.msk [vmem:[#allocation3 + $0x50] sm:$0xff] %vm10143_vm12, %v2728_v21  ;;  %v676_v39 = vpop.f32.mrf.mxu3  ;;  %v7659_v60 = vpop.eup %5800  ;;  %v2281_v59 = vld [vmem:[#allocation3 + $0x10] sm:$0xff]  ;;  %vm10147_vm10 = vmmov %vm10118_vm0 }
 0x1b2   : > { %v2719_v32 = vadd.f32 %v2703_v16, %v2686_v31  ;;  %v2131_v61 = vld [vmem:[#allocation3 + $0x78] sm:$0xff]  ;;  %v7663_v16 = vld [vmem:[#allocation2 + $0x10b] sm:$0xff]  ;;  %2660 = vst.msk [vmem:[#allocation3 + $0x38] sm:$0xff] %vm10118_vm0, %v2644_v29  ;;  %v1482_v33 = vmul.f32 %v7659_v60, %v7625_v25  ;;  %vm10148_vm13 = vmmov %vm10118_vm0  ;;  %vm1487_vm7 = vweird.f32 %v7659_v60 }
 0x1b3   : > { %2493 = vst.msk [vmem:[#allocation3 + $0x18] sm:$0xff] %vm10138_vm4, %v2477_v26  ;;  %v2369_v14 = vld [vmem:[#allocation3 + $0x48] sm:$0xff]  ;;  %v2164_v2 = vadd.f32 %v2148_v19, %v2131_v61  ;;  %v2229_v21 = vmul.f32 %v6655_v17, %v7663_v16  ;;  %v2314_v61 = vadd.f32 %v2298_v9, %v2281_v59  ;;  %vm10149_vm4 = vmmov %vm10118_vm0  ;;  %v1492_v17 = vand.u32 2147483648, %v7625_v25 }
 0x1b4   : > { %2735 = vst.msk [vmem:[#allocation3 + $0x8] sm:$0xff] %vm10139_vm11, %v2719_v32  ;;  %v2402_v13 = vadd.f32 %v2386_v58, %v2369_v14  ;;  %v2857_v48 = vld [vmem:[#allocation3 + $0x28] sm:$0xff]  ;;  %v2467_v32 = vmul.f32 %v7672_v6, %v7048_v24  ;;  %v2556_v14 = vadd.f32 %v2540_v11, %v2523_v12  ;;  %v1483_v5 = vsub.f32 1.0, %v1482_v33  ;;  %vm10150_vm11 = vmmov %vm10118_vm0 }
 0x1b5   : > { %2180 = vst.msk [vmem:[#allocation3 + $0x78] sm:$0xff] %vm10144_vm9, %v2164_v2  ;;  %v2890_v63 = vadd.f32 %v2874_v40, %v2857_v48  ;;  %v2373_v53 = vld [vmem:[#allocation3 + $0x68] sm:$0xff]  ;;  %v1490_v2 = vand.u32 2147483647, %v7625_v25  ;;  %v1659_v40 = vadd.s32 10, %v6338_v38  ;;  %vm10151_vm1 = vmmov %vm10118_vm0  ;;  %v2471_v33 = vmul.f32 %v7048_v24, %v7663_v16 }
 0x1b6   : > { %2418 = vst.msk [vmem:[#allocation3 + $0x48] sm:$0xff] %vm10145_vm2, %v2402_v13  ;;  %v2406_v19 = vadd.f32 %v2390_v20, %v2373_v53  ;;  %v2615_v58 = vld [vmem:[#allocation3 + $0x58] sm:$0xff]  ;;  %v2709_v13 = vmul.f32 %v7672_v6, %v7554_v34  ;;  %v5896_v48 = vld [vmem:[%s9921_s2] ss:$0 sm:$0xff]  ;;  %v1484_v9 = vmul.f32 %v7659_v60, %v1483_v5  ;;  %vm10152_vm6 = vmmov %vm10118_vm0  ;;  %v2878_v25 = vmul.f32 %v7654_v10, %v7641_v37 }
 0x1b7   : > { %2906 = vst.msk [vmem:[#allocation3 + $0x28] sm:$0xff] %vm10146_vm5, %v2890_v63  ;;  %v2648_v55 = vadd.f32 %v2632_v22, %v2615_v58  ;;  %v7701_v39 = vadd.f32 %v5896_v48, %v7585_v18  ;;  %v2955_v63 = vmul.f32 %v7666_v3, %v7354_v8  ;;  %vm1676_vm15 = vcmp.ge.s32.totalorder %v1659_v40, 2  ;;  %vm7715_vm12 = vmor %vm1486_vm3, %vm1487_vm7  ;;  %v7720_v11 = vld [vmem:[#allocation2 + $0x121] sm:$0xff]  ;;  %v7768_v18 = vld [vmem:[#allocation2 + $0xe9] sm:$0xff] }
 0x1b8   : > { %2422 = vst.msk [vmem:[#allocation3 + $0x68] sm:$0xff] %vm10149_vm4, %v2406_v19  ;;  %v1493_v8 = vor.u32 1.1754944e-38, %v1492_v17  ;;  %vm1688_vm9 = vcmp.lt.s32.totalorder %v1659_v40, 18  ;;  %vm10155_vm2 = vmmov %vm10118_vm0  ;;  %vm7724_vm0 = vcmp.eq.f32.partialorder %v1490_v2, 8.507059e+37  ;;  %v2713_v17 = vmul.f32 %v7554_v34, %v7663_v16 }
 0x1b9   : > { %2664 = vst.msk [vmem:[#allocation3 + $0x58] sm:$0xff] %vm10150_vm11, %v2648_v55  ;;  %vm7728_vm5 = vmand %vm1676_vm15, %vm1688_vm9  ;;  %v2552_v40 = vmul.f32 %v7267_v50, %v7720_v11 }
 0x1ba   : > { %v2526_v27 = vld [vmem:[#allocation3 + $0x18] sm:$0xff]  ;;  %2330 = vst.msk [vmem:[#allocation3 + $0x10] sm:$0xff] %vm10151_vm1, %v2314_v61  ;;  %vm10162_vm3 = vmmov %vm10151_vm1 }
 0x1bb   : > { %v2559_v26 = vadd.f32 %v2543_v56, %v2526_v27  ;;  %v2772_v31 = vld [vmem:[#allocation3 + $0x8] sm:$0xff]  ;;  %v2624_v56 = vmul.f32 %v7692_v47, %v7362_v42  ;;  %2572 = vst.msk [vmem:[#allocation3] sm:$0xff] %vm10152_vm6, %v2556_v14  ;;  %v2535_v14 = vld [vmem:[#allocation3 + $0x60] sm:$0xff]  ;;  %vm7752_vm7 = vmand %vm7728_vm5, %vm1702_vm8 }
 0x1bc   : > { %v2805_v7 = vadd.f32 %v2789_v54, %v2772_v31  ;;  %v2212_v29 = vld [vmem:[#allocation3 + $0x78] sm:$0xff]  ;;  %v7704_v54 = vadd.f32 %v5896_v48, %v7630_v41  ;;  %v2837_v27 = vld [vmem:[#allocation2 + $0x9] sm:$0xff]  ;;  %v5533_v41 = vmul.f32 -1.442695, %v7701_v39  ;;  %vm10165_vm4 = vmmov %vm10151_vm1 }
 0x1bd   : > { %2575 = vst.msk [vmem:[#allocation3 + $0x18] sm:$0xff] %vm10147_vm10, %v2559_v26  ;;  %v2450_v59 = vld [vmem:[#allocation3 + $0x48] sm:$0xff]  ;;  %v2245_v51 = vadd.f32 %v2229_v21, %v2212_v29  ;;  %v2692_v31 = vld [vmem:[#allocation3 + $0x38] sm:$0xff]  ;;  %v2870_v22 = vmul.f32 %v7641_v37, %v2837_v27  ;;  %vm10160_vm10 = vmmov %vm10151_vm1 }
 0x1be   : > { %2821 = vst.msk [vmem:[#allocation3 + $0x8] sm:$0xff] %vm10148_vm13, %v2805_v7  ;;  %v2483_v26 = vadd.f32 %v2467_v32, %v2450_v59  ;;  %v2725_v20 = vadd.f32 %v2709_v13, %v2692_v31  ;;  %v2938_v12 = vld [vmem:[#allocation3 + $0x28] sm:$0xff]  ;;  %v1485_v32 = vadd.f32 %v7659_v60, %v1484_v9  ;;  %v5534_v53 = vmul.f32 -1.442695, %v7704_v54  ;;  %vm10161_vm13 = vmmov %vm10151_vm1 }
 0x1bf   : > { %2261 = vst.msk [vmem:[#allocation3 + $0x78] sm:$0xff] %vm10155_vm2, %v2245_v51  ;;  %v2971_v19 = vadd.f32 %v2955_v63, %v2938_v12  ;;  %5802 = vpow2.f32 %v5533_v41  ;;  %v2454_v2 = vld [vmem:[#allocation3 + $0x68] sm:$0xff]  ;;  %vm10166_vm11 = vmmov %vm10151_vm1  ;;  %v2568_v59 = vadd.f32 %v2552_v40, %v2535_v14  ;;  %v7766_v31 = vperm.slane %v7593_v52, 3  ;;  %v2287_v40 = vld [vmem:[#allocation3 + $0x40] sm:$0xff] }
 0x1c0   : > { %2499 = vst.msk [vmem:[#allocation3 + $0x48] sm:$0xff] %vm10160_vm10, %v2483_v26  ;;  %v1489_v55 = vsel %vm7715_vm12, %v7659_v60, %v1485_v32  ;;  %5804 = vpow2.f32 %v5534_v53  ;;  %v2278_v13 = vld [vmem:[#allocation2 + $0x129] sm:$0xff]  ;;  %v2487_v29 = vadd.f32 %v2471_v33, %v2454_v2  ;;  %v2696_v48 = vld [vmem:[#allocation3 + $0x58] sm:$0xff]  ;;  %vm10167_vm15 = vmmov %vm10151_vm1 }
 0x1c1   : > { %2741 = vst.msk [vmem:[#allocation3 + $0x38] sm:$0xff] %vm10161_vm13, %v2725_v20  ;;  %v7759_v27 = vld [vmem:[#allocation2 + $0x68] sm:$0xff]  ;;  %v2729_v63 = vadd.f32 %v2713_v17, %v2696_v48  ;;  %v2311_v51 = vmul.f32 %v6886_v44, %v2278_v13  ;;  %vm10168_vm6 = vmmov %vm10151_vm1 }
 0x1c2   : > { %2987 = vst.msk [vmem:[#allocation3 + $0x28] sm:$0xff] %vm10162_vm3, %v2971_v19  ;;  %v2918_v20 = vld [vmem:[#allocation2 + $0xa] sm:$0xff]  ;;  %v2795_v32 = vmul.f32 %v7759_v27, %v7602_v36  ;;  %vm10169_vm12 = vmmov %vm10151_vm1 }
 0x1c3   : > { %2503 = vst.msk [vmem:[#allocation3 + $0x68] sm:$0xff] %vm10151_vm1, %v2487_v29  ;;  %vm10170_vm9 = vmmov %vm10151_vm1 }
 0x1c4   : > { %v2607_v21 = vld [vmem:[#allocation3 + $0x18] sm:$0xff]  ;;  %2745 = vst.msk [vmem:[#allocation3 + $0x58] sm:$0xff] %vm10167_vm15, %v2729_v63  ;;  %vm10171_vm2 = vmmov %vm10151_vm1  ;;  %v2553_v63 = vmul.f32 %v7267_v50, %v2278_v13 }
 0x1c5   : > { %v2640_v58 = vadd.f32 %v2624_v56, %v2607_v21  ;;  %v2853_v61 = vld [vmem:[#allocation3 + $0x8] sm:$0xff]  ;;  %v1494_v56 = vsel %vm7724_vm0, %v1493_v8, %v1489_v55  ;;  %v5803_v26 = vpop.eup %5802  ;;  %2584 = vst.msk [vmem:[#allocation3 + $0x60] sm:$0xff] %vm10169_vm12, %v2568_v59  ;;  %vm10172_vm0 = vmmov %vm10151_vm1 }
 0x1c6   : > { %v2886_v5 = vadd.f32 %v2870_v22, %v2853_v61  ;;  %v1641_v16 = vmul.f32 %v1494_v56, %v7532_v49  ;;  %v2549_v49 = vmul.f32 %v7768_v18, %v7267_v50  ;;  %v2294_v8 = vld [vmem:[#allocation3 + $0x78] sm:$0xff]  ;;  %v5805_v41 = vpop.eup %5804  ;;  %v7776_v53 = vadd.f32 1.0, %v5803_v26  ;;  %v7783_v61 = vld [vmem:[#allocation2 + $0x8b] sm:$0xff]  ;;  %v7793_v56 = vld [vmem:[#allocation2 + $0xc1] sm:$0xff] }
 0x1c7   : > { %2656 = vst.msk [vmem:[#allocation3 + $0x18] sm:$0xff] %vm10165_vm4, %v2640_v58  ;;  %v2532_v12 = vld [vmem:[#allocation3 + $0x48] sm:$0xff]  ;;  %v2327_v7 = vadd.f32 %v2311_v51, %v2294_v8  ;;  %v3036_v22 = vmul.f32 %v7766_v31, %v7387_v15  ;;  %v7781_v58 = vadd.f32 1.0, %v5805_v41  ;;  %v2705_v33 = vmul.f32 %v7783_v61, %v7554_v34  ;;  %vm10173_vm10 = vmmov %vm10172_vm0 }
 0x1c8   : > { %2902 = vst.msk [vmem:[#allocation3 + $0x8] sm:$0xff] %vm10166_vm11, %v2886_v5  ;;  %v1942_v9 = vsel %vm7752_vm7, %v1641_v16, 0.0  ;;  %v2565_v21 = vadd.f32 %v2549_v49, %v2532_v12  ;;  %v2778_v19 = vld [vmem:[#allocation3 + $0x38] sm:$0xff]  ;;  %v7787_v5 = vld [vmem:[#allocation2 + $0xa8] sm:$0xff]  ;;  %5806 = vrcp.f32 %v7776_v53  ;;  %v2951_v15 = vmul.f32 %v7666_v3, %v2918_v20  ;;  %vm10174_vm13 = vmmov %vm10172_vm0 }
 0x1c9   : > { %1991 = vst.msk [vmem:[#allocation2 + $0x140] sm:$0xff] %vm10168_vm6, %v1942_v9  ;;  %v2811_v55 = vadd.f32 %v2795_v32, %v2778_v19  ;;  %v3019_v14 = vld [vmem:[#allocation3 + $0x28] sm:$0xff]  ;;  %v2304_v60 = vmul.f32 %v7793_v56, %v6886_v44  ;;  %5808 = vrcp.f32 %v7781_v58  ;;  %v2799_v51 = vmul.f32 %v7787_v5, %v7602_v36  ;;  %vm10175_vm3 = vmmov %vm10172_vm0 }
 0x1ca   : > { %2343 = vst.msk [vmem:[#allocation3 + $0x78] sm:$0xff] %vm10170_vm9, %v2327_v7  ;;  %v3052_v17 = vadd.f32 %v3036_v22, %v3019_v14  ;;  %v7798_v16 = vld [vmem:[#allocation2 + $0x122] sm:$0xff]  ;;  %v2359_v9 = vld [vmem:[#allocation2 + $0x12a] sm:$0xff]  ;;  %vm10176_vm7 = vmmov %vm10172_vm0  ;;  %vm1501_vm6 = vweird.f32 %v7776_v53 }
 0x1cb   : > { %2581 = vst.msk [vmem:[#allocation3 + $0x48] sm:$0xff] %vm10171_vm2, %v2565_v21  ;;  %v2536_v26 = vld [vmem:[#allocation3 + $0x68] sm:$0xff]  ;;  %v2782_v49 = vld [vmem:[#allocation3 + $0x58] sm:$0xff]  ;;  %v2320_v41 = vadd.f32 %v2304_v60, %v2287_v40  ;;  %v2633_v13 = vmul.f32 %v7362_v42, %v7798_v16  ;;  %v2392_v7 = vmul.f32 %v6989_v35, %v2359_v9  ;;  %v7816_v21 = vperm.slane %v7593_v52, 4  ;;  %vm10177_vm4 = vmmov %vm10172_vm0 }
 0x1cc   : > { %2827 = vst.msk [vmem:[#allocation3 + $0x38] sm:$0xff] %vm10172_vm0, %v2811_v55  ;;  %v2569_v8 = vadd.f32 %v2553_v63, %v2536_v26  ;;  %v2815_v20 = vadd.f32 %v2799_v51, %v2782_v49  ;;  %v7811_v32 = vld [vmem:[#allocation2 + $0x4c] sm:$0xff]  ;;  %v2616_v22 = vld [vmem:[#allocation3 + $0x60] sm:$0xff]  ;;  %v2876_v52 = vmul.f32 %v7402_v28, %v7641_v37  ;;  %vm10178_vm11 = vmmov %vm10172_vm0 }
 0x1cd   : > { %3068 = vst.msk [vmem:[#allocation3 + $0x28] sm:$0xff] %vm10173_vm10, %v3052_v17  ;;  %v2999_v19 = vld [vmem:[#allocation2 + $0xb] sm:$0xff]  ;;  %v3117_v63 = vmul.f32 %v7816_v21, %v7811_v32  ;;  %vm10179_vm1 = vmmov %vm10172_vm0 }
 0x1ce   : > { %v2688_v2 = vld [vmem:[#allocation3 + $0x18] sm:$0xff]  ;;  %v7809_v12 = vpop.eup %5806  ;;  %2585 = vst.msk [vmem:[#allocation3 + $0x68] sm:$0xff] %vm10176_vm7, %v2569_v8  ;;  %v7820_v55 = vld [vmem:[#allocation2 + $0xea] sm:$0xff]  ;;  %v3032_v49 = vmul.f32 %v7766_v31, %v2999_v19  ;;  %vm10180_vm15 = vmmov %vm10172_vm0 }
 0x1cf   : > { %v2721_v29 = vadd.f32 %v2705_v33, %v2688_v2  ;;  %v2934_v48 = vld [vmem:[#allocation3 + $0x8] sm:$0xff]  ;;  %v2630_v14 = vmul.f32 %v7820_v55, %v7362_v42  ;;  %2831 = vst.msk [vmem:[#allocation3 + $0x58] sm:$0xff] %vm10177_vm4, %v2815_v20  ;;  %v2649_v2 = vadd.f32 %v2633_v13, %v2616_v22  ;;  %v1497_v17 = vmul.f32 %v7809_v12, %v7776_v53  ;;  %v7827_v40 = vpop.eup %5808  ;;  %vm10181_vm12 = vmmov %vm10172_vm0  ;;  %v2529_v22 = vld [vmem:[#allocation3 + $0x30] sm:$0xff] }
 0x1d0   : > { %v2967_v59 = vadd.f32 %v2951_v15, %v2934_v48  ;;  %v7818_v33 = vld [vmem:[#allocation2 + $0x28] sm:$0xff]  ;;  %2336 = vst.msk [vmem:[#allocation3 + $0x40] sm:$0xff] %vm10178_vm11, %v2320_v41  ;;  %vm1502_vm9 = vweird.f32 %v7809_v12  ;;  %v1512_v19 = vmul.f32 %v7827_v40, %v7781_v58  ;;  %vm10182_vm2 = vmmov %vm10172_vm0 }
 0x1d1   : > { %2737 = vst.msk [vmem:[#allocation3 + $0x18] sm:$0xff] %vm10174_vm13, %v2721_v29  ;;  %v2375_v15 = vld [vmem:[#allocation3 + $0x78] sm:$0xff]  ;;  %v2513_v48 = vld [vmem:[#allocation2 + $0xc1] sm:$0xff]  ;;  %v1498_v26 = vsub.f32 1.0, %v1497_v17  ;;  %v2791_v8 = vmul.f32 %v7602_v36, %v7818_v33  ;;  %vm10183_vm10 = vmmov %vm10172_vm0 }
 0x1d2   : > { %2983 = vst.msk [vmem:[#allocation3 + $0x8] sm:$0xff] %vm10175_vm3, %v2967_v59  ;;  %v2613_v60 = vld [vmem:[#allocation3 + $0x48] sm:$0xff]  ;;  %v2408_v29 = vadd.f32 %v2392_v7, %v2375_v15  ;;  %vm7866_vm13 = vmor %vm1501_vm6, %vm1502_vm9  ;;  %vm1516_vm9 = vweird.f32 %v7781_v58 }
 0x1d3   : > { %v2646_v59 = vadd.f32 %v2630_v14, %v2613_v60  ;;  %v2859_v51 = vld [vmem:[#allocation3 + $0x38] sm:$0xff]  ;;  %2665 = vst.msk [vmem:[#allocation3 + $0x60] sm:$0xff] %vm10179_vm1, %v2649_v2  ;;  %v1499_v14 = vmul.f32 %v7809_v12, %v1498_v26  ;;  %v7848_v15 = vld [vmem:[%s9887_s4 + $0x8] sm:$0x1f]  ;;  %v2546_v2 = vmul.f32 %v7267_v50, %v2513_v48  ;;  %vm10186_vm3 = vmmov %vm10172_vm0 }
 0x1d4   : > { %v2892_v20 = vadd.f32 %v2876_v52, %v2859_v51  ;;  %v3100_v13 = vld [vmem:[#allocation3 + $0x28] sm:$0xff]  ;;  %2424 = vst.msk [vmem:[#allocation3 + $0x78] sm:$0xff] %vm10180_vm15, %v2408_v29  ;;  %v2634_v29 = vmul.f32 %v7362_v42, %v2359_v9  ;;  %v2880_v51 = vmul.f32 %v7641_v37, %v7383_v23  ;;  %vm10187_vm7 = vmmov %vm10172_vm0 }
 0x1d5   : > { %2662 = vst.msk [vmem:[#allocation3 + $0x48] sm:$0xff] %vm10181_vm12, %v2646_v59  ;;  %v3133_v7 = vadd.f32 %v3117_v63, %v3100_v13  ;;  %v7852_v60 = vld [vmem:[#allocation2 + $0x123] sm:$0xff]  ;;  %v1507_v63 = vand.u32 2147483648, %v7776_v53  ;;  %v2440_v26 = vld [vmem:[#allocation2 + $0x12b] sm:$0xff]  ;;  %v1500_v48 = vadd.f32 %v7809_v12, %v1499_v14  ;;  %v2562_v45 = vadd.f32 %v2546_v2, %v2529_v22  ;;  %vm10189_vm4 = vmmov %vm10172_vm0 }
 0x1d6   : > { %2908 = vst.msk [vmem:[#allocation3 + $0x38] sm:$0xff] %vm10182_vm2, %v2892_v20  ;;  %v2617_v13 = vld [vmem:[#allocation3 + $0x68] sm:$0xff]  ;;  %v2863_v20 = vld [vmem:[#allocation3 + $0x58] sm:$0xff]  ;;  %v7874_v14 = vperm.slane %v7848_v15, 0  ;;  %v2473_v22 = vmul.f32 %v7048_v24, %v2440_v26  ;;  %vm10192_vm1 = vmmov %vm10172_vm0  ;;  %vm1517_vm2 = vweird.f32 %v7827_v40 }
 0x1d7   : > { %3149 = vst.msk [vmem:[#allocation3 + $0x28] sm:$0xff] %vm10172_vm0, %v3133_v7  ;;  %v2896_v23 = vadd.f32 %v2880_v51, %v2863_v20  ;;  %v1513_v7 = vsub.f32 1.0, %v1512_v19  ;;  %v1504_v19 = vsel %vm7866_vm13, %v7809_v12, %v1500_v48  ;;  %v2759_v20 = vld [vmem:[#allocation2 + $0x40] sm:$0xff]  ;;  %vm10193_vm15 = vmmov %vm10172_vm0 }
 0x1d8   : > { %v2774_v41 = vld [vmem:[#allocation3 + $0x18] sm:$0xff]  ;;  %2578 = vst.msk [vmem:[#allocation3 + $0x30] sm:$0xff] %vm10192_vm1, %v2562_v45  ;;  %vm10194_vm6 = vmmov %vm10172_vm0 }
 0x1d9   : > { %v2807_v17 = vadd.f32 %v2791_v8, %v2774_v41  ;;  %v3015_v52 = vld [vmem:[#allocation3 + $0x8] sm:$0xff]  ;;  %v1505_v8 = vand.u32 2147483647, %v7776_v53  ;;  %v2650_v41 = vadd.f32 %v2634_v29, %v2617_v13  ;;  %v1508_v53 = vor.u32 1.1754944e-38, %v1507_v63  ;;  %2912 = vst.msk [vmem:[#allocation3 + $0x58] sm:$0xff] %vm10189_vm4, %v2896_v23  ;;  %vm10195_vm12 = vmmov %vm10172_vm0 }
 0x1da   : > { %v3048_v59 = vadd.f32 %v3032_v49, %v3015_v52  ;;  %v2714_v49 = vmul.f32 %v7554_v34, %v7852_v60  ;;  %v2697_v2 = vld [vmem:[#allocation3 + $0x60] sm:$0xff]  ;;  %v7878_v52 = vld [vmem:[#allocation2 + $0xeb] sm:$0xff]  ;;  %v2957_v63 = vmul.f32 %v7571_v43, %v7666_v3  ;;  %v1514_v12 = vmul.f32 %v7827_v40, %v1513_v7  ;;  %vm10197_vm13 = vmmov %vm10172_vm0 }
 0x1db   : > { %2823 = vst.msk [vmem:[#allocation3 + $0x18] sm:$0xff] %vm10183_vm10, %v2807_v17  ;;  %v3080_v17 = vld [vmem:[#allocation2 + $0xc] sm:$0xff]  ;;  %v2711_v29 = vmul.f32 %v7878_v52, %v7554_v34  ;;  %vm7886_vm11 = vcmp.eq.f32.partialorder %v1505_v8, 8.507059e+37  ;;  %vm10196_vm10 = vmmov %vm10172_vm0 }
 0x1dc   : > { %3064 = vst.msk [vmem:[#allocation3 + $0x8] sm:$0xff] %vm10186_vm3, %v3048_v59  ;;  %v2456_v59 = vld [vmem:[#allocation3 + $0x78] sm:$0xff]  ;;  %v2730_v51 = vadd.f32 %v2714_v49, %v2697_v2  ;;  %v3198_v49 = vmul.f32 %v7759_v27, %v7874_v14  ;;  %v3113_v48 = vmul.f32 %v7816_v21, %v3080_v17  ;;  %v7898_v8 = vld [vmem:[#allocation2 + $0x29] sm:$0xff]  ;;  %v1509_v45 = vsel %vm7886_vm11, %v1508_v53, %v1504_v19  ;;  %v4380_v17 = vld [vmem:[#allocation2 + $0xc0] sm:$0xff] }
 0x1dd   : > { %2666 = vst.msk [vmem:[#allocation3 + $0x68] sm:$0xff] %vm10187_vm7, %v2650_v41  ;;  %v2694_v41 = vld [vmem:[#allocation3 + $0x48] sm:$0xff]  ;;  %v2489_v38 = vadd.f32 %v2473_v22, %v2456_v59  ;;  %v2940_v23 = vld [vmem:[#allocation3 + $0x38] sm:$0xff]  ;;  %v2872_v9 = vmul.f32 %v7898_v8, %v7641_v37  ;;  %v2792_v27 = vmul.f32 %v7602_v36, %v2759_v20  ;;  %v2775_v59 = vld [vmem:[#allocation3 + $0x20] sm:$0xff]  ;;  %v2715_v53 = vmul.f32 %v7554_v34, %v2440_v26 }
 0x1de   : > { %10188 = vst [vmem:[#allocation13_spill] sm:$0xff] %v7878_v52  ;;  %v2727_v52 = vadd.f32 %v2711_v29, %v2694_v41  ;;  %v2973_v2 = vadd.f32 %v2957_v63, %v2940_v23  ;;  %v3181_v22 = vld [vmem:[#allocation3 + $0x28] sm:$0xff]  ;;  %v1522_v19 = vand.u32 2147483648, %v7781_v58  ;;  %v1642_v41 = vmul.f32 %v1509_v45, %v7701_v39  ;;  %vm7925_vm3 = vmor %vm1516_vm9, %vm1517_vm2 }
 0x1df   : > { %2746 = vst.msk [vmem:[#allocation3 + $0x60] sm:$0xff] %vm10193_vm15, %v2730_v51  ;;  %v3214_v7 = vadd.f32 %v3198_v49, %v3181_v22  ;;  %v1515_v23 = vadd.f32 %v7827_v40, %v1514_v12  ;;  %v1520_v49 = vand.u32 2147483647, %v7781_v58  ;;  %vm10200_vm7 = vmmov %vm10172_vm0  ;;  %v7932_v12 = vperm.slane %v7848_v15, 1 }
 0x1e0   : > { %2505 = vst.msk [vmem:[#allocation3 + $0x78] sm:$0xff] %vm10194_vm6, %v2489_v38  ;;  %v2961_v38 = vmul.f32 %v7666_v3, %v7431_v57  ;;  %v2944_v57 = vld [vmem:[#allocation3 + $0x58] sm:$0xff]  ;;  %vm10201_vm4 = vmmov %vm10172_vm0  ;;  %v2310_v26 = vmul.f32 %v6886_v44, %v7720_v11  ;;  %v7974_v11 = vld [vmem:[#allocation2 + $0x6c] sm:$0xff] }
 0x1e1   : > { %2743 = vst.msk [vmem:[#allocation3 + $0x48] sm:$0xff] %vm10195_vm12, %v2727_v52  ;;  %v7914_v52 = vld [vmem:[#allocation2 + $0x88] sm:$0xff]  ;;  %vm10202_vm11 = vmmov %vm10172_vm0  ;;  %vm1521_vm1 = vcmp.eq.f32.partialorder %v1520_v49, 8.507059e+37 }
 0x1e2   : > { %v2855_v29 = vld [vmem:[#allocation3 + $0x18] sm:$0xff]  ;;  %2989 = vst.msk [vmem:[#allocation3 + $0x38] sm:$0xff] %vm10172_vm0, %v2973_v2  ;;  %v2808_v2 = vadd.f32 %v2792_v27, %v2775_v59  ;;  %v2977_v39 = vadd.f32 %v2961_v38, %v2944_v57  ;;  %v2797_v22 = vmul.f32 %v7914_v52, %v7602_v36  ;;  %v1523_v27 = vor.u32 1.1754944e-38, %v1522_v19  ;;  %vm10203_vm15 = vmmov %vm10172_vm0  ;;  %v7949_v19 = vld [vmem:[#allocation2 + $0x2a] sm:$0xff] }
 0x1e3   : > { %v2888_v51 = vadd.f32 %v2872_v9, %v2855_v29  ;;  %v3096_v63 = vld [vmem:[#allocation3 + $0x8] sm:$0xff]  ;;  %3230 = vst.msk [vmem:[#allocation3 + $0x28] sm:$0xff] %vm10196_vm10, %v3214_v7  ;;  %v1943_v29 = vsel %vm7728_vm5, %v1642_v41, 0.0  ;;  %v1519_v7 = vsel %vm7925_vm3, %v7827_v40, %v1515_v23  ;;  %v3038_v59 = vmul.f32 %v7617_v62, %v7766_v31  ;;  %vm10204_vm6 = vmmov %vm10172_vm0  ;;  %v2293_v57 = vld [vmem:[#allocation3 + $0x70] sm:$0xff] }
 0x1e4   : > { %v3129_v13 = vadd.f32 %v3113_v48, %v3096_v63  ;;  %v2698_v20 = vld [vmem:[#allocation3 + $0x68] sm:$0xff]  ;;  %v2800_v48 = vmul.f32 %v4380_v17, %v7602_v36  ;;  %2993 = vst.msk [vmem:[#allocation3 + $0x58] sm:$0xff] %vm10202_vm11, %v2977_v39  ;;  %v2953_v40 = vmul.f32 %v7949_v19, %v7666_v3  ;;  %vm10205_vm12 = vmmov %vm10172_vm0  ;;  %v1524_v41 = vsel %vm1521_vm1, %v1523_v27, %v1519_v7 }
 0x1e5   : > { %2904 = vst.msk [vmem:[#allocation3 + $0x18] sm:$0xff] %vm10197_vm13, %v2888_v51  ;;  %v2731_v9 = vadd.f32 %v2715_v53, %v2698_v20  ;;  %v3279_v51 = vmul.f32 %v7402_v28, %v7932_v12  ;;  %v2768_v53 = vld [vmem:[#allocation2 + $0xc8] sm:$0xff]  ;;  %v3194_v23 = vmul.f32 %v7874_v14, %v7818_v33  ;;  %vm10206_vm9 = vmmov %vm10172_vm0 }
 0x1e6   : > { %3145 = vst.msk [vmem:[#allocation3 + $0x8] sm:$0xff] %vm10200_vm7, %v3129_v13  ;;  %v2783_v45 = vld [vmem:[#allocation3 + $0x60] sm:$0xff]  ;;  %vm10207_vm2 = vmmov %vm10172_vm0 }
 0x1e7   : > { %2747 = vst.msk [vmem:[#allocation3 + $0x68] sm:$0xff] %vm10201_vm4, %v2731_v9  ;;  %v2816_v58 = vadd.f32 %v2800_v48, %v2783_v45  ;;  %v2801_v48 = vmul.f32 %v7602_v36, %v2768_v53  ;;  %v1643_v45 = vmul.f32 %v1524_v41, %v7704_v54  ;;  %vm10208_vm10 = vmmov %vm10172_vm0  ;;  %v7998_v41 = vld [vmem:[#allocation2 + $0xac] sm:$0xff]  ;;  %v5906_v44 = vld [vmem:[#allocation2 + $0xc2] sm:$0xff] }
 0x1e8   : > { %v2780_v17 = vld [vmem:[#allocation3 + $0x48] sm:$0xff]  ;;  %2824 = vst.msk [vmem:[#allocation3 + $0x20] sm:$0xff] %vm10203_vm15, %v2808_v2  ;;  %vm7970_vm13 = vmand %vm7728_vm5, %vm1756_vm14 }
 0x1e9   : > { %v2813_v63 = vadd.f32 %v2797_v22, %v2780_v17  ;;  %v3021_v38 = vld [vmem:[#allocation3 + $0x38] sm:$0xff]  ;;  %2832 = vst.msk [vmem:[#allocation3 + $0x60] sm:$0xff] %vm10204_vm6, %v2816_v58  ;;  %v3042_v22 = vmul.f32 %v7766_v31, %v7519_v30  ;;  %v2881_v30 = vmul.f32 %v7793_v56, %v7641_v37  ;;  %vm10211_vm3 = vmmov %vm10172_vm0  ;;  %v3119_v56 = vmul.f32 %v7816_v21, %v7974_v11 }
 0x1ea   : > { %v3054_v13 = vadd.f32 %v3038_v59, %v3021_v38  ;;  %v3262_v20 = vld [vmem:[#allocation3 + $0x28] sm:$0xff]  ;;  %1992 = vst.msk [vmem:[#allocation2 + $0x148] sm:$0xff] %vm10205_vm12, %v1943_v29  ;;  %v2326_v29 = vadd.f32 %v2310_v26, %v2293_v57  ;;  %vm10212_vm7 = vmmov %vm10172_vm0  ;;  %v7981_v59 = vperm.slane %v7848_v15, 2 }
 0x1eb   : > { %2829 = vst.msk [vmem:[#allocation3 + $0x48] sm:$0xff] %vm10206_vm9, %v2813_v63  ;;  %v3295_v28 = vadd.f32 %v3279_v51, %v3262_v20  ;;  %v3025_v27 = vld [vmem:[#allocation3 + $0x58] sm:$0xff]  ;;  %vm10213_vm5 = vmmov %vm10172_vm0  ;;  %v1944_v51 = vsel %vm7970_vm13, %v1643_v45, 0.0 }
 0x1ec   : > { %v2936_v49 = vld [vmem:[#allocation3 + $0x18] sm:$0xff]  ;;  %3070 = vst.msk [vmem:[#allocation3 + $0x38] sm:$0xff] %vm10207_vm2, %v3054_v13  ;;  %v3058_v54 = vadd.f32 %v3042_v22, %v3025_v27  ;;  %vm10214_vm4 = vmmov %vm10172_vm0  ;;  %v3360_v38 = vmul.f32 %v7571_v43, %v7981_v59  ;;  %v7994_v13 = vld [vmem:[#allocation2 + $0x2b] sm:$0xff] }
 0x1ed   : > { %v2969_v9 = vadd.f32 %v2953_v40, %v2936_v49  ;;  %v3177_v2 = vld [vmem:[#allocation3 + $0x8] sm:$0xff]  ;;  %3311 = vst.msk [vmem:[#allocation3 + $0x28] sm:$0xff] %vm10172_vm0, %v3295_v28  ;;  %vm10215_vm11 = vmmov %vm10172_vm0  ;;  %v3034_v20 = vmul.f32 %v7994_v13, %v7766_v31  ;;  %v3275_v28 = vmul.f32 %v7898_v8, %v7932_v12 }
 0x1ee   : > { %v3210_v39 = vadd.f32 %v3194_v23, %v3177_v2  ;;  %v2784_v33 = vld [vmem:[#allocation3 + $0x68] sm:$0xff]  ;;  %3074 = vst.msk [vmem:[#allocation3 + $0x58] sm:$0xff] %vm10213_vm5, %v3058_v54  ;;  %vm10216_vm1 = vmmov %vm10172_vm0 }
 0x1ef   : > { %2985 = vst.msk [vmem:[#allocation3 + $0x18] sm:$0xff] %vm10208_vm10, %v2969_v9  ;;  %v2817_v58 = vadd.f32 %v2801_v48, %v2784_v33  ;;  %vm10217_vm15 = vmmov %vm10172_vm0  ;;  %v2882_v9 = vmul.f32 %v7604_v0, %v7641_v37  ;;  %v2362_v33 = vld [vmem:[#allocation3 + $0x10] sm:$0xff]  ;;  %v5905_v8 = vld [vmem:[#allocation2 + $0x62] sm:$0xff] }
 0x1f0   : > { %3226 = vst.msk [vmem:[#allocation3 + $0x8] sm:$0xff] %vm10211_vm3, %v3210_v39  ;;  %v2864_v7 = vld [vmem:[#allocation3 + $0x60] sm:$0xff]  ;;  %vm10218_vm6 = vmmov %vm10172_vm0  ;;  %v3123_v39 = vmul.f32 %v7816_v21, %v7998_v41  ;;  %v2379_v45 = vmul.f32 %v5905_v8, %v6989_v35 }
 0x1f1   : > { %2833 = vst.msk [vmem:[#allocation3 + $0x68] sm:$0xff] %vm10212_vm7, %v2817_v58  ;;  %v2897_v17 = vadd.f32 %v2881_v30, %v2864_v7  ;;  %vm10219_vm12 = vmmov %vm10172_vm0  ;;  %v2391_v58 = vmul.f32 %v6989_v35, %v7798_v16  ;;  %v2962_v30 = vmul.f32 %v5906_v44, %v7666_v3  ;;  %v2959_v16 = vmul.f32 %v7692_v47, %v7666_v3 }
 0x1f2   : > { %v2861_v63 = vld [vmem:[#allocation3 + $0x48] sm:$0xff]  ;;  %2342 = vst.msk [vmem:[#allocation3 + $0x70] sm:$0xff] %vm10214_vm4, %v2326_v29  ;;  %vm10220_vm9 = vmmov %vm10172_vm0 }
 0x1f3   : > { %v2894_v53 = vadd.f32 %v2878_v25, %v2861_v63  ;;  %v3102_v40 = vld [vmem:[#allocation3 + $0x38] sm:$0xff]  ;;  %2913 = vst.msk [vmem:[#allocation3 + $0x60] sm:$0xff] %vm10215_vm11, %v2897_v17  ;;  %vm10221_vm2 = vmmov %vm10172_vm0  ;;  %v8020_v63 = vld [vmem:[#allocation2 + $0x2c] sm:$0xff] }
 0x1f4   : > { %v3135_v23 = vadd.f32 %v3119_v56, %v3102_v40  ;;  %v3343_v49 = vld [vmem:[#allocation3 + $0x28] sm:$0xff]  ;;  %1993 = vst.msk [vmem:[#allocation2 + $0x150] sm:$0xff] %vm10216_vm1, %v1944_v51  ;;  %v2395_v51 = vadd.f32 %v2379_v45, %v2362_v33  ;;  %v8018_v56 = vperm.slane %v7848_v15, 3  ;;  %vm10222_vm10 = vmmov %vm10172_vm0  ;;  %v3200_v40 = vmul.f32 %v7914_v52, %v7874_v14 }
 0x1f5   : > { %2910 = vst.msk [vmem:[#allocation3 + $0x48] sm:$0xff] %vm10217_vm15, %v2894_v53  ;;  %v3376_v43 = vadd.f32 %v3360_v38, %v3343_v49  ;;  %v3106_v27 = vld [vmem:[#allocation3 + $0x58] sm:$0xff]  ;;  %vm10223_vm13 = vmmov %vm10172_vm0 }
 0x1f6   : > { %v3017_v57 = vld [vmem:[#allocation3 + $0x18] sm:$0xff]  ;;  %3151 = vst.msk [vmem:[#allocation3 + $0x38] sm:$0xff] %vm10218_vm6, %v3135_v23  ;;  %v3139_v54 = vadd.f32 %v3123_v39, %v3106_v27  ;;  %vm10224_vm3 = vmmov %vm10172_vm0  ;;  %v2963_v39 = vmul.f32 %v7643_v4, %v7666_v3 }
 0x1f7   : > { %v3050_v2 = vadd.f32 %v3034_v20, %v3017_v57  ;;  %v3258_v26 = vld [vmem:[#allocation3 + $0x8] sm:$0xff]  ;;  %3392 = vst.msk [vmem:[#allocation3 + $0x28] sm:$0xff] %vm10219_vm12, %v3376_v43  ;;  %v3441_v20 = vmul.f32 %v7617_v62, %v8018_v56  ;;  %vm10225_vm7 = vmmov %vm10172_vm0 }
 0x1f8   : > { %v3291_v48 = vadd.f32 %v3275_v28, %v3258_v26  ;;  %v2865_v22 = vld [vmem:[#allocation3 + $0x68] sm:$0xff]  ;;  %3155 = vst.msk [vmem:[#allocation3 + $0x58] sm:$0xff] %vm10222_vm10, %v3139_v54  ;;  %v3115_v28 = vmul.f32 %v7816_v21, %v8020_v63  ;;  %vm10226_vm5 = vmmov %vm10172_vm0 }
 0x1f9   : > { %3066 = vst.msk [vmem:[#allocation3 + $0x18] sm:$0xff] %vm10220_vm9, %v3050_v2  ;;  %v2898_v29 = vadd.f32 %v2882_v9, %v2865_v22  ;;  %v2374_v7 = vld [vmem:[#allocation3 + $0x70] sm:$0xff]  ;;  %v8033_v9 = vld [vmem:[#allocation2 + $0xc8] sm:$0xff]  ;;  %v3356_v2 = vmul.f32 %v7949_v19, %v7981_v59  ;;  %vm10227_vm4 = vmmov %vm10172_vm0 }
 0x1fa   : > { %3307 = vst.msk [vmem:[#allocation3 + $0x8] sm:$0xff] %vm10221_vm2, %v3291_v48  ;;  %v2945_v25 = vld [vmem:[#allocation3 + $0x60] sm:$0xff]  ;;  %v2407_v17 = vadd.f32 %v2391_v58, %v2374_v7  ;;  %vm10228_vm11 = vmmov %vm10172_vm0  ;;  %v3204_v45 = vmul.f32 %v8033_v9, %v7874_v14  ;;  %v2538_v19 = vld [vmem:[#allocation3 + $0x78] sm:$0xff] }
 0x1fb   : > { %2914 = vst.msk [vmem:[#allocation3 + $0x68] sm:$0xff] %vm10172_vm0, %v2898_v29  ;;  %v2978_v38 = vadd.f32 %v2962_v30, %v2945_v25  ;;  %v2522_v48 = vld [vmem:[#allocation2 + $0x149] sm:$0xff]  ;;  %vm10229_vm1 = vmmov %vm10172_vm0  ;;  %v2472_v29 = vmul.f32 %v7048_v24, %v7852_v60  ;;  %v3040_v60 = vmul.f32 %v7783_v61, %v7766_v31 }
 0x1fc   : > { %v2942_v53 = vld [vmem:[#allocation3 + $0x48] sm:$0xff]  ;;  %2423 = vst.msk [vmem:[#allocation3 + $0x70] sm:$0xff] %vm10223_vm13, %v2407_v17  ;;  %v2555_v30 = vmul.f32 %v7267_v50, %v2522_v48  ;;  %vm10230_vm15 = vmmov %vm10172_vm0 }
 0x1fd   : > { %v2975_v23 = vadd.f32 %v2959_v16, %v2942_v53  ;;  %v3183_v49 = vld [vmem:[#allocation3 + $0x38] sm:$0xff]  ;;  %2994 = vst.msk [vmem:[#allocation3 + $0x60] sm:$0xff] %vm10224_vm3, %v2978_v38  ;;  %v5907_v54 = vld [vmem:[#allocation2 + $0xc3] sm:$0xff]  ;;  %vm10231_vm6 = vmmov %vm10172_vm0  ;;  %v8053_v53 = vperm.slane %v7848_v15, 4  ;;  %v3196_v15 = vmul.f32 %v7874_v14, %v7597_v46  ;;  %v3285_v46 = vmul.f32 %v7604_v0, %v7932_v12 }
 0x1fe   : > { %v3216_v57 = vadd.f32 %v3200_v40, %v3183_v49  ;;  %v3424_v43 = vld [vmem:[#allocation3 + $0x28] sm:$0xff]  ;;  %2411 = vst.msk [vmem:[#allocation3 + $0x10] sm:$0xff] %vm10225_vm7, %v2395_v51  ;;  %v3043_v7 = vmul.f32 %v5907_v54, %v7766_v31  ;;  %v2571_v38 = vadd.f32 %v2555_v30, %v2538_v19  ;;  %vm10232_vm12 = vmmov %vm10172_vm0 }
 0x1ff   : > { %2991 = vst.msk [vmem:[#allocation3 + $0x48] sm:$0xff] %vm10226_vm5, %v2975_v23  ;;  %v3457_v62 = vadd.f32 %v3441_v20, %v3424_v43  ;;  %v3187_v58 = vld [vmem:[#allocation3 + $0x58] sm:$0xff]  ;;  %v3281_v20 = vmul.f32 %v7654_v10, %v7932_v12  ;;  %vm10233_vm9 = vmmov %vm10172_vm0  ;;  %v3522_v49 = vmul.f32 %v8053_v53, %v7974_v11  ;;  %v2603_v19 = vld [vmem:[#allocation2 + $0x14a] sm:$0xff] }
 0x200   : > { %v3098_v26 = vld [vmem:[#allocation3 + $0x18] sm:$0xff]  ;;  %3232 = vst.msk [vmem:[#allocation3 + $0x38] sm:$0xff] %vm10227_vm4, %v3216_v57  ;;  %v3220_v25 = vadd.f32 %v3204_v45, %v3187_v58  ;;  %vm10234_vm2 = vmmov %vm10172_vm0  ;;  %v8079_v58 = vld [vmem:[%s9887_s4 + $0x10] sm:$0x1f] }
 0x201   : > { %v3131_v22 = vadd.f32 %v3115_v28, %v3098_v26  ;;  %v3339_v33 = vld [vmem:[#allocation3 + $0x8] sm:$0xff]  ;;  %3473 = vst.msk [vmem:[#allocation3 + $0x28] sm:$0xff] %vm10228_vm11, %v3457_v62  ;;  %v3437_v26 = vmul.f32 %v7994_v13, %v8018_v56  ;;  %vm10235_vm10 = vmmov %vm10172_vm0 }
 0x202   : > { %v3372_v8 = vadd.f32 %v3356_v2, %v3339_v33  ;;  %v2946_v27 = vld [vmem:[#allocation3 + $0x68] sm:$0xff]  ;;  %3236 = vst.msk [vmem:[#allocation3 + $0x58] sm:$0xff] %vm10232_vm12, %v3220_v25  ;;  %vm10236_vm13 = vmmov %vm10172_vm0 }
 0x203   : > { %3147 = vst.msk [vmem:[#allocation3 + $0x18] sm:$0xff] %vm10229_vm1, %v3131_v22  ;;  %v2979_v44 = vadd.f32 %v2963_v39, %v2946_v27  ;;  %v2455_v17 = vld [vmem:[#allocation3 + $0x70] sm:$0xff]  ;;  %v2521_v39 = vld [vmem:[#allocation2 + $0x141] sm:$0xff]  ;;  %v3044_v22 = vmul.f32 %v7672_v6, %v7766_v31  ;;  %vm10237_vm3 = vmmov %vm10172_vm0 }
 0x204   : > { %3388 = vst.msk [vmem:[#allocation3 + $0x8] sm:$0xff] %vm10230_vm15, %v3372_v8  ;;  %v3026_v51 = vld [vmem:[#allocation3 + $0x60] sm:$0xff]  ;;  %v2488_v16 = vadd.f32 %v2472_v29, %v2455_v17  ;;  %v8081_v29 = vld [vmem:[#allocation2 + $0x8c] sm:$0xff]  ;;  %vm10238_vm7 = vmmov %vm10172_vm0  ;;  %v2554_v54 = vmul.f32 %v7267_v50, %v2521_v39 }
 0x205   : > { %2995 = vst.msk [vmem:[#allocation3 + $0x68] sm:$0xff] %vm10231_vm6, %v2979_v44  ;;  %v3059_v40 = vadd.f32 %v3043_v7, %v3026_v51  ;;  %v4704_v33 = vld [vmem:[#allocation2 + $0xc4] sm:$0xff]  ;;  %vm10239_vm5 = vmmov %vm10172_vm0 }
 0x206   : > { %v3023_v23 = vld [vmem:[#allocation3 + $0x48] sm:$0xff]  ;;  %2504 = vst.msk [vmem:[#allocation3 + $0x70] sm:$0xff] %vm10233_vm9, %v2488_v16  ;;  %v3124_v0 = vmul.f32 %v4704_v33, %v7816_v21  ;;  %vm10240_vm4 = vmmov %vm10172_vm0  ;;  %v2636_v16 = vmul.f32 %v7362_v42, %v2603_v19  ;;  %v3366_v19 = vmul.f32 %v7643_v4, %v7981_v59 }
 0x207   : > { %v3056_v28 = vadd.f32 %v3040_v60, %v3023_v23  ;;  %v3264_v57 = vld [vmem:[#allocation3 + $0x38] sm:$0xff]  ;;  %3075 = vst.msk [vmem:[#allocation3 + $0x60] sm:$0xff] %vm10234_vm2, %v3059_v40  ;;  %v3121_v60 = vmul.f32 %v7816_v21, %v8081_v29  ;;  %vm10242_vm11 = vmmov %vm10172_vm0  ;;  %v3362_v23 = vmul.f32 %v7692_v47, %v7981_v59 }
 0x208   : > { %v3297_v43 = vadd.f32 %v3281_v20, %v3264_v57  ;;  %v3505_v2 = vld [vmem:[#allocation3 + $0x28] sm:$0xff]  ;;  %2587 = vst.msk [vmem:[#allocation3 + $0x78] sm:$0xff] %vm10172_vm0, %v2571_v38  ;;  %v8090_v38 = vperm.slane %v8079_v58, 0  ;;  %vm10243_vm1 = vmmov %vm10172_vm0 }
 0x209   : > { %3072 = vst.msk [vmem:[#allocation3 + $0x48] sm:$0xff] %vm10235_vm10, %v3056_v28  ;;  %v3538_v48 = vadd.f32 %v3522_v49, %v3505_v2  ;;  %v3268_v44 = vld [vmem:[#allocation3 + $0x58] sm:$0xff]  ;;  %v8098_v57 = vld [vmem:[#allocation2 + $0xcc] sm:$0xff]  ;;  %vm10244_vm15 = vmmov %vm10172_vm0 }
 0x20a   : > { %v3179_v62 = vld [vmem:[#allocation3 + $0x18] sm:$0xff]  ;;  %3313 = vst.msk [vmem:[#allocation3 + $0x38] sm:$0xff] %vm10236_vm13, %v3297_v43  ;;  %v3301_v7 = vadd.f32 %v3285_v46, %v3268_v44  ;;  %v3603_v2 = vmul.f32 %v7914_v52, %v8090_v38  ;;  %vm10245_vm6 = vmmov %vm10172_vm0  ;;  %v3125_v52 = vmul.f32 %v7816_v21, %v8098_v57  ;;  %v3575_v46 = vld [vmem:[#allocation2 + $0xe0] sm:$0xff] }
 0x20b   : > { %v3212_v8 = vadd.f32 %v3196_v15, %v3179_v62  ;;  %v3420_v45 = vld [vmem:[#allocation3 + $0x8] sm:$0xff]  ;;  %3554 = vst.msk [vmem:[#allocation3 + $0x28] sm:$0xff] %vm10237_vm3, %v3538_v48  ;;  %vm10246_vm12 = vmmov %vm10172_vm0 }
 0x20c   : > { %v3453_v27 = vadd.f32 %v3437_v26, %v3420_v45  ;;  %v3027_v13 = vld [vmem:[#allocation3 + $0x68] sm:$0xff]  ;;  %10241 = vst [vmem:[#allocation14_spill] sm:$0xff] %v8090_v38  ;;  %vm10247_vm9 = vmmov %vm10172_vm0 }
 0x20d   : > { %3228 = vst.msk [vmem:[#allocation3 + $0x18] sm:$0xff] %vm10238_vm7, %v3212_v8  ;;  %v3060_v30 = vadd.f32 %v3044_v22, %v3027_v13  ;;  %v2537_v25 = vld [vmem:[#allocation3 + $0x70] sm:$0xff]  ;;  %v3518_v22 = vmul.f32 %v8053_v53, %v8020_v63  ;;  %v2602_v45 = vld [vmem:[#allocation2 + $0x142] sm:$0xff]  ;;  %vm10248_vm2 = vmmov %vm10172_vm0 }
 0x20e   : > { %3469 = vst.msk [vmem:[#allocation3 + $0x8] sm:$0xff] %vm10239_vm5, %v3453_v27  ;;  %v3107_v17 = vld [vmem:[#allocation3 + $0x60] sm:$0xff]  ;;  %v2570_v51 = vadd.f32 %v2554_v54, %v2537_v25  ;;  %v8103_v26 = vld [vmem:[#allocation2 + $0x49] sm:$0xff]  ;;  %v3205_v25 = vmul.f32 %v3575_v46, %v7874_v14  ;;  %vm10249_vm10 = vmmov %vm10172_vm0 }
 0x20f   : > { %3076 = vst.msk [vmem:[#allocation3 + $0x68] sm:$0xff] %vm10240_vm4, %v3060_v30  ;;  %v3140_v40 = vadd.f32 %v3124_v0, %v3107_v17  ;;  %v2619_v20 = vld [vmem:[#allocation3 + $0x78] sm:$0xff]  ;;  %v3277_v62 = vmul.f32 %v8103_v26, %v7932_v12  ;;  %v2684_v30 = vld [vmem:[#allocation2 + $0x14b] sm:$0xff]  ;;  %vm10250_vm13 = vmmov %vm10172_vm0 }
 0x210   : > { %3317 = vst.msk [vmem:[#allocation3 + $0x58] sm:$0xff] %vm10242_vm11, %v3301_v7  ;;  %v3104_v49 = vld [vmem:[#allocation3 + $0x48] sm:$0xff]  ;;  %v2652_v28 = vadd.f32 %v2636_v16, %v2619_v20  ;;  %v2635_v7 = vmul.f32 %v7362_v42, %v2602_v45  ;;  %v3202_v20 = vmul.f32 %v7874_v14, %v7787_v5  ;;  %vm10251_vm3 = vmmov %vm10172_vm0 }
 0x211   : > { %2586 = vst.msk [vmem:[#allocation3 + $0x70] sm:$0xff] %vm10243_vm1, %v2570_v51  ;;  %v3137_v15 = vadd.f32 %v3121_v60, %v3104_v49  ;;  %v3345_v43 = vld [vmem:[#allocation3 + $0x38] sm:$0xff]  ;;  %v2717_v60 = vmul.f32 %v7554_v34, %v2684_v30  ;;  %vm10252_vm7 = vmmov %vm10172_vm0  ;;  %v5910_v46 = vld [vmem:[#allocation2 + $0x48] sm:$0xff] }
 0x212   : > { %3156 = vst.msk [vmem:[#allocation3 + $0x60] sm:$0xff] %vm10244_vm15, %v3140_v40  ;;  %v3378_v48 = vadd.f32 %v3362_v23, %v3345_v43  ;;  %v3586_v39 = vld [vmem:[#allocation3 + $0x28] sm:$0xff]  ;;  %v8124_v40 = vperm.slane %v8079_v58, 1  ;;  %vm10253_vm5 = vmmov %vm10172_vm0 }
 0x213   : > { %2668 = vst.msk [vmem:[#allocation3 + $0x78] sm:$0xff] %vm10245_vm6, %v2652_v28  ;;  %v3619_v8 = vadd.f32 %v3603_v2, %v3586_v39  ;;  %v3443_v28 = vmul.f32 %v7783_v61, %v8018_v56  ;;  %v8134_v39 = vld [vmem:[#allocation2 + $0xe8] sm:$0xff]  ;;  %vm10254_vm4 = vmmov %vm10172_vm0 }
 0x214   : > { %v3260_v33 = vld [vmem:[#allocation3 + $0x18] sm:$0xff]  ;;  %3153 = vst.msk [vmem:[#allocation3 + $0x48] sm:$0xff] %vm10246_vm12, %v3137_v15  ;;  %v3684_v2 = vmul.f32 %v7654_v10, %v8124_v40  ;;  %vm10255_vm11 = vmmov %vm10172_vm0  ;;  %v3206_v30 = vmul.f32 %v8134_v39, %v7874_v14 }
 0x215   : > { %v3293_v27 = vadd.f32 %v3277_v62, %v3260_v33  ;;  %v3501_v13 = vld [vmem:[#allocation3 + $0x8] sm:$0xff]  ;;  %3394 = vst.msk [vmem:[#allocation3 + $0x38] sm:$0xff] %vm10247_vm9, %v3378_v48  ;;  %vm10256_vm1 = vmmov %vm10172_vm0 }
 0x216   : > { %v3534_v44 = vadd.f32 %v3518_v22, %v3501_v13  ;;  %3635 = vst.msk [vmem:[#allocation3 + $0x28] sm:$0xff] %vm10248_vm2, %v3619_v8  ;;  %v3108_v63 = vld [vmem:[#allocation3 + $0x68] sm:$0xff]  ;;  %vm10257_vm15 = vmmov %vm10172_vm0 }
 0x217   : > { %3309 = vst.msk [vmem:[#allocation3 + $0x18] sm:$0xff] %vm10172_vm0, %v3293_v27  ;;  %v3349_v54 = vld [vmem:[#allocation3 + $0x58] sm:$0xff]  ;;  %v3141_v0 = vadd.f32 %v3125_v52, %v3108_v63  ;;  %v8137_v22 = vld [vmem:[#allocation2 + $0x4a] sm:$0xff]  ;;  %v3599_v27 = vmul.f32 %v5910_v46, %v8090_v38  ;;  %vm10258_vm6 = vmmov %vm10172_vm0 }
 0x218   : > { %3550 = vst.msk [vmem:[#allocation3 + $0x8] sm:$0xff] %vm10249_vm10, %v3534_v44  ;;  %v3382_v17 = vadd.f32 %v3366_v19, %v3349_v54  ;;  %v2618_v51 = vld [vmem:[#allocation3 + $0x70] sm:$0xff]  ;;  %v3358_v33 = vmul.f32 %v8137_v22, %v7981_v59  ;;  %v2683_v13 = vld [vmem:[#allocation2 + $0x143] sm:$0xff]  ;;  %v3447_v54 = vmul.f32 %v7672_v6, %v8018_v56  ;;  %vm10259_vm12 = vmmov %vm10172_vm0 }
 0x219   : > { %3157 = vst.msk [vmem:[#allocation3 + $0x68] sm:$0xff] %vm10250_vm13, %v3141_v0  ;;  %v3188_v4 = vld [vmem:[#allocation3 + $0x60] sm:$0xff]  ;;  %v2651_v16 = vadd.f32 %v2635_v7, %v2618_v51  ;;  %vm10260_vm9 = vmmov %vm10172_vm0 }
 0x21a   : > { %3398 = vst.msk [vmem:[#allocation3 + $0x58] sm:$0xff] %vm10251_vm3, %v3382_v17  ;;  %v3221_v23 = vadd.f32 %v3205_v25, %v3188_v4  ;;  %v2700_v49 = vld [vmem:[#allocation3 + $0x78] sm:$0xff]  ;;  %v3656_v19 = vld [vmem:[#allocation2 + $0xe1] sm:$0xff]  ;;  %v2716_v4 = vmul.f32 %v7554_v34, %v2683_v13  ;;  %vm10261_vm2 = vmmov %vm10172_vm0 }
 0x21b   : > { %v3185_v15 = vld [vmem:[#allocation3 + $0x48] sm:$0xff]  ;;  %2667 = vst.msk [vmem:[#allocation3 + $0x70] sm:$0xff] %vm10252_vm7, %v2651_v16  ;;  %v2733_v43 = vadd.f32 %v2717_v60, %v2700_v49  ;;  %v3286_v16 = vmul.f32 %v3656_v19, %v7932_v12  ;;  %vm10262_vm10 = vmmov %vm10172_vm0 }
 0x21c   : > { %v3218_v62 = vadd.f32 %v3202_v20, %v3185_v15  ;;  %v3426_v48 = vld [vmem:[#allocation3 + $0x38] sm:$0xff]  ;;  %3237 = vst.msk [vmem:[#allocation3 + $0x60] sm:$0xff] %vm10253_vm5, %v3221_v23  ;;  %v2770_v25 = vld [vmem:[#allocation2 + $0xe8] sm:$0xff]  ;;  %vm10263_vm13 = vmmov %vm10172_vm0 }
 0x21d   : > { %v3459_v8 = vadd.f32 %v3443_v28, %v3426_v48  ;;  %v3667_v45 = vld [vmem:[#allocation3 + $0x28] sm:$0xff]  ;;  %2749 = vst.msk [vmem:[#allocation3 + $0x78] sm:$0xff] %vm10254_vm4, %v2733_v43  ;;  %v2803_v49 = vmul.f32 %v7602_v36, %v2770_v25  ;;  %v8157_v28 = vperm.slane %v8079_v58, 2  ;;  %v3524_v48 = vmul.f32 %v8053_v53, %v8081_v29  ;;  %vm10264_vm3 = vmmov %vm10172_vm0 }
 0x21e   : > { %v3341_v52 = vld [vmem:[#allocation3 + $0x18] sm:$0xff]  ;;  %3234 = vst.msk [vmem:[#allocation3 + $0x48] sm:$0xff] %vm10255_vm11, %v3218_v62  ;;  %v3700_v10 = vadd.f32 %v3684_v2, %v3667_v45  ;;  %v8159_v15 = vld [vmem:[#allocation2 + $0xa9] sm:$0xff]  ;;  %vm10265_vm7 = vmmov %vm10172_vm0 }
 0x21f   : > { %v3374_v44 = vadd.f32 %v3358_v33, %v3341_v52  ;;  %v3582_v63 = vld [vmem:[#allocation3 + $0x8] sm:$0xff]  ;;  %3475 = vst.msk [vmem:[#allocation3 + $0x38] sm:$0xff] %vm10256_vm1, %v3459_v8  ;;  %v3283_v43 = vmul.f32 %v8159_v15, %v7932_v12  ;;  %v3765_v45 = vmul.f32 %v7692_v47, %v8157_v28  ;;  %vm10266_vm5 = vmmov %vm10172_vm0 }
 0x220   : > { %v3615_v0 = vadd.f32 %v3599_v27, %v3582_v63  ;;  %3716 = vst.msk [vmem:[#allocation3 + $0x28] sm:$0xff] %vm10257_vm15, %v3700_v10  ;;  %v3189_v7 = vld [vmem:[#allocation3 + $0x68] sm:$0xff]  ;;  %v3680_v63 = vmul.f32 %v8103_v26, %v8124_v40  ;;  %vm10267_vm4 = vmmov %vm10172_vm0 }
 0x221   : > { %3390 = vst.msk [vmem:[#allocation3 + $0x18] sm:$0xff] %vm10258_vm6, %v3374_v44  ;;  %v3430_v17 = vld [vmem:[#allocation3 + $0x58] sm:$0xff]  ;;  %v3222_v51 = vadd.f32 %v3206_v30, %v3189_v7  ;;  %v8170_v27 = vld [vmem:[#allocation2 + $0x4b] sm:$0xff]  ;;  %v2769_v30 = vld [vmem:[#allocation2 + $0xe0] sm:$0xff] }
 0x222   : > { %3631 = vst.msk [vmem:[#allocation3 + $0x8] sm:$0xff] %vm10259_vm12, %v3615_v0  ;;  %v3463_v60 = vadd.f32 %v3447_v54, %v3430_v17  ;;  %v2699_v20 = vld [vmem:[#allocation3 + $0x70] sm:$0xff]  ;;  %v3439_v10 = vmul.f32 %v8170_v27, %v8018_v56  ;;  %v3287_v54 = vmul.f32 %v7768_v18, %v7932_v12  ;;  %v3737_v0 = vld [vmem:[#allocation2 + $0xe2] sm:$0xff]  ;;  %v3528_v17 = vmul.f32 %v8053_v53, %v8098_v57  ;;  %vm10268_vm11 = vmmov %vm10172_vm0 }
 0x223   : > { %3238 = vst.msk [vmem:[#allocation3 + $0x68] sm:$0xff] %vm10260_vm9, %v3222_v51  ;;  %v3269_v6 = vld [vmem:[#allocation3 + $0x60] sm:$0xff]  ;;  %v2732_v23 = vadd.f32 %v2716_v4, %v2699_v20  ;;  %v3367_v20 = vmul.f32 %v3737_v0, %v7981_v59  ;;  %vm10269_vm1 = vmmov %vm10172_vm0 }
 0x224   : > { %3479 = vst.msk [vmem:[#allocation3 + $0x58] sm:$0xff] %vm10261_vm2, %v3463_v60  ;;  %v3302_v2 = vadd.f32 %v3286_v16, %v3269_v6  ;;  %v2786_v62 = vld [vmem:[#allocation3 + $0x78] sm:$0xff]  ;;  %v2802_v60 = vmul.f32 %v7602_v36, %v2769_v30  ;;  %vm10270_vm15 = vmmov %vm10172_vm0  ;;  %v2850_v0 = vld [vmem:[#allocation2 + $0xe1] sm:$0xff] }
 0x225   : > { %v3266_v33 = vld [vmem:[#allocation3 + $0x48] sm:$0xff]  ;;  %2748 = vst.msk [vmem:[#allocation3 + $0x70] sm:$0xff] %vm10172_vm0, %v2732_v23  ;;  %v2819_v8 = vadd.f32 %v2803_v49, %v2786_v62  ;;  %v2884_v49 = vmul.f32 %v7768_v18, %v7641_v37  ;;  %v8192_v62 = vperm.slane %v8079_v58, 3  ;;  %v3605_v18 = vmul.f32 %v8090_v38, %v7787_v5  ;;  %vm10271_vm6 = vmmov %vm10172_vm0 }
 0x226   : > { %v3299_v52 = vadd.f32 %v3283_v43, %v3266_v33  ;;  %v3507_v46 = vld [vmem:[#allocation3 + $0x38] sm:$0xff]  ;;  %3318 = vst.msk [vmem:[#allocation3 + $0x60] sm:$0xff] %vm10262_vm10, %v3302_v2  ;;  %vm10272_vm12 = vmmov %vm10172_vm0  ;;  %v3761_v5 = vmul.f32 %v8137_v22, %v8157_v28 }
 0x227   : > { %v3540_v13 = vadd.f32 %v3524_v48, %v3507_v46  ;;  %v3748_v19 = vld [vmem:[#allocation3 + $0x28] sm:$0xff]  ;;  %2835 = vst.msk [vmem:[#allocation3 + $0x78] sm:$0xff] %vm10263_vm13, %v2819_v8  ;;  %vm10273_vm9 = vmmov %vm10172_vm0 }
 0x228   : > { %v3422_v44 = vld [vmem:[#allocation3 + $0x18] sm:$0xff]  ;;  %3315 = vst.msk [vmem:[#allocation3 + $0x48] sm:$0xff] %vm10264_vm3, %v3299_v52  ;;  %v3781_v47 = vadd.f32 %v3765_v45, %v3748_v19  ;;  %v8194_v48 = vld [vmem:[#allocation2 + $0xaa] sm:$0xff]  ;;  %vm10274_vm2 = vmmov %vm10172_vm0 }
 0x229   : > { %v3455_v7 = vadd.f32 %v3439_v10, %v3422_v44  ;;  %v3663_v25 = vld [vmem:[#allocation3 + $0x8] sm:$0xff]  ;;  %3556 = vst.msk [vmem:[#allocation3 + $0x38] sm:$0xff] %vm10265_vm7, %v3540_v13  ;;  %v3364_v33 = vmul.f32 %v8194_v48, %v7981_v59  ;;  %v3846_v10 = vmul.f32 %v7783_v61, %v8192_v62  ;;  %v3520_v44 = vmul.f32 %v8053_v53, %v7811_v32  ;;  %vm10275_vm10 = vmmov %vm10172_vm0 }
 0x22a   : > { %v3696_v51 = vadd.f32 %v3680_v63, %v3663_v25  ;;  %3797 = vst.msk [vmem:[#allocation3 + $0x28] sm:$0xff] %vm10266_vm5, %v3781_v47  ;;  %v3270_v4 = vld [vmem:[#allocation3 + $0x68] sm:$0xff]  ;;  %v3368_v61 = vmul.f32 %v7820_v55, %v7981_v59  ;;  %vm10276_vm13 = vmmov %vm10172_vm0 }
 0x22b   : > { %3471 = vst.msk [vmem:[#allocation3 + $0x18] sm:$0xff] %vm10267_vm4, %v3455_v7  ;;  %v3511_v26 = vld [vmem:[#allocation3 + $0x58] sm:$0xff]  ;;  %v3303_v16 = vadd.f32 %v3287_v54, %v3270_v4  ;;  %v3818_v7 = vld [vmem:[#allocation2 + $0xe3] sm:$0xff]  ;;  %vm10277_vm3 = vmmov %vm10172_vm0 }
 0x22c   : > { %3712 = vst.msk [vmem:[#allocation3 + $0x8] sm:$0xff] %vm10268_vm11, %v3696_v51  ;;  %v3544_v6 = vadd.f32 %v3528_v17, %v3511_v26  ;;  %v2785_v23 = vld [vmem:[#allocation3 + $0x70] sm:$0xff]  ;;  %v3609_v51 = vmul.f32 %v8134_v39, %v8090_v38  ;;  %vm10278_vm7 = vmmov %vm10172_vm0 }
 0x22d   : > { %3319 = vst.msk [vmem:[#allocation3 + $0x68] sm:$0xff] %vm10269_vm1, %v3303_v16  ;;  %v3350_v43 = vld [vmem:[#allocation3 + $0x60] sm:$0xff]  ;;  %v2818_v2 = vadd.f32 %v2802_v60, %v2785_v23  ;;  %v2883_v16 = vmul.f32 %v7641_v37, %v2850_v0  ;;  %v3448_v60 = vmul.f32 %v3818_v7, %v8018_v56  ;;  %v2965_v23 = vmul.f32 %v7820_v55, %v7666_v3  ;;  %vm10279_vm5 = vmmov %vm10172_vm0  ;;  %v10284_v0 = vld [vmem:[#allocation13_spill] sm:$0xff] }
 0x22e   : > { %3560 = vst.msk [vmem:[#allocation3 + $0x58] sm:$0xff] %vm10270_vm15, %v3544_v6  ;;  %v3383_v8 = vadd.f32 %v3367_v20, %v3350_v43  ;;  %v2867_v45 = vld [vmem:[#allocation3 + $0x78] sm:$0xff]  ;;  %v3686_v55 = vmul.f32 %v8159_v15, %v8124_v40  ;;  %vm10280_vm4 = vmmov %vm10172_vm0  ;;  %v3899_v7 = vld [vmem:[#allocation2 + $0xe4] sm:$0xff] }
 0x22f   : > { %v3347_v52 = vld [vmem:[#allocation3 + $0x48] sm:$0xff]  ;;  %2834 = vst.msk [vmem:[#allocation3 + $0x70] sm:$0xff] %vm10271_vm6, %v2818_v2  ;;  %v2900_v46 = vadd.f32 %v2884_v49, %v2867_v45  ;;  %v8225_v2 = vperm.slane %v8079_v58, 4  ;;  %vm10281_vm11 = vmmov %vm10172_vm0 }
 0x230   : > { %v3380_v13 = vadd.f32 %v3364_v33, %v3347_v52  ;;  %v3588_v19 = vld [vmem:[#allocation3 + $0x38] sm:$0xff]  ;;  %3399 = vst.msk [vmem:[#allocation3 + $0x60] sm:$0xff] %vm10272_vm12, %v3383_v8  ;;  %v8227_v33 = vld [vmem:[#allocation2 + $0xab] sm:$0xff]  ;;  %vm10282_vm1 = vmmov %vm10172_vm0 }
 0x231   : > { %v3621_v63 = vadd.f32 %v3605_v18, %v3588_v19  ;;  %v3829_v47 = vld [vmem:[#allocation3 + $0x28] sm:$0xff]  ;;  %2916 = vst.msk [vmem:[#allocation3 + $0x78] sm:$0xff] %vm10273_vm9, %v2900_v46  ;;  %v3445_v8 = vmul.f32 %v8227_v33, %v8018_v56  ;;  %v3927_v58 = vmul.f32 %v8225_v2, %v8081_v29  ;;  %vm10283_vm15 = vmmov %vm10172_vm0 }
 0x232   : > { %v3503_v30 = vld [vmem:[#allocation3 + $0x18] sm:$0xff]  ;;  %3396 = vst.msk [vmem:[#allocation3 + $0x48] sm:$0xff] %vm10274_vm2, %v3380_v13  ;;  %v3862_v54 = vadd.f32 %v3846_v10, %v3829_v47  ;;  %v8238_v19 = vld [vmem:[#allocation2 + $0x68] sm:$0xff]  ;;  %vm10285_vm6 = vmmov %vm10172_vm0 }
 0x233   : > { %v3536_v25 = vadd.f32 %v3520_v44, %v3503_v30  ;;  %v3744_v17 = vld [vmem:[#allocation3 + $0x8] sm:$0xff]  ;;  %3637 = vst.msk [vmem:[#allocation3 + $0x38] sm:$0xff] %vm10172_vm0, %v3621_v63  ;;  %v3601_v44 = vmul.f32 %v8238_v19, %v8090_v38  ;;  %vm10286_vm12 = vmmov %vm10172_vm0 }
 0x234   : > { %v3777_v32 = vadd.f32 %v3761_v5, %v3744_v17  ;;  %3878 = vst.msk [vmem:[#allocation3 + $0x28] sm:$0xff] %vm10275_vm10, %v3862_v54  ;;  %v3351_v4 = vld [vmem:[#allocation3 + $0x68] sm:$0xff]  ;;  %v3842_v5 = vmul.f32 %v8170_v27, %v8192_v62  ;;  %vm10287_vm9 = vmmov %vm10172_vm0 }
 0x235   : > { %3552 = vst.msk [vmem:[#allocation3 + $0x18] sm:$0xff] %vm10276_vm13, %v3536_v25  ;;  %v3592_v22 = vld [vmem:[#allocation3 + $0x58] sm:$0xff]  ;;  %v3384_v26 = vadd.f32 %v3368_v61, %v3351_v4  ;;  %v2931_v54 = vld [vmem:[#allocation2 + $0xe2] sm:$0xff]  ;;  %v3449_v61 = vmul.f32 %v10284_v0, %v8018_v56  ;;  %vm10288_vm2 = vmmov %vm10172_vm0 }
 0x236   : > { %3793 = vst.msk [vmem:[#allocation3 + $0x8] sm:$0xff] %vm10277_vm3, %v3777_v32  ;;  %v3625_v20 = vadd.f32 %v3609_v51, %v3592_v22  ;;  %v2866_v6 = vld [vmem:[#allocation3 + $0x70] sm:$0xff]  ;;  %v8257_v22 = vld [vmem:[%s9887_s4 + $0x18] sm:$0x1f]  ;;  %vm10289_vm10 = vmmov %vm10172_vm0 }
 0x237   : > { %3400 = vst.msk [vmem:[#allocation3 + $0x68] sm:$0xff] %vm10278_vm7, %v3384_v26  ;;  %v3431_v49 = vld [vmem:[#allocation3 + $0x60] sm:$0xff]  ;;  %v2899_v43 = vadd.f32 %v2883_v16, %v2866_v6  ;;  %v8249_v32 = vld [vmem:[#allocation2 + $0xe9] sm:$0xff]  ;;  %vm10290_vm13 = vmmov %vm10172_vm0 }
 0x238   : > { %3641 = vst.msk [vmem:[#allocation3 + $0x58] sm:$0xff] %vm10279_vm5, %v3625_v20  ;;  %v3464_v45 = vadd.f32 %v3448_v60, %v3431_v49  ;;  %v2948_v52 = vld [vmem:[#allocation3 + $0x78] sm:$0xff]  ;;  %v3690_v51 = vmul.f32 %v8249_v32, %v8124_v40  ;;  %v2964_v60 = vmul.f32 %v7666_v3, %v2931_v54  ;;  %v3529_v20 = vmul.f32 %v3899_v7, %v8053_v53  ;;  %vm10291_vm3 = vmmov %vm10172_vm0  ;;  %v5919_v7 = vld [vmem:[#allocation2 + $0x4c] sm:$0xff] }
 0x239   : > { %v3428_v18 = vld [vmem:[#allocation3 + $0x48] sm:$0xff]  ;;  %2915 = vst.msk [vmem:[#allocation3 + $0x70] sm:$0xff] %vm10280_vm4, %v2899_v43  ;;  %v2981_v46 = vadd.f32 %v2965_v23, %v2948_v52  ;;  %v3046_v49 = vmul.f32 %v10284_v0, %v7766_v31  ;;  %v3526_v52 = vmul.f32 %v8053_v53, %v7998_v41  ;;  %vm10292_vm7 = vmmov %vm10172_vm0 }
 0x23a   : > { %v3461_v10 = vadd.f32 %v3445_v8, %v3428_v18  ;;  %v3669_v13 = vld [vmem:[#allocation3 + $0x38] sm:$0xff]  ;;  %3480 = vst.msk [vmem:[#allocation3 + $0x60] sm:$0xff] %vm10281_vm11, %v3464_v45  ;;  %v8267_v45 = vperm.slane %v8257_v22, 0  ;;  %vm10293_vm5 = vmmov %vm10172_vm0 }
 0x23b   : > { %v3702_v63 = vadd.f32 %v3686_v55, %v3669_v13  ;;  %v3910_v47 = vld [vmem:[#allocation3 + $0x28] sm:$0xff]  ;;  %2997 = vst.msk [vmem:[#allocation3 + $0x78] sm:$0xff] %vm10282_vm1, %v2981_v46  ;;  %vm10294_vm4 = vmmov %vm10172_vm0 }
 0x23c   : > { %v3584_v30 = vld [vmem:[#allocation3 + $0x18] sm:$0xff]  ;;  %3477 = vst.msk [vmem:[#allocation3 + $0x48] sm:$0xff] %vm10283_vm15, %v3461_v10  ;;  %v3943_v29 = vadd.f32 %v3927_v58, %v3910_v47  ;;  %v3767_v58 = vmul.f32 %v8194_v48, %v8157_v28  ;;  %v8275_v13 = vld [vmem:[#allocation2 + $0xec] sm:$0xff]  ;;  %vm10295_vm11 = vmmov %vm10172_vm0 }
 0x23d   : > { %v3617_v25 = vadd.f32 %v3601_v44, %v3584_v30  ;;  %v3825_v17 = vld [vmem:[#allocation3 + $0x8] sm:$0xff]  ;;  %3718 = vst.msk [vmem:[#allocation3 + $0x38] sm:$0xff] %vm10285_vm6, %v3702_v63  ;;  %vm10296_vm1 = vmmov %vm10172_vm0 }
 0x23e   : > { %v3858_v4 = vadd.f32 %v3842_v5, %v3825_v17  ;;  %3959 = vst.msk [vmem:[#allocation3 + $0x28] sm:$0xff] %vm10286_vm12, %v3943_v29  ;;  %v3432_v27 = vld [vmem:[#allocation3 + $0x68] sm:$0xff]  ;;  %vm10297_vm15 = vmmov %vm10172_vm0 }
 0x23f   : > { %3633 = vst.msk [vmem:[#allocation3 + $0x18] sm:$0xff] %vm10287_vm9, %v3617_v25  ;;  %v3673_v26 = vld [vmem:[#allocation3 + $0x58] sm:$0xff]  ;;  %v3465_v16 = vadd.f32 %v3449_v61, %v3432_v27  ;;  %v8277_v47 = vld [vmem:[#allocation2 + $0xa8] sm:$0xff]  ;;  %v3923_v25 = vmul.f32 %v5919_v7, %v8225_v2  ;;  %v8291_v27 = vld [vmem:[#allocation2 + $0x100] sm:$0xff] }
 0x240   : > { %3874 = vst.msk [vmem:[#allocation3 + $0x8] sm:$0xff] %vm10288_vm2, %v3858_v4  ;;  %v3706_v6 = vadd.f32 %v3690_v51, %v3673_v26  ;;  %v2947_v23 = vld [vmem:[#allocation3 + $0x70] sm:$0xff]  ;;  %v4008_v30 = vmul.f32 %v8277_v47, %v8267_v45  ;;  %v3012_v51 = vld [vmem:[#allocation2 + $0xe3] sm:$0xff]  ;;  %v3530_v4 = vmul.f32 %v8053_v53, %v8275_v13  ;;  %vm10298_vm6 = vmmov %vm10172_vm0 }
 0x241   : > { %3481 = vst.msk [vmem:[#allocation3 + $0x68] sm:$0xff] %vm10172_vm0, %v3465_v16  ;;  %v3512_v43 = vld [vmem:[#allocation3 + $0x60] sm:$0xff]  ;;  %v2980_v8 = vadd.f32 %v2964_v60, %v2947_v23  ;;  %v8282_v5 = vld [vmem:[#allocation2 + $0x69] sm:$0xff]  ;;  %vm10299_vm12 = vmmov %vm10172_vm0 }
 0x242   : > { %3722 = vst.msk [vmem:[#allocation3 + $0x58] sm:$0xff] %vm10289_vm10, %v3706_v6  ;;  %v3545_v18 = vadd.f32 %v3529_v20, %v3512_v43  ;;  %v3029_v55 = vld [vmem:[#allocation3 + $0x78] sm:$0xff]  ;;  %v3682_v29 = vmul.f32 %v8282_v5, %v8124_v40  ;;  %v8294_v60 = vld [vmem:[#allocation2 + $0xea] sm:$0xff]  ;;  %vm10300_vm9 = vmmov %vm10172_vm0 }
 0x243   : > { %v3509_v46 = vld [vmem:[#allocation3 + $0x48] sm:$0xff]  ;;  %2996 = vst.msk [vmem:[#allocation3 + $0x70] sm:$0xff] %vm10290_vm13, %v2980_v8  ;;  %v3062_v10 = vadd.f32 %v3046_v49, %v3029_v55  ;;  %v3771_v20 = vmul.f32 %v8294_v60, %v8157_v28  ;;  %v3045_v8 = vmul.f32 %v7766_v31, %v3012_v51  ;;  %vm10301_vm2 = vmmov %vm10172_vm0 }
 0x244   : > { %v3542_v44 = vadd.f32 %v3526_v52, %v3509_v46  ;;  %v3750_v63 = vld [vmem:[#allocation3 + $0x38] sm:$0xff]  ;;  %3561 = vst.msk [vmem:[#allocation3 + $0x60] sm:$0xff] %vm10291_vm3, %v3545_v18  ;;  %v3610_v52 = vmul.f32 %v8090_v38, %v8291_v27  ;;  %v3127_v46 = vmul.f32 %v7816_v21, %v8275_v13  ;;  %v8318_v51 = vld [vmem:[#allocation2 + $0x108] sm:$0xff]  ;;  %vm10302_vm10 = vmmov %vm10172_vm0 }
 0x245   : > { %v3783_v54 = vadd.f32 %v3767_v58, %v3750_v63  ;;  %v3991_v0 = vld [vmem:[#allocation3 + $0x28] sm:$0xff]  ;;  %3078 = vst.msk [vmem:[#allocation3 + $0x78] sm:$0xff] %vm10292_vm7, %v3062_v10  ;;  %v3607_v63 = vmul.f32 %v8090_v38, %v8033_v9  ;;  %vm10303_vm13 = vmmov %vm10172_vm0 }
 0x246   : > { %v3665_v61 = vld [vmem:[#allocation3 + $0x18] sm:$0xff]  ;;  %3558 = vst.msk [vmem:[#allocation3 + $0x48] sm:$0xff] %vm10293_vm5, %v3542_v44  ;;  %v4024_v17 = vadd.f32 %v4008_v30, %v3991_v0  ;;  %v8308_v44 = vperm.slane %v8257_v22, 1  ;;  %v3848_v0 = vmul.f32 %v8227_v33, %v8192_v62  ;;  %vm10304_vm3 = vmmov %vm10172_vm0 }
 0x247   : > { %v3698_v26 = vadd.f32 %v3682_v29, %v3665_v61  ;;  %v3906_v16 = vld [vmem:[#allocation3 + $0x8] sm:$0xff]  ;;  %3799 = vst.msk [vmem:[#allocation3 + $0x38] sm:$0xff] %vm10294_vm4, %v3783_v54  ;;  %vm10305_vm7 = vmmov %vm10172_vm0 }
 0x248   : > { %v3939_v6 = vadd.f32 %v3923_v25, %v3906_v16  ;;  %4040 = vst.msk [vmem:[#allocation3 + $0x28] sm:$0xff] %vm10295_vm11, %v4024_v17  ;;  %v3513_v23 = vld [vmem:[#allocation3 + $0x68] sm:$0xff]  ;;  %v4089_v17 = vmul.f32 %v8159_v15, %v8308_v44  ;;  %vm10306_vm5 = vmmov %vm10172_vm0 }
 0x249   : > { %3714 = vst.msk [vmem:[#allocation3 + $0x18] sm:$0xff] %vm10296_vm1, %v3698_v26  ;;  %v3754_v49 = vld [vmem:[#allocation3 + $0x58] sm:$0xff]  ;;  %v3546_v43 = vadd.f32 %v3530_v4, %v3513_v23  ;;  %v8321_v4 = vld [vmem:[#allocation2 + $0x6a] sm:$0xff]  ;;  %v4004_v23 = vmul.f32 %v8238_v19, %v8267_v45  ;;  %vm10307_vm4 = vmmov %vm10172_vm0 }
 0x24a   : > { %3955 = vst.msk [vmem:[#allocation3 + $0x8] sm:$0xff] %vm10297_vm15, %v3939_v6  ;;  %v3787_v18 = vadd.f32 %v3771_v20, %v3754_v49  ;;  %v3028_v55 = vld [vmem:[#allocation3 + $0x70] sm:$0xff]  ;;  %v3763_v26 = vmul.f32 %v8321_v4, %v8157_v28  ;;  %v3093_v49 = vld [vmem:[#allocation2 + $0xe4] sm:$0xff]  ;;  %vm10309_vm11 = vmmov %vm10172_vm0 }
 0x24b   : > { %3562 = vst.msk [vmem:[#allocation3 + $0x68] sm:$0xff] %vm10298_vm6, %v3546_v43  ;;  %v3593_v58 = vld [vmem:[#allocation3 + $0x60] sm:$0xff]  ;;  %v3061_v10 = vadd.f32 %v3045_v8, %v3028_v55  ;;  %vm10310_vm1 = vmmov %vm10172_vm0 }
 0x24c   : > { %3803 = vst.msk [vmem:[#allocation3 + $0x58] sm:$0xff] %vm10299_vm12, %v3787_v18  ;;  %v3626_v30 = vadd.f32 %v3610_v52, %v3593_v58  ;;  %v3110_v29 = vld [vmem:[#allocation3 + $0x78] sm:$0xff]  ;;  %v3611_v52 = vmul.f32 %v8318_v51, %v8090_v38  ;;  %v8332_v18 = vld [vmem:[#allocation2 + $0xeb] sm:$0xff]  ;;  %vm10311_vm15 = vmmov %vm10172_vm0 }
 0x24d   : > { %v3590_v54 = vld [vmem:[#allocation3 + $0x48] sm:$0xff]  ;;  %3077 = vst.msk [vmem:[#allocation3 + $0x70] sm:$0xff] %vm10300_vm9, %v3061_v10  ;;  %v3143_v61 = vadd.f32 %v3127_v46, %v3110_v29  ;;  %v3852_v55 = vmul.f32 %v8332_v18, %v8192_v62  ;;  %vm10312_vm6 = vmmov %vm10172_vm0 }
 0x24e   : > { %v3623_v7 = vadd.f32 %v3607_v63, %v3590_v54  ;;  %v3831_v25 = vld [vmem:[#allocation3 + $0x38] sm:$0xff]  ;;  %3642 = vst.msk [vmem:[#allocation3 + $0x60] sm:$0xff] %vm10301_vm2, %v3626_v30  ;;  %v3175_v58 = vld [vmem:[#allocation2 + $0x108] sm:$0xff]  ;;  %v3126_v30 = vmul.f32 %v7816_v21, %v3093_v49  ;;  %v3929_v49 = vmul.f32 %v8225_v2, %v7998_v41  ;;  %v4085_v41 = vmul.f32 %v8282_v5, %v8308_v44  ;;  %vm10313_vm12 = vmmov %vm10172_vm0 }
 0x24f   : > { %v3864_v16 = vadd.f32 %v3848_v0, %v3831_v25  ;;  %v4072_v20 = vld [vmem:[#allocation3 + $0x28] sm:$0xff]  ;;  %3159 = vst.msk [vmem:[#allocation3 + $0x78] sm:$0xff] %vm10172_vm0, %v3143_v61  ;;  %vm10314_vm9 = vmmov %vm10172_vm0 }
 0x250   : > { %v3746_v6 = vld [vmem:[#allocation3 + $0x18] sm:$0xff]  ;;  %3639 = vst.msk [vmem:[#allocation3 + $0x48] sm:$0xff] %vm10302_vm10, %v3623_v7  ;;  %v4105_v15 = vadd.f32 %v4089_v17, %v4072_v20  ;;  %v8340_v29 = vld [vmem:[#allocation2 + $0x101] sm:$0xff]  ;;  %v3208_v17 = vmul.f32 %v7874_v14, %v3175_v58  ;;  %vm10315_vm2 = vmmov %vm10172_vm0 }
 0x251   : > { %v3779_v43 = vadd.f32 %v3763_v26, %v3746_v6  ;;  %v3987_v8 = vld [vmem:[#allocation3 + $0x8] sm:$0xff]  ;;  %3880 = vst.msk [vmem:[#allocation3 + $0x38] sm:$0xff] %vm10303_vm13, %v3864_v16  ;;  %v3691_v54 = vmul.f32 %v8340_v29, %v8124_v40  ;;  %v8347_v26 = vperm.slane %v8257_v22, 2  ;;  %vm10316_vm10 = vmmov %vm10172_vm0 }
 0x252   : > { %v4020_v46 = vadd.f32 %v4004_v23, %v3987_v8  ;;  %4121 = vst.msk [vmem:[#allocation3 + $0x28] sm:$0xff] %vm10304_vm3, %v4105_v15  ;;  %v3594_v19 = vld [vmem:[#allocation3 + $0x68] sm:$0xff]  ;;  %vm10317_vm13 = vmmov %vm10172_vm0 }
 0x253   : > { %3795 = vst.msk [vmem:[#allocation3 + $0x18] sm:$0xff] %vm10305_vm7, %v3779_v43  ;;  %v3835_v10 = vld [vmem:[#allocation3 + $0x58] sm:$0xff]  ;;  %v3627_v63 = vadd.f32 %v3611_v52, %v3594_v19  ;;  %v8349_v16 = vld [vmem:[#allocation2 + $0xc9] sm:$0xff]  ;;  %vm10319_vm3 = vmmov %vm10172_vm0 }
 0x254   : > { %4036 = vst.msk [vmem:[#allocation3 + $0x8] sm:$0xff] %vm10306_vm5, %v4020_v46  ;;  %v3868_v0 = vadd.f32 %v3852_v55, %v3835_v10  ;;  %v3109_v61 = vld [vmem:[#allocation3 + $0x70] sm:$0xff]  ;;  %v3688_v20 = vmul.f32 %v8349_v16, %v8124_v40  ;;  %v4170_v55 = vmul.f32 %v8194_v48, %v8347_v26  ;;  %vm10320_vm7 = vmmov %vm10172_vm0 }
 0x255   : > { %3643 = vst.msk [vmem:[#allocation3 + $0x68] sm:$0xff] %vm10307_vm4, %v3627_v63  ;;  %v3674_v7 = vld [vmem:[#allocation3 + $0x60] sm:$0xff]  ;;  %v3142_v25 = vadd.f32 %v3126_v30, %v3109_v61  ;;  %v8360_v46 = vld [vmem:[#allocation2 + $0x6b] sm:$0xff]  ;;  %vm10321_vm5 = vmmov %vm10172_vm0 }
 0x256   : > { %10308 = vst [vmem:[#allocation13_spill] sm:$0xff] %v8347_v26  ;;  %v3707_v6 = vadd.f32 %v3691_v54, %v3674_v7  ;;  %v3191_v23 = vld [vmem:[#allocation3 + $0x78] sm:$0xff]  ;;  %v3844_v19 = vmul.f32 %v8360_v46, %v8192_v62  ;;  %v3933_v7 = vmul.f32 %v8225_v2, %v8275_v13  ;;  %vm10322_vm4 = vmmov %vm10172_vm0 }
 0x257   : > { %3884 = vst.msk [vmem:[#allocation3 + $0x58] sm:$0xff] %vm10309_vm11, %v3868_v0  ;;  %v3671_v15 = vld [vmem:[#allocation3 + $0x48] sm:$0xff]  ;;  %v3224_v43 = vadd.f32 %v3208_v17, %v3191_v23  ;;  %v3207_v17 = vmul.f32 %v7874_v14, %v8291_v27  ;;  %vm10323_vm11 = vmmov %vm10172_vm0 }
 0x258   : > { %3158 = vst.msk [vmem:[#allocation3 + $0x70] sm:$0xff] %vm10310_vm1, %v3142_v25  ;;  %v3704_v8 = vadd.f32 %v3688_v20, %v3671_v15  ;;  %v3912_v52 = vld [vmem:[#allocation3 + $0x38] sm:$0xff]  ;;  %v8369_v0 = vld [vmem:[#allocation2 + $0x109] sm:$0xff]  ;;  %vm10324_vm1 = vmmov %vm10172_vm0 }
 0x259   : > { %3723 = vst.msk [vmem:[#allocation3 + $0x60] sm:$0xff] %vm10311_vm15, %v3707_v6  ;;  %v3945_v58 = vadd.f32 %v3929_v49, %v3912_v52  ;;  %v4153_v10 = vld [vmem:[#allocation3 + $0x28] sm:$0xff]  ;;  %v3692_v61 = vmul.f32 %v8369_v0, %v8124_v40  ;;  %vm10325_vm15 = vmmov %vm10172_vm0 }
 0x25a   : > { %3240 = vst.msk [vmem:[#allocation3 + $0x78] sm:$0xff] %vm10312_vm6, %v3224_v43  ;;  %v3827_v63 = vld [vmem:[#allocation3 + $0x18] sm:$0xff]  ;;  %v4186_v30 = vadd.f32 %v4170_v55, %v4153_v10  ;;  %v8380_v23 = vld [vmem:[#allocation2 + $0x102] sm:$0xff]  ;;  %v8388_v55 = vperm.slane %v8257_v22, 3  ;;  %vm10326_vm6 = vmmov %vm10172_vm0 }
 0x25b   : > { %3720 = vst.msk [vmem:[#allocation3 + $0x48] sm:$0xff] %vm10313_vm12, %v3704_v8  ;;  %v3860_v54 = vadd.f32 %v3844_v19, %v3827_v63  ;;  %v4068_v48 = vld [vmem:[#allocation3 + $0x8] sm:$0xff]  ;;  %v3772_v15 = vmul.f32 %v8380_v23, %v8157_v28  ;;  %v3289_v8 = vmul.f32 %v8369_v0, %v7932_v12  ;;  %vm10327_vm12 = vmmov %vm10172_vm0 }
 0x25c   : > { %3961 = vst.msk [vmem:[#allocation3 + $0x38] sm:$0xff] %vm10314_vm9, %v3945_v58  ;;  %v4101_v25 = vadd.f32 %v4085_v41, %v4068_v48  ;;  %v3675_v5 = vld [vmem:[#allocation3 + $0x68] sm:$0xff]  ;;  %vm10328_vm9 = vmmov %vm10172_vm0 }
 0x25d   : > { %4202 = vst.msk [vmem:[#allocation3 + $0x28] sm:$0xff] %vm10315_vm2, %v4186_v30  ;;  %v3708_v6 = vadd.f32 %v3692_v61, %v3675_v5  ;;  %v8390_v19 = vld [vmem:[#allocation2 + $0xca] sm:$0xff]  ;;  %v4010_v30 = vmul.f32 %v8267_v45, %v8033_v9  ;;  %v4166_v9 = vmul.f32 %v8321_v4, %v8347_v26  ;;  %vm10329_vm2 = vmmov %vm10172_vm0 }
 0x25e   : > { %3876 = vst.msk [vmem:[#allocation3 + $0x18] sm:$0xff] %vm10172_vm0, %v3860_v54  ;;  %v3916_v20 = vld [vmem:[#allocation3 + $0x58] sm:$0xff]  ;;  %v3769_v58 = vmul.f32 %v8390_v19, %v8157_v28 }
 0x25f   : > { %4117 = vst.msk [vmem:[#allocation3 + $0x8] sm:$0xff] %vm10316_vm10, %v4101_v25  ;;  %v3949_v49 = vadd.f32 %v3933_v7, %v3916_v20  ;;  %v3190_v43 = vld [vmem:[#allocation3 + $0x70] sm:$0xff]  ;;  %v4251_v7 = vmul.f32 %v8227_v33, %v8388_v55  ;;  %v3925_v25 = vmul.f32 %v8225_v2, %v7974_v11  ;;  %vm10330_vm10 = vmmov %vm10172_vm0 }
 0x260   : > { %3724 = vst.msk [vmem:[#allocation3 + $0x68] sm:$0xff] %vm10317_vm13, %v3708_v6  ;;  %v3755_v52 = vld [vmem:[#allocation3 + $0x60] sm:$0xff]  ;;  %v3223_v27 = vadd.f32 %v3207_v17, %v3190_v43  ;;  %v8408_v33 = vld [vmem:[#allocation2 + $0x10a] sm:$0xff]  ;;  %vm10331_vm13 = vmmov %vm10172_vm0 }
 0x261   : > { %10318 = vst [vmem:[#allocation15_spill] sm:$0xff] %v8388_v55  ;;  %v3788_v10 = vadd.f32 %v3772_v15, %v3755_v52  ;;  %v3272_v41 = vld [vmem:[#allocation3 + $0x78] sm:$0xff]  ;;  %v3773_v11 = vmul.f32 %v8408_v33, %v8157_v28  ;;  %v3288_v52 = vmul.f32 %v8340_v29, %v7932_v12  ;;  %v8427_v29 = vperm.slane %v8257_v22, 4  ;;  %v8437_v22 = vld [vmem:[#allocation2 + $0xac] sm:$0xff] }
 0x262   : > { %3965 = vst.msk [vmem:[#allocation3 + $0x58] sm:$0xff] %vm10319_vm3, %v3949_v49  ;;  %v3752_v63 = vld [vmem:[#allocation3 + $0x48] sm:$0xff]  ;;  %v3305_v54 = vadd.f32 %v3289_v8, %v3272_v41  ;;  %v4014_v8 = vmul.f32 %v8267_v45, %v8318_v51  ;;  %vm10332_vm3 = vmmov %vm10172_vm0 }
 0x263   : > { %3239 = vst.msk [vmem:[#allocation3 + $0x70] sm:$0xff] %vm10320_vm7, %v3223_v27  ;;  %v3785_v48 = vadd.f32 %v3769_v58, %v3752_v63  ;;  %v3993_v61 = vld [vmem:[#allocation3 + $0x38] sm:$0xff]  ;;  %vm10333_vm7 = vmmov %vm10172_vm0 }
 0x264   : > { %3804 = vst.msk [vmem:[#allocation3 + $0x60] sm:$0xff] %vm10321_vm5, %v3788_v10  ;;  %v4026_v5 = vadd.f32 %v4010_v30, %v3993_v61  ;;  %v4234_v17 = vld [vmem:[#allocation3 + $0x28] sm:$0xff]  ;;  %vm10334_vm5 = vmmov %vm10172_vm0 }
 0x265   : > { %3321 = vst.msk [vmem:[#allocation3 + $0x78] sm:$0xff] %vm10322_vm4, %v3305_v54  ;;  %v3908_v20 = vld [vmem:[#allocation3 + $0x18] sm:$0xff]  ;;  %v4267_v6 = vadd.f32 %v4251_v7, %v4234_v17  ;;  %v8419_v10 = vld [vmem:[#allocation2 + $0x103] sm:$0xff]  ;;  %v3370_v54 = vmul.f32 %v8408_v33, %v7981_v59  ;;  %v8429_v7 = vld [vmem:[#allocation2 + $0xcb] sm:$0xff] }
 0x266   : > { %3801 = vst.msk [vmem:[#allocation3 + $0x48] sm:$0xff] %vm10323_vm11, %v3785_v48  ;;  %v3941_v15 = vadd.f32 %v3925_v25, %v3908_v20  ;;  %v4149_v49 = vld [vmem:[#allocation3 + $0x8] sm:$0xff]  ;;  %v3853_v41 = vmul.f32 %v8419_v10, %v8192_v62  ;;  %v3850_v25 = vmul.f32 %v8429_v7, %v8192_v62  ;;  %vm10335_vm4 = vmmov %vm10172_vm0 }
 0x267   : > { %4042 = vst.msk [vmem:[#allocation3 + $0x38] sm:$0xff] %vm10324_vm1, %v4026_v5  ;;  %v4182_v43 = vadd.f32 %v4166_v9, %v4149_v49  ;;  %v3756_v4 = vld [vmem:[#allocation3 + $0x68] sm:$0xff]  ;;  %v4091_v9 = vmul.f32 %v8349_v16, %v8308_v44  ;;  %vm10336_vm11 = vmmov %vm10172_vm0 }
 0x268   : > { %4283 = vst.msk [vmem:[#allocation3 + $0x28] sm:$0xff] %vm10325_vm15, %v4267_v6  ;;  %v3789_v58 = vadd.f32 %v3773_v11, %v3756_v4  ;;  %v4332_v11 = vmul.f32 %v8437_v22, %v8427_v29  ;;  %vm10337_vm1 = vmmov %vm10172_vm0 }
 0x269   : > { %3957 = vst.msk [vmem:[#allocation3 + $0x18] sm:$0xff] %vm10326_vm6, %v3941_v15  ;;  %v3997_v27 = vld [vmem:[#allocation3 + $0x58] sm:$0xff]  ;;  %vm10339_vm15 = vmmov %vm10172_vm0 }
 0x26a   : > { %4198 = vst.msk [vmem:[#allocation3 + $0x8] sm:$0xff] %vm10327_vm12, %v4182_v43  ;;  %v4030_v63 = vadd.f32 %v4014_v8, %v3997_v27  ;;  %v3271_v30 = vld [vmem:[#allocation3 + $0x70] sm:$0xff]  ;;  %v8442_v43 = vld [vmem:[#allocation2 + $0x88] sm:$0xff]  ;;  %v4247_v27 = vmul.f32 %v8360_v46, %v8388_v55  ;;  %v4095_v46 = vmul.f32 %v8369_v0, %v8308_v44  ;;  %vm10340_vm6 = vmmov %vm10172_vm0 }
 0x26b   : > { %3805 = vst.msk [vmem:[#allocation3 + $0x68] sm:$0xff] %vm10328_vm9, %v3789_v58  ;;  %v3836_v48 = vld [vmem:[#allocation3 + $0x60] sm:$0xff]  ;;  %v3304_v61 = vadd.f32 %v3288_v52, %v3271_v30  ;;  %v4006_v8 = vmul.f32 %v8442_v43, %v8267_v45  ;;  %vm10341_vm12 = vmmov %vm10172_vm0 }
 0x26c   : > { %4046 = vst.msk [vmem:[#allocation3 + $0x58] sm:$0xff] %vm10329_vm2, %v4030_v63  ;;  %v3869_v5 = vadd.f32 %v3853_v41, %v3836_v48  ;;  %v3353_v17 = vld [vmem:[#allocation3 + $0x78] sm:$0xff]  ;;  %v8450_v63 = vld [vmem:[#allocation2 + $0x104] sm:$0xff]  ;;  %vm10342_vm9 = vmmov %vm10172_vm0 }
 0x26d   : > { %v3833_v20 = vld [vmem:[#allocation3 + $0x48] sm:$0xff]  ;;  %3320 = vst.msk [vmem:[#allocation3 + $0x70] sm:$0xff] %vm10172_vm0, %v3304_v61  ;;  %v3386_v6 = vadd.f32 %v3370_v54, %v3353_v17  ;;  %v8463_v17 = vld [vmem:[%s9887_s4 + $0x20] sm:$0x1f]  ;;  %vm10343_vm2 = vmmov %vm10172_vm0 }
 0x26e   : > { %v3866_v15 = vadd.f32 %v3850_v25, %v3833_v20  ;;  %v4074_v49 = vld [vmem:[#allocation3 + $0x38] sm:$0xff]  ;;  %3885 = vst.msk [vmem:[#allocation3 + $0x60] sm:$0xff] %vm10330_vm10, %v3869_v5  ;;  %v8453_v48 = vld [vmem:[#allocation2 + $0x10b] sm:$0xff]  ;;  %vm10344_vm10 = vmmov %vm10172_vm0 }
 0x26f   : > { %v4107_v4 = vadd.f32 %v4091_v9, %v4074_v49  ;;  %v4315_v52 = vld [vmem:[#allocation3 + $0x28] sm:$0xff]  ;;  %3402 = vst.msk [vmem:[#allocation3 + $0x78] sm:$0xff] %vm10331_vm13, %v3386_v6  ;;  %v3854_v61 = vmul.f32 %v8453_v48, %v8192_v62  ;;  %v3369_v9 = vmul.f32 %v8380_v23, %v7981_v59  ;;  %v8475_v23 = vperm.slane %v8463_v17, 0  ;;  %vm10345_vm13 = vmmov %vm10172_vm0 }
 0x270   : > { %3882 = vst.msk [vmem:[#allocation3 + $0x48] sm:$0xff] %vm10332_vm3, %v3866_v15  ;;  %v3989_v58 = vld [vmem:[#allocation3 + $0x18] sm:$0xff]  ;;  %v4348_v41 = vadd.f32 %v4332_v11, %v4315_v52  ;;  %v3934_v15 = vmul.f32 %v8225_v2, %v8450_v63  ;;  %vm10346_vm3 = vmmov %vm10172_vm0 }
 0x271   : > { %v4230_v30 = vld [vmem:[#allocation3 + $0x8] sm:$0xff]  ;;  %v4022_v54 = vadd.f32 %v4006_v8, %v3989_v58  ;;  %4123 = vst.msk [vmem:[#allocation3 + $0x38] sm:$0xff] %vm10333_vm7, %v4107_v4  ;;  %v3451_v8 = vmul.f32 %v8453_v48, %v8018_v56  ;;  %vm10347_vm7 = vmmov %vm10172_vm0 }
 0x272   : > { %v4263_v25 = vadd.f32 %v4247_v27, %v4230_v30  ;;  %4364 = vst.msk [vmem:[#allocation3 + $0x28] sm:$0xff] %vm10334_vm5, %v4348_v41  ;;  %v3837_v5 = vld [vmem:[#allocation3 + $0x68] sm:$0xff]  ;;  %v3931_v27 = vmul.f32 %v8225_v2, %v8098_v57  ;;  %v4172_v30 = vmul.f32 %v8390_v19, %v8347_v26  ;;  %vm10349_vm5 = vmmov %vm10172_vm0 }
 0x273   : > { %4038 = vst.msk [vmem:[#allocation3 + $0x18] sm:$0xff] %vm10335_vm4, %v4022_v54  ;;  %v4078_v20 = vld [vmem:[#allocation3 + $0x58] sm:$0xff]  ;;  %v3870_v6 = vadd.f32 %v3854_v61, %v3837_v5  ;;  %v5935_v5 = vld [vmem:[#allocation2 + $0xc8] sm:$0xff]  ;;  %vm10350_vm4 = vmmov %vm10172_vm0 }
 0x274   : > { %4279 = vst.msk [vmem:[#allocation3 + $0x8] sm:$0xff] %vm10336_vm11, %v4263_v25  ;;  %v4111_v49 = vadd.f32 %v4095_v46, %v4078_v20  ;;  %v3352_v11 = vld [vmem:[#allocation3 + $0x70] sm:$0xff]  ;;  %vm10351_vm11 = vmmov %vm10172_vm0 }
 0x275   : > { %3886 = vst.msk [vmem:[#allocation3 + $0x68] sm:$0xff] %vm10337_vm1, %v3870_v6  ;;  %v3917_v4 = vld [vmem:[#allocation3 + $0x60] sm:$0xff]  ;;  %v3385_v52 = vadd.f32 %v3369_v9, %v3352_v11  ;;  %v4414_v9 = vmul.f32 %v5935_v5, %v8475_v23  ;;  %v8484_v20 = vld [vmem:[#allocation2 + $0x10c] sm:$0xff]  ;;  %vm10352_vm1 = vmmov %vm10172_vm0 }
 0x276   : > { %10338 = vst [vmem:[#allocation16_spill] sm:$0xff] %v8475_v23  ;;  %v3950_v58 = vadd.f32 %v3934_v15, %v3917_v4  ;;  %v3434_v41 = vld [vmem:[#allocation3 + $0x78] sm:$0xff]  ;;  %v8487_v57 = vld [vmem:[#allocation2 + $0x89] sm:$0xff] }
 0x277   : > { %4127 = vst.msk [vmem:[#allocation3 + $0x58] sm:$0xff] %vm10339_vm15, %v4111_v49  ;;  %v3914_v54 = vld [vmem:[#allocation3 + $0x48] sm:$0xff]  ;;  %v3467_v61 = vadd.f32 %v3451_v8, %v3434_v41  ;;  %v4087_v6 = vmul.f32 %v8487_v57, %v8308_v44  ;;  %vm10353_vm15 = vmmov %vm10172_vm0 }
 0x278   : > { %3401 = vst.msk [vmem:[#allocation3 + $0x70] sm:$0xff] %vm10340_vm6, %v3385_v52  ;;  %v3947_v25 = vadd.f32 %v3931_v27, %v3914_v54  ;;  %v4155_v46 = vld [vmem:[#allocation3 + $0x38] sm:$0xff]  ;;  %v5937_v11 = vld [vmem:[#allocation2 + $0x6c] sm:$0xff]  ;;  %v8494_v27 = vld [vmem:[#allocation2 + $0x120] sm:$0xff]  ;;  %v3935_v54 = vmul.f32 %v8225_v2, %v8484_v20 }
 0x279   : > { %3966 = vst.msk [vmem:[#allocation3 + $0x60] sm:$0xff] %vm10341_vm12, %v3950_v58  ;;  %v4188_v15 = vadd.f32 %v4172_v30, %v4155_v46  ;;  %v4397_v49 = vld [vmem:[#allocation3 + $0x28] sm:$0xff]  ;;  %v4328_v8 = vmul.f32 %v5937_v11, %v8427_v29  ;;  %v3532_v11 = vmul.f32 %v8053_v53, %v8484_v20  ;;  %vm10354_vm6 = vmmov %vm10172_vm0 }
 0x27a   : > { %3483 = vst.msk [vmem:[#allocation3 + $0x78] sm:$0xff] %vm10342_vm9, %v3467_v61  ;;  %v4070_v4 = vld [vmem:[#allocation3 + $0x18] sm:$0xff]  ;;  %v4430_v52 = vadd.f32 %v4414_v9, %v4397_v49  ;;  %v4176_v61 = vmul.f32 %v8408_v33, %v8347_v26  ;;  %vm10355_vm12 = vmmov %vm10172_vm0 }
 0x27b   : > { %3963 = vst.msk [vmem:[#allocation3 + $0x48] sm:$0xff] %vm10343_vm2, %v3947_v25  ;;  %v4311_v41 = vld [vmem:[#allocation3 + $0x8] sm:$0xff]  ;;  %v4103_v58 = vadd.f32 %v4087_v6, %v4070_v4  ;;  %v3450_v25 = vmul.f32 %v8419_v10, %v8018_v56  ;;  %v4015_v6 = vmul.f32 %v8267_v45, %v8494_v27  ;;  %v8512_v10 = vperm.slane %v8463_v17, 1  ;;  %vm10356_vm9 = vmmov %vm10172_vm0 }
 0x27c   : > { %4204 = vst.msk [vmem:[#allocation3 + $0x38] sm:$0xff] %vm10172_vm0, %v4188_v15  ;;  %v4344_v30 = vadd.f32 %v4328_v8, %v4311_v41  ;;  %v3918_v46 = vld [vmem:[#allocation3 + $0x68] sm:$0xff]  ;;  %vm10357_vm2 = vmmov %vm10172_vm0 }
 0x27d   : > { %4446 = vst.msk [vmem:[#allocation3 + $0x28] sm:$0xff] %vm10344_vm10, %v4430_v52  ;;  %v3951_v9 = vadd.f32 %v3935_v54, %v3918_v46  ;;  %v4012_v52 = vmul.f32 %v8134_v39, %v8267_v45  ;;  %v4253_v54 = vmul.f32 %v8429_v7, %v8388_v55  ;;  %v4495_v46 = vmul.f32 %v8349_v16, %v8512_v10  ;;  %vm10359_vm10 = vmmov %vm10172_vm0 }
 0x27e   : > { %4119 = vst.msk [vmem:[#allocation3 + $0x18] sm:$0xff] %vm10345_vm13, %v4103_v58  ;;  %v4159_v5 = vld [vmem:[#allocation3 + $0x58] sm:$0xff]  ;;  %vm10360_vm13 = vmmov %vm10172_vm0 }
 0x27f   : > { %4360 = vst.msk [vmem:[#allocation3 + $0x8] sm:$0xff] %vm10346_vm3, %v4344_v30  ;;  %v4192_v15 = vadd.f32 %v4176_v61, %v4159_v5  ;;  %v3433_v49 = vld [vmem:[#allocation3 + $0x70] sm:$0xff]  ;;  %vm10361_vm3 = vmmov %vm10172_vm0 }
 0x280   : > { %3967 = vst.msk [vmem:[#allocation3 + $0x68] sm:$0xff] %vm10347_vm7, %v3951_v9  ;;  %v3998_v8 = vld [vmem:[#allocation3 + $0x60] sm:$0xff]  ;;  %v3466_v4 = vadd.f32 %v3450_v25, %v3433_v49  ;;  %v8522_v9 = vld [vmem:[#allocation2 + $0x128] sm:$0xff]  ;;  %vm10362_vm7 = vmmov %vm10172_vm0 }
 0x281   : > { %10348 = vst [vmem:[#allocation17_spill] sm:$0xff] %v8512_v10  ;;  %v4031_v41 = vadd.f32 %v4015_v6, %v3998_v8  ;;  %v3515_v58 = vld [vmem:[#allocation3 + $0x78] sm:$0xff]  ;;  %v8525_v49 = vld [vmem:[#allocation2 + $0x8a] sm:$0xff] }
 0x282   : > { %4208 = vst.msk [vmem:[#allocation3 + $0x58] sm:$0xff] %vm10349_vm5, %v4192_v15  ;;  %v3995_v30 = vld [vmem:[#allocation3 + $0x48] sm:$0xff]  ;;  %v3548_v61 = vadd.f32 %v3532_v11, %v3515_v58  ;;  %v4168_v6 = vmul.f32 %v8525_v49, %v8347_v26  ;;  %v4410_v11 = vmul.f32 %v8442_v43, %v8475_v23  ;;  %v3531_v43 = vmul.f32 %v8053_v53, %v8450_v63  ;;  %vm10363_vm5 = vmmov %vm10172_vm0 }
 0x283   : > { %3482 = vst.msk [vmem:[#allocation3 + $0x70] sm:$0xff] %vm10350_vm4, %v3466_v4  ;;  %v4236_v25 = vld [vmem:[#allocation3 + $0x38] sm:$0xff]  ;;  %v4028_v5 = vadd.f32 %v4012_v52, %v3995_v30  ;;  %v3613_v63 = vmul.f32 %v8522_v9, %v8090_v38  ;;  %vm10364_vm4 = vmmov %vm10172_vm0 }
 0x284   : > { %4047 = vst.msk [vmem:[#allocation3 + $0x60] sm:$0xff] %vm10351_vm11, %v4031_v41  ;;  %v4269_v15 = vadd.f32 %v4253_v54, %v4236_v25  ;;  %v4478_v8 = vld [vmem:[#allocation3 + $0x28] sm:$0xff]  ;;  %v4016_v41 = vmul.f32 %v8267_v45, %v8522_v9  ;;  %v4257_v54 = vmul.f32 %v8453_v48, %v8388_v55  ;;  %vm10365_vm11 = vmmov %vm10172_vm0 }
 0x285   : > { %3564 = vst.msk [vmem:[#allocation3 + $0x78] sm:$0xff] %vm10352_vm1, %v3548_v61  ;;  %v4151_v4 = vld [vmem:[#allocation3 + $0x18] sm:$0xff]  ;;  %v4511_v16 = vadd.f32 %v4495_v46, %v4478_v8  ;;  %vm10366_vm1 = vmmov %vm10172_vm0 }
 0x286   : > { %4044 = vst.msk [vmem:[#allocation3 + $0x48] sm:$0xff] %vm10353_vm15, %v4028_v5  ;;  %v4393_v52 = vld [vmem:[#allocation3 + $0x8] sm:$0xff]  ;;  %v4184_v58 = vadd.f32 %v4168_v6, %v4151_v4  ;;  %vm10367_vm15 = vmmov %vm10172_vm0 }
 0x287   : > { %4285 = vst.msk [vmem:[#allocation3 + $0x38] sm:$0xff] %vm10354_vm6, %v4269_v15  ;;  %v4426_v30 = vadd.f32 %v4410_v11, %v4393_v52  ;;  %v3999_v61 = vld [vmem:[#allocation3 + $0x68] sm:$0xff]  ;;  %v4093_v52 = vmul.f32 %v8249_v32, %v8308_v44  ;;  %vm10368_vm6 = vmmov %vm10172_vm0 }
 0x288   : > { %4527 = vst.msk [vmem:[#allocation3 + $0x28] sm:$0xff] %vm10355_vm12, %v4511_v16  ;;  %v4032_v25 = vadd.f32 %v4016_v41, %v3999_v61  ;;  %v8543_v6 = vld [vmem:[#allocation2 + $0x121] sm:$0xff]  ;;  %v8551_v16 = vperm.slane %v8463_v17, 2  ;;  %vm10370_vm12 = vmmov %vm10172_vm0 }
 0x289   : > { %4200 = vst.msk [vmem:[#allocation3 + $0x18] sm:$0xff] %vm10356_vm9, %v4184_v58  ;;  %v4240_v46 = vld [vmem:[#allocation3 + $0x58] sm:$0xff]  ;;  %v4096_v15 = vmul.f32 %v8543_v6, %v8308_v44  ;;  %vm10371_vm9 = vmmov %vm10172_vm0 }
 0x28a   : > { %4442 = vst.msk [vmem:[#allocation3 + $0x8] sm:$0xff] %vm10357_vm2, %v4426_v30  ;;  %v4273_v5 = vadd.f32 %v4257_v54, %v4240_v46  ;;  %v3514_v8 = vld [vmem:[#allocation3 + $0x70] sm:$0xff]  ;;  %v4576_v46 = vmul.f32 %v8390_v19, %v8551_v16  ;;  %vm10372_vm2 = vmmov %vm10172_vm0 }
 0x28b   : > { %4048 = vst.msk [vmem:[#allocation3 + $0x68] sm:$0xff] %vm10172_vm0, %v4032_v25  ;;  %v4079_v11 = vld [vmem:[#allocation3 + $0x60] sm:$0xff]  ;;  %v3547_v4 = vadd.f32 %v3531_v43, %v3514_v8  ;;  %v8556_v30 = vld [vmem:[#allocation2 + $0xcc] sm:$0xff] }
 0x28c   : > { %10358 = vst [vmem:[#allocation18_spill] sm:$0xff] %v8551_v16  ;;  %v4112_v58 = vadd.f32 %v4096_v15, %v4079_v11  ;;  %v3596_v41 = vld [vmem:[#allocation3 + $0x78] sm:$0xff]  ;;  %v4334_v54 = vmul.f32 %v8556_v30, %v8427_v29 }
 0x28d   : > { %4289 = vst.msk [vmem:[#allocation3 + $0x58] sm:$0xff] %vm10359_vm10, %v4273_v5  ;;  %v4076_v61 = vld [vmem:[#allocation3 + $0x48] sm:$0xff]  ;;  %v3629_v43 = vadd.f32 %v3613_v63, %v3596_v41  ;;  %v4249_v5 = vmul.f32 %v8564_v1, %v8388_v55  ;;  %vm10373_vm10 = vmmov %vm10172_vm0 }
 0x28e   : > { %3563 = vst.msk [vmem:[#allocation3 + $0x70] sm:$0xff] %vm10360_vm13, %v3547_v4  ;;  %v4317_v25 = vld [vmem:[#allocation3 + $0x38] sm:$0xff]  ;;  %v4109_v8 = vadd.f32 %v4093_v52, %v4076_v61  ;;  %v4491_v4 = vmul.f32 %v8487_v57, %v8512_v10  ;;  %vm10374_vm13 = vmmov %vm10172_vm0 }
 0x28f   : > { %4128 = vst.msk [vmem:[#allocation3 + $0x60] sm:$0xff] %vm10361_vm3, %v4112_v58  ;;  %v4350_v15 = vadd.f32 %v4334_v54, %v4317_v25  ;;  %v4559_v11 = vld [vmem:[#allocation3 + $0x28] sm:$0xff]  ;;  %vm10375_vm3 = vmmov %vm10172_vm0 }
 0x290   : > { %3645 = vst.msk [vmem:[#allocation3 + $0x78] sm:$0xff] %vm10362_vm7, %v3629_v43  ;;  %v4232_v63 = vld [vmem:[#allocation3 + $0x18] sm:$0xff]  ;;  %v4592_v41 = vadd.f32 %v4576_v46, %v4559_v11  ;;  %v8573_v58 = vld [vmem:[#allocation2 + $0x129] sm:$0xff]  ;;  %v4338_v43 = vmul.f32 %v8427_v29, %v8484_v20  ;;  %v3612_v46 = vmul.f32 %v8090_v38, %v8494_v27  ;;  %vm10376_vm7 = vmmov %vm10172_vm0 }
 0x291   : > { %4125 = vst.msk [vmem:[#allocation3 + $0x48] sm:$0xff] %vm10363_vm5, %v4109_v8  ;;  %v4474_v19 = vld [vmem:[#allocation3 + $0x8] sm:$0xff]  ;;  %v4265_v52 = vadd.f32 %v4249_v5, %v4232_v63  ;;  %v4097_v61 = vmul.f32 %v8573_v58, %v8308_v44  ;;  %v3694_v63 = vmul.f32 %v8573_v58, %v8124_v40  ;;  %vm10377_vm5 = vmmov %vm10172_vm0 }
 0x292   : > { %4366 = vst.msk [vmem:[#allocation3 + $0x38] sm:$0xff] %vm10364_vm4, %v4350_v15  ;;  %v4507_v54 = vadd.f32 %v4491_v4, %v4474_v19  ;;  %v4080_v57 = vld [vmem:[#allocation3 + $0x68] sm:$0xff]  ;;  %v8592_v19 = vperm.slane %v8463_v17, 3  ;;  %vm10378_vm4 = vmmov %vm10172_vm0 }
 0x293   : > { %4608 = vst.msk [vmem:[#allocation3 + $0x28] sm:$0xff] %vm10365_vm11, %v4592_v41  ;;  %v4113_v8 = vadd.f32 %v4097_v61, %v4080_v57  ;;  %v8584_v15 = vld [vmem:[#allocation2 + $0x122] sm:$0xff]  ;;  %v8603_v38 = vld [vmem:[#allocation2 + $0x8c] sm:$0xff]  ;;  %vm10379_vm11 = vmmov %vm10172_vm0 }
 0x294   : > { %4281 = vst.msk [vmem:[#allocation3 + $0x18] sm:$0xff] %vm10366_vm1, %v4265_v52  ;;  %v4321_v25 = vld [vmem:[#allocation3 + $0x58] sm:$0xff]  ;;  %v4177_v11 = vmul.f32 %v8584_v15, %v8347_v26  ;;  %v4174_v52 = vmul.f32 %v8294_v60, %v8347_v26  ;;  %vm10380_vm1 = vmmov %vm10172_vm0 }
 0x295   : > { %4523 = vst.msk [vmem:[#allocation3 + $0x8] sm:$0xff] %vm10367_vm15, %v4507_v54  ;;  %v4354_v5 = vadd.f32 %v4338_v43, %v4321_v25  ;;  %v3595_v4 = vld [vmem:[#allocation3 + $0x70] sm:$0xff]  ;;  %v4416_v43 = vmul.f32 %v8475_v23, %v8134_v39  ;;  %v4572_v39 = vmul.f32 %v8525_v49, %v8551_v16  ;;  %v4420_v49 = vmul.f32 %v8475_v23, %v8522_v9  ;;  %vm10381_vm15 = vmmov %vm10172_vm0 }
 0x296   : > { %4129 = vst.msk [vmem:[#allocation3 + $0x68] sm:$0xff] %vm10368_vm6, %v4113_v8  ;;  %v4160_v41 = vld [vmem:[#allocation3 + $0x60] sm:$0xff]  ;;  %v3628_v27 = vadd.f32 %v3612_v46, %v3595_v4  ;;  %v4657_v46 = vmul.f32 %v8429_v7, %v8592_v19  ;;  %vm10382_vm6 = vmmov %vm10172_vm0 }
 0x297   : > { %10369 = vst [vmem:[#allocation19_spill] sm:$0xff] %v8592_v19  ;;  %v4193_v61 = vadd.f32 %v4177_v11, %v4160_v41  ;;  %v3677_v54 = vld [vmem:[#allocation3 + $0x78] sm:$0xff] }
 0x298   : > { %4370 = vst.msk [vmem:[#allocation3 + $0x58] sm:$0xff] %vm10370_vm12, %v4354_v5  ;;  %v4157_v57 = vld [vmem:[#allocation3 + $0x48] sm:$0xff]  ;;  %v3710_v25 = vadd.f32 %v3694_v63, %v3677_v54  ;;  %v4330_v5 = vmul.f32 %v8603_v38, %v8427_v29  ;;  %vm10383_vm12 = vmmov %vm10172_vm0 }
 0x299   : > { %3644 = vst.msk [vmem:[#allocation3 + $0x70] sm:$0xff] %vm10371_vm9, %v3628_v27  ;;  %v4399_v8 = vld [vmem:[#allocation3 + $0x38] sm:$0xff]  ;;  %v4190_v4 = vadd.f32 %v4174_v52, %v4157_v57  ;;  %vm10384_vm9 = vmmov %vm10172_vm0 }
 0x29a   : > { %4209 = vst.msk [vmem:[#allocation3 + $0x60] sm:$0xff] %vm10372_vm2, %v4193_v61  ;;  %v4432_v11 = vadd.f32 %v4416_v43, %v4399_v8  ;;  %v4640_v41 = vld [vmem:[#allocation3 + $0x28] sm:$0xff]  ;;  %vm10385_vm2 = vmmov %vm10172_vm0 }
 0x29b   : > { %3726 = vst.msk [vmem:[#allocation3 + $0x78] sm:$0xff] %vm10172_vm0, %v3710_v25  ;;  %v4313_v63 = vld [vmem:[#allocation3 + $0x18] sm:$0xff]  ;;  %v4673_v27 = vadd.f32 %v4657_v46, %v4640_v41  ;;  %v8612_v61 = vld [vmem:[#allocation2 + $0x12a] sm:$0xff]  ;;  %v3693_v25 = vmul.f32 %v8543_v6, %v8124_v40  ;;  %v8631_v6 = vperm.slane %v8463_v17, 4 }
 0x29c   : > { %4206 = vst.msk [vmem:[#allocation3 + $0x48] sm:$0xff] %vm10373_vm10, %v4190_v4  ;;  %v4555_v7 = vld [vmem:[#allocation3 + $0x8] sm:$0xff]  ;;  %v4346_v52 = vadd.f32 %v4330_v5, %v4313_v63  ;;  %v4178_v54 = vmul.f32 %v8612_v61, %v8347_v26  ;;  %vm10386_vm10 = vmmov %vm10172_vm0 }
 0x29d   : > { %4448 = vst.msk [vmem:[#allocation3 + $0x38] sm:$0xff] %vm10374_vm13, %v4432_v11  ;;  %v4588_v43 = vadd.f32 %v4572_v39, %v4555_v7  ;;  %v4161_v57 = vld [vmem:[#allocation3 + $0x68] sm:$0xff]  ;;  %v3775_v39 = vmul.f32 %v8612_v61, %v8157_v28  ;;  %vm10387_vm13 = vmmov %vm10172_vm0 }
 0x29e   : > { %4689 = vst.msk [vmem:[#allocation3 + $0x28] sm:$0xff] %vm10375_vm3, %v4673_v27  ;;  %v4194_v46 = vadd.f32 %v4178_v54, %v4161_v57  ;;  %v8623_v4 = vld [vmem:[#allocation2 + $0x123] sm:$0xff]  ;;  %v4255_v27 = vmul.f32 %v8332_v18, %v8388_v55  ;;  %v4497_v54 = vmul.f32 %v8249_v32, %v8512_v10  ;;  %v4653_v32 = vmul.f32 %v8564_v1, %v8592_v19  ;;  %vm10388_vm3 = vmmov %vm10172_vm0 }
 0x29f   : > { %4362 = vst.msk [vmem:[#allocation3 + $0x18] sm:$0xff] %vm10376_vm7, %v4346_v52  ;;  %v4403_v8 = vld [vmem:[#allocation3 + $0x58] sm:$0xff]  ;;  %v4258_v5 = vmul.f32 %v8623_v4, %v8388_v55  ;;  %v4501_v1 = vmul.f32 %v8573_v58, %v8512_v10  ;;  %vm10389_vm7 = vmmov %vm10172_vm0 }
 0x2a0   : > { %4604 = vst.msk [vmem:[#allocation3 + $0x8] sm:$0xff] %vm10377_vm5, %v4588_v43  ;;  %v4436_v11 = vadd.f32 %v4420_v49, %v4403_v8  ;;  %v3676_v41 = vld [vmem:[#allocation3 + $0x70] sm:$0xff]  ;;  %v4738_v49 = vmul.f32 %v8556_v30, %v8631_v6  ;;  %vm10390_vm5 = vmmov %vm10172_vm0 }
 0x2a1   : > { %4210 = vst.msk [vmem:[#allocation3 + $0x68] sm:$0xff] %vm10378_vm4, %v4194_v46  ;;  %v4241_v9 = vld [vmem:[#allocation3 + $0x60] sm:$0xff]  ;;  %v3709_v63 = vadd.f32 %v3693_v25, %v3676_v41  ;;  %v4412_v46 = vmul.f32 %v8277_v47, %v8475_v23  ;;  %vm10391_vm4 = vmmov %vm10172_vm0 }
 0x2a2   : > { %4452 = vst.msk [vmem:[#allocation3 + $0x58] sm:$0xff] %vm10379_vm11, %v4436_v11  ;;  %v4274_v7 = vadd.f32 %v4258_v5, %v4241_v9  ;;  %v3758_v52 = vld [vmem:[#allocation3 + $0x78] sm:$0xff]  ;;  %v8649_v9 = vld [vmem:[#allocation2 + $0x124] sm:$0xff]  ;;  %vm10392_vm11 = vmmov %vm10172_vm0 }
 0x2a3   : > { %v4238_v43 = vld [vmem:[#allocation3 + $0x48] sm:$0xff]  ;;  %3725 = vst.msk [vmem:[#allocation3 + $0x70] sm:$0xff] %vm10380_vm1, %v3709_v63  ;;  %v3791_v57 = vadd.f32 %v3775_v39, %v3758_v52  ;;  %v3774_v52 = vmul.f32 %v8584_v15, %v8157_v28  ;;  %vm10393_vm1 = vmmov %vm10172_vm0 }
 0x2a4   : > { %v4480_v25 = vld [vmem:[#allocation3 + $0x38] sm:$0xff]  ;;  %v4271_v17 = vadd.f32 %v4255_v27, %v4238_v43  ;;  %4290 = vst.msk [vmem:[#allocation3 + $0x60] sm:$0xff] %vm10381_vm15, %v4274_v7  ;;  %v8651_v63 = vld [vmem:[#allocation2 + $0x12b] sm:$0xff]  ;;  %vm10394_vm15 = vmmov %vm10172_vm0 }
 0x2a5   : > { %v4513_v8 = vadd.f32 %v4497_v54, %v4480_v25  ;;  %v4721_v5 = vld [vmem:[#allocation3 + $0x28] sm:$0xff]  ;;  %3807 = vst.msk [vmem:[#allocation3 + $0x78] sm:$0xff] %vm10382_vm6, %v3791_v57  ;;  %v4259_v47 = vmul.f32 %v8651_v63, %v8388_v55  ;;  %v4339_v57 = vmul.f32 %v8427_v29, %v8649_v9  ;;  %vm10395_vm6 = vmmov %vm10172_vm0 }
 0x2a6   : > { %v4395_v11 = vld [vmem:[#allocation3 + $0x18] sm:$0xff]  ;;  %v4754_v41 = vadd.f32 %v4738_v49, %v4721_v5  ;;  %4287 = vst.msk [vmem:[#allocation3 + $0x48] sm:$0xff] %vm10383_vm12, %v4271_v17  ;;  %v3856_v17 = vmul.f32 %v8651_v63, %v8192_v62  ;;  %v8667_v5 = vld [vmem:[#allocation2 + $0x62] sm:$0xff]  ;;  %vm10396_vm12 = vmmov %vm10172_vm0 }
 0x2a7   : > { %v4636_v39 = vld [vmem:[#allocation3 + $0x8] sm:$0xff]  ;;  %v4428_v30 = vadd.f32 %v4412_v46, %v4395_v11  ;;  %4529 = vst.msk [vmem:[#allocation3 + $0x38] sm:$0xff] %vm10384_vm9, %v4513_v8  ;;  %v2604_v46 = vld [vmem:[#allocation3] sm:$0xff]  ;;  %v2621_v15 = vmul.f32 %v8667_v5, %v7362_v42  ;;  %vm10397_vm9 = vmmov %vm10172_vm0 }
 0x2a8   : > { %v4669_v27 = vadd.f32 %v4653_v32, %v4636_v39  ;;  %4770 = vst.msk [vmem:[#allocation3 + $0x28] sm:$0xff] %vm10385_vm2, %v4754_v41  ;;  %v4242_v7 = vld [vmem:[#allocation3 + $0x68] sm:$0xff]  ;;  %v4336_v32 = vmul.f32 %v8427_v29, %v8275_v13  ;;  %v4578_v39 = vmul.f32 %v8294_v60, %v8551_v16  ;;  %vm10398_vm2 = vmmov %vm10172_vm0 }
 0x2a9   : > { %4444 = vst.msk [vmem:[#allocation3 + $0x18] sm:$0xff] %vm10172_vm0, %v4428_v30  ;;  %v4275_v54 = vadd.f32 %v4259_v47, %v4242_v7  ;;  %v4484_v43 = vld [vmem:[#allocation3 + $0x58] sm:$0xff]  ;;  %v2637_v13 = vadd.f32 %v2621_v15, %v2604_v46  ;;  %v8696_v15 = vld [vmem:[#allocation2 + $0x140] sm:$0xff] }
 0x2aa   : > { %4685 = vst.msk [vmem:[#allocation3 + $0x8] sm:$0xff] %vm10386_vm10, %v4669_v27  ;;  %v4517_v49 = vadd.f32 %v4501_v1, %v4484_v43  ;;  %v3757_v25 = vld [vmem:[#allocation3 + $0x70] sm:$0xff]  ;;  %v8680_v27 = vld [vmem:[%s9888_s5] ss:$0 sm:$0xff]  ;;  %vm10399_vm10 = vmmov %vm10172_vm0 }
 0x2ab   : > { %4291 = vst.msk [vmem:[#allocation3 + $0x68] sm:$0xff] %vm10387_vm13, %v4275_v54  ;;  %v4322_v58 = vld [vmem:[#allocation3 + $0x60] sm:$0xff]  ;;  %v3790_v8 = vadd.f32 %v3774_v52, %v3757_v25  ;;  %v8682_v52 = vld [vmem:[#allocation2 + $0x12c] sm:$0xff]  ;;  %vm10400_vm13 = vmmov %vm10172_vm0 }
 0x2ac   : > { %4533 = vst.msk [vmem:[#allocation3 + $0x58] sm:$0xff] %vm10388_vm3, %v4517_v49  ;;  %v4355_v11 = vadd.f32 %v4339_v57, %v4322_v58  ;;  %v3839_v41 = vld [vmem:[#allocation3 + $0x78] sm:$0xff]  ;;  %v5949_v54 = vld [vmem:[#allocation2 + $0xa9] sm:$0xff]  ;;  %v4734_v49 = vmul.f32 %v8603_v38, %v8631_v6  ;;  %v4340_v46 = vmul.f32 %v8427_v29, %v8682_v52  ;;  %v4582_v38 = vmul.f32 %v8612_v61, %v8551_v16  ;;  %vm10401_vm3 = vmmov %vm10172_vm0 }
 0x2ad   : > { %v4319_v30 = vld [vmem:[#allocation3 + $0x48] sm:$0xff]  ;;  %3806 = vst.msk [vmem:[#allocation3 + $0x70] sm:$0xff] %vm10389_vm7, %v3790_v8  ;;  %v3872_v47 = vadd.f32 %v3856_v17, %v3839_v41  ;;  %v4493_v43 = vmul.f32 %v5949_v54, %v8512_v10  ;;  %v4421_v54 = vmul.f32 %v8475_v23, %v8696_v15  ;;  %v3937_v61 = vmul.f32 %v8225_v2, %v8682_v52  ;;  %vm10402_vm7 = vmmov %vm10172_vm0 }
 0x2ae   : > { %v4561_v7 = vld [vmem:[#allocation3 + $0x38] sm:$0xff]  ;;  %v4352_v1 = vadd.f32 %v4336_v32, %v4319_v30  ;;  %4371 = vst.msk [vmem:[#allocation3 + $0x60] sm:$0xff] %vm10390_vm5, %v4355_v11  ;;  %v3855_v30 = vmul.f32 %v8623_v4, %v8192_v62  ;;  %vm10403_vm5 = vmmov %vm10172_vm0 }
 0x2af   : > { %v4594_v60 = vadd.f32 %v4578_v39, %v4561_v7  ;;  %v4786_v57 = vld [vmem:[#allocation3 + $0x28] sm:$0xff]  ;;  %3888 = vst.msk [vmem:[#allocation3 + $0x78] sm:$0xff] %vm10391_vm4, %v3872_v47  ;;  %v3571_v39 = vld [vmem:[#allocation2 + $0xa0] sm:$0xff]  ;;  %vm10404_vm4 = vmmov %vm10172_vm0 }
 0x2b0   : > { %v4476_v25 = vld [vmem:[#allocation3 + $0x18] sm:$0xff]  ;;  %v8690_v17 = vadd.f32 %v8680_v27, %v4786_v57  ;;  %4368 = vst.msk [vmem:[#allocation3 + $0x48] sm:$0xff] %vm10392_vm11, %v4352_v1  ;;  %v2798_v4 = vmul.f32 %v3571_v39, %v7602_v36  ;;  %vm10405_vm11 = vmmov %vm10172_vm0 }
 0x2b1   : > { %v4717_v58 = vld [vmem:[#allocation3 + $0x8] sm:$0xff]  ;;  %v4509_v8 = vadd.f32 %v4493_v43, %v4476_v25  ;;  %4610 = vst.msk [vmem:[#allocation3 + $0x38] sm:$0xff] %vm10393_vm1, %v4594_v60  ;;  %v2781_v60 = vld [vmem:[#allocation3 + $0x50] sm:$0xff]  ;;  %v4418_v25 = vmul.f32 %v8475_v23, %v8318_v51  ;;  %vm10406_vm1 = vmmov %vm10172_vm0 }
 0x2b2   : > { %v4750_v32 = vadd.f32 %v4734_v49, %v4717_v58  ;;  %v5545_v11 = vmul.f32 -1.442695, %v8690_v17  ;;  %v4323_v41 = vld [vmem:[#allocation3 + $0x68] sm:$0xff]  ;;  %2653 = vst.msk [vmem:[#allocation3] sm:$0xff] %vm10394_vm15, %v2637_v13  ;;  %v2610_v51 = vld [vmem:[#allocation3 + $0x30] sm:$0xff]  ;;  %vm10407_vm15 = vmmov %vm10172_vm0 }
 0x2b3   : > { %4525 = vst.msk [vmem:[#allocation3 + $0x18] sm:$0xff] %vm10395_vm6, %v4509_v8  ;;  %v4356_v47 = vadd.f32 %v4340_v46, %v4323_v41  ;;  %v4565_v7 = vld [vmem:[#allocation3 + $0x58] sm:$0xff]  ;;  %v2594_v49 = vld [vmem:[#allocation2 + $0xc2] sm:$0xff]  ;;  %v4659_v46 = vmul.f32 %v8332_v18, %v8592_v19  ;;  %vm10408_vm6 = vmmov %vm10172_vm0 }
 0x2b4   : > { %4766 = vst.msk [vmem:[#allocation3 + $0x8] sm:$0xff] %vm10396_vm12, %v4750_v32  ;;  %5810 = vpow2.f32 %v5545_v11  ;;  %v4598_v1 = vadd.f32 %v4582_v38, %v4565_v7  ;;  %v3838_v43 = vld [vmem:[#allocation3 + $0x70] sm:$0xff]  ;;  %v2368_v11 = vld [vmem:[#allocation3 + $0x40] sm:$0xff]  ;;  %v2814_v7 = vadd.f32 %v2798_v4, %v2781_v60  ;;  %vm10409_vm12 = vmmov %vm10172_vm0 }
 0x2b5   : > { %4372 = vst.msk [vmem:[#allocation3 + $0x68] sm:$0xff] %vm10397_vm9, %v4356_v47  ;;  %v4404_v13 = vld [vmem:[#allocation3 + $0x60] sm:$0xff]  ;;  %v3871_v57 = vadd.f32 %v3855_v30, %v3838_v43  ;;  %vm10410_vm9 = vmmov %vm10172_vm0 }
 0x2b6   : > { %4614 = vst.msk [vmem:[#allocation3 + $0x58] sm:$0xff] %vm10398_vm2, %v4598_v1  ;;  %v4437_v58 = vadd.f32 %v4421_v54, %v4404_v13  ;;  %v3920_v8 = vld [vmem:[#allocation3 + $0x78] sm:$0xff]  ;;  %v8718_v38 = vld [vmem:[#allocation2 + $0xc2] sm:$0xff]  ;;  %v2627_v1 = vmul.f32 %v7362_v42, %v2594_v49  ;;  %v5951_v54 = vld [vmem:[#allocation2 + $0xaa] sm:$0xff] }
 0x2b7   : > { %v4401_v32 = vld [vmem:[#allocation3 + $0x48] sm:$0xff]  ;;  %3887 = vst.msk [vmem:[#allocation3 + $0x70] sm:$0xff] %vm10172_vm0, %v3871_v57  ;;  %v3953_v41 = vadd.f32 %v3937_v61, %v3920_v8  ;;  %v2385_v39 = vmul.f32 %v8718_v38, %v6989_v35  ;;  %v4574_v18 = vmul.f32 %v5951_v54, %v8551_v16  ;;  %v4663_v8 = vmul.f32 %v8651_v63, %v8592_v19  ;;  %v2443_v63 = vld [vmem:[#allocation3 + $0x10] sm:$0xff]  ;;  %vm10411_vm2 = vmmov %vm10172_vm0 }
 0x2b8   : > { %v4642_v30 = vld [vmem:[#allocation3 + $0x38] sm:$0xff]  ;;  %v4434_v47 = vadd.f32 %v4418_v25, %v4401_v32  ;;  %4453 = vst.msk [vmem:[#allocation3 + $0x60] sm:$0xff] %vm10399_vm10, %v4437_v58  ;;  %v2856_v58 = vld [vmem:[#allocation3 + $0x20] sm:$0xff]  ;;  %v2643_v60 = vadd.f32 %v2627_v1, %v2610_v51  ;;  %v3936_v32 = vmul.f32 %v8225_v2, %v8649_v9  ;;  %v4499_v9 = vmul.f32 %v8369_v0, %v8512_v10  ;;  %vm10412_vm10 = vmmov %vm10172_vm0 }
 0x2b9   : > { %v4675_v43 = vadd.f32 %v4659_v46, %v4642_v30  ;;  %3969 = vst.msk [vmem:[#allocation3 + $0x78] sm:$0xff] %vm10400_vm13, %v3953_v41  ;;  %v2401_v57 = vadd.f32 %v2385_v39, %v2368_v11  ;;  %v5952_v4 = vld [vmem:[#allocation2 + $0x41] sm:$0xff]  ;;  %vm10413_vm13 = vmmov %vm10172_vm0 }
 0x2ba   : > { %v5811_v61 = vpop.eup %5810  ;;  %v4557_v13 = vld [vmem:[#allocation3 + $0x18] sm:$0xff]  ;;  %4450 = vst.msk [vmem:[#allocation3 + $0x48] sm:$0xff] %vm10401_vm3, %v4434_v47  ;;  %v2873_v49 = vmul.f32 %v5952_v4, %v7641_v37  ;;  %v3985_v46 = vld [vmem:[#allocation2 + $0x148] sm:$0xff] }
 0x2bb   : > { %v4590_v35 = vadd.f32 %v4574_v18, %v4557_v13  ;;  %4691 = vst.msk [vmem:[#allocation3 + $0x38] sm:$0xff] %vm10402_vm7, %v4675_v43  ;;  %v8728_v25 = vadd.f32 1.0, %v5811_v61  ;;  %v4018_v51 = vmul.f32 %v8267_v45, %v3985_v46  ;;  %v5954_v18 = vld [vmem:[#allocation2 + $0xec] sm:$0xff]  ;;  %vm10414_vm7 = vmmov %vm10172_vm0 }
 0x2bc   : > { %2830 = vst.msk [vmem:[#allocation3 + $0x50] sm:$0xff] %vm10403_vm5, %v2814_v7  ;;  %v2889_v30 = vadd.f32 %v2873_v49, %v2856_v58  ;;  %v8741_v7 = vld [vmem:[#allocation2 + $0x63] sm:$0xff]  ;;  %v4740_v43 = vmul.f32 %v5954_v18, %v8631_v6  ;;  %v5955_v4 = vld [vmem:[#allocation2 + $0xab] sm:$0xff]  ;;  %vm10415_vm5 = vmmov %vm10172_vm0 }
 0x2bd   : > { %4606 = vst.msk [vmem:[#allocation3 + $0x18] sm:$0xff] %vm10404_vm4, %v4590_v35  ;;  %5812 = vrcp.f32 %v8728_v25  ;;  %v4646_v11 = vld [vmem:[#allocation3 + $0x58] sm:$0xff]  ;;  %v2460_v1 = vmul.f32 %v8741_v7, %v7048_v24  ;;  %v4655_v0 = vmul.f32 %v5955_v4, %v8592_v19  ;;  %v4967_v18 = vand.u32 2147483648, %v8728_v25 }
 0x2be   : > { %v4679_v41 = vadd.f32 %v4663_v8, %v4646_v11  ;;  %v3919_v39 = vld [vmem:[#allocation3 + $0x70] sm:$0xff]  ;;  %2417 = vst.msk [vmem:[#allocation3 + $0x40] sm:$0xff] %vm10405_vm11, %v2401_v57  ;;  %v4422_v8 = vmul.f32 %v8475_v23, %v3985_v46  ;;  %v4965_v4 = vand.u32 2147483647, %v8728_v25  ;;  %vm4961_vm4 = vweird.f32 %v8728_v25  ;;  %vm10416_vm11 = vmmov %vm10172_vm0 }
 0x2bf   : > { %v3952_v47 = vadd.f32 %v3936_v32, %v3919_v39  ;;  %2659 = vst.msk [vmem:[#allocation3 + $0x30] sm:$0xff] %vm10406_vm1, %v2643_v60  ;;  %v2476_v58 = vadd.f32 %v2460_v1, %v2443_v63  ;;  %v2685_v39 = vld [vmem:[#allocation3] sm:$0xff] }
 0x2c0   : > { %4695 = vst.msk [vmem:[#allocation3 + $0x58] sm:$0xff] %vm10407_vm15, %v4679_v41  ;;  %v4001_v54 = vld [vmem:[#allocation3 + $0x78] sm:$0xff]  ;;  %v4405_v41 = vld [vmem:[#allocation3 + $0x68] sm:$0xff]  ;;  %vm10417_vm15 = vmmov %vm10172_vm0 }
 0x2c1   : > { %v4482_v61 = vld [vmem:[#allocation3 + $0x48] sm:$0xff]  ;;  %3968 = vst.msk [vmem:[#allocation3 + $0x70] sm:$0xff] %vm10408_vm6, %v3952_v47  ;;  %v4034_v13 = vadd.f32 %v4018_v51, %v4001_v54  ;;  %v4438_v51 = vadd.f32 %v4422_v8, %v4405_v41  ;;  %v4485_v54 = vld [vmem:[#allocation3 + $0x60] sm:$0xff]  ;;  %vm4966_vm6 = vcmp.eq.f32.partialorder %v4965_v4, 8.507059e+37 }
 0x2c2   : > { %v4723_v57 = vld [vmem:[#allocation3 + $0x38] sm:$0xff]  ;;  %v4515_v35 = vadd.f32 %v4499_v9, %v4482_v61  ;;  %2905 = vst.msk [vmem:[#allocation3 + $0x20] sm:$0xff] %vm10409_vm12, %v2889_v30  ;;  %v2702_v30 = vmul.f32 %v8741_v7, %v7554_v34  ;;  %v8762_v63 = vld [vmem:[#allocation2 + $0x141] sm:$0xff]  ;;  %v4744_v9 = vmul.f32 %v8631_v6, %v8682_v52  ;;  %v4017_v61 = vmul.f32 %v8267_v45, %v8696_v15  ;;  %vm10418_vm12 = vmmov %vm10172_vm0 }
 0x2c3   : > { %v8751_v60 = vpop.eup %5812  ;;  %v4756_v49 = vadd.f32 %v4740_v43, %v4723_v57  ;;  %4050 = vst.msk [vmem:[#allocation3 + $0x78] sm:$0xff] %vm10410_vm9, %v4034_v13  ;;  %v4502_v46 = vmul.f32 %v8762_v63, %v8512_v10  ;;  %vm10419_vm9 = vmmov %vm10172_vm0  ;;  %v8809_v4 = vld [vmem:[#allocation2 + $0x142] sm:$0xff] }
 0x2c4   : > { %v4638_v32 = vld [vmem:[#allocation3 + $0x18] sm:$0xff]  ;;  %v4957_v11 = vmul.f32 %v8751_v60, %v8728_v25  ;;  %4531 = vst.msk [vmem:[#allocation3 + $0x48] sm:$0xff] %vm10411_vm2, %v4515_v35  ;;  %v2718_v57 = vadd.f32 %v2702_v30, %v2685_v39  ;;  %vm4962_vm3 = vweird.f32 %v8751_v60  ;;  %v8783_v39 = vld [vmem:[#allocation2 + $0xc3] sm:$0xff]  ;;  %vm10421_vm2 = vmmov %vm10172_vm0 }
 0x2c5   : > { %v4671_v47 = vadd.f32 %v4655_v0, %v4638_v32  ;;  %4772 = vst.msk [vmem:[#allocation3 + $0x38] sm:$0xff] %vm10172_vm0, %v4756_v49  ;;  %v4518_v13 = vadd.f32 %v4502_v46, %v4485_v54  ;;  %v8777_v49 = vld [vmem:[#allocation2 + $0xa1] sm:$0xff]  ;;  %v5958_v32 = vld [vmem:[#allocation2 + $0x149] sm:$0xff]  ;;  %v2466_v30 = vmul.f32 %v8783_v39, %v7048_v24  ;;  %vm4963_vm1 = vmor %vm4961_vm4, %vm4962_vm3 }
 0x2c6   : > { %v4958_v1 = vsub.f32 1.0, %v4957_v11  ;;  %2492 = vst.msk [vmem:[#allocation3 + $0x10] sm:$0xff] %vm10412_vm10, %v2476_v58  ;;  %v2862_v58 = vld [vmem:[#allocation3 + $0x50] sm:$0xff]  ;;  %v2879_v8 = vmul.f32 %v8777_v49, %v7641_v37  ;;  %v4099_v11 = vmul.f32 %v5958_v32, %v8308_v44  ;;  %v2449_v41 = vld [vmem:[#allocation3 + $0x40] sm:$0xff]  ;;  %vm10422_vm10 = vmmov %vm10172_vm0 }
 0x2c7   : > { %4687 = vst.msk [vmem:[#allocation3 + $0x18] sm:$0xff] %vm10413_vm13, %v4671_v47  ;;  %v4727_v43 = vld [vmem:[#allocation3 + $0x58] sm:$0xff]  ;;  %vm5191_vm13 = vcmask 257024   ;;  %vm10423_vm3 = vmmov %vm10172_vm0 }
 0x2c8   : > { %v4959_v35 = vmul.f32 %v8751_v60, %v4958_v1  ;;  %v4760_v52 = vadd.f32 %v4744_v9, %v4727_v43  ;;  %v4000_v0 = vld [vmem:[#allocation3 + $0x70] sm:$0xff]  ;;  %4454 = vst.msk [vmem:[#allocation3 + $0x68] sm:$0xff] %vm10414_vm7, %v4438_v51  ;;  %v4580_v51 = vmul.f32 %v8408_v33, %v8551_v16  ;;  %v2675_v1 = vld [vmem:[#allocation2 + $0xc3] sm:$0xff]  ;;  %v4968_v9 = vor.u32 1.1754944e-38, %v4967_v18  ;;  %vm10424_vm7 = vmmov %vm10172_vm0 }
 0x2c9   : > { %v4033_v15 = vadd.f32 %v4017_v61, %v4000_v0  ;;  %4534 = vst.msk [vmem:[#allocation3 + $0x60] sm:$0xff] %vm10415_vm5, %v4518_v13  ;;  %v2895_v43 = vadd.f32 %v2879_v8, %v2862_v58  ;;  %v2482_v61 = vadd.f32 %v2466_v30, %v2449_v41  ;;  %v4736_v13 = vmul.f32 %v8437_v22, %v8631_v6  ;;  %vm10425_vm5 = vmmov %vm10172_vm0 }
 0x2ca   : > { %v4960_v47 = vadd.f32 %v8751_v60, %v4959_v35  ;;  %4776 = vst.msk [vmem:[#allocation3 + $0x58] sm:$0xff] %vm10416_vm11, %v4760_v52  ;;  %v4082_v46 = vld [vmem:[#allocation3 + $0x78] sm:$0xff]  ;;  %v2691_v52 = vld [vmem:[#allocation3 + $0x30] sm:$0xff]  ;;  %v2708_v18 = vmul.f32 %v7554_v34, %v2675_v1  ;;  %vm10426_vm4 = vmmov %vm10172_vm0 }
 0x2cb   : > { %v4563_v54 = vld [vmem:[#allocation3 + $0x48] sm:$0xff]  ;;  %4049 = vst.msk [vmem:[#allocation3 + $0x70] sm:$0xff] %vm10417_vm15, %v4033_v15  ;;  %v4115_v24 = vadd.f32 %v4099_v11, %v4082_v46  ;;  %v4098_v11 = vmul.f32 %v8762_v63, %v8308_v44  ;;  %vm10427_vm11 = vmmov %vm10172_vm0  ;;  %vm10429_vm15 = vcmask 64512  }
 0x2cc   : > { %v4964_v25 = vsel %vm4963_vm1, %v8751_v60, %v4960_v47  ;;  %v4596_v33 = vadd.f32 %v4580_v51, %v4563_v54  ;;  %2734 = vst.msk [vmem:[#allocation3] sm:$0xff] %vm10418_vm12, %v2718_v57  ;;  %v4583_v57 = vmul.f32 %v8809_v4, %v8551_v16  ;;  %v2724_v15 = vadd.f32 %v2708_v18, %v2691_v52  ;;  %v2755_v51 = vld [vmem:[#allocation2] sm:$0xff]  ;;  %vm10428_vm1 = vmmov %vm10172_vm0 }
 0x2cd   : > { %v4969_v35 = vsel %vm4966_vm6, %v4968_v9, %v4964_v25  ;;  %4131 = vst.msk [vmem:[#allocation3 + $0x78] sm:$0xff] %vm10419_vm9, %v4115_v24  ;;  %v4503_v47 = vmul.f32 %v5958_v32, %v8512_v10  ;;  %v2937_v9 = vld [vmem:[#allocation3 + $0x20] sm:$0xff]  ;;  %v5962_v32 = vld [vmem:[#allocation2 + $0x14a] sm:$0xff]  ;;  %vm10430_vm6 = vmmov %vm10172_vm0 }
 0x2ce   : > { %v4719_v0 = vld [vmem:[#allocation3 + $0x18] sm:$0xff]  ;;  %v8806_v58 = vmul.f32 %v4969_v35, %v8690_v17  ;;  %4612 = vst.msk [vmem:[#allocation3 + $0x48] sm:$0xff] %vm10421_vm2, %v4596_v33  ;;  %v8828_v54 = vld [vmem:[#allocation2 + $0x42] sm:$0xff]  ;;  %v2525_v33 = vld [vmem:[#allocation3 + $0x10] sm:$0xff]  ;;  %v4661_v35 = vmul.f32 %v8453_v48, %v8592_v19 }
 0x2cf   : > { %v4752_v60 = vadd.f32 %v4736_v13, %v4719_v0  ;;  %2911 = vst.msk [vmem:[#allocation3 + $0x50] sm:$0xff] %vm10172_vm0, %v2895_v43  ;;  %v4486_v30 = vld [vmem:[#allocation3 + $0x68] sm:$0xff]  ;;  %v2954_v63 = vmul.f32 %v8828_v54, %v7666_v3  ;;  %v4180_v43 = vmul.f32 %v5962_v32, %v8347_v26  ;;  %vm10431_vm12 = vmmov %vm10172_vm0 }
 0x2d0   : > { %10420 = vst [vmem:[#allocation20_spill] sm:$0xff] %v8806_v58  ;;  %v5180_v22 = vpack.c.bf16 %v8806_v58, %v8806_v58  ;;  %v4566_v8 = vld [vmem:[#allocation3 + $0x60] sm:$0xff]  ;;  %v4519_v25 = vadd.f32 %v4503_v47, %v4486_v30  ;;  %vm10432_vm9 = vmmov %vm10172_vm0 }
 0x2d1   : > { %2498 = vst.msk [vmem:[#allocation3 + $0x40] sm:$0xff] %vm10422_vm10, %v2482_v61  ;;  %v4792_v17 = vld [vmem:[#allocation3 + $0x58] sm:$0xff]  ;;  %v4599_v41 = vadd.f32 %v4583_v57, %v4566_v8  ;;  %v8834_v61 = vld [vmem:[#allocation2 + $0x81] sm:$0xff]  ;;  %v5590_v8 = vld [vmem:[%s6272_s17 + $0xb0] sm:$0xff] }
 0x2d2   : > { %4768 = vst.msk [vmem:[#allocation3 + $0x18] sm:$0xff] %vm10423_vm3, %v4752_v60  ;;  %v8826_v46 = vadd.f32 %v8680_v27, %v4792_v17  ;;  %v4081_v1 = vld [vmem:[#allocation3 + $0x70] sm:$0xff]  ;;  %v2542_v13 = vmul.f32 %v8834_v61, %v7267_v50  ;;  %v2788_v60 = vmul.f32 %v7602_v36, %v2755_v51  ;;  %v2970_v17 = vadd.f32 %v2954_v63, %v2937_v9  ;;  %v5965_v9 = vld [vmem:[#allocation2 + $0xe1] sm:$0xff]  ;;  %vm10433_vm2 = vmmov %vm10172_vm0 }
 0x2d3   : > { %5197 = vst.msk [vmem:[%s8821_s18 + $0x14] sm:$0xf] %vm5191_vm13, %v5180_v22  ;;  %v4114_v24 = vadd.f32 %v4098_v11, %v4081_v1  ;;  %v2771_v0 = vld [vmem:[#allocation3] sm:$0xff]  ;;  %5490 = vmatmul.msk.bf16.gmra.mxu3 %vm10429_vm15, %v5590_v8  ;;  %v2548_v63 = vmul.f32 %v5965_v9, %v7267_v50  ;;  %vm10434_vm10 = vmmov %vm10172_vm0 }
 0x2d4   : > { %4615 = vst.msk [vmem:[#allocation3 + $0x60] sm:$0xff] %vm10424_vm7, %v4599_v41  ;;  %v5551_v52 = vmul.f32 -1.442695, %v8826_v46  ;;  %v4163_v18 = vld [vmem:[#allocation3 + $0x78] sm:$0xff]  ;;  %v8845_v11 = vld [vmem:[#allocation2 + $0xa2] sm:$0xff]  ;;  %v2804_v51 = vadd.f32 %v2788_v60, %v2771_v0  ;;  %v4179_v0 = vmul.f32 %v8809_v4, %v8347_v26  ;;  %v4742_v4 = vmul.f32 %v8631_v6, %v8484_v20  ;;  %vm10435_vm3 = vmmov %vm10172_vm0 }
 0x2d5   : > { %2740 = vst.msk [vmem:[#allocation3 + $0x30] sm:$0xff] %vm10425_vm5, %v2724_v15  ;;  %v4644_v57 = vld [vmem:[#allocation3 + $0x48] sm:$0xff]  ;;  %v4196_v22 = vadd.f32 %v4180_v43, %v4163_v18  ;;  %v2960_v41 = vmul.f32 %v8845_v11, %v7666_v3  ;;  %v2558_v15 = vadd.f32 %v2542_v13, %v2525_v33  ;;  %v8852_v1 = vld [vmem:[#allocation2 + $0x60] sm:$0xff]  ;;  %vm10436_vm7 = vmmov %vm10172_vm0 }
 0x2d6   : > { %4130 = vst.msk [vmem:[#allocation3 + $0x70] sm:$0xff] %vm10426_vm4, %v4114_v24  ;;  %v4677_v48 = vadd.f32 %v4661_v35, %v4644_v57  ;;  %5814 = vpow2.f32 %v5551_v52  ;;  %v2943_v30 = vld [vmem:[#allocation3 + $0x50] sm:$0xff]  ;;  %v2794_v50 = vmul.f32 %v7602_v36, %v8852_v1  ;;  %vm10437_vm5 = vmmov %vm10172_vm0 }
 0x2d7   : > { %4535 = vst.msk [vmem:[#allocation3 + $0x68] sm:$0xff] %vm10427_vm11, %v4519_v25  ;;  %v2976_v43 = vadd.f32 %v2960_v41, %v2943_v30  ;;  %v8859_v25 = vld [vmem:[#allocation2 + $0x143] sm:$0xff]  ;;  %vm10438_vm4 = vmmov %vm10172_vm0 }
 0x2d8   : > { %4212 = vst.msk [vmem:[#allocation3 + $0x78] sm:$0xff] %vm10428_vm1, %v4196_v22  ;;  %v2531_v47 = vld [vmem:[#allocation3 + $0x40] sm:$0xff]  ;;  %v4664_v33 = vmul.f32 %v8859_v25, %v8592_v19  ;;  %vm10439_vm11 = vmmov %vm10172_vm0 }
 0x2d9   : > { %v4784_v24 = vld [vmem:[#allocation3 + $0x18] sm:$0xff]  ;;  %4693 = vst.msk [vmem:[#allocation3 + $0x48] sm:$0xff] %vm10430_vm6, %v4677_v48  ;;  %v2564_v52 = vadd.f32 %v2548_v63, %v2531_v47  ;;  %v2836_v47 = vld [vmem:[#allocation2 + $0x1] sm:$0xff]  ;;  %vm10440_vm1 = vmmov %vm10172_vm0 }
 0x2da   : > { %v8857_v35 = vadd.f32 %v8680_v27, %v4784_v24  ;;  %2986 = vst.msk [vmem:[#allocation3 + $0x20] sm:$0xff] %vm10431_vm12, %v2970_v17  ;;  %v4584_v17 = vmul.f32 %v5962_v32, %v8551_v16  ;;  %v8880_v32 = vld [vmem:[#allocation2 + $0x43] sm:$0xff]  ;;  %vm10441_vm15 = vmmov %vm10172_vm0  ;;  %v5591_v16 = vld [vmem:[%s6272_s17 + $0xb8] sm:$0xff] }
 0x2db   : > { %v4647_v13 = vld [vmem:[#allocation3 + $0x60] sm:$0xff]  ;;  %2574 = vst.msk [vmem:[#allocation3 + $0x10] sm:$0xff] %vm10432_vm9, %v2558_v15  ;;  %vm10442_vm6 = vmmov %vm10172_vm0 }
 0x2dc   : > { %v5543_v18 = vmul.f32 -1.442695, %v8857_v35  ;;  %v4680_v60 = vadd.f32 %v4664_v33, %v4647_v13  ;;  %v2777_v57 = vld [vmem:[#allocation3 + $0x30] sm:$0xff]  ;;  %2820 = vst.msk [vmem:[#allocation3] sm:$0xff] %vm10433_vm2, %v2804_v51  ;;  %v5815_v22 = vpop.eup %5814  ;;  %v8886_v13 = vld [vmem:[#allocation2 + $0x82] sm:$0xff]  ;;  %vm10443_vm12 = vmmov %vm10172_vm0  ;;  %vm10445_vm2 = vcmask 64512  }
 0x2dd   : > { %v4162_v8 = vld [vmem:[#allocation3 + $0x70] sm:$0xff]  ;;  %2992 = vst.msk [vmem:[#allocation3 + $0x50] sm:$0xff] %vm10172_vm0, %v2976_v43  ;;  %v8873_v41 = vadd.f32 1.0, %v5815_v22  ;;  %v2810_v15 = vadd.f32 %v2794_v50, %v2777_v57  ;;  %v3035_v43 = vmul.f32 %v8880_v32, %v7766_v31  ;;  %v2623_v20 = vmul.f32 %v8886_v13, %v7362_v42  ;;  %vm10444_vm9 = vmmov %vm10172_vm0 }
 0x2de   : > { %5816 = vpow2.f32 %v5543_v18  ;;  %v4195_v48 = vadd.f32 %v4179_v0, %v4162_v8  ;;  %4696 = vst.msk [vmem:[#allocation3 + $0x60] sm:$0xff] %vm10434_vm10, %v4680_v60  ;;  %v4567_v30 = vld [vmem:[#allocation3 + $0x68] sm:$0xff]  ;;  %v2869_v60 = vmul.f32 %v7641_v37, %v2836_v47  ;;  %vm10446_vm10 = vmmov %vm10172_vm0 }
 0x2df   : > { %v4244_v9 = vld [vmem:[#allocation3 + $0x78] sm:$0xff]  ;;  %v5967_v51 = vld [vmem:[#allocation2 + $0x14b] sm:$0xff]  ;;  %v4600_v24 = vadd.f32 %v4584_v17, %v4567_v30  ;;  %2580 = vst.msk [vmem:[#allocation3 + $0x40] sm:$0xff] %vm10435_vm3, %v2564_v52  ;;  %5818 = vrcp.f32 %v8873_v41  ;;  %v8895_v8 = vld [vmem:[#allocation2 + $0xa3] sm:$0xff] }
 0x2e0   : > { %v4261_v63 = vmul.f32 %v5967_v51, %v8388_v55  ;;  %v4725_v33 = vld [vmem:[#allocation3 + $0x48] sm:$0xff]  ;;  %4211 = vst.msk [vmem:[#allocation3 + $0x70] sm:$0xff] %vm10436_vm7, %v4195_v48  ;;  %v3041_v17 = vmul.f32 %v8895_v8, %v7766_v31  ;;  %vm10447_vm3 = vmmov %vm10172_vm0 }
 0x2e1   : > { %v4758_v50 = vadd.f32 %v4742_v4, %v4725_v33  ;;  %v8890_v18 = vld [vmem:[#allocation2 + $0x144] sm:$0xff]  ;;  %4616 = vst.msk [vmem:[#allocation3 + $0x68] sm:$0xff] %vm10437_vm5, %v4600_v24  ;;  %vm10448_vm5 = vmmov %vm10172_vm0 }
 0x2e2   : > { %v4277_v0 = vadd.f32 %v4261_v63, %v4244_v9  ;;  %v3018_v52 = vld [vmem:[#allocation3 + $0x20] sm:$0xff]  ;;  %v2606_v22 = vld [vmem:[#allocation3 + $0x10] sm:$0xff]  ;;  %2826 = vst.msk [vmem:[#allocation3 + $0x30] sm:$0xff] %vm10438_vm4, %v2810_v15  ;;  %v4745_v9 = vmul.f32 %v8631_v6, %v8890_v18  ;;  %vm10449_vm4 = vmmov %vm10172_vm0 }
 0x2e3   : > { %v3051_v57 = vadd.f32 %v3035_v43, %v3018_v52  ;;  %4774 = vst.msk [vmem:[#allocation3 + $0x48] sm:$0xff] %vm10439_vm11, %v4758_v50  ;;  %v2852_v48 = vld [vmem:[#allocation3] sm:$0xff]  ;;  %v2639_v30 = vadd.f32 %v2623_v20, %v2606_v22  ;;  %v4260_v22 = vmul.f32 %v8859_v25, %v8388_v55  ;;  %5491 = vmatmul.msk.bf16.gmra.mxu3 %vm10445_vm2, %v5591_v16  ;;  %vm5051_vm11 = vweird.f32 %v8873_v41 }
 0x2e4   : > { %v5817_v4 = vpop.eup %5816  ;;  %4293 = vst.msk [vmem:[#allocation3 + $0x78] sm:$0xff] %vm10440_vm1, %v4277_v0  ;;  %v3024_v47 = vld [vmem:[#allocation3 + $0x50] sm:$0xff]  ;;  %v2885_v63 = vadd.f32 %v2869_v60, %v2852_v48  ;;  %v2917_v50 = vld [vmem:[#allocation2 + $0x2] sm:$0xff]  ;;  %vm10450_vm1 = vmmov %vm10172_vm0 }
 0x2e5   : > { %v8903_v24 = vadd.f32 1.0, %v5817_v4  ;;  %v4728_v15 = vld [vmem:[#allocation3 + $0x60] sm:$0xff]  ;;  %3067 = vst.msk [vmem:[#allocation3 + $0x20] sm:$0xff] %vm10441_vm15, %v3051_v57  ;;  %v3057_v43 = vadd.f32 %v3041_v17, %v3024_v47  ;;  %v8906_v33 = vpop.eup %5818  ;;  %v4309_v48 = vld [vmem:[#allocation2 + $0x14c] sm:$0xff]  ;;  %v4665_v4 = vmul.f32 %v5967_v51, %v8592_v19 }
 0x2e6   : > { %v5971_v52 = vld [vmem:[#allocation2 + $0xe2] sm:$0xff]  ;;  %v4761_v58 = vadd.f32 %v4745_v9, %v4728_v15  ;;  %2655 = vst.msk [vmem:[#allocation3 + $0x10] sm:$0xff] %vm10442_vm6, %v2639_v30  ;;  %v5047_v25 = vmul.f32 %v8906_v33, %v8873_v41  ;;  %v2950_v15 = vmul.f32 %v7666_v3, %v2917_v50  ;;  %v4342_v50 = vmul.f32 %v8427_v29, %v4309_v48 }
 0x2e7   : > { %v2629_v20 = vmul.f32 %v5971_v52, %v7362_v42  ;;  %v2612_v0 = vld [vmem:[#allocation3 + $0x40] sm:$0xff]  ;;  %5820 = vrcp.f32 %v8903_v24  ;;  %v4243_v17 = vld [vmem:[#allocation3 + $0x70] sm:$0xff]  ;;  %2901 = vst.msk [vmem:[#allocation3] sm:$0xff] %vm10443_vm12, %v2885_v63  ;;  %vm5052_vm7 = vweird.f32 %v8906_v33  ;;  %vm10451_vm12 = vmmov %vm10172_vm0 }
 0x2e8   : > { %v8913_v60 = vld [vmem:[#allocation2 + $0x61] sm:$0xff]  ;;  %v4276_v9 = vadd.f32 %v4260_v22, %v4243_v17  ;;  %4777 = vst.msk [vmem:[#allocation3 + $0x60] sm:$0xff] %vm10444_vm9, %v4761_v58  ;;  %v5048_v16 = vsub.f32 1.0, %v5047_v25  ;;  %vm5053_vm15 = vmor %vm5051_vm11, %vm5052_vm7 }
 0x2e9   : > { %v2875_v57 = vmul.f32 %v8913_v60, %v7641_v37  ;;  %v8920_v42 = vld [vmem:[#allocation2 + $0x44] sm:$0xff]  ;;  %v2645_v47 = vadd.f32 %v2629_v20, %v2612_v0  ;;  %v2858_v10 = vld [vmem:[#allocation3 + $0x30] sm:$0xff]  ;;  %3073 = vst.msk [vmem:[#allocation3 + $0x50] sm:$0xff] %vm10172_vm0, %v3057_v43  ;;  %v5057_v43 = vand.u32 2147483648, %v8873_v41  ;;  %vm10452_vm9 = vmmov %vm10172_vm0 }
 0x2ea   : > { %v4648_v30 = vld [vmem:[#allocation3 + $0x68] sm:$0xff]  ;;  %4292 = vst.msk [vmem:[#allocation3 + $0x70] sm:$0xff] %vm10446_vm10, %v4276_v9  ;;  %v3116_v0 = vmul.f32 %v7816_v21, %v8920_v42  ;;  %v5049_v25 = vmul.f32 %v8906_v33, %v5048_v16  ;;  %vm4931_vm10 = vweird.f32 %v8903_v24  ;;  %vm10455_vm7 = vmmov %vm10172_vm0 }
 0x2eb   : > { %v8927_v52 = vld [vmem:[#allocation2 + $0x83] sm:$0xff]  ;;  %v4681_v19 = vadd.f32 %v4665_v4, %v4648_v30  ;;  %v2891_v20 = vadd.f32 %v2875_v57, %v2858_v10  ;;  %v5055_v4 = vand.u32 2147483647, %v8873_v41  ;;  %v4325_v30 = vld [vmem:[#allocation3 + $0x78] sm:$0xff]  ;;  %2661 = vst.msk [vmem:[#allocation3 + $0x40] sm:$0xff] %vm10448_vm5, %v2645_v47 }
 0x2ec   : > { %v2704_v51 = vmul.f32 %v8927_v52, %v7554_v34  ;;  %v8931_v63 = vld [vmem:[#allocation2 + $0xa4] sm:$0xff]  ;;  %v4358_v10 = vadd.f32 %v4342_v50, %v4325_v30  ;;  %v5050_v50 = vadd.f32 %v8906_v33, %v5049_v25 }
 0x2ed   : > { %v5974_v22 = vld [vmem:[#allocation2 + $0xe3] sm:$0xff]  ;;  %4697 = vst.msk [vmem:[#allocation3 + $0x68] sm:$0xff] %vm10447_vm3, %v4681_v19  ;;  %v8952_v9 = vpop.eup %5820  ;;  %v4746_v19 = vmul.f32 %v8631_v6, %v4309_v48  ;;  %v2687_v55 = vld [vmem:[#allocation3 + $0x10] sm:$0xff]  ;;  %vm5056_vm6 = vcmp.eq.f32.partialorder %v5055_v4, 8.507059e+37  ;;  %vm10454_vm3 = vmmov %vm10172_vm0 }
 0x2ee   : > { %v8935_v58 = vmul.f32 %v5974_v22, %v7554_v34  ;;  %v4790_v17 = vld [vmem:[#allocation3 + $0x48] sm:$0xff]  ;;  %v3122_v34 = vmul.f32 %v7816_v21, %v8931_v63  ;;  %v3099_v57 = vld [vmem:[#allocation3 + $0x20] sm:$0xff]  ;;  %2907 = vst.msk [vmem:[#allocation3 + $0x30] sm:$0xff] %vm10449_vm4, %v2891_v20  ;;  %v4927_v16 = vmul.f32 %v8952_v9, %v8903_v24  ;;  %v2720_v47 = vadd.f32 %v2704_v51, %v2687_v55  ;;  %vm10456_vm4 = vmmov %vm10172_vm0 }
 0x2ef   : > { %v8942_v23 = vadd.f32 %v8680_v27, %v4790_v17  ;;  %v4341_v17 = vmul.f32 %v8427_v29, %v8890_v18  ;;  %v3132_v26 = vadd.f32 %v3116_v0, %v3099_v57  ;;  %4374 = vst.msk [vmem:[#allocation3 + $0x78] sm:$0xff] %vm10450_vm1, %v4358_v10  ;;  %v2933_v30 = vld [vmem:[#allocation3] sm:$0xff]  ;;  %v5058_v18 = vor.u32 1.1754944e-38, %v5057_v43  ;;  %vm10457_vm1 = vmmov %vm10172_vm0 }
 0x2f0   : > { %v4793_v48 = vld [vmem:[#allocation3 + $0x60] sm:$0xff]  ;;  %v2966_v20 = vadd.f32 %v2950_v15, %v2933_v30  ;;  %v4928_v0 = vsub.f32 1.0, %v4927_v16  ;;  %v4935_v57 = vand.u32 2147483647, %v8903_v24  ;;  %v5054_v25 = vsel %vm5053_vm15, %v8906_v33, %v5050_v50  ;;  %2736 = vst.msk [vmem:[#allocation3 + $0x10] sm:$0xff] %vm10452_vm9, %v2720_v47  ;;  %v3105_v55 = vld [vmem:[#allocation3 + $0x50] sm:$0xff]  ;;  %vm10458_vm15 = vmmov %vm10172_vm0 }
 0x2f1   : > { %v5549_v22 = vmul.f32 -1.442695, %v8942_v23  ;;  %3148 = vst.msk [vmem:[#allocation3 + $0x20] sm:$0xff] %vm10451_vm12, %v3132_v26  ;;  %v8970_v41 = vadd.f32 %v8680_v27, %v4793_v48  ;;  %vm4932_vm2 = vweird.f32 %v8952_v9  ;;  %v4937_v51 = vand.u32 2147483648, %v8903_v24  ;;  %v4324_v43 = vld [vmem:[#allocation3 + $0x70] sm:$0xff]  ;;  %vm10460_vm12 = vmmov %vm10172_vm0 }
 0x2f2   : > { %v5059_v4 = vsel %vm5056_vm6, %v5058_v18, %v5054_v25  ;;  %2982 = vst.msk [vmem:[#allocation3] sm:$0xff] %vm10172_vm0, %v2966_v20  ;;  %v3138_v26 = vadd.f32 %v3122_v34, %v3105_v55  ;;  %v4929_v15 = vmul.f32 %v8952_v9, %v4928_v0  ;;  %v4357_v33 = vadd.f32 %v4341_v17, %v4324_v43  ;;  %v2693_v30 = vld [vmem:[#allocation3 + $0x40] sm:$0xff]  ;;  %vm4933_vm5 = vmor %vm4931_vm10, %vm4932_vm2 }
 0x2f3   : > { %5822 = vpow2.f32 %v5549_v22  ;;  %v8978_v10 = vmul.f32 %v5059_v4, %v8826_v46  ;;  %v5552_v22 = vmul.f32 -1.442695, %v8970_v41  ;;  %v2956_v50 = vmul.f32 %v8667_v5, %v7666_v3  ;;  %v2998_v18 = vld [vmem:[#allocation2 + $0x3] sm:$0xff]  ;;  %vm10459_vm6 = vmmov %vm10172_vm0 }
 0x2f4   : > { %v4729_v16 = vld [vmem:[#allocation3 + $0x68] sm:$0xff]  ;;  %3154 = vst.msk [vmem:[#allocation3 + $0x50] sm:$0xff] %vm10454_vm3, %v3138_v26  ;;  %v8985_v34 = vld [vmem:[#allocation2 + $0x20] sm:$0xff]  ;;  %v4930_v46 = vadd.f32 %v8952_v9, %v4929_v15  ;;  %v2726_v48 = vadd.f32 %v8935_v58, %v2693_v30  ;;  %v4938_v0 = vor.u32 1.1754944e-38, %v4937_v51  ;;  %vm4936_vm11 = vcmp.eq.f32.partialorder %v4935_v57, 8.507059e+37  ;;  %vm10461_vm9 = vmmov %vm10172_vm0 }
 0x2f5   : > { %10453 = vst [vmem:[#allocation21_spill] sm:$0xff] %v8978_v10  ;;  %v4762_v47 = vadd.f32 %v4746_v19, %v4729_v16  ;;  %v5186_v17 = vpack.c.bf16 %v8978_v10, %v8978_v10  ;;  %5824 = vpow2.f32 %v5552_v22  ;;  %v2939_v20 = vld [vmem:[#allocation3 + $0x30] sm:$0xff]  ;;  %v3197_v19 = vmul.f32 %v7874_v14, %v8852_v1  ;;  %v9011_v57 = vld [vmem:[#allocation2 + $0xc0] sm:$0xff]  ;;  %vm10462_vm2 = vmmov %vm10172_vm0 }
 0x2f6   : > { %4373 = vst.msk [vmem:[#allocation3 + $0x70] sm:$0xff] %vm10455_vm7, %v4357_v33  ;;  %v2972_v25 = vadd.f32 %v2956_v50, %v2939_v20  ;;  %v4934_v55 = vsel %vm4933_vm5, %v8952_v9, %v4930_v46  ;;  %v3031_v43 = vmul.f32 %v7766_v31, %v2998_v18  ;;  %v2790_v26 = vmul.f32 %v7602_v36, %v8985_v34  ;;  %v2763_v46 = vld [vmem:[#allocation2 + $0x80] sm:$0xff]  ;;  %vm10463_vm3 = vmmov %vm10172_vm0 }
 0x2f7   : > { %4778 = vst.msk [vmem:[#allocation3 + $0x68] sm:$0xff] %vm10456_vm4, %v4762_v47  ;;  %v4939_v15 = vsel %vm4936_vm11, %v4938_v0, %v4934_v55  ;;  %v2773_v51 = vld [vmem:[#allocation3 + $0x10] sm:$0xff]  ;;  %v3203_v16 = vmul.f32 %v9011_v57, %v7874_v14  ;;  %v2796_v0 = vmul.f32 %v7602_v36, %v2763_v46  ;;  %vm10464_vm7 = vmmov %vm10172_vm0 }
 0x2f8   : > { %5203 = vst.msk [vmem:[%s8821_s18 + $0x2c] sm:$0xf] %vm5191_vm13, %v5186_v17  ;;  %v3180_v58 = vld [vmem:[#allocation3 + $0x20] sm:$0xff]  ;;  %v9007_v22 = vmul.f32 %v4939_v15, %v8857_v35  ;;  %v2806_v50 = vadd.f32 %v2790_v26, %v2773_v51  ;;  %vm10465_vm4 = vmmov %vm10172_vm0 }
 0x2f9   : > { %v5823_v24 = vpop.eup %5822  ;;  %2742 = vst.msk [vmem:[#allocation3 + $0x40] sm:$0xff] %vm10457_vm1, %v2726_v48  ;;  %v3213_v33 = vadd.f32 %v3197_v19, %v3180_v58  ;;  %v3014_v9 = vld [vmem:[#allocation3] sm:$0xff]  ;;  %v3037_v19 = vmul.f32 %v8741_v7, %v7766_v31 }
 0x2fa   : > { %v8998_v4 = vadd.f32 1.0, %v5823_v24  ;;  %2988 = vst.msk [vmem:[#allocation3 + $0x30] sm:$0xff] %vm10458_vm15, %v2972_v25  ;;  %v3047_v47 = vadd.f32 %v3031_v43, %v3014_v9  ;;  %v5178_v35 = vpack.c.bf16 %v9007_v22, %v9007_v22  ;;  %v3079_v58 = vld [vmem:[#allocation2 + $0x4] sm:$0xff]  ;;  %v3278_v43 = vmul.f32 %v8913_v60, %v7932_v12  ;;  %vm10466_vm15 = vmmov %vm10172_vm0 }
 0x2fb   : > { %3229 = vst.msk [vmem:[#allocation3 + $0x20] sm:$0xff] %vm10459_vm6, %v3213_v33  ;;  %v5825_v30 = vpop.eup %5824  ;;  %v3186_v18 = vld [vmem:[#allocation3 + $0x50] sm:$0xff] }
 0x2fc   : > { %5826 = vrcp.f32 %v8998_v4  ;;  %v9018_v17 = vadd.f32 1.0, %v5825_v30  ;;  %2822 = vst.msk [vmem:[#allocation3 + $0x10] sm:$0xff] %vm10460_vm12, %v2806_v50  ;;  %v3219_v48 = vadd.f32 %v3203_v16, %v3186_v18  ;;  %v9036_v50 = vld [vmem:[#allocation2 + $0x21] sm:$0xff]  ;;  %v3112_v30 = vmul.f32 %v7816_v21, %v3079_v58  ;;  %vm10467_vm12 = vmmov %vm10172_vm0 }
 0x2fd   : > { %5195 = vst.msk [vmem:[%s8821_s18 + $0xc] sm:$0xf] %vm5191_vm13, %v5178_v35  ;;  %v2871_v36 = vmul.f32 %v9036_v50, %v7641_v37  ;;  %v5027_v35 = vand.u32 2147483648, %v8998_v4  ;;  %vm5021_vm5 = vweird.f32 %v8998_v4 }
 0x2fe   : > { %v4794_v20 = vld [vmem:[#allocation3 + $0x68] sm:$0xff]  ;;  %5828 = vrcp.f32 %v9018_v17  ;;  %3063 = vst.msk [vmem:[#allocation3] sm:$0xff] %vm10461_vm9, %v3047_v47  ;;  %vm5066_vm9 = vweird.f32 %v9018_v17 }
 0x2ff   : > { %v9029_v25 = vadd.f32 %v8680_v27, %v4794_v20  ;;  %3235 = vst.msk [vmem:[#allocation3 + $0x50] sm:$0xff] %vm10462_vm2, %v3219_v48  ;;  %v5025_v20 = vand.u32 2147483647, %v8998_v4 }
 0x300   : > { %v2779_v55 = vld [vmem:[#allocation3 + $0x40] sm:$0xff] }
 0x301   : > { %v3020_v15 = vld [vmem:[#allocation3 + $0x30] sm:$0xff]  ;;  %v5553_v51 = vmul.f32 -1.442695, %v9029_v25  ;;  %v2812_v33 = vadd.f32 %v2796_v0, %v2779_v55  ;;  %v2844_v0 = vld [vmem:[#allocation2 + $0x81] sm:$0xff]  ;;  %vm5026_vm1 = vcmp.eq.f32.partialorder %v5025_v20, 8.507059e+37  ;;  %v3359_v20 = vmul.f32 %v8667_v5, %v7981_v59 }
 0x302   : > { %v5827_v24 = vpop.eup %5826  ;;  %v3053_v9 = vadd.f32 %v3037_v19, %v3020_v15  ;;  %v3261_v16 = vld [vmem:[#allocation3 + $0x20] sm:$0xff] }
 0x303   : > { %v5017_v26 = vmul.f32 %v5827_v24, %v8998_v4  ;;  %v3294_v47 = vadd.f32 %v3278_v43, %v3261_v16  ;;  %5830 = vpow2.f32 %v5553_v51  ;;  %2828 = vst.msk [vmem:[#allocation3 + $0x40] sm:$0xff] %vm10172_vm0, %v2812_v33  ;;  %v2854_v18 = vld [vmem:[#allocation3 + $0x10] sm:$0xff]  ;;  %vm5022_vm10 = vweird.f32 %v5827_v24  ;;  %v9045_v55 = vld [vmem:[#allocation2 + $0xc1] sm:$0xff] }
 0x304   : > { %v5829_v46 = vpop.eup %5828  ;;  %v2887_v19 = vadd.f32 %v2871_v36, %v2854_v18  ;;  %3069 = vst.msk [vmem:[#allocation3 + $0x30] sm:$0xff] %vm10463_vm3, %v3053_v9  ;;  %v3284_v58 = vmul.f32 %v9045_v55, %v7932_v12  ;;  %v9053_v16 = vld [vmem:[#allocation2 + $0x64] sm:$0xff]  ;;  %vm5023_vm11 = vmor %vm5021_vm5, %vm5022_vm10  ;;  %v5028_v9 = vor.u32 1.1754944e-38, %v5027_v35  ;;  %v2877_v18 = vmul.f32 %v7641_v37, %v2844_v0 }
 0x305   : > { %v5018_v27 = vsub.f32 1.0, %v5017_v26  ;;  %v5062_v43 = vmul.f32 %v5829_v46, %v9018_v17  ;;  %v3095_v26 = vld [vmem:[#allocation3] sm:$0xff]  ;;  %3310 = vst.msk [vmem:[#allocation3 + $0x20] sm:$0xff] %vm10464_vm7, %v3294_v47  ;;  %v5072_v47 = vand.u32 2147483648, %v9018_v17  ;;  %vm5067_vm6 = vweird.f32 %v5829_v46  ;;  %vm10468_vm10 = vmmov %vm10463_vm3 }
 0x306   : > { %2903 = vst.msk [vmem:[#allocation3 + $0x10] sm:$0xff] %vm10465_vm4, %v2887_v19  ;;  %v3128_v51 = vadd.f32 %v3112_v30, %v3095_v26  ;;  %v3267_v33 = vld [vmem:[#allocation3 + $0x50] sm:$0xff]  ;;  %v5070_v30 = vand.u32 2147483647, %v9018_v17  ;;  %v3118_v35 = vmul.f32 %v7816_v21, %v9053_v16  ;;  %v9071_v26 = vld [vmem:[#allocation2 + $0x22] sm:$0xff]  ;;  %vm5068_vm2 = vmor %vm5066_vm9, %vm5067_vm6 }
 0x307   : > { %v5019_v48 = vmul.f32 %v5827_v24, %v5018_v27  ;;  %v5063_v36 = vsub.f32 1.0, %v5062_v43  ;;  %v3300_v27 = vadd.f32 %v3284_v58, %v3267_v33  ;;  %vm10469_vm7 = vmmov %vm10463_vm3 }
 0x308   : > { %3144 = vst.msk [vmem:[#allocation3] sm:$0xff] %vm10466_vm15, %v3128_v51  ;;  %v5073_v51 = vor.u32 1.1754944e-38, %v5072_v47  ;;  %vm5071_vm0 = vcmp.eq.f32.partialorder %v5070_v30, 8.507059e+37  ;;  %v3365_v47 = vmul.f32 %v8718_v38, %v7981_v59  ;;  %vm10470_vm5 = vmmov %vm10463_vm3 }
 0x309   : > { %v5020_v15 = vadd.f32 %v5827_v24, %v5019_v48  ;;  %v5831_v4 = vpop.eup %5830  ;;  %v5064_v19 = vmul.f32 %v5829_v46, %v5063_v36  ;;  %3316 = vst.msk [vmem:[#allocation3 + $0x50] sm:$0xff] %vm10467_vm12, %v3300_v27  ;;  %v3193_v27 = vmul.f32 %v7874_v14, %v8985_v34  ;;  %vm10471_vm4 = vmmov %vm10463_vm3 }
 0x30a   : > { %v9066_v37 = vadd.f32 1.0, %v5831_v4  ;;  %vm10473_vm15 = vmmov %vm10463_vm3 }
 0x30b   : > { %v5024_v10 = vsel %vm5023_vm11, %v5827_v24, %v5020_v15  ;;  %v2860_v24 = vld [vmem:[#allocation3 + $0x40] sm:$0xff]  ;;  %v5065_v0 = vadd.f32 %v5829_v46, %v5064_v19  ;;  %v3101_v43 = vld [vmem:[#allocation3 + $0x30] sm:$0xff]  ;;  %v2952_v15 = vmul.f32 %v9071_v26, %v7666_v3  ;;  %vm10472_vm11 = vmmov %vm10463_vm3 }
 0x30c   : > { %v5029_v48 = vsel %vm5026_vm1, %v5028_v9, %v5024_v10  ;;  %v2893_v10 = vadd.f32 %v2877_v18, %v2860_v24  ;;  %5832 = vrcp.f32 %v9066_v37  ;;  %v3342_v5 = vld [vmem:[#allocation3 + $0x20] sm:$0xff]  ;;  %v3134_v9 = vadd.f32 %v3118_v35, %v3101_v43  ;;  %vm10474_vm12 = vmmov %vm10463_vm3 }
 0x30d   : > { %v9064_v58 = vmul.f32 %v5029_v48, %v8942_v23  ;;  %v5069_v33 = vsel %vm5068_vm2, %v5829_v46, %v5065_v0  ;;  %v2935_v17 = vld [vmem:[#allocation3 + $0x10] sm:$0xff]  ;;  %v3375_v36 = vadd.f32 %v3359_v20, %v3342_v5  ;;  %v2925_v19 = vld [vmem:[#allocation2 + $0x82] sm:$0xff]  ;;  %vm5081_vm6 = vweird.f32 %v9066_v37  ;;  %vm10475_vm2 = vmmov %vm10463_vm3 }
 0x30e   : > { %2909 = vst.msk [vmem:[#allocation3 + $0x40] sm:$0xff] %vm10468_vm10, %v2893_v10  ;;  %v5074_v18 = vsel %vm5071_vm0, %v5073_v51, %v5069_v33  ;;  %v2968_v4 = vadd.f32 %v2952_v15, %v2935_v17  ;;  %v9094_v0 = vld [vmem:[#allocation2 + $0x80] sm:$0xff]  ;;  %v2958_v38 = vmul.f32 %v7666_v3, %v2925_v19  ;;  %v3440_v51 = vmul.f32 %v8741_v7, %v8018_v56  ;;  %vm10476_vm10 = vmmov %vm10475_vm2 }
 0x30f   : > { %v5184_v23 = vpack.c.bf16 %v9064_v58, %v9064_v58  ;;  %v9087_v48 = vmul.f32 %v5074_v18, %v8970_v41  ;;  %3150 = vst.msk [vmem:[#allocation3 + $0x30] sm:$0xff] %vm10463_vm3, %v3134_v9  ;;  %v3176_v46 = vld [vmem:[#allocation3] sm:$0xff]  ;;  %v3199_v43 = vmul.f32 %v7874_v14, %v9094_v0  ;;  %v5087_v33 = vand.u32 2147483648, %v9066_v37  ;;  %vm10477_vm3 = vmmov %vm10475_vm2 }
 0x310   : > { %2984 = vst.msk [vmem:[#allocation3 + $0x10] sm:$0xff] %vm10469_vm7, %v2968_v4  ;;  %v3209_v30 = vadd.f32 %v3193_v27, %v3176_v46  ;;  %v3348_v35 = vld [vmem:[#allocation3 + $0x50] sm:$0xff]  ;;  %v9106_v5 = vld [vmem:[#allocation2 + $0x23] sm:$0xff]  ;;  %v3274_v4 = vmul.f32 %v9036_v50, %v7932_v12  ;;  %vm10478_vm7 = vmmov %vm10475_vm2 }
 0x311   : > { %5201 = vst.msk [vmem:[%s8821_s18 + $0x24] sm:$0xf] %vm5191_vm13, %v5184_v23  ;;  %v5187_v34 = vpack.c.bf16 %v9087_v48, %v9087_v48  ;;  %v3381_v24 = vadd.f32 %v3365_v47, %v3348_v35  ;;  %v3033_v3 = vmul.f32 %v9106_v5, %v7766_v31  ;;  %v3006_v35 = vld [vmem:[#allocation2 + $0x83] sm:$0xff] }
 0x312   : > { %3391 = vst.msk [vmem:[#allocation3 + $0x20] sm:$0xff] %vm10470_vm5, %v3375_v36  ;;  %v5833_v20 = vpop.eup %5832  ;;  %v5085_v36 = vand.u32 2147483647, %v9066_v37  ;;  %vm10479_vm5 = vmmov %vm10475_vm2 }
 0x313   : > { %3225 = vst.msk [vmem:[#allocation3] sm:$0xff] %vm10471_vm4, %v3209_v30  ;;  %v5077_v41 = vmul.f32 %v5833_v20, %v9066_v37  ;;  %vm5082_vm1 = vweird.f32 %v5833_v20  ;;  %vm10480_vm4 = vmmov %vm10475_vm2 }
 0x314   : > { %5204 = vst.msk [vmem:[%s8821_s18 + $0x30] sm:$0xf] %vm5191_vm13, %v5187_v34  ;;  %v3446_v34 = vmul.f32 %v8783_v39, %v8018_v56  ;;  %vm5083_vm9 = vmor %vm5081_vm6, %vm5082_vm1  ;;  %vm5086_vm0 = vcmp.eq.f32.partialorder %v5085_v36, 8.507059e+37  ;;  %v3039_v39 = vmul.f32 %v7766_v31, %v3006_v35  ;;  %v3521_v31 = vmul.f32 %v8053_v53, %v9053_v16 }
 0x315   : > { %v2941_v10 = vld [vmem:[#allocation3 + $0x40] sm:$0xff]  ;;  %3397 = vst.msk [vmem:[#allocation3 + $0x50] sm:$0xff] %vm10472_vm11, %v3381_v24  ;;  %v5078_v15 = vsub.f32 1.0, %v5077_v41  ;;  %v5088_v24 = vor.u32 1.1754944e-38, %v5087_v33  ;;  %v3355_v36 = vmul.f32 %v9071_v26, %v7981_v59  ;;  %vm10481_vm11 = vmmov %vm10475_vm2 }
 0x316   : > { %v2974_v23 = vadd.f32 %v2958_v38, %v2941_v10  ;;  %v3182_v17 = vld [vmem:[#allocation3 + $0x30] sm:$0xff]  ;;  %vm10482_vm1 = vmmov %vm10475_vm2 }
 0x317   : > { %v5079_v9 = vmul.f32 %v5833_v20, %v5078_v15  ;;  %v3016_v27 = vld [vmem:[#allocation3 + $0x10] sm:$0xff]  ;;  %v3215_v18 = vadd.f32 %v3199_v43, %v3182_v17  ;;  %v9123_v43 = vld [vmem:[#allocation2 + $0x24] sm:$0xff]  ;;  %vm10484_vm6 = vmmov %vm10482_vm1 }
 0x318   : > { %2990 = vst.msk [vmem:[#allocation3 + $0x40] sm:$0xff] %vm10473_vm15, %v2974_v23  ;;  %v3049_v7 = vadd.f32 %v3033_v3, %v3016_v27  ;;  %v3114_v33 = vmul.f32 %v7816_v21, %v9123_v43  ;;  %vm10483_vm15 = vmmov %vm10482_vm1 }
 0x319   : > { %v3423_v47 = vld [vmem:[#allocation3 + $0x20] sm:$0xff]  ;;  %v5080_v46 = vadd.f32 %v5833_v20, %v5079_v9  ;;  %3231 = vst.msk [vmem:[#allocation3 + $0x30] sm:$0xff] %vm10474_vm12, %v3215_v18  ;;  %vm10486_vm12 = vmmov %vm10482_vm1 }
 0x31a   : > { %v3257_v19 = vld [vmem:[#allocation3] sm:$0xff]  ;;  %v3456_v30 = vadd.f32 %v3440_v51, %v3423_v47  ;;  %3065 = vst.msk [vmem:[#allocation3 + $0x10] sm:$0xff] %vm10475_vm2, %v3049_v7  ;;  %vm10488_vm2 = vmmov %vm10482_vm1 }
 0x31b   : > { %v3290_v38 = vadd.f32 %v3274_v4, %v3257_v19  ;;  %v5084_v50 = vsel %vm5083_vm9, %v5833_v20, %v5080_v46  ;;  %v3280_v20 = vmul.f32 %v8834_v61, %v7932_v12  ;;  %v9144_v47 = vld [vmem:[#allocation2 + $0xc4] sm:$0xff]  ;;  %vm10487_vm9 = vmmov %vm10482_vm1 }
 0x31c   : > { %v3429_v41 = vld [vmem:[#allocation3 + $0x50] sm:$0xff]  ;;  %3472 = vst.msk [vmem:[#allocation3 + $0x20] sm:$0xff] %vm10476_vm10, %v3456_v30  ;;  %v5089_v37 = vsel %vm5086_vm0, %v5088_v24, %v5084_v50  ;;  %v3527_v46 = vmul.f32 %v9144_v47, %v8053_v53  ;;  %v3087_v30 = vld [vmem:[#allocation2 + $0x84] sm:$0xff]  ;;  %v3361_v24 = vmul.f32 %v8886_v13, %v7981_v59  ;;  %vm10489_vm0 = vmmov %vm10482_vm1 }
 0x31d   : > { %3306 = vst.msk [vmem:[#allocation3] sm:$0xff] %vm10477_vm3, %v3290_v38  ;;  %v3462_v10 = vadd.f32 %v3446_v34, %v3429_v41  ;;  %v9127_v15 = vmul.f32 %v5089_v37, %v9029_v25  ;;  %v3120_v34 = vmul.f32 %v7816_v21, %v3087_v30  ;;  %v5981_v50 = vld [vmem:[#allocation2 + $0x40] sm:$0xff]  ;;  %vm10490_vm10 = vmmov %vm10489_vm0 }
 0x31e   : > { %v3195_v41 = vmul.f32 %v5981_v50, %v7874_v14  ;;  %vm10491_vm3 = vmmov %vm10489_vm0 }
 0x31f   : > { %v3022_v23 = vld [vmem:[#allocation3 + $0x40] sm:$0xff]  ;;  %3478 = vst.msk [vmem:[#allocation3 + $0x50] sm:$0xff] %vm10478_vm7, %v3462_v10  ;;  %v5188_v51 = vpack.c.bf16 %v9127_v15, %v9127_v15  ;;  %vm10492_vm7 = vmmov %vm10489_vm0 }
 0x320   : > { %v3055_v3 = vadd.f32 %v3039_v39, %v3022_v23  ;;  %v3263_v17 = vld [vmem:[#allocation3 + $0x30] sm:$0xff] }
 0x321   : > { %5205 = vst.msk [vmem:[%s8821_s18 + $0x34] sm:$0xf] %vm5191_vm13, %v5188_v51  ;;  %v3097_v25 = vld [vmem:[#allocation3 + $0x10] sm:$0xff]  ;;  %v3296_v9 = vadd.f32 %v3280_v20, %v3263_v17 }
 0x322   : > { %3071 = vst.msk [vmem:[#allocation3 + $0x40] sm:$0xff] %vm10479_vm5, %v3055_v3  ;;  %v3130_v27 = vadd.f32 %v3114_v33, %v3097_v25  ;;  %v10485_v39 = vld [vmem:[#allocation14_spill] sm:$0xff]  ;;  %v3436_v3 = vmul.f32 %v9106_v5, %v8018_v56  ;;  %v9162_v25 = vld [vmem:[#allocation2 + $0xe0] sm:$0xff]  ;;  %vm10493_vm5 = vmmov %vm10489_vm0 }
 0x323   : > { %v3504_v18 = vld [vmem:[#allocation3 + $0x20] sm:$0xff]  ;;  %3312 = vst.msk [vmem:[#allocation3 + $0x30] sm:$0xff] %vm10480_vm4, %v3296_v9  ;;  %v3602_v23 = vmul.f32 %v10485_v39, %v9094_v0  ;;  %v3608_v9 = vmul.f32 %v9162_v25, %v10485_v39  ;;  %vm10494_vm4 = vmmov %vm10489_vm0 }
 0x324   : > { %v3338_v4 = vld [vmem:[#allocation3] sm:$0xff]  ;;  %v3537_v7 = vadd.f32 %v3521_v31, %v3504_v18  ;;  %3146 = vst.msk [vmem:[#allocation3 + $0x10] sm:$0xff] %vm10481_vm11, %v3130_v27  ;;  %vm10495_vm11 = vmmov %vm10489_vm0 }
 0x325   : > { %v3371_v19 = vadd.f32 %v3355_v36, %v3338_v4  ;;  %v9169_v18 = vld [vmem:[#allocation2 + $0xa0] sm:$0xff] }
 0x326   : > { %v3510_v35 = vld [vmem:[#allocation3 + $0x50] sm:$0xff]  ;;  %3553 = vst.msk [vmem:[#allocation3 + $0x20] sm:$0xff] %vm10482_vm1, %v3537_v7  ;;  %v3201_v4 = vmul.f32 %v9169_v18, %v7874_v14  ;;  %v3442_v7 = vmul.f32 %v8927_v52, %v8018_v56  ;;  %vm10496_vm1 = vmmov %vm10489_vm0 }
 0x327   : > { %3387 = vst.msk [vmem:[#allocation3] sm:$0xff] %vm10483_vm15, %v3371_v19  ;;  %v3543_v26 = vadd.f32 %v3527_v46, %v3510_v35  ;;  %v5984_v19 = vld [vmem:[#allocation2 + $0x41] sm:$0xff]  ;;  %vm10497_vm15 = vmmov %vm10489_vm0 }
 0x328   : > { %v3276_v30 = vmul.f32 %v5984_v19, %v7932_v12 }
 0x329   : > { %3559 = vst.msk [vmem:[#allocation3 + $0x50] sm:$0xff] %vm10484_vm6, %v3543_v26  ;;  %v3103_v38 = vld [vmem:[#allocation3 + $0x40] sm:$0xff]  ;;  %vm10498_vm6 = vmmov %vm10489_vm0 }
 0x32a   : > { %v3136_v37 = vadd.f32 %v3120_v34, %v3103_v38  ;;  %v3344_v10 = vld [vmem:[#allocation3 + $0x30] sm:$0xff]  ;;  %v3683_v34 = vmul.f32 %v8834_v61, %v8124_v40 }
 0x32b   : > { %v3178_v20 = vld [vmem:[#allocation3 + $0x10] sm:$0xff]  ;;  %v3377_v51 = vadd.f32 %v3361_v24, %v3344_v10 }
 0x32c   : > { %3152 = vst.msk [vmem:[#allocation3 + $0x40] sm:$0xff] %vm10486_vm12, %v3136_v37  ;;  %v3211_v21 = vadd.f32 %v3195_v41, %v3178_v20  ;;  %v3517_v41 = vmul.f32 %v8053_v53, %v9123_v43  ;;  %v9183_v20 = vld [vmem:[#allocation2 + $0xe1] sm:$0xff]  ;;  %vm10499_vm12 = vmmov %vm10489_vm0 }
 0x32d   : > { %v3585_v33 = vld [vmem:[#allocation3 + $0x20] sm:$0xff]  ;;  %3393 = vst.msk [vmem:[#allocation3 + $0x30] sm:$0xff] %vm10487_vm9, %v3377_v51  ;;  %v3689_v51 = vmul.f32 %v9183_v20, %v8124_v40  ;;  %vm10500_vm9 = vmmov %vm10489_vm0 }
 0x32e   : > { %v3419_v17 = vld [vmem:[#allocation3] sm:$0xff]  ;;  %v3618_v31 = vadd.f32 %v3602_v23, %v3585_v33  ;;  %3227 = vst.msk [vmem:[#allocation3 + $0x10] sm:$0xff] %vm10488_vm2, %v3211_v21  ;;  %v3282_v33 = vmul.f32 %v8777_v49, %v7932_v12  ;;  %vm10501_vm2 = vmmov %vm10489_vm0 }
 0x32f   : > { %v3452_v36 = vadd.f32 %v3436_v3, %v3419_v17  ;;  %v9189_v43 = vld [vmem:[#allocation2 + $0x84] sm:$0xff] }
 0x330   : > { %v3591_v27 = vld [vmem:[#allocation3 + $0x50] sm:$0xff]  ;;  %3634 = vst.msk [vmem:[#allocation3 + $0x20] sm:$0xff] %vm10489_vm0, %v3618_v31  ;;  %v3523_v17 = vmul.f32 %v8053_v53, %v9189_v43 }
 0x331   : > { %3468 = vst.msk [vmem:[#allocation3] sm:$0xff] %vm10490_vm10, %v3452_v36  ;;  %v3624_v5 = vadd.f32 %v3608_v9, %v3591_v27  ;;  %v3357_v9 = vmul.f32 %v8828_v54, %v7981_v59  ;;  %vm10502_vm10 = vmmov %vm10489_vm0 }
 0x333   : > { %3640 = vst.msk [vmem:[#allocation3 + $0x50] sm:$0xff] %vm10491_vm3, %v3624_v5  ;;  %v3184_v46 = vld [vmem:[#allocation3 + $0x40] sm:$0xff]  ;;  %v3764_v5 = vmul.f32 %v8886_v13, %v8157_v28  ;;  %vm10503_vm3 = vmmov %vm10489_vm0 }
 0x334   : > { %v3217_v35 = vadd.f32 %v3201_v4, %v3184_v46  ;;  %v3425_v26 = vld [vmem:[#allocation3 + $0x30] sm:$0xff]  ;;  %v3598_v46 = vmul.f32 %v5981_v50, %v10485_v39 }
 0x335   : > { %v3259_v24 = vld [vmem:[#allocation3 + $0x10] sm:$0xff]  ;;  %v3458_v38 = vadd.f32 %v3442_v7, %v3425_v26  ;;  %v9204_v26 = vld [vmem:[#allocation2 + $0xe2] sm:$0xff] }
 0x336   : > { %3233 = vst.msk [vmem:[#allocation3 + $0x40] sm:$0xff] %vm10492_vm7, %v3217_v35  ;;  %v3292_v14 = vadd.f32 %v3276_v30, %v3259_v24  ;;  %vm10504_vm7 = vmmov %vm10489_vm0 }
 0x337   : > { %v3666_v37 = vld [vmem:[#allocation3 + $0x20] sm:$0xff]  ;;  %3474 = vst.msk [vmem:[#allocation3 + $0x30] sm:$0xff] %vm10493_vm5, %v3458_v38  ;;  %v3363_v38 = vmul.f32 %v8845_v11, %v7981_v59  ;;  %vm10505_vm5 = vmmov %vm10489_vm0 }
 0x338   : > { %v3500_v10 = vld [vmem:[#allocation3] sm:$0xff]  ;;  %v3699_v23 = vadd.f32 %v3683_v34, %v3666_v37  ;;  %3308 = vst.msk [vmem:[#allocation3 + $0x10] sm:$0xff] %vm10494_vm4, %v3292_v14  ;;  %v3770_v34 = vmul.f32 %v9204_v26, %v8157_v28  ;;  %v3438_v37 = vmul.f32 %v8880_v32, %v8018_v56  ;;  %vm10506_vm4 = vmmov %vm10489_vm0 }
 0x339   : > { %v3533_v61 = vadd.f32 %v3517_v41, %v3500_v10  ;;  %v3604_v41 = vmul.f32 %v9169_v18, %v10485_v39 }
 0x33a   : > { %v3672_v3 = vld [vmem:[#allocation3 + $0x50] sm:$0xff]  ;;  %3715 = vst.msk [vmem:[#allocation3 + $0x20] sm:$0xff] %vm10495_vm11, %v3699_v23  ;;  %vm10507_vm11 = vmmov %vm10489_vm0 }
 0x33b   : > { %3549 = vst.msk [vmem:[#allocation3] sm:$0xff] %vm10496_vm1, %v3533_v61  ;;  %v3705_v21 = vadd.f32 %v3689_v51, %v3672_v3  ;;  %v3845_v51 = vmul.f32 %v8927_v52, %v8192_v62  ;;  %vm10508_vm1 = vmmov %vm10489_vm0 }
 0x33d   : > { %3721 = vst.msk [vmem:[#allocation3 + $0x50] sm:$0xff] %vm10497_vm15, %v3705_v21  ;;  %v3265_v31 = vld [vmem:[#allocation3 + $0x40] sm:$0xff]  ;;  %v3679_v21 = vmul.f32 %v5984_v19, %v8124_v40  ;;  %vm10509_vm15 = vmmov %vm10489_vm0 }
 0x33e   : > { %v3298_v36 = vadd.f32 %v3282_v33, %v3265_v31  ;;  %v3506_v27 = vld [vmem:[#allocation3 + $0x30] sm:$0xff] }
 0x33f   : > { %v3340_v4 = vld [vmem:[#allocation3 + $0x10] sm:$0xff]  ;;  %v3539_v7 = vadd.f32 %v3523_v17, %v3506_v27 }
 0x340   : > { %3314 = vst.msk [vmem:[#allocation3 + $0x40] sm:$0xff] %vm10498_vm6, %v3298_v36  ;;  %v3373_v12 = vadd.f32 %v3357_v9, %v3340_v4  ;;  %v9223_v9 = vld [vmem:[#allocation2 + $0xe3] sm:$0xff]  ;;  %vm10510_vm6 = vmmov %vm10489_vm0 }
 0x341   : > { %v3747_v49 = vld [vmem:[#allocation3 + $0x20] sm:$0xff]  ;;  %3555 = vst.msk [vmem:[#allocation3 + $0x30] sm:$0xff] %vm10499_vm12, %v3539_v7  ;;  %v3851_v36 = vmul.f32 %v9223_v9, %v8192_v62  ;;  %vm10511_vm12 = vmmov %vm10489_vm0 }
 0x342   : > { %v3581_v30 = vld [vmem:[#allocation3] sm:$0xff]  ;;  %v3780_v35 = vadd.f32 %v3764_v5, %v3747_v49  ;;  %3389 = vst.msk [vmem:[#allocation3 + $0x10] sm:$0xff] %vm10500_vm9, %v3373_v12  ;;  %v3444_v5 = vmul.f32 %v8895_v8, %v8018_v56  ;;  %v3519_v12 = vmul.f32 %v8053_v53, %v8920_v42  ;;  %v3760_v56 = vmul.f32 %v8828_v54, %v8157_v28  ;;  %vm10512_vm9 = vmmov %vm10489_vm0 }
 0x343   : > { %v3614_v13 = vadd.f32 %v3598_v46, %v3581_v30  ;;  %v9233_v4 = vld [vmem:[#allocation2 + $0xa1] sm:$0xff] }
 0x344   : > { %v3753_v24 = vld [vmem:[#allocation3 + $0x50] sm:$0xff]  ;;  %3796 = vst.msk [vmem:[#allocation3 + $0x20] sm:$0xff] %vm10501_vm2, %v3780_v35  ;;  %v3685_v7 = vmul.f32 %v9233_v4, %v8124_v40  ;;  %v3926_v35 = vmul.f32 %v8225_v2, %v9189_v43  ;;  %vm10513_vm2 = vmmov %vm10489_vm0 }
 0x345   : > { %3630 = vst.msk [vmem:[#allocation3] sm:$0xff] %vm10489_vm0, %v3614_v13  ;;  %v3786_v50 = vadd.f32 %v3770_v34, %v3753_v24 }
 0x347   : > { %3802 = vst.msk [vmem:[#allocation3 + $0x50] sm:$0xff] %vm10502_vm10, %v3786_v50  ;;  %v3346_v14 = vld [vmem:[#allocation3 + $0x40] sm:$0xff]  ;;  %vm10514_vm10 = vmmov %vm10489_vm0 }
 0x348   : > { %v3379_v10 = vadd.f32 %v3363_v38, %v3346_v14  ;;  %v3587_v23 = vld [vmem:[#allocation3 + $0x30] sm:$0xff]  ;;  %v9245_v14 = vld [vmem:[#allocation2 + $0xe4] sm:$0xff] }
 0x349   : > { %v3421_v61 = vld [vmem:[#allocation3 + $0x10] sm:$0xff]  ;;  %v3620_v3 = vadd.f32 %v3604_v41, %v3587_v23 }
 0x34a   : > { %3395 = vst.msk [vmem:[#allocation3 + $0x40] sm:$0xff] %vm10503_vm3, %v3379_v10  ;;  %v3454_v59 = vadd.f32 %v3438_v37, %v3421_v61  ;;  %v3932_v37 = vmul.f32 %v9245_v14, %v8225_v2  ;;  %v3766_v61 = vmul.f32 %v8845_v11, %v8157_v28  ;;  %vm10515_vm3 = vmmov %vm10489_vm0 }
 0x34b   : > { %v3828_v33 = vld [vmem:[#allocation3 + $0x20] sm:$0xff]  ;;  %3636 = vst.msk [vmem:[#allocation3 + $0x30] sm:$0xff] %vm10504_vm7, %v3620_v3  ;;  %vm10516_vm7 = vmmov %vm10489_vm0 }
 0x34c   : > { %v3662_v17 = vld [vmem:[#allocation3] sm:$0xff]  ;;  %v3861_v31 = vadd.f32 %v3845_v51, %v3828_v33  ;;  %3470 = vst.msk [vmem:[#allocation3 + $0x10] sm:$0xff] %vm10505_vm5, %v3454_v59  ;;  %v3525_v51 = vmul.f32 %v8053_v53, %v8931_v63  ;;  %vm10517_vm5 = vmmov %vm10489_vm0 }
 0x34d   : > { %v3695_v52 = vadd.f32 %v3679_v21, %v3662_v17  ;;  %v3600_v21 = vmul.f32 %v10485_v39, %v8852_v1 }
 0x34e   : > { %v3834_v27 = vld [vmem:[#allocation3 + $0x50] sm:$0xff]  ;;  %3877 = vst.msk [vmem:[#allocation3 + $0x20] sm:$0xff] %vm10506_vm4, %v3861_v31  ;;  %v4007_v31 = vmul.f32 %v9169_v18, %v8267_v45  ;;  %vm10518_vm4 = vmmov %vm10489_vm0 }
 0x34f   : > { %3711 = vst.msk [vmem:[#allocation3] sm:$0xff] %vm10507_vm11, %v3695_v52  ;;  %v3867_v19 = vadd.f32 %v3851_v36, %v3834_v27  ;;  %v9264_v36 = vld [vmem:[%s9921_s2] ss:$0 sm:$0xff]  ;;  %v3841_v27 = vmul.f32 %v8880_v32, %v8192_v62  ;;  %vm10519_vm11 = vmmov %vm10489_vm0 }
 0x351   : > { %3883 = vst.msk [vmem:[#allocation3 + $0x50] sm:$0xff] %vm10508_vm1, %v3867_v19  ;;  %v3427_v46 = vld [vmem:[#allocation3 + $0x40] sm:$0xff]  ;;  %vm10520_vm1 = vmmov %vm10489_vm0 }
 0x352   : > { %v3460_v49 = vadd.f32 %v3444_v5, %v3427_v46  ;;  %v3668_v30 = vld [vmem:[#allocation3 + $0x30] sm:$0xff] }
 0x353   : > { %v3502_v34 = vld [vmem:[#allocation3 + $0x10] sm:$0xff]  ;;  %v3701_v13 = vadd.f32 %v3685_v7, %v3668_v30 }
 0x354   : > { %3476 = vst.msk [vmem:[#allocation3 + $0x40] sm:$0xff] %vm10509_vm15, %v3460_v49  ;;  %v3535_v24 = vadd.f32 %v3519_v12, %v3502_v34  ;;  %v9274_v12 = vld [vmem:[#allocation2 + $0x100] sm:$0xff]  ;;  %v3606_v34 = vmul.f32 %v9011_v57, %v10485_v39  ;;  %vm10521_vm15 = vmmov %vm10489_vm0 }
 0x355   : > { %v3909_v50 = vld [vmem:[#allocation3 + $0x20] sm:$0xff]  ;;  %3717 = vst.msk [vmem:[#allocation3 + $0x30] sm:$0xff] %vm10510_vm6, %v3701_v13  ;;  %v4013_v49 = vmul.f32 %v9274_v12, %v8267_v45  ;;  %v3847_v13 = vmul.f32 %v8895_v8, %v8192_v62  ;;  %v3922_v8 = vmul.f32 %v8225_v2, %v8920_v42  ;;  %vm10522_vm6 = vmmov %vm10489_vm0 }
 0x356   : > { %v3743_v38 = vld [vmem:[#allocation3] sm:$0xff]  ;;  %v3942_v41 = vadd.f32 %v3926_v35, %v3909_v50  ;;  %3551 = vst.msk [vmem:[#allocation3 + $0x10] sm:$0xff] %vm10511_vm12, %v3535_v24  ;;  %v679_v59 = vpop.f32.mrf.mxu3  ;;  %v3681_v24 = vmul.f32 %v8913_v60, %v8124_v40  ;;  %vm10523_vm12 = vmmov %vm10489_vm0 }
 0x357   : > { %v3776_v10 = vadd.f32 %v3760_v56, %v3743_v38  ;;  %v9267_v53 = vadd.f32 %v9264_v36, %v679_v59 }
 0x358   : > { %v3915_v23 = vld [vmem:[#allocation3 + $0x50] sm:$0xff]  ;;  %3958 = vst.msk [vmem:[#allocation3 + $0x20] sm:$0xff] %vm10512_vm9, %v3942_v41  ;;  %vm10524_vm9 = vmmov %vm10489_vm0 }
 0x359   : > { %3792 = vst.msk [vmem:[#allocation3] sm:$0xff] %vm10513_vm2, %v3776_v10  ;;  %v3948_v54 = vadd.f32 %v3932_v37, %v3915_v23  ;;  %v5536_v5 = vmul.f32 -1.442695, %v9267_v53  ;;  %v4088_v37 = vmul.f32 %v9233_v4, %v8308_v44  ;;  %vm10525_vm2 = vmmov %vm10489_vm0 }
 0x35b   : > { %3964 = vst.msk [vmem:[#allocation3 + $0x50] sm:$0xff] %vm10489_vm0, %v3948_v54  ;;  %v3508_v3 = vld [vmem:[#allocation3 + $0x40] sm:$0xff]  ;;  %5834 = vpow2.f32 %v5536_v5 }
 0x35c   : > { %v3541_v33 = vadd.f32 %v3525_v51, %v3508_v3  ;;  %v3749_v17 = vld [vmem:[#allocation3 + $0x30] sm:$0xff]  ;;  %v9296_v3 = vld [vmem:[#allocation2 + $0x101] sm:$0xff] }
 0x35d   : > { %v3583_v52 = vld [vmem:[#allocation3 + $0x10] sm:$0xff]  ;;  %v3782_v11 = vadd.f32 %v3766_v61, %v3749_v17  ;;  %v9313_v5 = vld [vmem:[#allocation2 + $0x62] sm:$0xff] }
 0x35e   : > { %3557 = vst.msk [vmem:[#allocation3 + $0x40] sm:$0xff] %vm10514_vm10, %v3541_v33  ;;  %v3616_v1 = vadd.f32 %v3600_v21, %v3583_v52  ;;  %v4094_v21 = vmul.f32 %v9296_v3, %v8308_v44  ;;  %v681_v59 = vpop.f32.mrf.mxu3  ;;  %vm10528_vm10 = vmmov %vm10520_vm1 }
 0x35f   : > { %v3990_v19 = vld [vmem:[#allocation3 + $0x20] sm:$0xff]  ;;  %3798 = vst.msk [vmem:[#allocation3 + $0x30] sm:$0xff] %vm10515_vm3, %v3782_v11  ;;  %v9303_v33 = vadd.f32 %v9264_v36, %v681_v59  ;;  %v3687_v11 = vmul.f32 %v9045_v55, %v8124_v40  ;;  %v10527_v40 = vld [vmem:[#allocation13_spill] sm:$0xff] }
 0x360   : > { %v3824_v7 = vld [vmem:[#allocation3] sm:$0xff]  ;;  %v4023_v46 = vadd.f32 %v4007_v31, %v3990_v19  ;;  %3632 = vst.msk [vmem:[#allocation3 + $0x10] sm:$0xff] %vm10516_vm7, %v3616_v1  ;;  %vm10529_vm7 = vmmov %vm10520_vm1 }
 0x361   : > { %v3857_v30 = vadd.f32 %v3841_v27, %v3824_v7  ;;  %v5835_v41 = vpop.eup %5834  ;;  %v5537_v52 = vmul.f32 -1.442695, %v9303_v33  ;;  %v3928_v27 = vmul.f32 %v8225_v2, %v8931_v63  ;;  %v3762_v7 = vmul.f32 %v9313_v5, %v8157_v28 }
 0x362   : > { %v3996_v32 = vld [vmem:[#allocation3 + $0x50] sm:$0xff]  ;;  %4039 = vst.msk [vmem:[#allocation3 + $0x20] sm:$0xff] %vm10517_vm5, %v4023_v46  ;;  %v9290_v54 = vadd.f32 1.0, %v5835_v41 }
 0x363   : > { %3873 = vst.msk [vmem:[#allocation3] sm:$0xff] %vm10518_vm4, %v3857_v30  ;;  %v4029_v35 = vadd.f32 %v4013_v49, %v3996_v32  ;;  %v10526_v46 = vld [vmem:[#allocation10_spill] sm:$0xff] }
 0x364   : > { %5836 = vrcp.f32 %v9290_v54  ;;  %v1660_v49 = vadd.s32 11, %v10526_v46  ;;  %vm1546_vm0 = vweird.f32 %v9290_v54 }
 0x365   : > { %4045 = vst.msk [vmem:[#allocation3 + $0x50] sm:$0xff] %vm10519_vm11, %v4029_v35  ;;  %v3589_v56 = vld [vmem:[#allocation3 + $0x40] sm:$0xff]  ;;  %5838 = vpow2.f32 %v5537_v52  ;;  %vm10530_vm11 = vmmov %vm10520_vm1 }
 0x366   : > { %v3622_v50 = vadd.f32 %v3606_v34, %v3589_v56  ;;  %v3830_v38 = vld [vmem:[#allocation3 + $0x30] sm:$0xff]  ;;  %v9318_v35 = vld [vmem:[#allocation2 + $0xa2] sm:$0xff]  ;;  %vm1677_vm5 = vcmp.ge.s32.totalorder %v1660_v49, 2  ;;  %vm1689_vm4 = vcmp.lt.s32.totalorder %v1660_v49, 18 }
 0x367   : > { %v3664_v10 = vld [vmem:[#allocation3 + $0x10] sm:$0xff]  ;;  %v3863_v23 = vadd.f32 %v3847_v13, %v3830_v38  ;;  %v4169_v55 = vmul.f32 %v9318_v35, %v10527_v40  ;;  %v5995_v56 = vld [vmem:[#allocation2 + $0x60] sm:$0xff] }
 0x368   : > { %3638 = vst.msk [vmem:[#allocation3 + $0x40] sm:$0xff] %vm10520_vm1, %v3622_v50  ;;  %v3697_v39 = vadd.f32 %v3681_v24, %v3664_v10  ;;  %v4003_v24 = vmul.f32 %v5995_v56, %v8267_v45  ;;  %v1552_v50 = vand.u32 2147483648, %v9290_v54  ;;  %v1550_v10 = vand.u32 2147483647, %v9290_v54 }
 0x369   : > { %v4071_v51 = vld [vmem:[#allocation3 + $0x20] sm:$0xff]  ;;  %3879 = vst.msk [vmem:[#allocation3 + $0x30] sm:$0xff] %vm10521_vm15, %v3863_v23 }
 0x36a   : > { %v3905_v60 = vld [vmem:[#allocation3] sm:$0xff]  ;;  %v4104_v61 = vadd.f32 %v4088_v37, %v4071_v51  ;;  %3713 = vst.msk [vmem:[#allocation3 + $0x10] sm:$0xff] %vm10522_vm6, %v3697_v39  ;;  %v5837_v19 = vpop.eup %5836  ;;  %vm1551_vm6 = vcmp.eq.f32.partialorder %v1550_v10, 8.507059e+37 }
 0x36b   : > { %v3938_v17 = vadd.f32 %v3922_v8, %v3905_v60  ;;  %v1542_v34 = vmul.f32 %v5837_v19, %v9290_v54  ;;  %vm1547_vm3 = vweird.f32 %v5837_v19  ;;  %v9329_v39 = vld [vmem:[#allocation2 + $0x102] sm:$0xff]  ;;  %v5839_v60 = vpop.eup %5838 }
 0x36c   : > { %v4077_v31 = vld [vmem:[#allocation3 + $0x50] sm:$0xff]  ;;  %4120 = vst.msk [vmem:[#allocation3 + $0x20] sm:$0xff] %vm10523_vm12, %v4104_v61  ;;  %v4175_v51 = vmul.f32 %v9329_v39, %v10527_v40  ;;  %vm9338_vm15 = vmor %vm1546_vm0, %vm1547_vm3  ;;  %v9353_v54 = vld [vmem:[#allocation2 + $0xc2] sm:$0xff] }
 0x36d   : > { %v4110_v42 = vadd.f32 %v4094_v21, %v4077_v31  ;;  %3954 = vst.msk [vmem:[#allocation3] sm:$0xff] %vm10524_vm9, %v3938_v17  ;;  %v1543_v37 = vsub.f32 1.0, %v1542_v34  ;;  %v1553_v31 = vor.u32 1.1754944e-38, %v1552_v50  ;;  %vm9346_vm12 = vmand %vm1677_vm5, %vm1689_vm4 }
 0x36e   : > { %vm10535_vm9 = vmmov %vm10520_vm1 }
 0x36f   : > { %4126 = vst.msk [vmem:[#allocation3 + $0x50] sm:$0xff] %vm10525_vm2, %v4110_v42  ;;  %v3670_v1 = vld [vmem:[#allocation3 + $0x40] sm:$0xff]  ;;  %v1544_v61 = vmul.f32 %v5837_v19, %v1543_v37  ;;  %v9342_v42 = vadd.f32 1.0, %v5839_v60  ;;  %vm10536_vm2 = vmmov %vm10520_vm1  ;;  %v10540_v37 = vld [vmem:[#allocation15_spill] sm:$0xff] }
 0x370   : > { %v3703_v30 = vadd.f32 %v3687_v11, %v3670_v1  ;;  %v3911_v32 = vld [vmem:[#allocation3 + $0x30] sm:$0xff]  ;;  %v3976_v11 = vld [vmem:[#allocation2 + $0xc0] sm:$0xff]  ;;  %vm9368_vm0 = vmand %vm9346_vm12, %vm1702_vm8 }
 0x371   : > { %v3745_v63 = vld [vmem:[#allocation3 + $0x10] sm:$0xff]  ;;  %v3944_v13 = vadd.f32 %v3928_v27, %v3911_v32  ;;  %v1545_v27 = vadd.f32 %v5837_v19, %v1544_v61  ;;  %5840 = vrcp.f32 %v9342_v42  ;;  %v4009_v32 = vmul.f32 %v8267_v45, %v3976_v11  ;;  %v6000_v61 = vld [vmem:[#allocation2 + $0x61] sm:$0xff]  ;;  %vm10541_vm8 = vmmov %vm10520_vm1 }
 0x372   : > { %3719 = vst.msk [vmem:[#allocation3 + $0x40] sm:$0xff] %vm10528_vm10, %v3703_v30  ;;  %v3778_v38 = vadd.f32 %v3762_v7, %v3745_v63  ;;  %v3768_v7 = vmul.f32 %v9353_v54, %v8157_v28  ;;  %v684_v30 = vpop.f32.mrf.mxu3  ;;  %vm10542_vm10 = vmmov %vm10520_vm1  ;;  %vm1561_vm5 = vweird.f32 %v9342_v42 }
 0x373   : > { %v4152_v41 = vld [vmem:[#allocation3 + $0x20] sm:$0xff]  ;;  %3960 = vst.msk [vmem:[#allocation3 + $0x30] sm:$0xff] %vm10529_vm7, %v3944_v13  ;;  %v1549_v46 = vsel %vm9338_vm15, %v5837_v19, %v1545_v27  ;;  %v9373_v28 = vadd.f32 %v9264_v36, %v684_v30  ;;  %vm10543_vm3 = vmmov %vm10520_vm1 }
 0x374   : > { %v4185_v23 = vadd.f32 %v4169_v55, %v4152_v41  ;;  %3794 = vst.msk [vmem:[#allocation3 + $0x10] sm:$0xff] %vm10530_vm11, %v3778_v38  ;;  %v3986_v8 = vld [vmem:[#allocation3] sm:$0xff]  ;;  %v1554_v63 = vsel %vm1551_vm6, %v1553_v31, %v1549_v46  ;;  %v1567_v46 = vand.u32 2147483648, %v9342_v42  ;;  %vm10544_vm7 = vmmov %vm10520_vm1 }
 0x375   : > { %v4019_v21 = vadd.f32 %v4003_v24, %v3986_v8  ;;  %v9360_v55 = vld [vmem:[#allocation2 + $0x63] sm:$0xff]  ;;  %v1645_v24 = vmul.f32 %v1554_v63, %v9267_v53  ;;  %vm10545_vm11 = vmmov %vm10520_vm1 }
 0x376   : > { %v4158_v59 = vld [vmem:[#allocation3 + $0x50] sm:$0xff]  ;;  %4201 = vst.msk [vmem:[#allocation3 + $0x20] sm:$0xff] %vm10520_vm1, %v4185_v23  ;;  %v3843_v34 = vmul.f32 %v9360_v55, %v8192_v62  ;;  %v9376_v41 = vld [vmem:[#allocation2 + $0xa3] sm:$0xff]  ;;  %v5538_v23 = vmul.f32 -1.442695, %v9373_v28  ;;  %vm10546_vm15 = vmmov %vm10520_vm1 }
 0x377   : > { %v4191_v52 = vadd.f32 %v4175_v51, %v4158_v59  ;;  %4035 = vst.msk [vmem:[#allocation3] sm:$0xff] %vm10535_vm9, %v4019_v21  ;;  %v4250_v10 = vmul.f32 %v9376_v41, %v10540_v37  ;;  %v4084_v21 = vmul.f32 %v6000_v61, %v8308_v44  ;;  %v1946_v36 = vsel %vm9368_vm0, %v1645_v24, 0.0  ;;  %v5841_v53 = vpop.eup %5840  ;;  %v9385_v59 = vld [vmem:[#allocation2 + $0x103] sm:$0xff]  ;;  %vm10553_vm0 = vmmov %vm10520_vm1 }
 0x378   : > { %v4256_v17 = vmul.f32 %v9385_v59, %v10540_v37  ;;  %1995 = vst.msk [vmem:[#allocation2 + $0x160] sm:$0xff] %vm10542_vm10, %v1946_v36  ;;  %5842 = vpow2.f32 %v5538_v23  ;;  %v1557_v11 = vmul.f32 %v5841_v53, %v9342_v42  ;;  %vm1562_vm4 = vweird.f32 %v5841_v53  ;;  %v9398_v63 = vld [vmem:[#allocation2 + $0xc3] sm:$0xff]  ;;  %v4406_v23 = vld [vmem:[#allocation3 + $0x70] sm:$0xff]  ;;  %vm10555_vm10 = vmmov %vm10553_vm0 }
 0x379   : > { %4207 = vst.msk [vmem:[#allocation3 + $0x50] sm:$0xff] %vm10536_vm2, %v4191_v52  ;;  %v3751_v49 = vld [vmem:[#allocation3 + $0x40] sm:$0xff]  ;;  %v3849_v13 = vmul.f32 %v9398_v63, %v8192_v62  ;;  %v3924_v24 = vmul.f32 %v8225_v2, %v9053_v16  ;;  %vm9405_vm6 = vmor %vm1561_vm5, %vm1562_vm4 }
 0x37a   : > { %v3992_v19 = vld [vmem:[#allocation3 + $0x30] sm:$0xff]  ;;  %v3784_v50 = vadd.f32 %v3768_v7, %v3751_v49  ;;  %v1558_v49 = vsub.f32 1.0, %v1557_v11  ;;  %v6003_v61 = vld [vmem:[#allocation2 + $0xc1] sm:$0xff]  ;;  %vm10552_vm2 = vmmov %vm10520_vm1 }
 0x37b   : > { %v3826_v38 = vld [vmem:[#allocation3 + $0x10] sm:$0xff]  ;;  %v4025_v8 = vadd.f32 %v4009_v32, %v3992_v19  ;;  %v1565_v32 = vand.u32 2147483647, %v9342_v42  ;;  %v1568_v42 = vor.u32 1.1754944e-38, %v1567_v46  ;;  %v10551_v36 = vld [vmem:[#allocation16_spill] sm:$0xff]  ;;  %vm10558_vm5 = vmmov %vm10553_vm0 }
 0x37c   : > { %v3859_v51 = vadd.f32 %v3843_v34, %v3826_v38  ;;  %3800 = vst.msk [vmem:[#allocation3 + $0x40] sm:$0xff] %vm10541_vm8, %v3784_v50  ;;  %v686_v34 = vpop.f32.mrf.mxu3  ;;  %v1559_v56 = vmul.f32 %v5841_v53, %v1558_v49  ;;  %v9423_v46 = vld [vmem:[#allocation2 + $0xa4] sm:$0xff]  ;;  %vm10554_vm8 = vmmov %vm10553_vm0 }
 0x37d   : > { %v4233_v60 = vld [vmem:[#allocation3 + $0x20] sm:$0xff]  ;;  %4041 = vst.msk [vmem:[#allocation3 + $0x30] sm:$0xff] %vm10544_vm7, %v4025_v8  ;;  %vm9409_vm9 = vcmp.eq.f32.partialorder %v1565_v32, 8.507059e+37  ;;  %vm10557_vm7 = vmmov %vm10553_vm0 }
 0x37e   : > { %v4067_v31 = vld [vmem:[#allocation3] sm:$0xff]  ;;  %v4266_v52 = vadd.f32 %v4250_v10, %v4233_v60  ;;  %3875 = vst.msk [vmem:[#allocation3 + $0x10] sm:$0xff] %vm10543_vm3, %v3859_v51  ;;  %v5843_v19 = vpop.eup %5842  ;;  %v1560_v51 = vadd.f32 %v5841_v53, %v1559_v56  ;;  %vm10556_vm3 = vmmov %vm10553_vm0 }
 0x37f   : > { %v4100_v27 = vadd.f32 %v4084_v21, %v4067_v31  ;;  %v4390_v10 = vld [vmem:[#allocation2 + $0x160] sm:$0xff]  ;;  %v9413_v62 = vadd.f32 1.0, %v5843_v19  ;;  %v4090_v21 = vmul.f32 %v6003_v61, %v8308_v44  ;;  %vm10559_vm4 = vmmov %vm10553_vm0 }
 0x380   : > { %v4239_v7 = vld [vmem:[#allocation3 + $0x50] sm:$0xff]  ;;  %4282 = vst.msk [vmem:[#allocation3 + $0x20] sm:$0xff] %vm10520_vm1, %v4266_v52  ;;  %v4165_v52 = vmul.f32 %v9313_v5, %v10527_v40  ;;  %v1564_v11 = vsel %vm9405_vm6, %v5841_v53, %v1560_v51  ;;  %vm10561_vm1 = vmmov %vm10553_vm0 }
 0x381   : > { %v4272_v30 = vadd.f32 %v4256_v17, %v4239_v7  ;;  %4116 = vst.msk [vmem:[#allocation3] sm:$0xff] %vm10545_vm11, %v4100_v27  ;;  %v4423_v17 = vmul.f32 %v10551_v36, %v4390_v10  ;;  %5844 = vrcp.f32 %v9413_v62  ;;  %v1569_v32 = vsel %vm9409_vm9, %v1568_v42, %v1564_v11  ;;  %vm10560_vm11 = vmmov %vm10553_vm0  ;;  %v4407_v11 = vld [vmem:[#allocation3 + $0x78] sm:$0xff] }
 0x382   : > { %v1646_v56 = vmul.f32 %v1569_v32, %v9303_v33  ;;  %v3930_v33 = vmul.f32 %v9144_v47, %v8225_v2  ;;  %vm10563_vm9 = vmmov %vm10553_vm0 }
 0x383   : > { %4288 = vst.msk [vmem:[#allocation3 + $0x50] sm:$0xff] %vm10546_vm15, %v4272_v30  ;;  %v3832_v38 = vld [vmem:[#allocation3 + $0x40] sm:$0xff]  ;;  %v4331_v30 = vmul.f32 %v9423_v46, %v8427_v29  ;;  %v4439_v49 = vadd.f32 %v4423_v17, %v4406_v23  ;;  %vm1576_vm15 = vweird.f32 %v9413_v62 }
 0x384   : > { %v3865_v60 = vadd.f32 %v3849_v13, %v3832_v38  ;;  %v4073_v7 = vld [vmem:[#allocation3 + $0x30] sm:$0xff]  ;;  %v9429_v13 = vld [vmem:[#allocation2 + $0x104] sm:$0xff]  ;;  %v1947_v42 = vsel %vm9346_vm12, %v1646_v56, 0.0 }
 0x385   : > { %v3907_v31 = vld [vmem:[#allocation3 + $0x10] sm:$0xff]  ;;  %v4106_v34 = vadd.f32 %v4090_v21, %v4073_v7  ;;  %v4337_v53 = vmul.f32 %v9429_v13, %v8427_v29  ;;  %4455 = vst.msk [vmem:[#allocation3 + $0x70] sm:$0xff] %vm10554_vm8, %v4439_v49  ;;  %v10562_v56 = vld [vmem:[#allocation17_spill] sm:$0xff] }
 0x386   : > { %3881 = vst.msk [vmem:[#allocation3 + $0x40] sm:$0xff] %vm10552_vm2, %v3865_v60  ;;  %v3940_v27 = vadd.f32 %v3924_v24, %v3907_v31  ;;  %v4005_v60 = vmul.f32 %v8267_v45, %v9094_v0  ;;  %v6006_v31 = vld [vmem:[#allocation2 + $0xc2] sm:$0xff] }
 0x387   : > { %v4314_v24 = vld [vmem:[#allocation3 + $0x20] sm:$0xff]  ;;  %4122 = vst.msk [vmem:[#allocation3 + $0x30] sm:$0xff] %vm10555_vm10, %v4106_v34  ;;  %v5845_v23 = vpop.eup %5844  ;;  %v1582_v34 = vand.u32 2147483648, %v9413_v62  ;;  %vm10564_vm10 = vmmov %vm10553_vm0 }
 0x388   : > { %v4148_v5 = vld [vmem:[#allocation3] sm:$0xff]  ;;  %3956 = vst.msk [vmem:[#allocation3 + $0x10] sm:$0xff] %vm10553_vm0, %v3940_v27  ;;  %v4347_v38 = vadd.f32 %v4331_v30, %v4314_v24  ;;  %v1572_v51 = vmul.f32 %v5845_v23, %v9413_v62  ;;  %vm1577_vm6 = vweird.f32 %v5845_v23 }
 0x389   : > { %v4181_v19 = vadd.f32 %v4165_v52, %v4148_v5  ;;  %1996 = vst.msk [vmem:[#allocation2 + $0x168] sm:$0xff] %vm10556_vm3, %v1947_v42  ;;  %v4171_v52 = vmul.f32 %v6006_v31, %v10527_v40  ;;  %v4413_v42 = vmul.f32 %v9011_v57, %v10551_v36  ;;  %vm1578_vm2 = vmor %vm1576_vm15, %vm1577_vm6  ;;  %v9464_v31 = vld [vmem:[#allocation2 + $0x81] sm:$0xff] }
 0x38a   : > { %v4320_v50 = vld [vmem:[#allocation3 + $0x50] sm:$0xff]  ;;  %4363 = vst.msk [vmem:[#allocation3 + $0x20] sm:$0xff] %vm10558_vm5, %v4347_v38  ;;  %v1573_v21 = vsub.f32 1.0, %v1572_v51  ;;  %v4246_v38 = vmul.f32 %v9360_v55, %v10540_v37  ;;  %vm9473_vm3 = vmand %vm9346_vm12, %vm1756_vm14 }
 0x38b   : > { %v4353_v10 = vadd.f32 %v4337_v53, %v4320_v50  ;;  %4197 = vst.msk [vmem:[#allocation3] sm:$0xff] %vm10557_vm7, %v4181_v19  ;;  %vm10568_vm7 = vmmov %vm10553_vm0 }
 0x38c   : > { %v1574_v27 = vmul.f32 %v5845_v23, %v1573_v21  ;;  %v4487_v32 = vld [vmem:[#allocation3 + $0x70] sm:$0xff]  ;;  %vm10569_vm5 = vmmov %vm10553_vm0 }
 0x38d   : > { %v3913_v8 = vld [vmem:[#allocation3 + $0x40] sm:$0xff]  ;;  %4369 = vst.msk [vmem:[#allocation3 + $0x50] sm:$0xff] %vm10559_vm4, %v4353_v10  ;;  %vm10570_vm14 = vmmov %vm10553_vm0 }
 0x38e   : > { %v3946_v61 = vadd.f32 %v3930_v33, %v3913_v8  ;;  %v4154_v7 = vld [vmem:[#allocation3 + $0x30] sm:$0xff]  ;;  %v1575_v24 = vadd.f32 %v5845_v23, %v1574_v27  ;;  %v1580_v8 = vand.u32 2147483647, %v9413_v62  ;;  %vm10571_vm12 = vmmov %vm10553_vm0  ;;  %v6012_v62 = vld [vmem:[#allocation2 + $0x121] sm:$0xff] }
 0x38f   : > { %v3988_v17 = vld [vmem:[#allocation3 + $0x10] sm:$0xff]  ;;  %v4187_v5 = vadd.f32 %v4171_v52, %v4154_v7  ;;  %v4086_v52 = vmul.f32 %v9464_v31, %v8308_v44  ;;  %vm10572_vm4 = vmmov %vm10553_vm0 }
 0x390   : > { %3962 = vst.msk [vmem:[#allocation3 + $0x40] sm:$0xff] %vm10560_vm11, %v3946_v61  ;;  %v4021_v2 = vadd.f32 %v4005_v60, %v3988_v17  ;;  %v4391_v30 = vld [vmem:[#allocation2 + $0x168] sm:$0xff]  ;;  %v1583_v60 = vor.u32 1.1754944e-38, %v1582_v34  ;;  %v4011_v61 = vmul.f32 %v9162_v25, %v8267_v45  ;;  %v1579_v21 = vsel %vm1578_vm2, %v5845_v23, %v1575_v24  ;;  %v10573_v24 = vld [vmem:[#allocation18_spill] sm:$0xff]  ;;  %vm10574_vm11 = vmmov %vm10553_vm0 }
 0x391   : > { %v4471_v49 = vld [vmem:[#allocation2 + $0x161] sm:$0xff]  ;;  %v4424_v53 = vmul.f32 %v10551_v36, %v4391_v30  ;;  %4203 = vst.msk [vmem:[#allocation3 + $0x30] sm:$0xff] %vm10563_vm9, %v4187_v5  ;;  %vm1581_vm8 = vcmp.eq.f32.partialorder %v1580_v8, 8.507059e+37  ;;  %vm10576_vm15 = vmmov %vm10553_vm0  ;;  %v4500_v45 = vmul.f32 %v6012_v62, %v10562_v56  ;;  %v4254_v62 = vmul.f32 %v9223_v9, %v10540_v37 }
 0x392   : > { %4037 = vst.msk [vmem:[#allocation3 + $0x10] sm:$0xff] %vm10561_vm1, %v4021_v2  ;;  %v4504_v19 = vmul.f32 %v10562_v56, %v4471_v49  ;;  %v4229_v50 = vld [vmem:[#allocation3] sm:$0xff]  ;;  %v1584_v2 = vsel %vm1581_vm8, %v1583_v60, %v1579_v21  ;;  %vm10575_vm1 = vmmov %vm10553_vm0 }
 0x393   : > { %v4396_v10 = vld [vmem:[#allocation3 + $0x20] sm:$0xff]  ;;  %v4440_v33 = vadd.f32 %v4424_v53, %v4407_v11  ;;  %v4262_v55 = vadd.f32 %v4246_v38, %v4229_v50  ;;  %v1647_v7 = vmul.f32 %v1584_v2, %v9373_v28  ;;  %v4327_v38 = vmul.f32 %v8427_v29, %v9053_v16  ;;  %vm10577_vm6 = vmmov %vm10553_vm0 }
 0x394   : > { %v4520_v51 = vadd.f32 %v4504_v19, %v4487_v32  ;;  %v4429_v17 = vadd.f32 %v4413_v42, %v4396_v10  ;;  %v4402_v23 = vld [vmem:[#allocation3 + $0x50] sm:$0xff]  ;;  %v6008_v11 = vld [vmem:[#allocation2 + $0x120] sm:$0xff]  ;;  %v4092_v10 = vmul.f32 %v9183_v20, %v8308_v44  ;;  %vm10578_vm9 = vmmov %vm10553_vm0 }
 0x395   : > { %4456 = vst.msk [vmem:[#allocation3 + $0x78] sm:$0xff] %vm10553_vm0, %v4440_v33  ;;  %v4419_v27 = vmul.f32 %v6008_v11, %v10551_v36  ;;  %v6009_v49 = vld [vmem:[#allocation2 + $0xc3] sm:$0xff]  ;;  %v1948_v5 = vsel %vm9473_vm3, %v1647_v7, 0.0  ;;  %vm10579_vm2 = vmmov %vm10553_vm0 }
 0x396   : > { %4536 = vst.msk [vmem:[#allocation3 + $0x70] sm:$0xff] %vm10564_vm10, %v4520_v51  ;;  %v4252_v32 = vmul.f32 %v6009_v49, %v10540_v37  ;;  %v4552_v34 = vld [vmem:[#allocation2 + $0x162] sm:$0xff]  ;;  %v10580_v49 = vld [vmem:[#allocation19_spill] sm:$0xff]  ;;  %vm10581_vm8 = vmmov %vm10553_vm0 }
 0x397   : > { %v3994_v57 = vld [vmem:[#allocation3 + $0x40] sm:$0xff]  ;;  %4278 = vst.msk [vmem:[#allocation3] sm:$0xff] %vm10568_vm7, %v4262_v55  ;;  %v4435_v19 = vadd.f32 %v4419_v27, %v4402_v23  ;;  %v4585_v50 = vmul.f32 %v10573_v24, %v4552_v34  ;;  %vm10582_vm10 = vmmov %vm10553_vm0 }
 0x398   : > { %v4027_v25 = vadd.f32 %v4011_v61, %v3994_v57  ;;  %v4235_v53 = vld [vmem:[#allocation3 + $0x30] sm:$0xff]  ;;  %4445 = vst.msk [vmem:[#allocation3 + $0x20] sm:$0xff] %vm10570_vm14, %v4429_v17  ;;  %v4300_v8 = vld [vmem:[#allocation2 + $0xc4] sm:$0xff]  ;;  %vm10583_vm3 = vmmov %vm10553_vm0 }
 0x399   : > { %v4069_v30 = vld [vmem:[#allocation3 + $0x10] sm:$0xff]  ;;  %1997 = vst.msk [vmem:[#allocation2 + $0x170] sm:$0xff] %vm10571_vm12, %v1948_v5  ;;  %v4268_v28 = vadd.f32 %v4252_v32, %v4235_v53  ;;  %v6010_v60 = vld [vmem:[#allocation2 + $0xc1] sm:$0xff]  ;;  %v4333_v20 = vmul.f32 %v8427_v29, %v4300_v8  ;;  %v4173_v5 = vmul.f32 %v9204_v26, %v10527_v40  ;;  %vm10584_vm7 = vmmov %vm10553_vm0 }
 0x39a   : > { %4043 = vst.msk [vmem:[#allocation3 + $0x40] sm:$0xff] %vm10569_vm5, %v4027_v25  ;;  %v4102_v1 = vadd.f32 %v4086_v52, %v4069_v30  ;;  %v4494_v61 = vmul.f32 %v6010_v60, %v10562_v56  ;;  %v9496_v52 = vld [vmem:[#allocation2 + $0x82] sm:$0xff]  ;;  %vm10585_vm5 = vmmov %vm10553_vm0 }
 0x39b   : > { %4284 = vst.msk [vmem:[#allocation3 + $0x30] sm:$0xff] %vm10574_vm11, %v4268_v28  ;;  %v4167_v16 = vmul.f32 %v9496_v52, %v10527_v40  ;;  %v4633_v25 = vld [vmem:[#allocation2 + $0x163] sm:$0xff]  ;;  %vm10586_vm14 = vmmov %vm10553_vm0 }
 0x39c   : > { %4118 = vst.msk [vmem:[#allocation3 + $0x10] sm:$0xff] %vm10572_vm4, %v4102_v1  ;;  %v4666_v32 = vmul.f32 %v10580_v49, %v4633_v25  ;;  %v4409_v1 = vmul.f32 %v10551_v36, %v9094_v0  ;;  %v4382_v28 = vld [vmem:[#allocation2 + $0xe0] sm:$0xff]  ;;  %vm10587_vm12 = vmmov %vm10553_vm0 }
 0x39d   : > { %v4568_v42 = vld [vmem:[#allocation3 + $0x70] sm:$0xff]  ;;  %4451 = vst.msk [vmem:[#allocation3 + $0x50] sm:$0xff] %vm10575_vm1, %v4435_v19  ;;  %v4415_v40 = vmul.f32 %v10551_v36, %v4382_v28  ;;  %vm10588_vm4 = vmmov %vm10553_vm0 }
 0x39e   : > { %v4601_v33 = vadd.f32 %v4585_v50, %v4568_v42  ;;  %v4310_v51 = vld [vmem:[#allocation3] sm:$0xff]  ;;  %v4575_v50 = vmul.f32 %v9353_v54, %v10573_v24  ;;  %vm10589_vm11 = vmmov %vm10553_vm0 }
 0x39f   : > { %v4343_v55 = vadd.f32 %v4327_v38, %v4310_v51  ;;  %v4477_v17 = vld [vmem:[#allocation3 + $0x20] sm:$0xff]  ;;  %vm10590_vm1 = vmmov %vm10553_vm0 }
 0x3a0   : > { %4617 = vst.msk [vmem:[#allocation3 + $0x70] sm:$0xff] %vm10576_vm15, %v4601_v33  ;;  %v4510_v44 = vadd.f32 %v4494_v61, %v4477_v17  ;;  %v9516_v51 = vld [vmem:[#allocation2 + $0x83] sm:$0xff]  ;;  %vm10591_vm15 = vmmov %vm10553_vm0 }
 0x3a1   : > { %v4075_v21 = vld [vmem:[#allocation3 + $0x40] sm:$0xff]  ;;  %4359 = vst.msk [vmem:[#allocation3] sm:$0xff] %vm10577_vm6, %v4343_v55  ;;  %v4248_v0 = vmul.f32 %v9516_v51, %v10540_v37  ;;  %vm10592_vm6 = vmmov %vm10553_vm0 }
 0x3a2   : > { %v4108_v57 = vadd.f32 %v4092_v10, %v4075_v21  ;;  %v4316_v11 = vld [vmem:[#allocation3 + $0x30] sm:$0xff]  ;;  %4526 = vst.msk [vmem:[#allocation3 + $0x20] sm:$0xff] %vm10579_vm2, %v4510_v44  ;;  %v6014_v54 = vld [vmem:[#allocation2 + $0x122] sm:$0xff]  ;;  %vm10594_vm2 = vmmov %vm10553_vm0 }
 0x3a3   : > { %v4150_v2 = vld [vmem:[#allocation3 + $0x10] sm:$0xff]  ;;  %v4349_v27 = vadd.f32 %v4333_v20, %v4316_v11  ;;  %v4581_v60 = vmul.f32 %v6014_v54, %v10573_v24  ;;  %v4714_v61 = vld [vmem:[#allocation2 + $0x164] sm:$0xff]  ;;  %v4490_v20 = vmul.f32 %v9464_v31, %v10562_v56  ;;  %v4329_v31 = vmul.f32 %v8427_v29, %v9189_v43  ;;  %v4488_v54 = vld [vmem:[#allocation3 + $0x78] sm:$0xff] }
 0x3a4   : > { %4124 = vst.msk [vmem:[#allocation3 + $0x40] sm:$0xff] %vm10578_vm9, %v4108_v57  ;;  %v4183_v23 = vadd.f32 %v4167_v16, %v4150_v2  ;;  %v4483_v7 = vld [vmem:[#allocation3 + $0x50] sm:$0xff]  ;;  %v4747_v44 = vmul.f32 %v8631_v6, %v4714_v61  ;;  %vm10593_vm9 = vmmov %vm10553_vm0 }
 0x3a5   : > { %v4516_v30 = vadd.f32 %v4500_v45, %v4483_v7  ;;  %4365 = vst.msk [vmem:[#allocation3 + $0x30] sm:$0xff] %vm10581_vm8, %v4349_v27  ;;  %vm10595_vm8 = vmmov %vm10553_vm0 }
 0x3a6   : > { %4199 = vst.msk [vmem:[#allocation3 + $0x10] sm:$0xff] %vm10553_vm0, %v4183_v23  ;;  %v4656_v23 = vmul.f32 %v9398_v63, %v10580_v49 }
 0x3a7   : > { %v4649_v34 = vld [vmem:[#allocation3 + $0x70] sm:$0xff]  ;;  %4532 = vst.msk [vmem:[#allocation3 + $0x50] sm:$0xff] %vm10582_vm10, %v4516_v30  ;;  %vm10596_vm10 = vmmov %vm10553_vm0 }
 0x3a8   : > { %v4682_v53 = vadd.f32 %v4666_v32, %v4649_v34  ;;  %v4392_v19 = vld [vmem:[#allocation3] sm:$0xff] }
 0x3a9   : > { %v4425_v42 = vadd.f32 %v4409_v1, %v4392_v19  ;;  %v4558_v33 = vld [vmem:[#allocation3 + $0x20] sm:$0xff] }
 0x3aa   : > { %4698 = vst.msk [vmem:[#allocation3 + $0x70] sm:$0xff] %vm10583_vm3, %v4682_v53  ;;  %v4591_v26 = vadd.f32 %v4575_v50, %v4558_v33  ;;  %v6015_v1 = vld [vmem:[#allocation2 + $0xe1] sm:$0xff]  ;;  %v4472_v50 = vld [vmem:[#allocation2 + $0x169] sm:$0xff]  ;;  %v4335_v33 = vmul.f32 %v9245_v14, %v8427_v29  ;;  %vm10597_vm3 = vmmov %vm10553_vm0 }
 0x3ab   : > { %v4156_v38 = vld [vmem:[#allocation3 + $0x40] sm:$0xff]  ;;  %4441 = vst.msk [vmem:[#allocation3] sm:$0xff] %vm10584_vm7, %v4425_v42  ;;  %v4496_v9 = vmul.f32 %v6015_v1, %v10562_v56  ;;  %v4571_v42 = vmul.f32 %v9496_v52, %v10573_v24  ;;  %v4737_v52 = vmul.f32 %v9144_v47, %v8631_v6  ;;  %vm10598_vm7 = vmmov %vm10553_vm0 }
 0x3ac   : > { %v4189_v10 = vadd.f32 %v4173_v5, %v4156_v38  ;;  %v4398_v55 = vld [vmem:[#allocation3 + $0x30] sm:$0xff]  ;;  %4607 = vst.msk [vmem:[#allocation3 + $0x20] sm:$0xff] %vm10586_vm14, %v4591_v26  ;;  %v6016_v34 = vld [vmem:[#allocation2 + $0x123] sm:$0xff]  ;;  %vm10600_vm14 = vmmov %vm10553_vm0 }
 0x3ad   : > { %v4231_v8 = vld [vmem:[#allocation3 + $0x10] sm:$0xff]  ;;  %v4431_v57 = vadd.f32 %v4415_v40, %v4398_v55  ;;  %v4662_v63 = vmul.f32 %v6016_v34, %v10580_v49  ;;  %v4505_v40 = vmul.f32 %v10562_v56, %v4472_v50 }
 0x3ae   : > { %4205 = vst.msk [vmem:[#allocation3 + $0x40] sm:$0xff] %vm10585_vm5, %v4189_v10  ;;  %v4264_v21 = vadd.f32 %v4248_v0, %v4231_v8  ;;  %v4564_v17 = vld [vmem:[#allocation3 + $0x50] sm:$0xff]  ;;  %v9553_v0 = vld [vmem:[%s9888_s5] ss:$0 sm:$0xff]  ;;  %vm10599_vm5 = vmmov %vm10553_vm0 }
 0x3af   : > { %v4597_v16 = vadd.f32 %v4581_v60, %v4564_v17  ;;  %4447 = vst.msk [vmem:[#allocation3 + $0x30] sm:$0xff] %vm10588_vm4, %v4431_v57  ;;  %v4521_v29 = vadd.f32 %v4505_v40, %v4488_v54  ;;  %v4411_v57 = vmul.f32 %v9169_v18, %v10551_v36  ;;  %v4553_v18 = vld [vmem:[#allocation2 + $0x16a] sm:$0xff]  ;;  %vm10602_vm4 = vmmov %vm10553_vm0  ;;  %v4788_v40 = vld [vmem:[#allocation3 + $0x38] sm:$0xff] }
 0x3b0   : > { %4280 = vst.msk [vmem:[#allocation3 + $0x10] sm:$0xff] %vm10587_vm12, %v4264_v21  ;;  %vm10601_vm12 = vmmov %vm10553_vm0 }
 0x3b1   : > { %v4730_v2 = vld [vmem:[#allocation3 + $0x70] sm:$0xff]  ;;  %4613 = vst.msk [vmem:[#allocation3 + $0x50] sm:$0xff] %vm10589_vm11, %v4597_v16  ;;  %v6018_v16 = vld [vmem:[#allocation2 + $0xe2] sm:$0xff]  ;;  %vm10603_vm11 = vmmov %vm10553_vm0 }
 0x3b2   : > { %v4763_v45 = vadd.f32 %v4747_v44, %v4730_v2  ;;  %v4473_v25 = vld [vmem:[#allocation3] sm:$0xff]  ;;  %v4577_v44 = vmul.f32 %v6018_v16, %v10573_v24  ;;  %4537 = vst.msk [vmem:[#allocation3 + $0x78] sm:$0xff] %vm10597_vm3, %v4521_v29  ;;  %v4498_v16 = vmul.f32 %v9296_v3, %v10562_v56 }
 0x3b3   : > { %v4506_v27 = vadd.f32 %v4490_v20, %v4473_v25  ;;  %v4639_v30 = vld [vmem:[#allocation3 + $0x20] sm:$0xff] }
 0x3b4   : > { %4779 = vst.msk [vmem:[#allocation3 + $0x70] sm:$0xff] %vm10590_vm1, %v4763_v45  ;;  %v4672_v32 = vadd.f32 %v4656_v23, %v4639_v30  ;;  %v6019_v20 = vld [vmem:[#allocation2 + $0x124] sm:$0xff]  ;;  %v4586_v30 = vmul.f32 %v10573_v24, %v4553_v18  ;;  %vm10604_vm1 = vmmov %vm10553_vm0 }
 0x3b5   : > { %v4237_v11 = vld [vmem:[#allocation3 + $0x40] sm:$0xff]  ;;  %4522 = vst.msk [vmem:[#allocation3] sm:$0xff] %vm10591_vm15, %v4506_v27  ;;  %v4743_v2 = vmul.f32 %v6019_v20, %v8631_v6  ;;  %v4652_v27 = vmul.f32 %v9516_v51, %v10580_v49  ;;  %vm10605_vm15 = vmmov %vm10553_vm0 }
 0x3b6   : > { %v4270_v7 = vadd.f32 %v4254_v62, %v4237_v11  ;;  %v4479_v53 = vld [vmem:[#allocation3 + $0x30] sm:$0xff]  ;;  %4688 = vst.msk [vmem:[#allocation3 + $0x20] sm:$0xff] %vm10593_vm9, %v4672_v32  ;;  %vm10607_vm9 = vmmov %vm10553_vm0 }
 0x3b7   : > { %v4312_v37 = vld [vmem:[#allocation3 + $0x10] sm:$0xff]  ;;  %v4512_v19 = vadd.f32 %v4496_v9, %v4479_v53  ;;  %v6020_v53 = vld [vmem:[#allocation2 + $0xe3] sm:$0xff]  ;;  %vm10610_vm3 = vmmov %vm10604_vm1 }
 0x3b8   : > { %4286 = vst.msk [vmem:[#allocation3 + $0x40] sm:$0xff] %vm10592_vm6, %v4270_v7  ;;  %v4345_v5 = vadd.f32 %v4329_v31, %v4312_v37  ;;  %v4645_v28 = vld [vmem:[#allocation3 + $0x50] sm:$0xff]  ;;  %v4417_v37 = vmul.f32 %v9274_v12, %v10551_v36  ;;  %vm10606_vm6 = vmmov %vm10553_vm0 }
 0x3b9   : > { %v4678_v38 = vadd.f32 %v4662_v63, %v4645_v28  ;;  %4528 = vst.msk [vmem:[#allocation3 + $0x30] sm:$0xff] %vm10553_vm0, %v4512_v19  ;;  %v4569_v1 = vld [vmem:[#allocation3 + $0x78] sm:$0xff]  ;;  %v4658_v19 = vmul.f32 %v6020_v53, %v10580_v49 }
 0x3ba   : > { %4361 = vst.msk [vmem:[#allocation3 + $0x10] sm:$0xff] %vm10594_vm2, %v4345_v5  ;;  %v4602_v34 = vadd.f32 %v4586_v30, %v4569_v1  ;;  %v4492_v5 = vmul.f32 %v9233_v4, %v10562_v56  ;;  %vm10608_vm2 = vmmov %vm10553_vm0 }
 0x3bb   : > { %v4795_v10 = vld [vmem:[#allocation3 + $0x70] sm:$0xff]  ;;  %4694 = vst.msk [vmem:[#allocation3 + $0x50] sm:$0xff] %vm10595_vm8, %v4678_v38  ;;  %vm10609_vm8 = vmmov %vm10604_vm1 }
 0x3bc   : > { %v9556_v26 = vadd.f32 %v9553_v0, %v4795_v10  ;;  %v4554_v8 = vld [vmem:[#allocation3] sm:$0xff]  ;;  %4618 = vst.msk [vmem:[#allocation3 + $0x78] sm:$0xff] %vm10604_vm1, %v4602_v34 }
 0x3bd   : > { %v4587_v61 = vadd.f32 %v4571_v42, %v4554_v8  ;;  %v4720_v55 = vld [vmem:[#allocation3 + $0x20] sm:$0xff]  ;;  %v4634_v8 = vld [vmem:[#allocation2 + $0x16b] sm:$0xff] }
 0x3be   : > { %v5554_v21 = vmul.f32 -1.442695, %v9556_v26  ;;  %v4753_v17 = vadd.f32 %v4737_v52, %v4720_v55 }
 0x3bf   : > { %v4318_v60 = vld [vmem:[#allocation3 + $0x40] sm:$0xff]  ;;  %4603 = vst.msk [vmem:[#allocation3] sm:$0xff] %vm10596_vm10, %v4587_v61 }
 0x3c0   : > { %v4351_v14 = vadd.f32 %v4335_v33, %v4318_v60  ;;  %5846 = vpow2.f32 %v5554_v21  ;;  %v4560_v45 = vld [vmem:[#allocation3 + $0x30] sm:$0xff]  ;;  %4769 = vst.msk [vmem:[#allocation3 + $0x20] sm:$0xff] %vm10599_vm5, %v4753_v17  ;;  %v4782_v33 = vld [vmem:[#allocation3 + $0x8] sm:$0xff]  ;;  %v4733_v60 = vmul.f32 %v8631_v6, %v9189_v43  ;;  %v9605_v17 = vadd.f32 %v9553_v0, %v4788_v40  ;;  %vm10611_vm5 = vmmov %vm10604_vm1 }
 0x3c1   : > { %v4394_v47 = vld [vmem:[#allocation3 + $0x10] sm:$0xff]  ;;  %v4593_v25 = vadd.f32 %v4577_v44, %v4560_v45  ;;  %v4706_v21 = vld [vmem:[#allocation2 + $0xe4] sm:$0xff] }
 0x3c2   : > { %4367 = vst.msk [vmem:[#allocation3 + $0x40] sm:$0xff] %vm10598_vm7, %v4351_v14  ;;  %v4427_v62 = vadd.f32 %v4411_v57, %v4394_v47  ;;  %v4726_v23 = vld [vmem:[#allocation3 + $0x50] sm:$0xff]  ;;  %v4667_v14 = vmul.f32 %v10580_v49, %v4634_v8  ;;  %v9602_v57 = vadd.f32 %v9553_v0, %v4782_v33  ;;  %v4739_v45 = vmul.f32 %v8631_v6, %v4706_v21 }
 0x3c3   : > { %v4759_v11 = vadd.f32 %v4743_v2, %v4726_v23  ;;  %4609 = vst.msk [vmem:[#allocation3 + $0x30] sm:$0xff] %vm10601_vm12, %v4593_v25  ;;  %v4650_v44 = vld [vmem:[#allocation3 + $0x78] sm:$0xff]  ;;  %v4573_v25 = vmul.f32 %v9318_v35, %v10573_v24  ;;  %vm10612_vm12 = vmmov %vm10604_vm1 }
 0x3c4   : > { %4443 = vst.msk [vmem:[#allocation3 + $0x10] sm:$0xff] %vm10600_vm14, %v4427_v62  ;;  %v4683_v20 = vadd.f32 %v4667_v14, %v4650_v44  ;;  %v5541_v2 = vmul.f32 -1.442695, %v9602_v57  ;;  %v5547_v62 = vmul.f32 -1.442695, %v9605_v17 }
 0x3c5   : > { %4775 = vst.msk [vmem:[#allocation3 + $0x50] sm:$0xff] %vm10602_vm4, %v4759_v11  ;;  %vm10613_vm4 = vmmov %vm10604_vm1 }
 0x3c6   : > { %v5847_v7 = vpop.eup %5846  ;;  %v4635_v31 = vld [vmem:[#allocation3] sm:$0xff]  ;;  %4699 = vst.msk [vmem:[#allocation3 + $0x78] sm:$0xff] %vm10609_vm8, %v4683_v20  ;;  %v4660_v20 = vmul.f32 %v9385_v59, %v10580_v49 }
 0x3c7   : > { %v9576_v32 = vadd.f32 1.0, %v5847_v7  ;;  %v4668_v9 = vadd.f32 %v4652_v27, %v4635_v31  ;;  %v4785_v51 = vld [vmem:[#allocation3 + $0x20] sm:$0xff] }
 0x3c8   : > { %v9587_v38 = vadd.f32 %v9553_v0, %v4785_v51 }
 0x3c9   : > { %v4400_v63 = vld [vmem:[#allocation3 + $0x40] sm:$0xff]  ;;  %5848 = vrcp.f32 %v9576_v32  ;;  %4684 = vst.msk [vmem:[#allocation3] sm:$0xff] %vm10603_vm11, %v4668_v9  ;;  %v5100_v23 = vand.u32 2147483647, %v9576_v32  ;;  %v5102_v18 = vand.u32 2147483648, %v9576_v32  ;;  %vm5096_vm10 = vweird.f32 %v9576_v32  ;;  %vm10614_vm11 = vmmov %vm10604_vm1 }
 0x3ca   : > { %v4433_v28 = vadd.f32 %v4417_v37, %v4400_v63  ;;  %v4641_v36 = vld [vmem:[#allocation3 + $0x30] sm:$0xff]  ;;  %v5544_v10 = vmul.f32 -1.442695, %v9587_v38 }
 0x3cb   : > { %v4475_v50 = vld [vmem:[#allocation3 + $0x10] sm:$0xff]  ;;  %v4674_v4 = vadd.f32 %v4658_v19, %v4641_v36  ;;  %v5103_v34 = vor.u32 1.1754944e-38, %v5102_v18  ;;  %vm5101_vm14 = vcmp.eq.f32.partialorder %v5100_v23, 8.507059e+37 }
 0x3cc   : > { %v4508_v12 = vadd.f32 %v4492_v5, %v4475_v50  ;;  %4449 = vst.msk [vmem:[#allocation3 + $0x40] sm:$0xff] %vm10605_vm15, %v4433_v28  ;;  %v4791_v42 = vld [vmem:[#allocation3 + $0x50] sm:$0xff]  ;;  %5850 = vpow2.f32 %v5544_v10  ;;  %v4579_v10 = vmul.f32 %v9329_v39, %v10573_v24 }
 0x3cd   : > { %v9593_v52 = vadd.f32 %v9553_v0, %v4791_v42  ;;  %4690 = vst.msk [vmem:[#allocation3 + $0x30] sm:$0xff] %vm10607_vm9, %v4674_v4  ;;  %v4715_v63 = vld [vmem:[#allocation2 + $0x16c] sm:$0xff]  ;;  %v4731_v36 = vld [vmem:[#allocation3 + $0x78] sm:$0xff] }
 0x3ce   : > { %4524 = vst.msk [vmem:[#allocation3 + $0x10] sm:$0xff] %vm10606_vm6, %v4508_v12  ;;  %v4748_v28 = vmul.f32 %v8631_v6, %v4715_v63 }
 0x3cf   : > { %v5849_v54 = vpop.eup %5848  ;;  %v5550_v61 = vmul.f32 -1.442695, %v9593_v52 }
 0x3d0   : > { %v5092_v29 = vmul.f32 %v5849_v54, %v9576_v32  ;;  %v4716_v55 = vld [vmem:[#allocation3] sm:$0xff]  ;;  %vm5097_vm0 = vweird.f32 %v5849_v54  ;;  %v4764_v33 = vadd.f32 %v4748_v28, %v4731_v36 }
 0x3d1   : > { %v4749_v47 = vadd.f32 %v4733_v60, %v4716_v55  ;;  %5852 = vpow2.f32 %v5550_v61  ;;  %vm5098_vm7 = vmor %vm5096_vm10, %vm5097_vm0 }
 0x3d2   : > { %v5093_v43 = vsub.f32 1.0, %v5092_v29  ;;  %v5851_v3 = vpop.eup %5850  ;;  %5854 = vpow2.f32 %v5541_v2  ;;  %4780 = vst.msk [vmem:[#allocation3 + $0x78] sm:$0xff] %vm10613_vm4, %v4764_v33 }
 0x3d3   : > { %v4481_v11 = vld [vmem:[#allocation3 + $0x40] sm:$0xff]  ;;  %4765 = vst.msk [vmem:[#allocation3] sm:$0xff] %vm10608_vm2, %v4749_v47  ;;  %5856 = vpow2.f32 %v5547_v62  ;;  %v9618_v1 = vadd.f32 1.0, %v5851_v3 }
 0x3d4   : > { %v5094_v56 = vmul.f32 %v5849_v54, %v5093_v43  ;;  %v4514_v27 = vadd.f32 %v4498_v16, %v4481_v11  ;;  %v4722_v31 = vld [vmem:[#allocation3 + $0x30] sm:$0xff]  ;;  %v4735_v43 = vmul.f32 %v9423_v46, %v8631_v6 }
 0x3d5   : > { %v4556_v7 = vld [vmem:[#allocation3 + $0x10] sm:$0xff]  ;;  %v4755_v9 = vadd.f32 %v4739_v45, %v4722_v31  ;;  %5858 = vrcp.f32 %v9618_v1  ;;  %v4950_v55 = vand.u32 2147483647, %v9618_v1  ;;  %vm4946_vm15 = vweird.f32 %v9618_v1 }
 0x3d6   : > { %v4589_v30 = vadd.f32 %v4573_v25, %v4556_v7  ;;  %v5095_v35 = vadd.f32 %v5849_v54, %v5094_v56  ;;  %4530 = vst.msk [vmem:[#allocation3 + $0x40] sm:$0xff] %vm10610_vm3, %v4514_v27 }
 0x3d7   : > { %v5853_v37 = vpop.eup %5852  ;;  %4771 = vst.msk [vmem:[#allocation3 + $0x30] sm:$0xff] %vm10612_vm12, %v4755_v9  ;;  %vm9670_vm9 = vcmp.eq.f32.partialorder %v4950_v55, 8.507059e+37 }
 0x3d8   : > { %4605 = vst.msk [vmem:[#allocation3 + $0x10] sm:$0xff] %vm10611_vm5, %v4589_v30  ;;  %v5099_v5 = vsel %vm5098_vm7, %v5849_v54, %v5095_v35  ;;  %v9625_v51 = vadd.f32 1.0, %v5853_v37  ;;  %v5855_v19 = vpop.eup %5854  ;;  %v4654_v54 = vmul.f32 %v9376_v41, %v10580_v49  ;;  %v4952_v41 = vand.u32 2147483648, %v9618_v1  ;;  %vm10617_vm7 = vmmov %vm10604_vm1 }
 0x3d9   : > { %v5104_v53 = vsel %vm5101_vm14, %v5103_v34, %v5099_v5  ;;  %v5857_v12 = vpop.eup %5856  ;;  %v9635_v42 = vadd.f32 1.0, %v5855_v19  ;;  %v4796_v31 = vld [vmem:[#allocation3 + $0x78] sm:$0xff]  ;;  %vm10618_vm5 = vmmov %vm10604_vm1 }
 0x3da   : > { %v9628_v32 = vmul.f32 %v5104_v53, %v9556_v26  ;;  %v4781_v50 = vld [vmem:[#allocation3] sm:$0xff]  ;;  %5860 = vrcp.f32 %v9625_v51  ;;  %v9641_v40 = vadd.f32 1.0, %v5857_v12  ;;  %v4953_v46 = vor.u32 1.1754944e-38, %v4952_v41 }
 0x3db   : > { %v9633_v4 = vadd.f32 %v9553_v0, %v4781_v50  ;;  %v5859_v8 = vpop.eup %5858  ;;  %5862 = vrcp.f32 %v9635_v42  ;;  %v4907_v23 = vand.u32 2147483648, %v9635_v42  ;;  %vm5036_vm2 = vweird.f32 %v9625_v51 }
 0x3dc   : > { %v5189_v26 = vpack.c.bf16 %v9628_v32, %v9628_v32  ;;  %v4942_v39 = vmul.f32 %v5859_v8, %v9618_v1  ;;  %vm4947_vm6 = vweird.f32 %v5859_v8  ;;  %vm4901_vm0 = vweird.f32 %v9635_v42 }
 0x3dd   : > { %v4562_v60 = vld [vmem:[#allocation3 + $0x40] sm:$0xff]  ;;  %v5540_v61 = vmul.f32 -1.442695, %v9633_v4  ;;  %v4905_v56 = vand.u32 2147483647, %v9635_v42  ;;  %vm4948_vm8 = vmor %vm4946_vm15, %vm4947_vm6  ;;  %v5042_v7 = vand.u32 2147483648, %v9625_v51  ;;  %v9684_v34 = vadd.f32 %v9553_v0, %v4796_v31 }
 0x3de   : > { %5206 = vst.msk [vmem:[%s8821_s18 + $0x38] sm:$0xf] %vm5191_vm13, %v5189_v26  ;;  %v4595_v21 = vadd.f32 %v4579_v10, %v4562_v60  ;;  %v4787_v14 = vld [vmem:[#allocation3 + $0x30] sm:$0xff]  ;;  %v4943_v47 = vsub.f32 1.0, %v4942_v39  ;;  %v5040_v27 = vand.u32 2147483647, %v9625_v51  ;;  %vm4991_vm15 = vweird.f32 %v9641_v40 }
 0x3df   : > { %v4637_v29 = vld [vmem:[#allocation3 + $0x10] sm:$0xff]  ;;  %5864 = vpow2.f32 %v5540_v61  ;;  %v9657_v44 = vadd.f32 %v9553_v0, %v4787_v14  ;;  %v4908_v5 = vor.u32 1.1754944e-38, %v4907_v23  ;;  %v4995_v12 = vand.u32 2147483647, %v9641_v40 }
 0x3e0   : > { %v4670_v24 = vadd.f32 %v4654_v54, %v4637_v29  ;;  %v9653_v16 = vpop.eup %5860  ;;  %4611 = vst.msk [vmem:[#allocation3 + $0x40] sm:$0xff] %vm10614_vm11, %v4595_v21  ;;  %5866 = vrcp.f32 %v9641_v40  ;;  %v4944_v45 = vmul.f32 %v5859_v8, %v4943_v47  ;;  %v5555_v36 = vmul.f32 -1.442695, %v9684_v34 }
 0x3e1   : > { %v5032_v2 = vmul.f32 %v9653_v16, %v9625_v51  ;;  %v5546_v62 = vmul.f32 -1.442695, %v9657_v44  ;;  %v5863_v25 = vpop.eup %5862  ;;  %vm5037_vm10 = vweird.f32 %v9653_v16  ;;  %v4997_v54 = vand.u32 2147483648, %v9641_v40 }
 0x3e2   : > { %4686 = vst.msk [vmem:[#allocation3 + $0x10] sm:$0xff] %vm10604_vm1, %v4670_v24  ;;  %v4897_v49 = vmul.f32 %v5863_v25, %v9635_v42  ;;  %v4945_v11 = vadd.f32 %v5859_v8, %v4944_v45  ;;  %vm4902_vm3 = vweird.f32 %v5863_v25  ;;  %vm9706_vm14 = vmor %vm5036_vm2, %vm5037_vm10  ;;  %v5043_v24 = vor.u32 1.1754944e-38, %v5042_v7 }
 0x3e3   : > { %v5033_v59 = vsub.f32 1.0, %v5032_v2  ;;  %5868 = vpow2.f32 %v5546_v62  ;;  %vm4903_vm12 = vmor %vm4901_vm0, %vm4902_vm3  ;;  %vm4906_vm11 = vcmp.eq.f32.partialorder %v4905_v56, 8.507059e+37  ;;  %vm5041_vm1 = vcmp.eq.f32.partialorder %v5040_v27, 8.507059e+37 }
 0x3e4   : > { %v4898_v35 = vsub.f32 1.0, %v4897_v49  ;;  %v4949_v9 = vsel %vm4948_vm8, %v5859_v8, %v4945_v11  ;;  %v4741_v62 = vmul.f32 %v9429_v13, %v8631_v6  ;;  %vm10621_vm0 = vmmov %vm10618_vm5 }
 0x3e5   : > { %v5865_v3 = vpop.eup %5864  ;;  %v5034_v37 = vmul.f32 %v9653_v16, %v5033_v59  ;;  %v4954_v53 = vsel %vm9670_vm9, %v4953_v46, %v4949_v9  ;;  %vm4996_vm9 = vcmp.eq.f32.partialorder %v4995_v12, 8.507059e+37 }
 0x3e6   : > { %v5867_v30 = vpop.eup %5866  ;;  %v9680_v1 = vadd.f32 1.0, %v5865_v3  ;;  %v4899_v26 = vmul.f32 %v5863_v25, %v4898_v35  ;;  %v9697_v61 = vmul.f32 %v4954_v53, %v9587_v38 }
 0x3e7   : > { %v4643_v63 = vld [vmem:[#allocation3 + $0x40] sm:$0xff]  ;;  %v4987_v19 = vmul.f32 %v5867_v30, %v9641_v40  ;;  %v5035_v60 = vadd.f32 %v9653_v16, %v5034_v37  ;;  %vm4992_vm4 = vweird.f32 %v5867_v30 }
 0x3e8   : > { %v4676_v28 = vadd.f32 %v4660_v20, %v4643_v63  ;;  %5870 = vrcp.f32 %v9680_v1  ;;  %v4900_v29 = vadd.f32 %v5863_v25, %v4899_v26  ;;  %v5179_v55 = vpack.c.bf16 %v9697_v61, %v9697_v61  ;;  %vm4993_vm6 = vmor %vm4991_vm15, %vm4992_vm4 }
 0x3e9   : > { %v4718_v50 = vld [vmem:[#allocation3 + $0x10] sm:$0xff]  ;;  %v5869_v33 = vpop.eup %5868  ;;  %v4988_v8 = vsub.f32 1.0, %v4987_v19  ;;  %5872 = vpow2.f32 %v5555_v36  ;;  %v5039_v14 = vsel %vm9706_vm14, %v9653_v16, %v5035_v60  ;;  %v4998_v16 = vor.u32 1.1754944e-38, %v4997_v54 }
 0x3ea   : > { %v4751_v10 = vadd.f32 %v4735_v43, %v4718_v50  ;;  %4692 = vst.msk [vmem:[#allocation3 + $0x40] sm:$0xff] %vm10617_vm7, %v4676_v28  ;;  %v9700_v21 = vadd.f32 1.0, %v5869_v33  ;;  %v4904_v41 = vsel %vm4903_vm12, %v5863_v25, %v4900_v29  ;;  %v5044_v42 = vsel %vm5041_vm1, %v5043_v24, %v5039_v14 }
 0x3eb   : > { %v4989_v38 = vmul.f32 %v5867_v30, %v4988_v8  ;;  %v4909_v47 = vsel %vm4906_vm11, %v4908_v5, %v4904_v41  ;;  %5196 = vst.msk [vmem:[%s8821_s18 + $0x10] sm:$0xf] %vm5191_vm13, %v5179_v55  ;;  %v9723_v2 = vmul.f32 %v5044_v42, %v9593_v52  ;;  %v4890_v45 = vand.u32 2147483647, %v9680_v1 }
 0x3ec   : > { %4767 = vst.msk [vmem:[#allocation3 + $0x10] sm:$0xff] %vm10618_vm5, %v4751_v10  ;;  %5874 = vrcp.f32 %v9700_v21  ;;  %v9729_v59 = vmul.f32 %v4909_v47, %v9602_v57  ;;  %v4892_v13 = vand.u32 2147483648, %v9680_v1  ;;  %vm4886_vm8 = vweird.f32 %v9680_v1 }
 0x3ed   : > { %v4990_v43 = vadd.f32 %v5867_v30, %v4989_v38  ;;  %v5185_v49 = vpack.c.bf16 %v9723_v2, %v9723_v2  ;;  %vm4891_vm3 = vcmp.eq.f32.partialorder %v4890_v45, 8.507059e+37  ;;  %v4982_v53 = vand.u32 2147483648, %v9700_v21 }
 0x3ee   : > { %v5871_v51 = vpop.eup %5870  ;;  %v5176_v57 = vpack.c.bf16 %v9729_v59, %v9729_v59  ;;  %v4893_v35 = vor.u32 1.1754944e-38, %v4892_v13  ;;  %vm4976_vm5 = vweird.f32 %v9700_v21 }
 0x3ef   : > { %v4882_v20 = vmul.f32 %v5871_v51, %v9680_v1  ;;  %v4994_v25 = vsel %vm4993_vm6, %v5867_v30, %v4990_v43  ;;  %v5873_v23 = vpop.eup %5872  ;;  %vm4887_vm2 = vweird.f32 %v5871_v51  ;;  %5202 = vst.msk [vmem:[%s8821_s18 + $0x28] sm:$0xf] %vm5191_vm13, %v5185_v49  ;;  %v4980_v1 = vand.u32 2147483647, %v9700_v21 }
 0x3f0   : > { %v4999_v46 = vsel %vm4996_vm9, %v4998_v16, %v4994_v25  ;;  %v9733_v52 = vadd.f32 1.0, %v5873_v23  ;;  %5193 = vst.msk [vmem:[%s8821_s18 + $0x4] sm:$0xf] %vm5191_vm13, %v5176_v57  ;;  %vm4888_vm10 = vmor %vm4886_vm8, %vm4887_vm2  ;;  %v4983_v8 = vor.u32 1.1754944e-38, %v4982_v53  ;;  %vm10622_vm8 = vcmask 261120  }
 0x3f1   : > { %v4724_v40 = vld [vmem:[#allocation3 + $0x40] sm:$0xff]  ;;  %v4883_v18 = vsub.f32 1.0, %v4882_v20  ;;  %v9737_v3 = vmul.f32 %v4999_v46, %v9605_v17  ;;  %vm4981_vm12 = vcmp.eq.f32.partialorder %v4980_v1, 8.507059e+37 }
 0x3f2   : > { %v4757_v11 = vadd.f32 %v4741_v62, %v4724_v40  ;;  %v5875_v56 = vpop.eup %5874  ;;  %5876 = vrcp.f32 %v9733_v52  ;;  %vm5111_vm11 = vweird.f32 %v9733_v52 }
 0x3f3   : > { %v4783_v6 = vld [vmem:[#allocation3 + $0x10] sm:$0xff]  ;;  %v4884_v7 = vmul.f32 %v5871_v51, %v4883_v18  ;;  %v4972_v31 = vmul.f32 %v5875_v56, %v9700_v21  ;;  %v5182_v9 = vpack.c.bf16 %v9737_v3, %v9737_v3  ;;  %vm4977_vm7 = vweird.f32 %v5875_v56 }
 0x3f4   : > { %v9740_v27 = vadd.f32 %v9553_v0, %v4783_v6  ;;  %4773 = vst.msk [vmem:[#allocation3 + $0x40] sm:$0xff] %vm10621_vm0, %v4757_v11  ;;  %vm4978_vm14 = vmor %vm4976_vm5, %vm4977_vm7  ;;  %v5138_v6 = vsel %vm10622_vm8, %v9729_v59, 0.0 }
 0x3f5   : > { %v4885_v17 = vadd.f32 %v5871_v51, %v4884_v7  ;;  %v4973_v63 = vsub.f32 1.0, %v4972_v31  ;;  %5199 = vst.msk [vmem:[%s8821_s18 + $0x1c] sm:$0xf] %vm5191_vm13, %v5182_v9 }
 0x3f6   : > { %v5542_v30 = vmul.f32 -1.442695, %v9740_v27 }
 0x3f7   : > { %v4889_v37 = vsel %vm4888_vm10, %v5871_v51, %v4885_v17  ;;  %v4974_v19 = vmul.f32 %v5875_v56, %v4973_v63  ;;  %vm10623_vm10 = vmmov %vm10622_vm8 }
 0x3f8   : > { %5878 = vpow2.f32 %v5542_v30  ;;  %v4894_v5 = vsel %vm4891_vm3, %v4893_v35, %v4889_v37  ;;  %v5877_v50 = vpop.eup %5876  ;;  %vm10624_vm3 = vmmov %vm10622_vm8 }
 0x3f9   : > { %v5121_v28 = vmul.f32 %v4894_v5, %v9633_v4  ;;  %v5107_v12 = vmul.f32 %v5877_v50, %v9733_v52  ;;  %v4975_v10 = vadd.f32 %v5875_v56, %v4974_v19  ;;  %v5117_v4 = vand.u32 2147483648, %v9733_v52  ;;  %vm10625_vm5 = vmmov %vm10624_vm3 }
 0x3fa   : > { %vm5112_vm4 = vweird.f32 %v5877_v50  ;;  %v5142_v35 = vsel %vm10624_vm3, %v9007_v22, 0.0 }
 0x3fb   : > { %v4789_v36 = vld [vmem:[#allocation3 + $0x40] sm:$0xff]  ;;  %v5175_v26 = vpack.c.bf16 %v5121_v28, %v5121_v28  ;;  %v5108_v60 = vsub.f32 1.0, %v5107_v12  ;;  %v4979_v29 = vsel %vm4978_vm14, %v5875_v56, %v4975_v10  ;;  %vm5113_vm1 = vmor %vm5111_vm11, %vm5112_vm4  ;;  %v5118_v51 = vor.u32 1.1754944e-38, %v5117_v4 }
 0x3fc   : > { %v9763_v33 = vadd.f32 %v9553_v0, %v4789_v36  ;;  %v4984_v38 = vsel %vm4981_vm12, %v4983_v8, %v4979_v29  ;;  %v5115_v0 = vand.u32 2147483647, %v9733_v52  ;;  %v5137_v57 = vsel %vm10623_vm10, %v5121_v28, 0.0  ;;  %vm10626_vm11 = vmmov %vm10624_vm3  ;;  %v10627_v12 = vld [vmem:[#allocation20_spill] sm:$0xff] }
 0x3fd   : > { %5192 = vst.msk [vmem:[%s8821_s18] sm:$0xf] %vm5191_vm13, %v5175_v26  ;;  %v5109_v21 = vmul.f32 %v5877_v50, %v5108_v60  ;;  %v9771_v14 = vmul.f32 %v4984_v38, %v9657_v44  ;;  %v5139_v31 = vadd.f32 %v5138_v6, %v5137_v57  ;;  %v5144_v22 = vsel %vm10626_vm11, %v9697_v61, 0.0 }
 0x3fe   : > { %v5879_v54 = vpop.eup %5878  ;;  %v5548_v39 = vmul.f32 -1.442695, %v9763_v33  ;;  %vm5116_vm15 = vcmp.eq.f32.partialorder %v5115_v0, 8.507059e+37 }
 0x3ff   : > { %v4867_v24 = vadd.f32 1.0, %v5879_v54  ;;  %v5110_v55 = vadd.f32 %v5877_v50, %v5109_v21  ;;  %v5181_v41 = vpack.c.bf16 %v9771_v14, %v9771_v14 }
 0x400   : > { %5880 = vpow2.f32 %v5548_v39 }
 0x401   : > { %5882 = vrcp.f32 %v4867_v24  ;;  %v5114_v47 = vsel %vm5113_vm1, %v5877_v50, %v5110_v55  ;;  %5198 = vst.msk [vmem:[%s8821_s18 + $0x18] sm:$0xf] %vm5191_vm13, %v5181_v41  ;;  %v4922_v23 = vand.u32 2147483648, %v4867_v24  ;;  %v4920_v18 = vand.u32 2147483647, %v4867_v24  ;;  %vm10628_vm1 = vmmov %vm10624_vm3 }
 0x402   : > { %v5119_v43 = vsel %vm5116_vm15, %v5118_v51, %v5114_v47  ;;  %vm4916_vm9 = vweird.f32 %v4867_v24  ;;  %v5146_v36 = vsel %vm10628_vm1, %v10627_v12, 0.0  ;;  %vm10629_vm15 = vmmov %vm10628_vm1 }
 0x403   : > { %v9779_v44 = vmul.f32 %v5119_v43, %v9684_v34  ;;  %v4923_v49 = vor.u32 1.1754944e-38, %v4922_v23  ;;  %vm4921_vm0 = vcmp.eq.f32.partialorder %v4920_v18, 8.507059e+37  ;;  %v5148_v8 = vsel %vm10629_vm15, %v9771_v14, 0.0 }
 0x405   : > { %v5190_v16 = vpack.c.bf16 %v9779_v44, %v9779_v44 }
 0x406   : > { %v5881_v42 = vpop.eup %5880 }
 0x407   : > { %v5883_v20 = vpop.eup %5882  ;;  %v4873_v62 = vadd.f32 1.0, %v5881_v42  ;;  %5207 = vst.msk [vmem:[%s8821_s18 + $0x3c] sm:$0xf] %vm5191_vm13, %v5190_v16 }
 0x408   : > { %v4912_v45 = vmul.f32 %v5883_v20, %v4867_v24  ;;  %vm4917_vm6 = vweird.f32 %v5883_v20 }
 0x409   : > { %5884 = vrcp.f32 %v4873_v62  ;;  %vm4918_vm2 = vmor %vm4916_vm9, %vm4917_vm6  ;;  %v5010_v30 = vand.u32 2147483647, %v4873_v62  ;;  %v5012_v17 = vand.u32 2147483648, %v4873_v62  ;;  %vm5006_vm14 = vweird.f32 %v4873_v62 }
 0x40a   : > { %v4913_v25 = vsub.f32 1.0, %v4912_v45  ;;  %vm10630_vm6 = vmmov %vm10628_vm1 }
 0x40b   : > { %vm5011_vm4 = vcmp.eq.f32.partialorder %v5010_v30, 8.507059e+37  ;;  %v5150_v61 = vsel %vm10630_vm6, %v9737_v3, 0.0 }
 0x40c   : > { %v4914_v40 = vmul.f32 %v5883_v20, %v4913_v25 }
 0x40e   : > { %v4915_v46 = vadd.f32 %v5883_v20, %v4914_v40 }
 0x40f   : > { %v5885_v34 = vpop.eup %5884 }
 0x410   : > { %v4919_v52 = vsel %vm4918_vm2, %v5883_v20, %v4915_v46  ;;  %v5002_v11 = vmul.f32 %v5885_v34, %v4873_v62  ;;  %vm5007_vm7 = vweird.f32 %v5885_v34 }
 0x411   : > { %v4924_v13 = vsel %vm4921_vm0, %v4923_v49, %v4919_v52  ;;  %vm5008_vm12 = vmor %vm5006_vm14, %vm5007_vm7 }
 0x412   : > { %v5003_v56 = vsub.f32 1.0, %v5002_v11  ;;  %v5123_v7 = vmul.f32 %v4924_v13, %v9740_v27  ;;  %v5013_v27 = vor.u32 1.1754944e-38, %v5012_v17 }
 0x414   : > { %v5004_v9 = vmul.f32 %v5885_v34, %v5003_v56  ;;  %v5177_v37 = vpack.c.bf16 %v5123_v7, %v5123_v7  ;;  %v5140_v59 = vsel %vm10625_vm5, %v5123_v7, 0.0 }
 0x415   : > { %v5141_v63 = vadd.f32 %v5140_v59, %v5139_v31 }
 0x416   : > { %v5005_v5 = vadd.f32 %v5885_v34, %v5004_v9  ;;  %5194 = vst.msk [vmem:[%s8821_s18 + $0x8] sm:$0xf] %vm5191_vm13, %v5177_v37 }
 0x417   : > { %v5143_v53 = vadd.f32 %v5142_v35, %v5141_v63 }
 0x418   : > { %v5009_v19 = vsel %vm5008_vm12, %v5885_v34, %v5005_v5 }
 0x419   : > { %v5014_v1 = vsel %vm5011_vm4, %v5013_v27, %v5009_v19  ;;  %v5145_v28 = vadd.f32 %v5144_v22, %v5143_v53 }
 0x41a   : > { %v5129_v50 = vmul.f32 %v5014_v1, %v9763_v33 }
 0x41b   : > { %v5147_v10 = vadd.f32 %v5146_v36, %v5145_v28 }
 0x41c   : > { %v5183_v26 = vpack.c.bf16 %v5129_v50, %v5129_v50 }
 0x41d   : > { %v5149_v54 = vadd.f32 %v5148_v8, %v5147_v10 }
 0x41e   : > { %5200 = vst.msk [vmem:[%s8821_s18 + $0x20] sm:$0xf] %vm5191_vm13, %v5183_v26 }
 0x41f   : > { %6048 = shalt.err (!%p6045_p6)
}
 0x420   : > { %s6150_s18 = smov 64   ;;  %s6151_s2 = smov 4   ;;  %v5151_v3 = vadd.f32 %v5150_v61, %v5149_v54  ;;  %vm10631_vm13 = vmmov %vm10628_vm1  ;;  %v10634_v38 = vld [vmem:[#allocation21_spill] sm:$0xff] }
 0x421   : > { %5597 = dma.vmem_to_hbm [thread:$0]  (%p6243_p3), %s5230_s22, 1024, %s5232_s23, %s5209_s9, %s6150_s18, %s6150_s18, %s6151_s2   ;;  %v5152_v33 = vsel %vm10631_vm13, %v5129_v50, 0.0  ;;  %vm10632_vm9 = vmmov %vm10628_vm1 }
 0x422   : > { %v5153_v60 = vadd.f32 %v5152_v33, %v5151_v3  ;;  %v5154_v29 = vsel %vm10632_vm9, %v9064_v58, 0.0  ;;  %vm10633_vm2 = vmmov %vm10628_vm1  ;;  %s5562_s0 = sshll.u32 %s6135_s28, 1  ;;  %s5367_s2 = sshll.u32 %s8793_s13, 3 }
 0x423   : > { %v5156_v39 = vsel %vm10633_vm2, %v9723_v2, 0.0  ;;  %vm10635_vm0 = vmmov %vm10628_vm1  ;;  %s5244_s1 = sadd.s32 %s6131_s27, %s5562_s0  ;;  %s298_s16 = scalar_lea.vmem [#allocation6], %s5367_s2 }
 0x424   : > { %v5155_v4 = vadd.f32 %v5154_v29, %v5153_v60  ;;  %v5158_v21 = vsel %vm10635_vm0, %v10634_v38, 0.0  ;;  %vm10636_vm8 = vmmov %vm10635_vm0  ;;  %s5563_s22 = sshll.u32 %s5244_s1, 3  ;;  %s5248_s28 = sshll.u32 %s298_s16, 4  ;;  %s5249_s28 = int_to_ptr.vmem [resolvable:$true] %s5248_s28 }
 0x425   : > { %v5160_v14 = vsel %vm10636_vm8, %v9087_v48, 0.0  ;;  %vm10637_vm10 = vmmov %vm10635_vm0  ;;  %s5246_s10 = scalar_lea.hbm %s9890_s7, %s5563_s22  ;;  %s5214_s27 = scalar_lea.sflag [#allocation7], %s8793_s13 }
 0x426   : > { %v5157_v24 = vadd.f32 %v5156_v39, %v5155_v4  ;;  %v5162_v41 = vsel %vm10637_vm10, %v9127_v15, 0.0  ;;  %vm10638_vm3 = vmmov %vm10635_vm0  ;;  %s5250_s17 = sshll.u32 %s5246_s10, 4  ;;  %s6069_s1 = scalar_lea.hbm %s9890_s7, 32  ;;  %s5251_s17 = int_to_ptr.hbm [resolvable:$true] %s5250_s17 }
 0x427   : > { %v5164_v58 = vsel %vm10638_vm3, %v9628_v32, 0.0  ;;  %vm10639_vm7 = vmmov %vm10635_vm0  ;;  %s6063_s20 = sshra.s32 %s5251_s17, 4  ;;  %s6064_s20 = int_to_ptr.hbm [resolvable:$true] %s6063_s20 }
 0x428   : > { %v5159_v0 = vadd.f32 %v5158_v21, %v5157_v24  ;;  %v5166_v2 = vsel %vm10639_vm7, %v9779_v44, 0.0  ;;  %vm10640_vm5 = vmmov %vm10635_vm0  ;;  %s6065_s21 = scalar_lea.hbm %s6064_s20, 8  ;;  %p6070_p11 = scmp.lt.s32.totalorder %s6064_s20, %s9890_s7 }
 0x429   : > { %p6066_p7 = scmp.ne.s32.totalorder %s6064_s20, %s6065_s21  ;;  %p6071_p12 = scmp.lt.s32.totalorder %s6069_s1, %s6065_s21 }
 0x42a   : > { %v5161_v55 = vadd.f32 %v5160_v14, %v5159_v0 }
 0x42b   : > { %p6067_p9 = pnand %p6066_p7, %p6243_p3  ;;  %p6072_p13 = por %p6071_p12, %p6070_p11 }
 0x42c   : > { %v5163_v51 = vadd.f32 %v5162_v41, %v5161_v55 }
 0x42d   : > { %p6068_p10 = pneg %p6067_p9 }
 0x42e   : > { %v5165_v47 = vadd.f32 %v5164_v58, %v5163_v51 }
 0x42f   : > { %p6073_p0 = pnand %p6072_p13, %p6068_p10 }
 0x430   : > { %v5167_v43 = vadd.f32 %v5166_v2, %v5165_v47 }
 0x432   : > { %v5168_v42 = vrot.slane %v5167_v43, 4 }
 0x434   : > { %v5169_v48 = vadd.f32 %v5168_v42, %v5167_v43 }
 0x436   : > { %v5170_v20 = vrot.slane %v5169_v48, 2 }
 0x438   : > { %v5171_v15 = vadd.f32 %v5170_v20, %v5169_v48 }
 0x43a   : > { %v5172_v32 = vrot.slane %v5171_v15, 1 }
 0x43c   : > { %v5173_v16 = vadd.f32 %v5172_v32, %v5171_v15 }
 0x43e   : > { %5174 = vst.msk [vmem:[%s298_s16] sm:$0xff] %vm10640_vm5, %v5173_v16 }
 0x43f   : > { %6076 = shalt.err (!%p6073_p0)
}
 0x440   : > { %5598 = dma.vmem_to_hbm [thread:$0]  (%p6243_p3), %s5249_s28, 128, %s5251_s17, %s5214_s27  }
 0x441 PF: > { %p5608_p1 = scmp.ge.s32.totalorder %s6147_s8, 2  ;;  %s5262_s13 = sand.u32 1, %s6119_s24  }
 0x442   : > { %s5263_s23 = scalar_lea.sflag [#allocation5], %s5262_s13 }
 0x443   : > { %p5602_p2 = pnand %p5608_p1, %p6252_p8 }
 0x445   : > { %p5603_p4 = pneg %p5602_p2 }
 0x447   : > { %6110 = dma.done.wait (%p5603_p4), %s5263_s23, 1024  }
 0x448   : > { %6112 = vsyncadd (%p5603_p4), %s5263_s23, 4294966272  ;;  %s5273_s9 = scalar_lea.sflag [#allocation7], %s5262_s13 }
 0x449   : > { %6114 = dma.done.wait (%p5603_p4), %s5273_s9, 128  }
 0x44a   : > { %6116 = vsyncadd (%p5603_p4), %s5273_s9, 4294967168  ;;  %s24_s8 = sadd.s32 1, %s6147_s8   ;;  %s10641_s24 = smov %s6123_s25 }
 0x44b   : > { %p21_p5 = scmp.ge.s32.totalorder %s24_s8, 6   ;;  %s10642_s25 = smov %s6127_s26 }
 0x44c   : > { %s10643_s26 = smov %s6261_s19  ;;  %s10644_s27 = smov %s6139_s29 }
 0x44d   : > { %s10645_s28 = smov %s6143_s30  ;;  %s10646_s29 = smov %s10649_s11 }
 0x44e   : > { %s10647_s30 = smov %s10653_s12  ;;  %23 = sbr.rel (!%p21_p5) target bundleno = 11 (0xb), region = 101 }
 0x453   :  { %5279 = vsyncpa [#allocation5], 1 }
 0x454   :  { %5281 = vsyncpa [#allocation5 + $0x1], 1 }
 0x455   :  { %5282 = vsyncpa [#allocation7], 1 }
 0x456   :  { %5284 = vsyncpa [#allocation7 + $0x1], 1 }

</bundles_post_ra>
